<compile_context>
chip_gen: v6e
topology: v6e:2x2x1
jax: 0.10.0
libtpu: 0.0.40
codegen_flags: <defaults>
</compile_context>

<pallas_src>
import jax
import jax.numpy as jnp
from jax.experimental import pallas as pl
from jax.experimental.pallas import tpu as pltpu

LANE = 128  # channel padding so every GEMM operand / store is lane-dense


# --------------------------------------------------------------------------- #
# Fused whole-network Pallas kernel (one grid step = one batch element)
# --------------------------------------------------------------------------- #
def _convnet_kernel(
    x_ref,                      # (1, 1024, 32)  bf16  block-1 im2col (K padded 27->32)
    w1_ref, b1_ref,             # (32, 128) bf16, (1, 128) f32
    w2_ref, b2_ref,             # (3, 384, 128) bf16, (1, 128) f32
    w3_ref, b3_ref,             # (3, 384, 128) bf16, (1, 128) f32
    wf1_hbm,                    # (2048, 512) bf16  -- stays in HBM (pl.ANY)
    bf1_ref,                    # (1, 512) f32
    wf2_ref, bf2_ref,           # (512, 128) bf16, (1, 128) f32
    wf3_ref, bf3_ref,           # (128, 128) bf16, (1, 128) f32
    o_ref,                      # (1, 1, 128) f32  padded logits
    a1s_ref,                    # (3, 18, 16, 128) bf16 scratch: dx-shifted block-2 input
    a2s_ref,                    # (3, 10,  8, 128) bf16 scratch: dx-shifted block-3 input
    wf1_buf,                    # (2048, 512) bf16 scratch: FC1 weights landing buffer
    fc_sem,                     # DMA semaphore for the FC1 weight copy
):
    # Kick off the FC1 weight DMA (HBM -> VMEM); it is waited on just before FC1 so the
    # ~2 MB load is hidden behind the three conv blocks.
    pltpu.make_async_copy(wf1_hbm, wf1_buf, fc_sem).start()

    # ---- Block 1: 32x32x3 -> conv16 (+BN) + ReLU -> pool -> 16x16x(16 pad 128) ------- #
    a1s_ref[...] = jnp.zeros(a1s_ref.shape, a1s_ref.dtype)

    @pl.loop(0, 4)  # strip = 8 input rows = 256 im2col rows; acc (256,128) f32 fits vregs
    def _b1_strip(s):
        row0 = pl.multiple_of(s * 256, 256)
        xs = x_ref[0, pl.ds(row0, 256), :]                               # (256, 32)
        acc = jnp.dot(xs, w1_ref[...], preferred_element_type=jnp.float32)
        y = jnp.maximum(acc + b1_ref[...], 0.0)                          # (256, 128)
        y = jnp.max(y.reshape(128, 2, LANE), axis=1)                     # pool W pairs
        y = jnp.max(y.reshape(4, 2, 16, LANE), axis=1)                   # (4, 16, 128)
        y = y.astype(jnp.bfloat16)
        z = jnp.zeros((4, 1, LANE), jnp.bfloat16)
        r0 = 1 + s * 4
        # Three W-shifted, H-padded copies so block 2 only does aligned leading-dim reads.
        a1s_ref[1, pl.ds(r0, 4), :, :] = y                               # dx = 1 (center)
        a1s_ref[0, pl.ds(r0, 4), :, :] = jnp.concatenate([z, y[:, :15, :]], axis=1)
        a1s_ref[2, pl.ds(r0, 4), :, :] = jnp.concatenate([y[:, 1:, :], z], axis=1)

    # ---- Block 2: 16x16x16 -> conv32 (+BN) + ReLU -> pool -> 8x8x(32 pad 128) -------- #
    a2s_ref[...] = jnp.zeros(a2s_ref.shape, a2s_ref.dtype)

    @pl.loop(0, 2)  # strip = 8 input rows
    def _b2_strip(s):
        h0 = pl.multiple_of(s * 8, 8)
        acc = jnp.zeros((128, LANE), jnp.float32)
        for dy in range(3):            # merged kx taps: one K=384 GEMM per dy
            cols = jnp.concatenate(
                [a1s_ref[dx, pl.ds(h0 + dy, 8), :, :] for dx in range(3)], axis=-1)
            acc = acc + jnp.dot(cols.reshape(128, 3 * LANE), w2_ref[dy],
                                preferred_element_type=jnp.float32)
        y = jnp.maximum(acc + b2_ref[...], 0.0)                          # (128, 128)
        y = jnp.max(y.reshape(64, 2, LANE), axis=1)
        y = jnp.max(y.reshape(4, 2, 8, LANE), axis=1)                    # (4, 8, 128)
        y = y.astype(jnp.bfloat16)
        z = jnp.zeros((4, 1, LANE), jnp.bfloat16)
        r0 = 1 + s * 4
        a2s_ref[1, pl.ds(r0, 4), :, :] = y
        a2s_ref[0, pl.ds(r0, 4), :, :] = jnp.concatenate([z, y[:, :7, :]], axis=1)
        a2s_ref[2, pl.ds(r0, 4), :, :] = jnp.concatenate([y[:, 1:, :], z], axis=1)

    # ---- Block 3: 8x8x32 -> conv64 (+BN) + ReLU -> pool -> 4x4x(64 pad 128) ---------- #
    acc = jnp.zeros((64, LANE), jnp.float32)
    for dy in range(3):
        cols = jnp.concatenate(
            [a2s_ref[dx, dy:dy + 8, :, :] for dx in range(3)], axis=-1)
        acc = acc + jnp.dot(cols.reshape(64, 3 * LANE), w3_ref[dy],
                            preferred_element_type=jnp.float32)
    y = jnp.maximum(acc + b3_ref[...], 0.0)                              # (64, 128)
    y = jnp.max(y.reshape(32, 2, LANE), axis=1)
    y = jnp.max(y.reshape(4, 2, 4, LANE), axis=1)                        # (4, 4, 128) f32

    # ---- FC stack (intermediates stay in vregs; FC1 weights now resident in VMEM) ---- #
    p = y.reshape(16, LANE).astype(jnp.bfloat16)                         # rows = h*4 + w
    feat = jnp.concatenate([p[i:i + 1, :] for i in range(16)], axis=1)   # (1, 2048)

    pltpu.make_async_copy(wf1_hbm, wf1_buf, fc_sem).wait()
    h = jnp.dot(feat, wf1_buf[...], preferred_element_type=jnp.float32)  # (1, 512)
    h = jnp.maximum(h + bf1_ref[...], 0.0)
    h = jnp.dot(h.astype(jnp.bfloat16), wf2_ref[...], preferred_element_type=jnp.float32)
    h = jnp.maximum(h + bf2_ref[...], 0.0)
    h = jnp.dot(h.astype(jnp.bfloat16), wf3_ref[...], preferred_element_type=jnp.float32)
    o_ref[0] = h + bf3_ref[...]                                          # (1, 128)


def _convnet_call(cols, params):
    """cols: (B, 1024, 32) bf16 block-1 im2col -> (B, 1, 128) f32 padded logits."""
    (w1c, b1c, w2c, b2c, w3c, b3c, wf1, bf1, wf2, bf2, wf3, bf3) = params
    bsz = cols.shape[0]
    return pl.pallas_call(
        _convnet_kernel,
        out_shape=jax.ShapeDtypeStruct((bsz, 1, LANE), jnp.float32),
        grid=(bsz,),
        in_specs=[
            pl.BlockSpec((1, 1024, 32), lambda i: (i, 0, 0)),
            pl.BlockSpec((32, LANE), lambda i: (0, 0)),
            pl.BlockSpec((1, LANE), lambda i: (0, 0)),
            pl.BlockSpec((3, 3 * LANE, LANE), lambda i: (0, 0, 0)),
            pl.BlockSpec((1, LANE), lambda i: (0, 0)),
            pl.BlockSpec((3, 3 * LANE, LANE), lambda i: (0, 0, 0)),
            pl.BlockSpec((1, LANE), lambda i: (0, 0)),
            pl.BlockSpec(memory_space=pl.ANY),        # FC1 weights: manual async DMA
            pl.BlockSpec((1, 512), lambda i: (0, 0)),
            pl.BlockSpec((512, LANE), lambda i: (0, 0)),
            pl.BlockSpec((1, LANE), lambda i: (0, 0)),
            pl.BlockSpec((LANE, LANE), lambda i: (0, 0)),
            pl.BlockSpec((1, LANE), lambda i: (0, 0)),
        ],
        out_specs=pl.BlockSpec((1, 1, LANE), lambda i: (i, 0, 0)),
        scratch_shapes=[
            pltpu.VMEM((3, 18, 16, LANE), jnp.bfloat16),   # block-2 shifted input
            pltpu.VMEM((3, 10, 8, LANE), jnp.bfloat16),    # block-3 shifted input
            pltpu.VMEM((2048, 512), jnp.bfloat16),         # FC1 weight landing buffer
            pltpu.SemaphoreType.DMA(()),
        ],
        compiler_params=pltpu.CompilerParams(dimension_semantics=("parallel",)),
    )(cols, w1c, b1c, w2c, b2c, w3c, b3c, wf1, bf1, wf2, bf2, wf3, bf3)


# --------------------------------------------------------------------------- #
# Host-side prolog (single tiny fused XLA op) + forward
# --------------------------------------------------------------------------- #
def im2col_3x3(x):
    """x: (N,H,W,C) -> (N, H*W, 9*C), 'same' padding, (ky,kx,c) column order."""
    n, hh, ww, c = x.shape
    xp = jnp.pad(x, ((0, 0), (1, 1), (1, 1), (0, 0)))
    cols = [xp[:, dy:dy + hh, dx:dx + ww, :] for dy in range(3) for dx in range(3)]
    return jnp.stack(cols, axis=3).reshape(n, hh * ww, 9 * c)


@jax.jit
def forward(x_nchw, params):
    """BasicConvNet forward. x_nchw: (B, 3, 32, 32) -> padded logits (B, 1, 128)."""
    x = jnp.transpose(x_nchw, (0, 2, 3, 1))                 # NCHW -> NHWC
    cols = im2col_3x3(x)                                    # (B, 1024, 27)
    k = cols.shape[-1]
    cols = jnp.pad(cols, ((0, 0), (0, 0), (0, 32 - k))).astype(jnp.bfloat16)
    return _convnet_call(cols, params)


# --------------------------------------------------------------------------- #
# Parameter construction (raw, PyTorch-equivalent) and kernel-side preparation
# --------------------------------------------------------------------------- #
def make_conv_block_params(key, cin, cout):
    """Conv(3x3) weight + bias and BN(gamma,beta,mean,var) folded to (wmat, scale, bias)."""
    k1, k2, k3, k4, k5, k6 = jax.random.split(key, 6)
    w = jax.random.normal(k1, (3, 3, cin, cout), jnp.float32) / jnp.sqrt(9.0 * cin)
    b = 0.1 * jax.random.normal(k2, (cout,), jnp.float32)
    gamma = 1.0 + 0.1 * jax.random.normal(k3, (cout,), jnp.float32)
    beta = 0.1 * jax.random.normal(k4, (cout,), jnp.float32)
    rmean = 0.1 * jax.random.normal(k5, (cout,), jnp.float32)
    rvar = 1.0 + 0.1 * jnp.abs(jax.random.normal(k6, (cout,), jnp.float32))
    eps = 1e-5
    scale = gamma / jnp.sqrt(rvar + eps)
    bias = beta + scale * (b - rmean)
    wmat = w.reshape(9 * cin, cout)          # row index = (ky*3 + kx)*cin + ci
    return wmat, scale, bias


def make_fc_params(key, din, dout):
    k1, k2 = jax.random.split(key)
    w = jax.random.normal(k1, (din, dout), jnp.float32) / jnp.sqrt(float(din))
    b = 0.1 * jax.random.normal(k2, (dout,), jnp.float32)
    return w, b


def prepare_kernel_params(conv_raw, fc_raw, channels, num_classes):
    """Fold BN into weights; pad channels to 128 lanes; tap-merged conv weight layouts."""
    cin0, c1, c2, c3 = channels
    (w1m, s1, bb1), (w2m, s2, bb2), (w3m, s3, bb3) = conv_raw

    # Block 1: single K=32 GEMM matrix (27 real rows in (ky,kx,ci) order), Cout -> 128.
    w1 = w1m * s1[None, :]
    w1c = (jnp.zeros((32, LANE), jnp.float32)
           .at[:9 * cin0, :c1].set(w1).astype(jnp.bfloat16))
    b1c = jnp.zeros((1, LANE), jnp.float32).at[0, :c1].set(bb1)

    def tap_merged(wm, scale, cin, cout):
        w = wm.reshape(3, 3, cin, cout) * scale[None, None, None, :]
        wk = jnp.zeros((3, 3, LANE, LANE), jnp.float32).at[:, :, :cin, :cout].set(w)
        return wk.reshape(3, 3 * LANE, LANE).astype(jnp.bfloat16)   # [ky, kx*128+ci, co]

    w2c = tap_merged(w2m, s2, c1, c2)
    b2c = jnp.zeros((1, LANE), jnp.float32).at[0, :c2].set(bb2)
    w3c = tap_merged(w3m, s3, c2, c3)
    b3c = jnp.zeros((1, LANE), jnp.float32).at[0, :c3].set(bb3)

    (fw1, fb1), (fw2, fb2), (fw3, fb3) = fc_raw
    d1 = fw1.shape[1]
    # FC1 rows: PyTorch NCHW flatten (c*16 + h*4 + w) -> kernel NHWC(+pad) flatten order.
    w_hwc = jnp.transpose(fw1.reshape(c3, 4, 4, d1), (1, 2, 0, 3))
    wf1 = (jnp.zeros((4, 4, LANE, d1), jnp.float32).at[:, :, :c3, :].set(w_hwc)
           .reshape(4 * 4 * LANE, d1).astype(jnp.bfloat16))          # (2048, 512)
    bf1 = fb1.reshape(1, -1)
    wf2 = fw2.astype(jnp.bfloat16)
    bf2 = fb2.reshape(1, -1)
    wf3 = (jnp.zeros((fw3.shape[0], LANE), jnp.float32)
           .at[:, :num_classes].set(fw3).astype(jnp.bfloat16))
    bf3 = jnp.zeros((1, LANE), jnp.float32).at[0, :num_classes].set(fb3)
    return (w1c, b1c, w2c, b2c, w3c, b3c, wf1, bf1, wf2, bf2, wf3, bf3)


# --------------------------------------------------------------------------- #
# Pure-JAX f32 reference (identical math, for a sanity check)
# --------------------------------------------------------------------------- #
def forward_reference(x_nchw, raw):
    hi = jax.lax.Precision.HIGHEST
    x = jnp.transpose(x_nchw, (0, 2, 3, 1))
    for wmat, scale, bias in raw["conv"]:
        n, hh, ww, _ = x.shape
        cout = wmat.shape[1]
        patches = im2col_3x3(x).reshape(n * hh * ww, -1)
        y = jnp.dot(patches, wmat, precision=hi) * scale + bias
        y = jnp.maximum(y, 0.0).reshape(n, hh, ww, cout)
        x = y.reshape(n, hh // 2, 2, ww // 2, 2, cout).max(axis=(2, 4))
    n, hh, ww, c = x.shape
    feat = jnp.transpose(x, (0, 3, 1, 2)).reshape(n, c * hh * ww)
    for idx, (w, b) in enumerate(raw["fc"]):
        feat = jnp.dot(feat, w, precision=hi) + b
        if idx < len(raw["fc"]) - 1:
            feat = jnp.maximum(feat, 0.0)
    return feat


# --------------------------------------------------------------------------- #
if __name__ == "__main__":
    in_channels = 3
    num_classes = 10
    hidden_channels = [16, 32, 64]
    fc_hidden = [512, 128]

    key = jax.random.PRNGKey(0)
    kx, k0, k1, k2, k3, k4, k5 = jax.random.split(key, 7)

    # The module hardcodes feature_size = 4*4*hidden_channels[-1] => 32x32 spatial input.
    x = jax.random.normal(kx, (2, in_channels, 32, 32), jnp.float32)

    channels = [in_channels] + hidden_channels
    conv_raw = [make_conv_block_params(k, channels[i], channels[i + 1])
                for i, k in enumerate([k0, k1, k2])]
    fc_dims = [4 * 4 * hidden_channels[-1]] + fc_hidden + [num_classes]
    fc_raw = [make_fc_params(k, fc_dims[i], fc_dims[i + 1])
              for i, k in enumerate([k3, k4, k5])]

    params = prepare_kernel_params(conv_raw, fc_raw, channels, num_classes)

    out_padded = forward(x, params)                       # (2, 1, 128) padded logits
    out_padded = jax.block_until_ready(out_padded)
    logits = out_padded[:, 0, :num_classes]               # slice outside the fused kernel
    assert logits.shape == (2, num_classes)

    ref = forward_reference(x, {"conv": conv_raw, "fc": fc_raw})
    err = float(jnp.max(jnp.abs(logits - ref)))
    # Tolerance sized for bf16 MXU operands (f32 accumulation) vs the f32 HIGHEST reference.
    tol = 5e-2 * (1.0 + float(jnp.max(jnp.abs(ref))))
    assert err < tol, f"mismatch: max abs err {err} vs tol {tol}"

    print("KERNEL_OK")
</pallas_src>

<mosaic_0001>
module attributes {stable_mosaic.version = 11 : i64} {
  func.func @_convnet_kernel(%arg0: i32, %arg1: memref<1x1024x32xbf16, #tpu.memory_space<vmem>>, %arg2: memref<32x128xbf16, #tpu.memory_space<vmem>>, %arg3: memref<1x128xf32, #tpu.memory_space<vmem>>, %arg4: memref<3x384x128xbf16, #tpu.memory_space<vmem>>, %arg5: memref<1x128xf32, #tpu.memory_space<vmem>>, %arg6: memref<3x384x128xbf16, #tpu.memory_space<vmem>>, %arg7: memref<1x128xf32, #tpu.memory_space<vmem>>, %arg8: memref<2048x512xbf16, #tpu.memory_space<any>>, %arg9: memref<1x512xf32, #tpu.memory_space<vmem>>, %arg10: memref<512x128xbf16, #tpu.memory_space<vmem>>, %arg11: memref<1x128xf32, #tpu.memory_space<vmem>>, %arg12: memref<128x128xbf16, #tpu.memory_space<vmem>>, %arg13: memref<1x128xf32, #tpu.memory_space<vmem>>, %arg14: memref<1x1x128xf32, #tpu.memory_space<vmem>>, %arg15: memref<3x18x16x128xbf16, #tpu.memory_space<vmem>>, %arg16: memref<3x10x8x128xbf16, #tpu.memory_space<vmem>>, %arg17: memref<2048x512xbf16, #tpu.memory_space<vmem>>, %arg18: memref<!tpu.dma_semaphore, #tpu.memory_space<semaphore_mem>>) attributes {dimension_semantics = [#tpu.dimension_semantics<parallel>], iteration_bounds = array<i64: 2>, scalar_prefetch = 0 : i64, scratch_operands = 4 : i64, tpu.core_type = #tpu.core_type<tc>, window_params = [{transform_indices = @transform_0, window_bounds = array<i64: 1, 1024, 32>}, {pipeline_mode = #tpu.pipeline_mode<synchronous>, transform_indices = @transform_1, window_bounds = array<i64: 32, 128>}, {pipeline_mode = #tpu.pipeline_mode<synchronous>, transform_indices = @transform_2, window_bounds = array<i64: 1, 128>}, {pipeline_mode = #tpu.pipeline_mode<synchronous>, transform_indices = @transform_3, window_bounds = array<i64: 3, 384, 128>}, {pipeline_mode = #tpu.pipeline_mode<synchronous>, transform_indices = @transform_4, window_bounds = array<i64: 1, 128>}, {pipeline_mode = #tpu.pipeline_mode<synchronous>, transform_indices = @transform_5, window_bounds = array<i64: 3, 384, 128>}, {pipeline_mode = #tpu.pipeline_mode<synchronous>, transform_indices = @transform_6, window_bounds = array<i64: 1, 128>}, {}, {pipeline_mode = #tpu.pipeline_mode<synchronous>, transform_indices = @transform_8, window_bounds = array<i64: 1, 512>}, {pipeline_mode = #tpu.pipeline_mode<synchronous>, transform_indices = @transform_9, window_bounds = array<i64: 512, 128>}, {pipeline_mode = #tpu.pipeline_mode<synchronous>, transform_indices = @transform_10, window_bounds = array<i64: 1, 128>}, {pipeline_mode = #tpu.pipeline_mode<synchronous>, transform_indices = @transform_11, window_bounds = array<i64: 128, 128>}, {pipeline_mode = #tpu.pipeline_mode<synchronous>, transform_indices = @transform_12, window_bounds = array<i64: 1, 128>}, {transform_indices = @transform_13, window_bounds = array<i64: 1, 1, 128>}]} {
    tpu.enqueue_dma source(%arg8 : memref<2048x512xbf16, #tpu.memory_space<any>>) target(%arg17 : memref<2048x512xbf16, #tpu.memory_space<vmem>>) target_semaphore(%arg18 : memref<!tpu.dma_semaphore, #tpu.memory_space<semaphore_mem>>)
    %cst = arith.constant 0.000000e+00 : bf16
    %0 = vector.broadcast %cst : bf16 to vector<3x18x16x128xbf16>
    %c0 = arith.constant 0 : index
    %c0_0 = arith.constant 0 : index
    %c0_1 = arith.constant 0 : index
    %c0_2 = arith.constant 0 : index
    %1 = vector.load %arg15[%c0, %c0_0, %c0_1, %c0_2] : memref<3x18x16x128xbf16, #tpu.memory_space<vmem>>, vector<3x18x16x128xbf16>
    tpu.vector_store %arg15[%c0, %c0_0, %c0_1, %c0_2], %0 {strides = array<i32>} : memref<3x18x16x128xbf16, #tpu.memory_space<vmem>>, vector<3x18x16x128xbf16>,
    %c0_i32 = arith.constant 0 : i32
    %c4_i32 = arith.constant 4 : i32
    %2 = arith.addi %c0_i32, %c4_i32 : i32
    %c1_i32 = arith.constant 1 : i32
    scf.for %arg19 = %c0_i32 to %2 step %c1_i32  : i32 {
      %c1_i32_84 = arith.constant 1 : i32
      %92 = arith.muli %arg19, %c1_i32_84 : i32
      %c0_i32_85 = arith.constant 0 : i32
      %93 = arith.addi %c0_i32_85, %92 : i32
      %c256_i32 = arith.constant 256 : i32
      %94 = arith.muli %93, %c256_i32 : i32
      %95 = tpu.assume_multiple %94, 256 : i32
      %c0_86 = arith.constant 0 : index
      %96 = arith.index_cast %95 : i32 to index
      %c0_87 = arith.constant 0 : index
      %97 = vector.load %arg1[%c0_86, %96, %c0_87] : memref<1x1024x32xbf16, #tpu.memory_space<vmem>>, vector<1x256x32xbf16>
      %98 = vector.shape_cast %97 : vector<1x256x32xbf16> to vector<256x32xbf16>
      %c0_88 = arith.constant 0 : index
      %c0_89 = arith.constant 0 : index
      %99 = vector.load %arg2[%c0_88, %c0_89] : memref<32x128xbf16, #tpu.memory_space<vmem>>, vector<32x128xbf16>
      %cst_90 = arith.constant dense<0.000000e+00> : vector<256x128xf32>
      %100 = tpu.matmul %98, %99, %cst_90 {dimension_numbers = #tpu.dot_dimension_numbers<[1], [0], [0], [1], [0, 0, 1, 1], [], []>} : vector<256x32xbf16>, vector<32x128xbf16>, vector<256x128xf32> -> vector<256x128xf32>
      %c0_91 = arith.constant 0 : index
      %c0_92 = arith.constant 0 : index
      %101 = vector.load %arg3[%c0_91, %c0_92] : memref<1x128xf32, #tpu.memory_space<vmem>>, vector<1x128xf32>
      %102 = vector.broadcast %101 : vector<1x128xf32> to vector<256x128xf32>
      %103 = arith.addf %100, %102 : vector<256x128xf32>
      %cst_93 = arith.constant 0.000000e+00 : f32
      %104 = vector.broadcast %cst_93 : f32 to vector<256x128xf32>
      %105 = arith.maximumf %103, %104 : vector<256x128xf32>
      %106 = vector.shape_cast %105 : vector<256x128xf32> to vector<128x2x128xf32>
      %cst_94 = arith.constant dense<0xFF800000> : vector<128x128xf32>
      %107 = vector.multi_reduction <maximumf>, %106, %cst_94 [1] : vector<128x2x128xf32> to vector<128x128xf32>
      %108 = vector.shape_cast %107 : vector<128x128xf32> to vector<4x2x16x128xf32>
      %cst_95 = arith.constant dense<0xFF800000> : vector<4x16x128xf32>
      %109 = vector.multi_reduction <maximumf>, %108, %cst_95 [1] : vector<4x2x16x128xf32> to vector<4x16x128xf32>
      %110 = arith.truncf %109 : vector<4x16x128xf32> to vector<4x16x128xbf16>
      %cst_96 = arith.constant 0.000000e+00 : bf16
      %111 = vector.broadcast %cst_96 : bf16 to vector<4x1x128xbf16>
      %c4_i32_97 = arith.constant 4 : i32
      %112 = arith.muli %93, %c4_i32_97 : i32
      %c1_i32_98 = arith.constant 1 : i32
      %113 = arith.addi %c1_i32_98, %112 : i32
      %c1_99 = arith.constant 1 : index
      %114 = arith.index_cast %113 : i32 to index
      %c0_100 = arith.constant 0 : index
      %c0_101 = arith.constant 0 : index
      %115 = vector.load %arg15[%c1_99, %114, %c0_100, %c0_101] : memref<3x18x16x128xbf16, #tpu.memory_space<vmem>>, vector<1x4x16x128xbf16>
      %116 = vector.shape_cast %115 : vector<1x4x16x128xbf16> to vector<4x16x128xbf16>
      %117 = vector.shape_cast %110 : vector<4x16x128xbf16> to vector<1x4x16x128xbf16>
      tpu.vector_store %arg15[%c1_99, %114, %c0_100, %c0_101], %117 {strides = array<i32>} : memref<3x18x16x128xbf16, #tpu.memory_space<vmem>>, vector<1x4x16x128xbf16>,
      %118 = vector.extract_strided_slice %110 {offsets = [0, 0, 0], sizes = [4, 15, 128], strides = [1, 1, 1]} : vector<4x16x128xbf16> to vector<4x15x128xbf16>
      %119 = tpu.concatenate %111, %118 in 1 : vector<4x1x128xbf16>, vector<4x15x128xbf16> -> vector<4x16x128xbf16>
      %c0_102 = arith.constant 0 : index
      %120 = arith.index_cast %113 : i32 to index
      %c0_103 = arith.constant 0 : index
      %c0_104 = arith.constant 0 : index
      %121 = vector.load %arg15[%c0_102, %120, %c0_103, %c0_104] : memref<3x18x16x128xbf16, #tpu.memory_space<vmem>>, vector<1x4x16x128xbf16>
      %122 = vector.shape_cast %121 : vector<1x4x16x128xbf16> to vector<4x16x128xbf16>
      %123 = vector.shape_cast %119 : vector<4x16x128xbf16> to vector<1x4x16x128xbf16>
      tpu.vector_store %arg15[%c0_102, %120, %c0_103, %c0_104], %123 {strides = array<i32>} : memref<3x18x16x128xbf16, #tpu.memory_space<vmem>>, vector<1x4x16x128xbf16>,
      %124 = vector.extract_strided_slice %110 {offsets = [0, 1, 0], sizes = [4, 15, 128], strides = [1, 1, 1]} : vector<4x16x128xbf16> to vector<4x15x128xbf16>
      %125 = tpu.concatenate %124, %111 in 1 : vector<4x15x128xbf16>, vector<4x1x128xbf16> -> vector<4x16x128xbf16>
      %c2_105 = arith.constant 2 : index
      %126 = arith.index_cast %113 : i32 to index
      %c0_106 = arith.constant 0 : index
      %c0_107 = arith.constant 0 : index
      %127 = vector.load %arg15[%c2_105, %126, %c0_106, %c0_107] : memref<3x18x16x128xbf16, #tpu.memory_space<vmem>>, vector<1x4x16x128xbf16>
      %128 = vector.shape_cast %127 : vector<1x4x16x128xbf16> to vector<4x16x128xbf16>
      %129 = vector.shape_cast %125 : vector<4x16x128xbf16> to vector<1x4x16x128xbf16>
      tpu.vector_store %arg15[%c2_105, %126, %c0_106, %c0_107], %129 {strides = array<i32>} : memref<3x18x16x128xbf16, #tpu.memory_space<vmem>>, vector<1x4x16x128xbf16>,
    }
    %c4_i32_3 = arith.constant 4 : i32
    %cst_4 = arith.constant 0.000000e+00 : bf16
    %3 = vector.broadcast %cst_4 : bf16 to vector<3x10x8x128xbf16>
    %c0_5 = arith.constant 0 : index
    %c0_6 = arith.constant 0 : index
    %c0_7 = arith.constant 0 : index
    %c0_8 = arith.constant 0 : index
    %4 = vector.load %arg16[%c0_5, %c0_6, %c0_7, %c0_8] : memref<3x10x8x128xbf16, #tpu.memory_space<vmem>>, vector<3x10x8x128xbf16>
    tpu.vector_store %arg16[%c0_5, %c0_6, %c0_7, %c0_8], %3 {strides = array<i32>} : memref<3x10x8x128xbf16, #tpu.memory_space<vmem>>, vector<3x10x8x128xbf16>,
    %c0_i32_9 = arith.constant 0 : i32
    %c2_i32 = arith.constant 2 : i32
    %5 = arith.addi %c0_i32_9, %c2_i32 : i32
    %c1_i32_10 = arith.constant 1 : i32
    scf.for %arg19 = %c0_i32_9 to %5 step %c1_i32_10  : i32 {
      %c1_i32_84 = arith.constant 1 : i32
      %92 = arith.muli %arg19, %c1_i32_84 : i32
      %c0_i32_85 = arith.constant 0 : i32
      %93 = arith.addi %c0_i32_85, %92 : i32
      %c8_i32 = arith.constant 8 : i32
      %94 = arith.muli %93, %c8_i32 : i32
      %95 = tpu.assume_multiple %94, 8 : i32
      %cst_86 = arith.constant 0.000000e+00 : f32
      %96 = vector.broadcast %cst_86 : f32 to vector<128x128xf32>
      %c0_i32_87 = arith.constant 0 : i32
      %97 = arith.addi %95, %c0_i32_87 : i32
      %c0_88 = arith.constant 0 : index
      %98 = arith.index_cast %97 : i32 to index
      %c0_89 = arith.constant 0 : index
      %c0_90 = arith.constant 0 : index
      %99 = vector.load %arg15[%c0_88, %98, %c0_89, %c0_90] : memref<3x18x16x128xbf16, #tpu.memory_space<vmem>>, vector<1x8x16x128xbf16>
      %100 = vector.shape_cast %99 : vector<1x8x16x128xbf16> to vector<8x16x128xbf16>
      %c0_i32_91 = arith.constant 0 : i32
      %101 = arith.addi %95, %c0_i32_91 : i32
      %c1_92 = arith.constant 1 : index
      %102 = arith.index_cast %101 : i32 to index
      %c0_93 = arith.constant 0 : index
      %c0_94 = arith.constant 0 : index
      %103 = vector.load %arg15[%c1_92, %102, %c0_93, %c0_94] : memref<3x18x16x128xbf16, #tpu.memory_space<vmem>>, vector<1x8x16x128xbf16>
      %104 = vector.shape_cast %103 : vector<1x8x16x128xbf16> to vector<8x16x128xbf16>
      %c0_i32_95 = arith.constant 0 : i32
      %105 = arith.addi %95, %c0_i32_95 : i32
      %c2_96 = arith.constant 2 : index
      %106 = arith.index_cast %105 : i32 to index
      %c0_97 = arith.constant 0 : index
      %c0_98 = arith.constant 0 : index
      %107 = vector.load %arg15[%c2_96, %106, %c0_97, %c0_98] : memref<3x18x16x128xbf16, #tpu.memory_space<vmem>>, vector<1x8x16x128xbf16>
      %108 = vector.shape_cast %107 : vector<1x8x16x128xbf16> to vector<8x16x128xbf16>
      %109 = tpu.concatenate %100, %104, %108 in 2 : vector<8x16x128xbf16>, vector<8x16x128xbf16>, vector<8x16x128xbf16> -> vector<8x16x384xbf16>
      %110 = vector.shape_cast %109 : vector<8x16x384xbf16> to vector<128x384xbf16>
      %c0_99 = arith.constant 0 : index
      %c0_100 = arith.constant 0 : index
      %c0_101 = arith.constant 0 : index
      %111 = vector.load %arg4[%c0_99, %c0_100, %c0_101] : memref<3x384x128xbf16, #tpu.memory_space<vmem>>, vector<1x384x128xbf16>
      %112 = vector.shape_cast %111 : vector<1x384x128xbf16> to vector<384x128xbf16>
      %cst_102 = arith.constant dense<0.000000e+00> : vector<128x128xf32>
      %113 = tpu.matmul %110, %112, %cst_102 {dimension_numbers = #tpu.dot_dimension_numbers<[1], [0], [0], [1], [0, 0, 1, 1], [], []>} : vector<128x384xbf16>, vector<384x128xbf16>, vector<128x128xf32> -> vector<128x128xf32>
      %114 = arith.addf %96, %113 : vector<128x128xf32>
      %c1_i32_103 = arith.constant 1 : i32
      %115 = arith.addi %95, %c1_i32_103 : i32
      %c0_104 = arith.constant 0 : index
      %116 = arith.index_cast %115 : i32 to index
      %c0_105 = arith.constant 0 : index
      %c0_106 = arith.constant 0 : index
      %117 = vector.load %arg15[%c0_104, %116, %c0_105, %c0_106] : memref<3x18x16x128xbf16, #tpu.memory_space<vmem>>, vector<1x8x16x128xbf16>
      %118 = vector.shape_cast %117 : vector<1x8x16x128xbf16> to vector<8x16x128xbf16>
      %c1_i32_107 = arith.constant 1 : i32
      %119 = arith.addi %95, %c1_i32_107 : i32
      %c1_108 = arith.constant 1 : index
      %120 = arith.index_cast %119 : i32 to index
      %c0_109 = arith.constant 0 : index
      %c0_110 = arith.constant 0 : index
      %121 = vector.load %arg15[%c1_108, %120, %c0_109, %c0_110] : memref<3x18x16x128xbf16, #tpu.memory_space<vmem>>, vector<1x8x16x128xbf16>
      %122 = vector.shape_cast %121 : vector<1x8x16x128xbf16> to vector<8x16x128xbf16>
      %c1_i32_111 = arith.constant 1 : i32
      %123 = arith.addi %95, %c1_i32_111 : i32
      %c2_112 = arith.constant 2 : index
      %124 = arith.index_cast %123 : i32 to index
      %c0_113 = arith.constant 0 : index
      %c0_114 = arith.constant 0 : index
      %125 = vector.load %arg15[%c2_112, %124, %c0_113, %c0_114] : memref<3x18x16x128xbf16, #tpu.memory_space<vmem>>, vector<1x8x16x128xbf16>
      %126 = vector.shape_cast %125 : vector<1x8x16x128xbf16> to vector<8x16x128xbf16>
      %127 = tpu.concatenate %118, %122, %126 in 2 : vector<8x16x128xbf16>, vector<8x16x128xbf16>, vector<8x16x128xbf16> -> vector<8x16x384xbf16>
      %128 = vector.shape_cast %127 : vector<8x16x384xbf16> to vector<128x384xbf16>
      %c1_115 = arith.constant 1 : index
      %c0_116 = arith.constant 0 : index
      %c0_117 = arith.constant 0 : index
      %129 = vector.load %arg4[%c1_115, %c0_116, %c0_117] : memref<3x384x128xbf16, #tpu.memory_space<vmem>>, vector<1x384x128xbf16>
      %130 = vector.shape_cast %129 : vector<1x384x128xbf16> to vector<384x128xbf16>
      %cst_118 = arith.constant dense<0.000000e+00> : vector<128x128xf32>
      %131 = tpu.matmul %128, %130, %cst_118 {dimension_numbers = #tpu.dot_dimension_numbers<[1], [0], [0], [1], [0, 0, 1, 1], [], []>} : vector<128x384xbf16>, vector<384x128xbf16>, vector<128x128xf32> -> vector<128x128xf32>
      %132 = arith.addf %114, %131 : vector<128x128xf32>
      %c2_i32_119 = arith.constant 2 : i32
      %133 = arith.addi %95, %c2_i32_119 : i32
      %c0_120 = arith.constant 0 : index
      %134 = arith.index_cast %133 : i32 to index
      %c0_121 = arith.constant 0 : index
      %c0_122 = arith.constant 0 : index
      %135 = vector.load %arg15[%c0_120, %134, %c0_121, %c0_122] : memref<3x18x16x128xbf16, #tpu.memory_space<vmem>>, vector<1x8x16x128xbf16>
      %136 = vector.shape_cast %135 : vector<1x8x16x128xbf16> to vector<8x16x128xbf16>
      %c2_i32_123 = arith.constant 2 : i32
      %137 = arith.addi %95, %c2_i32_123 : i32
      %c1_124 = arith.constant 1 : index
      %138 = arith.index_cast %137 : i32 to index
      %c0_125 = arith.constant 0 : index
      %c0_126 = arith.constant 0 : index
      %139 = vector.load %arg15[%c1_124, %138, %c0_125, %c0_126] : memref<3x18x16x128xbf16, #tpu.memory_space<vmem>>, vector<1x8x16x128xbf16>
      %140 = vector.shape_cast %139 : vector<1x8x16x128xbf16> to vector<8x16x128xbf16>
      %c2_i32_127 = arith.constant 2 : i32
      %141 = arith.addi %95, %c2_i32_127 : i32
      %c2_128 = arith.constant 2 : index
      %142 = arith.index_cast %141 : i32 to index
      %c0_129 = arith.constant 0 : index
      %c0_130 = arith.constant 0 : index
      %143 = vector.load %arg15[%c2_128, %142, %c0_129, %c0_130] : memref<3x18x16x128xbf16, #tpu.memory_space<vmem>>, vector<1x8x16x128xbf16>
      %144 = vector.shape_cast %143 : vector<1x8x16x128xbf16> to vector<8x16x128xbf16>
      %145 = tpu.concatenate %136, %140, %144 in 2 : vector<8x16x128xbf16>, vector<8x16x128xbf16>, vector<8x16x128xbf16> -> vector<8x16x384xbf16>
      %146 = vector.shape_cast %145 : vector<8x16x384xbf16> to vector<128x384xbf16>
      %c2_131 = arith.constant 2 : index
      %c0_132 = arith.constant 0 : index
      %c0_133 = arith.constant 0 : index
      %147 = vector.load %arg4[%c2_131, %c0_132, %c0_133] : memref<3x384x128xbf16, #tpu.memory_space<vmem>>, vector<1x384x128xbf16>
      %148 = vector.shape_cast %147 : vector<1x384x128xbf16> to vector<384x128xbf16>
      %cst_134 = arith.constant dense<0.000000e+00> : vector<128x128xf32>
      %149 = tpu.matmul %146, %148, %cst_134 {dimension_numbers = #tpu.dot_dimension_numbers<[1], [0], [0], [1], [0, 0, 1, 1], [], []>} : vector<128x384xbf16>, vector<384x128xbf16>, vector<128x128xf32> -> vector<128x128xf32>
      %150 = arith.addf %132, %149 : vector<128x128xf32>
      %c0_135 = arith.constant 0 : index
      %c0_136 = arith.constant 0 : index
      %151 = vector.load %arg5[%c0_135, %c0_136] : memref<1x128xf32, #tpu.memory_space<vmem>>, vector<1x128xf32>
      %152 = vector.broadcast %151 : vector<1x128xf32> to vector<128x128xf32>
      %153 = arith.addf %150, %152 : vector<128x128xf32>
      %cst_137 = arith.constant 0.000000e+00 : f32
      %154 = vector.broadcast %cst_137 : f32 to vector<128x128xf32>
      %155 = arith.maximumf %153, %154 : vector<128x128xf32>
      %156 = vector.shape_cast %155 : vector<128x128xf32> to vector<64x2x128xf32>
      %cst_138 = arith.constant dense<0xFF800000> : vector<64x128xf32>
      %157 = vector.multi_reduction <maximumf>, %156, %cst_138 [1] : vector<64x2x128xf32> to vector<64x128xf32>
      %158 = vector.shape_cast %157 : vector<64x128xf32> to vector<4x2x8x128xf32>
      %cst_139 = arith.constant dense<0xFF800000> : vector<4x8x128xf32>
      %159 = vector.multi_reduction <maximumf>, %158, %cst_139 [1] : vector<4x2x8x128xf32> to vector<4x8x128xf32>
      %160 = arith.truncf %159 : vector<4x8x128xf32> to vector<4x8x128xbf16>
      %cst_140 = arith.constant 0.000000e+00 : bf16
      %161 = vector.broadcast %cst_140 : bf16 to vector<4x1x128xbf16>
      %c4_i32_141 = arith.constant 4 : i32
      %162 = arith.muli %93, %c4_i32_141 : i32
      %c1_i32_142 = arith.constant 1 : i32
      %163 = arith.addi %c1_i32_142, %162 : i32
      %c1_143 = arith.constant 1 : index
      %164 = arith.index_cast %163 : i32 to index
      %c0_144 = arith.constant 0 : index
      %c0_145 = arith.constant 0 : index
      %165 = vector.load %arg16[%c1_143, %164, %c0_144, %c0_145] : memref<3x10x8x128xbf16, #tpu.memory_space<vmem>>, vector<1x4x8x128xbf16>
      %166 = vector.shape_cast %165 : vector<1x4x8x128xbf16> to vector<4x8x128xbf16>
      %167 = vector.shape_cast %160 : vector<4x8x128xbf16> to vector<1x4x8x128xbf16>
      tpu.vector_store %arg16[%c1_143, %164, %c0_144, %c0_145], %167 {strides = array<i32>} : memref<3x10x8x128xbf16, #tpu.memory_space<vmem>>, vector<1x4x8x128xbf16>,
      %168 = vector.extract_strided_slice %160 {offsets = [0, 0, 0], sizes = [4, 7, 128], strides = [1, 1, 1]} : vector<4x8x128xbf16> to vector<4x7x128xbf16>
      %169 = tpu.concatenate %161, %168 in 1 : vector<4x1x128xbf16>, vector<4x7x128xbf16> -> vector<4x8x128xbf16>
      %c0_146 = arith.constant 0 : index
      %170 = arith.index_cast %163 : i32 to index
      %c0_147 = arith.constant 0 : index
      %c0_148 = arith.constant 0 : index
      %171 = vector.load %arg16[%c0_146, %170, %c0_147, %c0_148] : memref<3x10x8x128xbf16, #tpu.memory_space<vmem>>, vector<1x4x8x128xbf16>
      %172 = vector.shape_cast %171 : vector<1x4x8x128xbf16> to vector<4x8x128xbf16>
      %173 = vector.shape_cast %169 : vector<4x8x128xbf16> to vector<1x4x8x128xbf16>
      tpu.vector_store %arg16[%c0_146, %170, %c0_147, %c0_148], %173 {strides = array<i32>} : memref<3x10x8x128xbf16, #tpu.memory_space<vmem>>, vector<1x4x8x128xbf16>,
      %174 = vector.extract_strided_slice %160 {offsets = [0, 1, 0], sizes = [4, 7, 128], strides = [1, 1, 1]} : vector<4x8x128xbf16> to vector<4x7x128xbf16>
      %175 = tpu.concatenate %174, %161 in 1 : vector<4x7x128xbf16>, vector<4x1x128xbf16> -> vector<4x8x128xbf16>
      %c2_149 = arith.constant 2 : index
      %176 = arith.index_cast %163 : i32 to index
      %c0_150 = arith.constant 0 : index
      %c0_151 = arith.constant 0 : index
      %177 = vector.load %arg16[%c2_149, %176, %c0_150, %c0_151] : memref<3x10x8x128xbf16, #tpu.memory_space<vmem>>, vector<1x4x8x128xbf16>
      %178 = vector.shape_cast %177 : vector<1x4x8x128xbf16> to vector<4x8x128xbf16>
      %179 = vector.shape_cast %175 : vector<4x8x128xbf16> to vector<1x4x8x128xbf16>
      tpu.vector_store %arg16[%c2_149, %176, %c0_150, %c0_151], %179 {strides = array<i32>} : memref<3x10x8x128xbf16, #tpu.memory_space<vmem>>, vector<1x4x8x128xbf16>,
    }
    %c2_i32_11 = arith.constant 2 : i32
    %cst_12 = arith.constant 0.000000e+00 : f32
    %6 = vector.broadcast %cst_12 : f32 to vector<64x128xf32>
    %c0_13 = arith.constant 0 : index
    %c0_14 = arith.constant 0 : index
    %c0_15 = arith.constant 0 : index
    %c0_16 = arith.constant 0 : index
    %7 = vector.load %arg16[%c0_13, %c0_14, %c0_15, %c0_16] : memref<3x10x8x128xbf16, #tpu.memory_space<vmem>>, vector<1x8x8x128xbf16>
    %8 = vector.shape_cast %7 : vector<1x8x8x128xbf16> to vector<8x8x128xbf16>
    %c1 = arith.constant 1 : index
    %c0_17 = arith.constant 0 : index
    %c0_18 = arith.constant 0 : index
    %c0_19 = arith.constant 0 : index
    %9 = vector.load %arg16[%c1, %c0_17, %c0_18, %c0_19] : memref<3x10x8x128xbf16, #tpu.memory_space<vmem>>, vector<1x8x8x128xbf16>
    %10 = vector.shape_cast %9 : vector<1x8x8x128xbf16> to vector<8x8x128xbf16>
    %c2 = arith.constant 2 : index
    %c0_20 = arith.constant 0 : index
    %c0_21 = arith.constant 0 : index
    %c0_22 = arith.constant 0 : index
    %11 = vector.load %arg16[%c2, %c0_20, %c0_21, %c0_22] : memref<3x10x8x128xbf16, #tpu.memory_space<vmem>>, vector<1x8x8x128xbf16>
    %12 = vector.shape_cast %11 : vector<1x8x8x128xbf16> to vector<8x8x128xbf16>
    %13 = tpu.concatenate %8, %10, %12 in 2 : vector<8x8x128xbf16>, vector<8x8x128xbf16>, vector<8x8x128xbf16> -> vector<8x8x384xbf16>
    %14 = vector.shape_cast %13 : vector<8x8x384xbf16> to vector<64x384xbf16>
    %c0_23 = arith.constant 0 : index
    %c0_24 = arith.constant 0 : index
    %c0_25 = arith.constant 0 : index
    %15 = vector.load %arg6[%c0_23, %c0_24, %c0_25] : memref<3x384x128xbf16, #tpu.memory_space<vmem>>, vector<1x384x128xbf16>
    %16 = vector.shape_cast %15 : vector<1x384x128xbf16> to vector<384x128xbf16>
    %cst_26 = arith.constant dense<0.000000e+00> : vector<64x128xf32>
    %17 = tpu.matmul %14, %16, %cst_26 {dimension_numbers = #tpu.dot_dimension_numbers<[1], [0], [0], [1], [0, 0, 1, 1], [], []>} : vector<64x384xbf16>, vector<384x128xbf16>, vector<64x128xf32> -> vector<64x128xf32>
    %18 = arith.addf %6, %17 : vector<64x128xf32>
    %c0_27 = arith.constant 0 : index
    %c1_28 = arith.constant 1 : index
    %c0_29 = arith.constant 0 : index
    %c0_30 = arith.constant 0 : index
    %19 = vector.load %arg16[%c0_27, %c1_28, %c0_29, %c0_30] : memref<3x10x8x128xbf16, #tpu.memory_space<vmem>>, vector<1x8x8x128xbf16>
    %20 = vector.shape_cast %19 : vector<1x8x8x128xbf16> to vector<8x8x128xbf16>
    %c1_31 = arith.constant 1 : index
    %c1_32 = arith.constant 1 : index
    %c0_33 = arith.constant 0 : index
    %c0_34 = arith.constant 0 : index
    %21 = vector.load %arg16[%c1_31, %c1_32, %c0_33, %c0_34] : memref<3x10x8x128xbf16, #tpu.memory_space<vmem>>, vector<1x8x8x128xbf16>
    %22 = vector.shape_cast %21 : vector<1x8x8x128xbf16> to vector<8x8x128xbf16>
    %c2_35 = arith.constant 2 : index
    %c1_36 = arith.constant 1 : index
    %c0_37 = arith.constant 0 : index
    %c0_38 = arith.constant 0 : index
    %23 = vector.load %arg16[%c2_35, %c1_36, %c0_37, %c0_38] : memref<3x10x8x128xbf16, #tpu.memory_space<vmem>>, vector<1x8x8x128xbf16>
    %24 = vector.shape_cast %23 : vector<1x8x8x128xbf16> to vector<8x8x128xbf16>
    %25 = tpu.concatenate %20, %22, %24 in 2 : vector<8x8x128xbf16>, vector<8x8x128xbf16>, vector<8x8x128xbf16> -> vector<8x8x384xbf16>
    %26 = vector.shape_cast %25 : vector<8x8x384xbf16> to vector<64x384xbf16>
    %c1_39 = arith.constant 1 : index
    %c0_40 = arith.constant 0 : index
    %c0_41 = arith.constant 0 : index
    %27 = vector.load %arg6[%c1_39, %c0_40, %c0_41] : memref<3x384x128xbf16, #tpu.memory_space<vmem>>, vector<1x384x128xbf16>
    %28 = vector.shape_cast %27 : vector<1x384x128xbf16> to vector<384x128xbf16>
    %cst_42 = arith.constant dense<0.000000e+00> : vector<64x128xf32>
    %29 = tpu.matmul %26, %28, %cst_42 {dimension_numbers = #tpu.dot_dimension_numbers<[1], [0], [0], [1], [0, 0, 1, 1], [], []>} : vector<64x384xbf16>, vector<384x128xbf16>, vector<64x128xf32> -> vector<64x128xf32>
    %30 = arith.addf %18, %29 : vector<64x128xf32>
    %c0_43 = arith.constant 0 : index
    %c2_44 = arith.constant 2 : index
    %c0_45 = arith.constant 0 : index
    %c0_46 = arith.constant 0 : index
    %31 = vector.load %arg16[%c0_43, %c2_44, %c0_45, %c0_46] : memref<3x10x8x128xbf16, #tpu.memory_space<vmem>>, vector<1x8x8x128xbf16>
    %32 = vector.shape_cast %31 : vector<1x8x8x128xbf16> to vector<8x8x128xbf16>
    %c1_47 = arith.constant 1 : index
    %c2_48 = arith.constant 2 : index
    %c0_49 = arith.constant 0 : index
    %c0_50 = arith.constant 0 : index
    %33 = vector.load %arg16[%c1_47, %c2_48, %c0_49, %c0_50] : memref<3x10x8x128xbf16, #tpu.memory_space<vmem>>, vector<1x8x8x128xbf16>
    %34 = vector.shape_cast %33 : vector<1x8x8x128xbf16> to vector<8x8x128xbf16>
    %c2_51 = arith.constant 2 : index
    %c2_52 = arith.constant 2 : index
    %c0_53 = arith.constant 0 : index
    %c0_54 = arith.constant 0 : index
    %35 = vector.load %arg16[%c2_51, %c2_52, %c0_53, %c0_54] : memref<3x10x8x128xbf16, #tpu.memory_space<vmem>>, vector<1x8x8x128xbf16>
    %36 = vector.shape_cast %35 : vector<1x8x8x128xbf16> to vector<8x8x128xbf16>
    %37 = tpu.concatenate %32, %34, %36 in 2 : vector<8x8x128xbf16>, vector<8x8x128xbf16>, vector<8x8x128xbf16> -> vector<8x8x384xbf16>
    %38 = vector.shape_cast %37 : vector<8x8x384xbf16> to vector<64x384xbf16>
    %c2_55 = arith.constant 2 : index
    %c0_56 = arith.constant 0 : index
    %c0_57 = arith.constant 0 : index
    %39 = vector.load %arg6[%c2_55, %c0_56, %c0_57] : memref<3x384x128xbf16, #tpu.memory_space<vmem>>, vector<1x384x128xbf16>
    %40 = vector.shape_cast %39 : vector<1x384x128xbf16> to vector<384x128xbf16>
    %cst_58 = arith.constant dense<0.000000e+00> : vector<64x128xf32>
    %41 = tpu.matmul %38, %40, %cst_58 {dimension_numbers = #tpu.dot_dimension_numbers<[1], [0], [0], [1], [0, 0, 1, 1], [], []>} : vector<64x384xbf16>, vector<384x128xbf16>, vector<64x128xf32> -> vector<64x128xf32>
    %42 = arith.addf %30, %41 : vector<64x128xf32>
    %c0_59 = arith.constant 0 : index
    %c0_60 = arith.constant 0 : index
    %43 = vector.load %arg7[%c0_59, %c0_60] : memref<1x128xf32, #tpu.memory_space<vmem>>, vector<1x128xf32>
    %44 = vector.broadcast %43 : vector<1x128xf32> to vector<64x128xf32>
    %45 = arith.addf %42, %44 : vector<64x128xf32>
    %cst_61 = arith.constant 0.000000e+00 : f32
    %46 = vector.broadcast %cst_61 : f32 to vector<64x128xf32>
    %47 = arith.maximumf %45, %46 : vector<64x128xf32>
    %48 = vector.shape_cast %47 : vector<64x128xf32> to vector<32x2x128xf32>
    %cst_62 = arith.constant dense<0xFF800000> : vector<32x128xf32>
    %49 = vector.multi_reduction <maximumf>, %48, %cst_62 [1] : vector<32x2x128xf32> to vector<32x128xf32>
    %50 = vector.shape_cast %49 : vector<32x128xf32> to vector<4x2x4x128xf32>
    %cst_63 = arith.constant dense<0xFF800000> : vector<4x4x128xf32>
    %51 = vector.multi_reduction <maximumf>, %50, %cst_63 [1] : vector<4x2x4x128xf32> to vector<4x4x128xf32>
    %52 = vector.shape_cast %51 : vector<4x4x128xf32> to vector<16x128xf32>
    %53 = arith.truncf %52 : vector<16x128xf32> to vector<16x128xbf16>
    %54 = vector.extract_strided_slice %53 {offsets = [0, 0], sizes = [1, 128], strides = [1, 1]} : vector<16x128xbf16> to vector<1x128xbf16>
    %55 = vector.extract_strided_slice %53 {offsets = [1, 0], sizes = [1, 128], strides = [1, 1]} : vector<16x128xbf16> to vector<1x128xbf16>
    %56 = vector.extract_strided_slice %53 {offsets = [2, 0], sizes = [1, 128], strides = [1, 1]} : vector<16x128xbf16> to vector<1x128xbf16>
    %57 = vector.extract_strided_slice %53 {offsets = [3, 0], sizes = [1, 128], strides = [1, 1]} : vector<16x128xbf16> to vector<1x128xbf16>
    %58 = vector.extract_strided_slice %53 {offsets = [4, 0], sizes = [1, 128], strides = [1, 1]} : vector<16x128xbf16> to vector<1x128xbf16>
    %59 = vector.extract_strided_slice %53 {offsets = [5, 0], sizes = [1, 128], strides = [1, 1]} : vector<16x128xbf16> to vector<1x128xbf16>
    %60 = vector.extract_strided_slice %53 {offsets = [6, 0], sizes = [1, 128], strides = [1, 1]} : vector<16x128xbf16> to vector<1x128xbf16>
    %61 = vector.extract_strided_slice %53 {offsets = [7, 0], sizes = [1, 128], strides = [1, 1]} : vector<16x128xbf16> to vector<1x128xbf16>
    %62 = vector.extract_strided_slice %53 {offsets = [8, 0], sizes = [1, 128], strides = [1, 1]} : vector<16x128xbf16> to vector<1x128xbf16>
    %63 = vector.extract_strided_slice %53 {offsets = [9, 0], sizes = [1, 128], strides = [1, 1]} : vector<16x128xbf16> to vector<1x128xbf16>
    %64 = vector.extract_strided_slice %53 {offsets = [10, 0], sizes = [1, 128], strides = [1, 1]} : vector<16x128xbf16> to vector<1x128xbf16>
    %65 = vector.extract_strided_slice %53 {offsets = [11, 0], sizes = [1, 128], strides = [1, 1]} : vector<16x128xbf16> to vector<1x128xbf16>
    %66 = vector.extract_strided_slice %53 {offsets = [12, 0], sizes = [1, 128], strides = [1, 1]} : vector<16x128xbf16> to vector<1x128xbf16>
    %67 = vector.extract_strided_slice %53 {offsets = [13, 0], sizes = [1, 128], strides = [1, 1]} : vector<16x128xbf16> to vector<1x128xbf16>
    %68 = vector.extract_strided_slice %53 {offsets = [14, 0], sizes = [1, 128], strides = [1, 1]} : vector<16x128xbf16> to vector<1x128xbf16>
    %69 = vector.extract_strided_slice %53 {offsets = [15, 0], sizes = [1, 128], strides = [1, 1]} : vector<16x128xbf16> to vector<1x128xbf16>
    %70 = tpu.concatenate %54, %55, %56, %57, %58, %59, %60, %61, %62, %63, %64, %65, %66, %67, %68, %69 in 1 : vector<1x128xbf16>, vector<1x128xbf16>, vector<1x128xbf16>, vector<1x128xbf16>, vector<1x128xbf16>, vector<1x128xbf16>, vector<1x128xbf16>, vector<1x128xbf16>, vector<1x128xbf16>, vector<1x128xbf16>, vector<1x128xbf16>, vector<1x128xbf16>, vector<1x128xbf16>, vector<1x128xbf16>, vector<1x128xbf16>, vector<1x128xbf16> -> vector<1x2048xbf16>
    tpu.wait_dma2 semaphore(%arg18 : memref<!tpu.dma_semaphore, #tpu.memory_space<semaphore_mem>>) src(%arg8 : memref<2048x512xbf16, #tpu.memory_space<any>>) dst(%arg17 : memref<2048x512xbf16, #tpu.memory_space<vmem>>)
    %c0_64 = arith.constant 0 : index
    %c0_65 = arith.constant 0 : index
    %71 = vector.load %arg17[%c0_64, %c0_65] : memref<2048x512xbf16, #tpu.memory_space<vmem>>, vector<2048x512xbf16>
    %cst_66 = arith.constant dense<0.000000e+00> : vector<1x512xf32>
    %72 = tpu.matmul %70, %71, %cst_66 {dimension_numbers = #tpu.dot_dimension_numbers<[1], [0], [0], [1], [0, 0, 1, 1], [], []>} : vector<1x2048xbf16>, vector<2048x512xbf16>, vector<1x512xf32> -> vector<1x512xf32>
    %c0_67 = arith.constant 0 : index
    %c0_68 = arith.constant 0 : index
    %73 = vector.load %arg9[%c0_67, %c0_68] : memref<1x512xf32, #tpu.memory_space<vmem>>, vector<1x512xf32>
    %74 = arith.addf %72, %73 : vector<1x512xf32>
    %cst_69 = arith.constant 0.000000e+00 : f32
    %75 = vector.broadcast %cst_69 : f32 to vector<1x512xf32>
    %76 = arith.maximumf %74, %75 : vector<1x512xf32>
    %77 = arith.truncf %76 : vector<1x512xf32> to vector<1x512xbf16>
    %c0_70 = arith.constant 0 : index
    %c0_71 = arith.constant 0 : index
    %78 = vector.load %arg10[%c0_70, %c0_71] : memref<512x128xbf16, #tpu.memory_space<vmem>>, vector<512x128xbf16>
    %cst_72 = arith.constant dense<0.000000e+00> : vector<1x128xf32>
    %79 = tpu.matmul %77, %78, %cst_72 {dimension_numbers = #tpu.dot_dimension_numbers<[1], [0], [0], [1], [0, 0, 1, 1], [], []>} : vector<1x512xbf16>, vector<512x128xbf16>, vector<1x128xf32> -> vector<1x128xf32>
    %c0_73 = arith.constant 0 : index
    %c0_74 = arith.constant 0 : index
    %80 = vector.load %arg11[%c0_73, %c0_74] : memref<1x128xf32, #tpu.memory_space<vmem>>, vector<1x128xf32>
    %81 = arith.addf %79, %80 : vector<1x128xf32>
    %cst_75 = arith.constant 0.000000e+00 : f32
    %82 = vector.broadcast %cst_75 : f32 to vector<1x128xf32>
    %83 = arith.maximumf %81, %82 : vector<1x128xf32>
    %84 = arith.truncf %83 : vector<1x128xf32> to vector<1x128xbf16>
    %c0_76 = arith.constant 0 : index
    %c0_77 = arith.constant 0 : index
    %85 = vector.load %arg12[%c0_76, %c0_77] : memref<128x128xbf16, #tpu.memory_space<vmem>>, vector<128x128xbf16>
    %cst_78 = arith.constant dense<0.000000e+00> : vector<1x128xf32>
    %86 = tpu.matmul %84, %85, %cst_78 {dimension_numbers = #tpu.dot_dimension_numbers<[1], [0], [0], [1], [0, 0, 1, 1], [], []>} : vector<1x128xbf16>, vector<128x128xbf16>, vector<1x128xf32> -> vector<1x128xf32>
    %c0_79 = arith.constant 0 : index
    %c0_80 = arith.constant 0 : index
    %87 = vector.load %arg13[%c0_79, %c0_80] : memref<1x128xf32, #tpu.memory_space<vmem>>, vector<1x128xf32>
    %88 = arith.addf %86, %87 : vector<1x128xf32>
    %c0_81 = arith.constant 0 : index
    %c0_82 = arith.constant 0 : index
    %c0_83 = arith.constant 0 : index
    %89 = vector.load %arg14[%c0_81, %c0_82, %c0_83] : memref<1x1x128xf32, #tpu.memory_space<vmem>>, vector<1x1x128xf32>
    %90 = vector.shape_cast %89 : vector<1x1x128xf32> to vector<1x128xf32>
    %91 = vector.shape_cast %88 : vector<1x128xf32> to vector<1x1x128xf32>
    tpu.vector_store %arg14[%c0_81, %c0_82, %c0_83], %91 {strides = array<i32>} : memref<1x1x128xf32, #tpu.memory_space<vmem>>, vector<1x1x128xf32>,
    return
  }
  func.func @transform_0(%arg0: i32) -> (i32, i32, i32) {
    %c0_i32 = arith.constant 0 : i32
    %c0_i32_0 = arith.constant 0 : i32
    %c0_i32_1 = arith.constant 0 : i32
    return %arg0, %c0_i32, %c0_i32_0 : i32, i32, i32
  }
  func.func @transform_1(%arg0: i32) -> (i32, i32) {
    %c0_i32 = arith.constant 0 : i32
    %c0_i32_0 = arith.constant 0 : i32
    %c0_i32_1 = arith.constant 0 : i32
    return %c0_i32, %c0_i32_0 : i32, i32
  }
  func.func @transform_2(%arg0: i32) -> (i32, i32) {
    %c0_i32 = arith.constant 0 : i32
    %c0_i32_0 = arith.constant 0 : i32
    %c0_i32_1 = arith.constant 0 : i32
    return %c0_i32, %c0_i32_0 : i32, i32
  }
  func.func @transform_3(%arg0: i32) -> (i32, i32, i32) {
    %c0_i32 = arith.constant 0 : i32
    %c0_i32_0 = arith.constant 0 : i32
    %c0_i32_1 = arith.constant 0 : i32
    %c0_i32_2 = arith.constant 0 : i32
    return %c0_i32, %c0_i32_0, %c0_i32_1 : i32, i32, i32
  }
  func.func @transform_4(%arg0: i32) -> (i32, i32) {
    %c0_i32 = arith.constant 0 : i32
    %c0_i32_0 = arith.constant 0 : i32
    %c0_i32_1 = arith.constant 0 : i32
    return %c0_i32, %c0_i32_0 : i32, i32
  }
  func.func @transform_5(%arg0: i32) -> (i32, i32, i32) {
    %c0_i32 = arith.constant 0 : i32
    %c0_i32_0 = arith.constant 0 : i32
    %c0_i32_1 = arith.constant 0 : i32
    %c0_i32_2 = arith.constant 0 : i32
    return %c0_i32, %c0_i32_0, %c0_i32_1 : i32, i32, i32
  }
  func.func @transform_6(%arg0: i32) -> (i32, i32) {
    %c0_i32 = arith.constant 0 : i32
    %c0_i32_0 = arith.constant 0 : i32
    %c0_i32_1 = arith.constant 0 : i32
    return %c0_i32, %c0_i32_0 : i32, i32
  }
  func.func @transform_8(%arg0: i32) -> (i32, i32) {
    %c0_i32 = arith.constant 0 : i32
    %c0_i32_0 = arith.constant 0 : i32
    %c0_i32_1 = arith.constant 0 : i32
    return %c0_i32, %c0_i32_0 : i32, i32
  }
  func.func @transform_9(%arg0: i32) -> (i32, i32) {
    %c0_i32 = arith.constant 0 : i32
    %c0_i32_0 = arith.constant 0 : i32
    %c0_i32_1 = arith.constant 0 : i32
    return %c0_i32, %c0_i32_0 : i32, i32
  }
  func.func @transform_10(%arg0: i32) -> (i32, i32) {
    %c0_i32 = arith.constant 0 : i32
    %c0_i32_0 = arith.constant 0 : i32
    %c0_i32_1 = arith.constant 0 : i32
    return %c0_i32, %c0_i32_0 : i32, i32
  }
  func.func @transform_11(%arg0: i32) -> (i32, i32) {
    %c0_i32 = arith.constant 0 : i32
    %c0_i32_0 = arith.constant 0 : i32
    %c0_i32_1 = arith.constant 0 : i32
    return %c0_i32, %c0_i32_0 : i32, i32
  }
  func.func @transform_12(%arg0: i32) -> (i32, i32) {
    %c0_i32 = arith.constant 0 : i32
    %c0_i32_0 = arith.constant 0 : i32
    %c0_i32_1 = arith.constant 0 : i32
    return %c0_i32, %c0_i32_0 : i32, i32
  }
  func.func @transform_13(%arg0: i32) -> (i32, i32, i32) {
    %c0_i32 = arith.constant 0 : i32
    %c0_i32_0 = arith.constant 0 : i32
    %c0_i32_1 = arith.constant 0 : i32
    return %arg0, %c0_i32, %c0_i32_0 : i32, i32, i32
  }
}

</mosaic_0001>

<bundles_post_ra>
// kernel: forward.1
= control target key start
LH: loop header
LB: loop body
LE: loop exit
PB: predicated region body
PF: predicated region fallthrough
CT: control target
= control target key end

     0   :  { %s20715_s0 = inlined_call_operand.vmem [shape: bf16[2,1024,32], index: 0, kind: input, shape index: {}]   ;;  %s20716_s1 = inlined_call_operand.vmem [shape: bf16[32,128], index: 1, kind: input, shape index: {}]   ;;  %s20717_s2 = inlined_call_operand.vmem [shape: f32[1,128], index: 2, kind: input, shape index: {}]   ;;  %s20718_s3 = inlined_call_operand.vmem [shape: bf16[3,384,128], index: 3, kind: input, shape index: {}]   ;;  %s20719_s4 = inlined_call_operand.vmem [shape: f32[1,128], index: 4, kind: input, shape index: {}]   ;;  %s20720_s5 = inlined_call_operand.vmem [shape: bf16[3,384,128], index: 5, kind: input, shape index: {}]   ;;  %s20721_s6 = inlined_call_operand.vmem [shape: f32[1,128], index: 6, kind: input, shape index: {}]   ;;  %s20722_s7 = inlined_call_operand.vmem [shape: bf16[2048,512], index: 7, kind: input, shape index: {}]   ;;  %s20723_s8 = inlined_call_operand.vmem [shape: f32[1,512], index: 8, kind: input, shape index: {}]   ;;  %s20724_s9 = inlined_call_operand.vmem [shape: bf16[512,128], index: 9, kind: input, shape index: {}]   ;;  %s20725_s10 = inlined_call_operand.vmem [shape: f32[1,128], index: 10, kind: input, shape index: {}]   ;;  %s20726_s11 = inlined_call_operand.vmem [shape: bf16[128,128], index: 11, kind: input, shape index: {}]   ;;  %s20727_s12 = inlined_call_operand.vmem [shape: f32[1,128], index: 12, kind: input, shape index: {}]   ;;  %s20728_s13 = inlined_call_operand.hbm [shape: f32[2,1,128], index: 13, kind: output, shape index: {}]  }
   0x1   :  { %20742 = sst [smem:[#allocation25_spill]] %s20715_s0 }
   0x2   :  { %18 = vsyncpa [#allocation7], 0 }
   0x3   :  { %20 = vsyncpa [#allocation7 + $0x1], 0  ;;  %s16589_s25 = smov 0   ;;  %s16591_s26 = smov 0  }
   0x4   :  { %s16593_s27 = smov 0   ;;  %s16595_s28 = smov 0  }
   0x5 LB: > { %20743 = sst [smem:[#allocation11_spill]] %s16500_s27  ;;  %s16610_s29 = sadd.s32 4294967295, %s16504_s28   ;;  %s16504_s28 = sphi %s16595_s28, %s20794_s28   ;;  %s16500_s27 = sphi %s16593_s27, %s20796_s27   ;;  %s16496_s26 = sphi %s16591_s26, %s20798_s26   ;;  %s16492_s25 = sphi %s16589_s25, %s20797_s25  }
   0x6   : > { %s13349_s30 = sadd.s32 4294967294, %s16504_s28   ;;  %s16614_s14 = sadd.s32 1, %s16504_s28  }
   0x7   : > { %20744 = sst [smem:[#allocation12_spill]] %s16614_s14  ;;  %s290_s15 = sadd.s32 1, %s16500_s27 }
   0x8   : > { %s287_s16 = ssub.s32 %s16504_s28, %s16614_s14  ;;  %p300_p0 = scmp.ne.s32.totalorder %s16500_s27, %s16496_s26 }
   0x9   : > { %p288_p1 = scmp.eq.s32.totalorder %s287_s16, 0  ;;  %p301_p2 = scmp.eq.s32.totalorder %s16610_s29, 1 }
   0xa   : > { %p306_p3 = scmp.ne.s32.totalorder %s16496_s26, %s16492_s25  ;;  %p307_p4 = scmp.eq.s32.totalorder %s13349_s30, 1 }
   0xb   : > { %s16625_s17 = scalar_select %p288_p1, %s16500_s27, %s290_s15  }
   0xc   : > { %p16627_p5 = por %p301_p2, %p300_p0  ;;  %p16631_p6 = por %p307_p4, %p306_p3 }
   0xd   : > { %20745 = sst [smem:[#allocation13_spill]] %s16625_s17  ;;  %p13352_p7 = scmp.ge.s32.totalorder %s16504_s28, 1 }
   0xe   : > { %s20747_s19 = scalar_select %p16631_p6, 1, 0 }
   0xf   : > { %p366_p8 = scmp.lt.s32.totalorder %s16504_s28, 3 }
  0x10   : > { %20748 = sst [smem:[#allocation14_spill]] %s20747_s19 }
  0x11   : > { %p367_p9 = pnand %p13352_p7, %p366_p8 }
  0x13   : > { %370 = sbr.rel (%p367_p9) target bundleno = 2984 (0xba8), region = 68 }
  0x18   : > { %p407_p10 = scmp.lt.s32.totalorder %s16610_s29, 1  ;;  %v446_v0 = vld [vmem:[%s20722_s7] sm:$0xff]  ;;  %v448_v1 = vld [vmem:[%s20722_s7 + $0x8] sm:$0xff]  ;;  %v450_v2 = vld [vmem:[%s20722_s7 + $0x10] sm:$0xff]  ;;  %s20749_s0 = sld [smem:[#allocation25_spill]] }
  0x19   : > { %447 = vst [vmem:[#allocation4 + $0xab0] sm:$0xff] %v446_v0  ;;  %449 = vst [vmem:[#allocation4 + $0xbb0] sm:$0xff] %v448_v1  ;;  %v452_v3 = vld [vmem:[%s20722_s7 + $0x18] sm:$0xff]  ;;  %v454_v4 = vld [vmem:[%s20722_s7 + $0x20] sm:$0xff]  ;;  %s20750_s19 = sand.u32 1, %s16496_s26  }
  0x1a   : > { %451 = vst [vmem:[#allocation4 + $0x4d8] sm:$0xff] %v450_v2  ;;  %v456_v5 = vld [vmem:[%s20722_s7 + $0x28] sm:$0xff]  ;;  %s408_s23 = scalar_select %p407_p10, %s16610_s29, 1  ;;  %453 = vst [vmem:[#allocation4 + $0x818] sm:$0xff] %v452_v3  ;;  %v458_v6 = vld [vmem:[%s20722_s7 + $0x30] sm:$0xff] }
  0x1b   : > { %455 = vst [vmem:[#allocation4 + $0xc50] sm:$0xff] %v454_v4  ;;  %457 = vst [vmem:[#allocation4 + $0x810] sm:$0xff] %v456_v5  ;;  %v460_v7 = vld [vmem:[%s20722_s7 + $0x38] sm:$0xff]  ;;  %v462_v8 = vld [vmem:[%s20722_s7 + $0x40] sm:$0xff]  ;;  %s18183_s16 = scalar_lea.vmem [#allocation6], %s20750_s19 }
  0x1c   : > { %459 = vst [vmem:[#allocation4 + $0x770] sm:$0xff] %v458_v6  ;;  %461 = vst [vmem:[#allocation4 + $0x338] sm:$0xff] %v460_v7  ;;  %v464_v9 = vld [vmem:[%s20722_s7 + $0x48] sm:$0xff]  ;;  %v466_v10 = vld [vmem:[%s20722_s7 + $0x50] sm:$0xff]  ;;  %s14707_s14 = sshll.u32 %s408_s23, 9 }
  0x1d   : > { %463 = vst [vmem:[#allocation4 + $0x450] sm:$0xff] %v462_v8  ;;  %v468_v11 = vld [vmem:[%s20722_s7 + $0x58] sm:$0xff]  ;;  %465 = vst [vmem:[#allocation4 + $0xb88] sm:$0xff] %v464_v9  ;;  %v470_v12 = vld [vmem:[%s20722_s7 + $0x60] sm:$0xff] }
  0x1e   : > { %467 = vst [vmem:[#allocation4 + $0x918] sm:$0xff] %v466_v10  ;;  %469 = vst [vmem:[#allocation4 + $0xd20] sm:$0xff] %v468_v11  ;;  %v472_v13 = vld [vmem:[%s20722_s7 + $0x68] sm:$0xff]  ;;  %v474_v14 = vld [vmem:[%s20722_s7 + $0x70] sm:$0xff]  ;;  %s16688_s24 = scalar_lea.vmem %s20749_s0, %s14707_s14 }
  0x1f   : > { %471 = vst [vmem:[#allocation4 + $0xca0] sm:$0xff] %v470_v12  ;;  %473 = vst [vmem:[#allocation4 + $0xb28] sm:$0xff] %v472_v13  ;;  %v476_v15 = vld [vmem:[%s20722_s7 + $0x78] sm:$0xff]  ;;  %v478_v16 = vld [vmem:[%s20722_s7 + $0x80] sm:$0xff] }
  0x20   : > { %475 = vst [vmem:[#allocation4 + $0xd58] sm:$0xff] %v474_v14  ;;  %v480_v17 = vld [vmem:[%s20722_s7 + $0x88] sm:$0xff]  ;;  %477 = vst [vmem:[#allocation4 + $0x510] sm:$0xff] %v476_v15  ;;  %v482_v18 = vld [vmem:[%s20722_s7 + $0x90] sm:$0xff] }
  0x21   : > { %479 = vst [vmem:[#allocation4 + $0x728] sm:$0xff] %v478_v16  ;;  %481 = vst [vmem:[#allocation4 + $0x6e8] sm:$0xff] %v480_v17  ;;  %v484_v19 = vld [vmem:[%s20722_s7 + $0x98] sm:$0xff]  ;;  %v486_v20 = vld [vmem:[%s20722_s7 + $0xa0] sm:$0xff] }
  0x22   : > { %483 = vst [vmem:[#allocation4 + $0x790] sm:$0xff] %v482_v18  ;;  %485 = vst [vmem:[#allocation4 + $0x340] sm:$0xff] %v484_v19  ;;  %v488_v21 = vld [vmem:[%s20722_s7 + $0xa8] sm:$0xff]  ;;  %v490_v22 = vld [vmem:[%s20722_s7 + $0xb0] sm:$0xff] }
  0x23   : > { %487 = vst [vmem:[#allocation4 + $0x748] sm:$0xff] %v486_v20  ;;  %v492_v23 = vld [vmem:[%s20722_s7 + $0xb8] sm:$0xff]  ;;  %489 = vst [vmem:[#allocation4 + $0x830] sm:$0xff] %v488_v21  ;;  %v494_v24 = vld [vmem:[%s20722_s7 + $0xc0] sm:$0xff] }
  0x24   : > { %491 = vst [vmem:[#allocation4 + $0xaf0] sm:$0xff] %v490_v22  ;;  %493 = vst [vmem:[#allocation4 + $0x5b8] sm:$0xff] %v492_v23  ;;  %v496_v25 = vld [vmem:[%s20722_s7 + $0xc8] sm:$0xff]  ;;  %v498_v26 = vld [vmem:[%s20722_s7 + $0xd0] sm:$0xff] }
  0x25   : > { %495 = vst [vmem:[#allocation4 + $0x5c8] sm:$0xff] %v494_v24  ;;  %497 = vst [vmem:[#allocation4 + $0xd78] sm:$0xff] %v496_v25  ;;  %v500_v27 = vld [vmem:[%s20722_s7 + $0xd8] sm:$0xff]  ;;  %v502_v28 = vld [vmem:[%s20722_s7 + $0xe0] sm:$0xff] }
  0x26   : > { %499 = vst [vmem:[#allocation4 + $0x3f8] sm:$0xff] %v498_v26  ;;  %v504_v29 = vld [vmem:[%s20722_s7 + $0xe8] sm:$0xff]  ;;  %501 = vst [vmem:[#allocation4 + $0xf08] sm:$0xff] %v500_v27  ;;  %v506_v30 = vld [vmem:[%s20722_s7 + $0xf0] sm:$0xff] }
  0x27   : > { %503 = vst [vmem:[#allocation4 + $0xea0] sm:$0xff] %v502_v28  ;;  %505 = vst [vmem:[#allocation4 + $0xb78] sm:$0xff] %v504_v29  ;;  %v508_v31 = vld [vmem:[%s20722_s7 + $0xf8] sm:$0xff]  ;;  %v510_v32 = vld [vmem:[%s20722_s7 + $0x100] sm:$0xff] }
  0x28   : > { %507 = vst [vmem:[#allocation4 + $0x948] sm:$0xff] %v506_v30  ;;  %509 = vst [vmem:[#allocation4 + $0xbf8] sm:$0xff] %v508_v31  ;;  %v512_v33 = vld [vmem:[%s20722_s7 + $0x108] sm:$0xff]  ;;  %v514_v34 = vld [vmem:[%s20722_s7 + $0x110] sm:$0xff] }
  0x29   : > { %511 = vst [vmem:[#allocation4 + $0x9d0] sm:$0xff] %v510_v32  ;;  %v516_v35 = vld [vmem:[%s20722_s7 + $0x118] sm:$0xff]  ;;  %513 = vst [vmem:[#allocation4 + $0xa90] sm:$0xff] %v512_v33  ;;  %v518_v36 = vld [vmem:[%s20722_s7 + $0x120] sm:$0xff] }
  0x2a   : > { %515 = vst [vmem:[#allocation4 + $0x910] sm:$0xff] %v514_v34  ;;  %517 = vst [vmem:[#allocation4 + $0xbd0] sm:$0xff] %v516_v35  ;;  %v520_v37 = vld [vmem:[%s20722_s7 + $0x128] sm:$0xff]  ;;  %v522_v38 = vld [vmem:[%s20722_s7 + $0x130] sm:$0xff] }
  0x2b   : > { %519 = vst [vmem:[#allocation4 + $0xd68] sm:$0xff] %v518_v36  ;;  %521 = vst [vmem:[#allocation4 + $0xbf0] sm:$0xff] %v520_v37  ;;  %v524_v39 = vld [vmem:[%s20722_s7 + $0x138] sm:$0xff]  ;;  %v526_v40 = vld [vmem:[%s20722_s7 + $0x140] sm:$0xff] }
  0x2c   : > { %523 = vst [vmem:[#allocation4 + $0x868] sm:$0xff] %v522_v38  ;;  %v528_v41 = vld [vmem:[%s20722_s7 + $0x148] sm:$0xff]  ;;  %525 = vst [vmem:[#allocation4 + $0xe30] sm:$0xff] %v524_v39  ;;  %v530_v42 = vld [vmem:[%s20722_s7 + $0x150] sm:$0xff] }
  0x2d   : > { %527 = vst [vmem:[#allocation4 + $0xcd8] sm:$0xff] %v526_v40  ;;  %529 = vst [vmem:[#allocation4 + $0x18] sm:$0xff] %v528_v41  ;;  %v532_v43 = vld [vmem:[%s20722_s7 + $0x158] sm:$0xff]  ;;  %v534_v44 = vld [vmem:[%s20722_s7 + $0x160] sm:$0xff] }
  0x2e   : > { %531 = vst [vmem:[#allocation4 + $0x528] sm:$0xff] %v530_v42  ;;  %533 = vst [vmem:[#allocation4 + $0xfd8] sm:$0xff] %v532_v43  ;;  %v536_v45 = vld [vmem:[%s20722_s7 + $0x168] sm:$0xff]  ;;  %v538_v46 = vld [vmem:[%s20722_s7 + $0x170] sm:$0xff] }
  0x2f   : > { %535 = vst [vmem:[#allocation4 + $0x420] sm:$0xff] %v534_v44  ;;  %v540_v47 = vld [vmem:[%s20722_s7 + $0x178] sm:$0xff]  ;;  %537 = vst [vmem:[#allocation4 + $0x940] sm:$0xff] %v536_v45  ;;  %v542_v48 = vld [vmem:[%s20722_s7 + $0x180] sm:$0xff] }
  0x30   : > { %539 = vst [vmem:[#allocation4 + $0xed0] sm:$0xff] %v538_v46  ;;  %541 = vst [vmem:[#allocation4 + $0x160] sm:$0xff] %v540_v47  ;;  %v544_v49 = vld [vmem:[%s20722_s7 + $0x188] sm:$0xff]  ;;  %v546_v50 = vld [vmem:[%s20722_s7 + $0x190] sm:$0xff] }
  0x31   : > { %543 = vst [vmem:[#allocation4 + $0x8e8] sm:$0xff] %v542_v48  ;;  %545 = vst [vmem:[#allocation4 + $0x8b0] sm:$0xff] %v544_v49  ;;  %v548_v51 = vld [vmem:[%s20722_s7 + $0x198] sm:$0xff]  ;;  %v550_v52 = vld [vmem:[%s20722_s7 + $0x1a0] sm:$0xff] }
  0x32   : > { %547 = vst [vmem:[#allocation4 + $0x320] sm:$0xff] %v546_v50  ;;  %v552_v53 = vld [vmem:[%s20722_s7 + $0x1a8] sm:$0xff]  ;;  %549 = vst [vmem:[#allocation4 + $0x700] sm:$0xff] %v548_v51  ;;  %v554_v54 = vld [vmem:[%s20722_s7 + $0x1b0] sm:$0xff] }
  0x33   : > { %551 = vst [vmem:[#allocation4 + $0x5f8] sm:$0xff] %v550_v52  ;;  %553 = vst [vmem:[#allocation4 + $0x620] sm:$0xff] %v552_v53  ;;  %v556_v55 = vld [vmem:[%s20722_s7 + $0x1b8] sm:$0xff]  ;;  %v558_v56 = vld [vmem:[%s20722_s7 + $0x1c0] sm:$0xff] }
  0x34   : > { %555 = vst [vmem:[#allocation4 + $0x630] sm:$0xff] %v554_v54  ;;  %557 = vst [vmem:[#allocation4 + $0x7a8] sm:$0xff] %v556_v55  ;;  %v560_v57 = vld [vmem:[%s20722_s7 + $0x1c8] sm:$0xff]  ;;  %v562_v58 = vld [vmem:[%s20722_s7 + $0x1d0] sm:$0xff] }
  0x35   : > { %559 = vst [vmem:[#allocation4 + $0x70] sm:$0xff] %v558_v56  ;;  %v564_v59 = vld [vmem:[%s20722_s7 + $0x1d8] sm:$0xff]  ;;  %561 = vst [vmem:[#allocation4 + $0x678] sm:$0xff] %v560_v57  ;;  %v566_v60 = vld [vmem:[%s20722_s7 + $0x1e0] sm:$0xff] }
  0x36   : > { %563 = vst [vmem:[#allocation4 + $0xa88] sm:$0xff] %v562_v58  ;;  %565 = vst [vmem:[#allocation4 + $0xb80] sm:$0xff] %v564_v59  ;;  %v568_v61 = vld [vmem:[%s20722_s7 + $0x1e8] sm:$0xff]  ;;  %v570_v62 = vld [vmem:[%s20722_s7 + $0x1f0] sm:$0xff] }
  0x37   : > { %567 = vst [vmem:[#allocation4 + $0xc58] sm:$0xff] %v566_v60  ;;  %569 = vst [vmem:[#allocation4 + $0x8d8] sm:$0xff] %v568_v61  ;;  %v572_v63 = vld [vmem:[%s20722_s7 + $0x1f8] sm:$0xff]  ;;  %v574_v0 = vld [vmem:[%s20722_s7 + $0x200] sm:$0xff] }
  0x38   : > { %571 = vst [vmem:[#allocation4 + $0x9d8] sm:$0xff] %v570_v62  ;;  %v576_v1 = vld [vmem:[%s20722_s7 + $0x208] sm:$0xff]  ;;  %573 = vst [vmem:[#allocation4 + $0x800] sm:$0xff] %v572_v63  ;;  %v578_v2 = vld [vmem:[%s20722_s7 + $0x210] sm:$0xff] }
  0x39   : > { %575 = vst [vmem:[#allocation4 + $0xe68] sm:$0xff] %v574_v0  ;;  %577 = vst [vmem:[#allocation4 + $0x6f0] sm:$0xff] %v576_v1  ;;  %v580_v3 = vld [vmem:[%s20722_s7 + $0x218] sm:$0xff]  ;;  %v582_v4 = vld [vmem:[%s20722_s7 + $0x220] sm:$0xff] }
  0x3a   : > { %579 = vst [vmem:[#allocation4 + $0xbe8] sm:$0xff] %v578_v2  ;;  %581 = vst [vmem:[#allocation4 + $0xd30] sm:$0xff] %v580_v3  ;;  %v584_v5 = vld [vmem:[%s20722_s7 + $0x228] sm:$0xff]  ;;  %v586_v6 = vld [vmem:[%s20722_s7 + $0x230] sm:$0xff] }
  0x3b   : > { %583 = vst [vmem:[#allocation4 + $0x358] sm:$0xff] %v582_v4  ;;  %v588_v7 = vld [vmem:[%s20722_s7 + $0x238] sm:$0xff]  ;;  %585 = vst [vmem:[#allocation4 + $0x490] sm:$0xff] %v584_v5  ;;  %v590_v8 = vld [vmem:[%s20722_s7 + $0x240] sm:$0xff] }
  0x3c   : > { %587 = vst [vmem:[#allocation4 + $0x488] sm:$0xff] %v586_v6  ;;  %589 = vst [vmem:[#allocation4 + $0xd60] sm:$0xff] %v588_v7  ;;  %v592_v9 = vld [vmem:[%s20722_s7 + $0x248] sm:$0xff]  ;;  %v594_v10 = vld [vmem:[%s20722_s7 + $0x250] sm:$0xff] }
  0x3d   : > { %591 = vst [vmem:[#allocation4 + $0xbd8] sm:$0xff] %v590_v8  ;;  %593 = vst [vmem:[#allocation4 + $0x580] sm:$0xff] %v592_v9  ;;  %v596_v11 = vld [vmem:[%s20722_s7 + $0x258] sm:$0xff]  ;;  %v598_v12 = vld [vmem:[%s20722_s7 + $0x260] sm:$0xff] }
  0x3e   : > { %595 = vst [vmem:[#allocation4 + $0x208] sm:$0xff] %v594_v10  ;;  %v600_v13 = vld [vmem:[%s20722_s7 + $0x268] sm:$0xff]  ;;  %597 = vst [vmem:[#allocation4 + $0x158] sm:$0xff] %v596_v11  ;;  %v602_v14 = vld [vmem:[%s20722_s7 + $0x270] sm:$0xff] }
  0x3f   : > { %599 = vst [vmem:[#allocation4 + $0xec8] sm:$0xff] %v598_v12  ;;  %601 = vst [vmem:[#allocation4 + $0xdb0] sm:$0xff] %v600_v13  ;;  %v604_v15 = vld [vmem:[%s20722_s7 + $0x278] sm:$0xff]  ;;  %v606_v16 = vld [vmem:[%s20722_s7 + $0x280] sm:$0xff] }
  0x40   : > { %603 = vst [vmem:[#allocation4 + $0x660] sm:$0xff] %v602_v14  ;;  %605 = vst [vmem:[#allocation4 + $0x6d8] sm:$0xff] %v604_v15  ;;  %v608_v17 = vld [vmem:[%s20722_s7 + $0x288] sm:$0xff]  ;;  %v610_v18 = vld [vmem:[%s20722_s7 + $0x290] sm:$0xff] }
  0x41   : > { %607 = vst [vmem:[#allocation4 + $0xbc8] sm:$0xff] %v606_v16  ;;  %v612_v19 = vld [vmem:[%s20722_s7 + $0x298] sm:$0xff]  ;;  %609 = vst [vmem:[#allocation4 + $0xf38] sm:$0xff] %v608_v17  ;;  %v614_v20 = vld [vmem:[%s20722_s7 + $0x2a0] sm:$0xff] }
  0x42   : > { %611 = vst [vmem:[#allocation4 + $0x98] sm:$0xff] %v610_v18  ;;  %613 = vst [vmem:[#allocation4 + $0xa48] sm:$0xff] %v612_v19  ;;  %v616_v21 = vld [vmem:[%s20722_s7 + $0x2a8] sm:$0xff]  ;;  %v618_v22 = vld [vmem:[%s20722_s7 + $0x2b0] sm:$0xff] }
  0x43   : > { %615 = vst [vmem:[#allocation4 + $0x1b8] sm:$0xff] %v614_v20  ;;  %617 = vst [vmem:[#allocation4 + $0x188] sm:$0xff] %v616_v21  ;;  %v620_v23 = vld [vmem:[%s20722_s7 + $0x2b8] sm:$0xff]  ;;  %v622_v24 = vld [vmem:[%s20722_s7 + $0x2c0] sm:$0xff] }
  0x44   : > { %619 = vst [vmem:[#allocation4 + $0x650] sm:$0xff] %v618_v22  ;;  %v624_v25 = vld [vmem:[%s20722_s7 + $0x2c8] sm:$0xff]  ;;  %621 = vst [vmem:[#allocation4 + $0x90] sm:$0xff] %v620_v23  ;;  %v626_v26 = vld [vmem:[%s20722_s7 + $0x2d0] sm:$0xff] }
  0x45   : > { %623 = vst [vmem:[#allocation4 + $0xdf0] sm:$0xff] %v622_v24  ;;  %625 = vst [vmem:[#allocation4 + $0x9b0] sm:$0xff] %v624_v25  ;;  %v628_v27 = vld [vmem:[%s20722_s7 + $0x2d8] sm:$0xff]  ;;  %v630_v28 = vld [vmem:[%s20722_s7 + $0x2e0] sm:$0xff] }
  0x46   : > { %627 = vst [vmem:[#allocation4 + $0x180] sm:$0xff] %v626_v26  ;;  %629 = vst [vmem:[#allocation4 + $0x288] sm:$0xff] %v628_v27  ;;  %v632_v29 = vld [vmem:[%s20722_s7 + $0x2e8] sm:$0xff]  ;;  %v634_v30 = vld [vmem:[%s20722_s7 + $0x2f0] sm:$0xff] }
  0x47   : > { %631 = vst [vmem:[#allocation4 + $0x8e0] sm:$0xff] %v630_v28  ;;  %v636_v31 = vld [vmem:[%s20722_s7 + $0x2f8] sm:$0xff]  ;;  %633 = vst [vmem:[#allocation4 + $0xc00] sm:$0xff] %v632_v29  ;;  %v638_v32 = vld [vmem:[%s20722_s7 + $0x300] sm:$0xff] }
  0x48   : > { %635 = vst [vmem:[#allocation4 + $0x230] sm:$0xff] %v634_v30  ;;  %637 = vst [vmem:[#allocation4 + $0x2e0] sm:$0xff] %v636_v31  ;;  %v640_v33 = vld [vmem:[%s20722_s7 + $0x308] sm:$0xff]  ;;  %v642_v34 = vld [vmem:[%s20722_s7 + $0x310] sm:$0xff] }
  0x49   : > { %639 = vst [vmem:[#allocation4 + $0x708] sm:$0xff] %v638_v32  ;;  %641 = vst [vmem:[#allocation4 + $0x428] sm:$0xff] %v640_v33  ;;  %v644_v35 = vld [vmem:[%s20722_s7 + $0x318] sm:$0xff]  ;;  %v646_v36 = vld [vmem:[%s20722_s7 + $0x320] sm:$0xff] }
  0x4a   : > { %643 = vst [vmem:[#allocation4 + $0xe48] sm:$0xff] %v642_v34  ;;  %v648_v37 = vld [vmem:[%s20722_s7 + $0x328] sm:$0xff]  ;;  %645 = vst [vmem:[#allocation4 + $0xe80] sm:$0xff] %v644_v35  ;;  %v650_v38 = vld [vmem:[%s20722_s7 + $0x330] sm:$0xff] }
  0x4b   : > { %647 = vst [vmem:[#allocation4 + $0x250] sm:$0xff] %v646_v36  ;;  %649 = vst [vmem:[#allocation4 + $0x380] sm:$0xff] %v648_v37  ;;  %v652_v39 = vld [vmem:[%s20722_s7 + $0x338] sm:$0xff]  ;;  %v654_v40 = vld [vmem:[%s20722_s7 + $0x340] sm:$0xff] }
  0x4c   : > { %651 = vst [vmem:[#allocation4 + $0xa58] sm:$0xff] %v650_v38  ;;  %653 = vst [vmem:[#allocation4 + $0xae0] sm:$0xff] %v652_v39  ;;  %v656_v41 = vld [vmem:[%s20722_s7 + $0x348] sm:$0xff]  ;;  %v658_v42 = vld [vmem:[%s20722_s7 + $0x350] sm:$0xff] }
  0x4d   : > { %655 = vst [vmem:[#allocation4 + $0xea8] sm:$0xff] %v654_v40  ;;  %v660_v43 = vld [vmem:[%s20722_s7 + $0x358] sm:$0xff]  ;;  %657 = vst [vmem:[#allocation4 + $0x9c0] sm:$0xff] %v656_v41  ;;  %v662_v44 = vld [vmem:[%s20722_s7 + $0x360] sm:$0xff] }
  0x4e   : > { %659 = vst [vmem:[#allocation4 + $0x418] sm:$0xff] %v658_v42  ;;  %661 = vst [vmem:[#allocation4 + $0x410] sm:$0xff] %v660_v43  ;;  %v664_v45 = vld [vmem:[%s20722_s7 + $0x368] sm:$0xff]  ;;  %v666_v46 = vld [vmem:[%s20722_s7 + $0x370] sm:$0xff] }
  0x4f   : > { %663 = vst [vmem:[#allocation4 + $0x760] sm:$0xff] %v662_v44  ;;  %665 = vst [vmem:[#allocation4 + $0x9e0] sm:$0xff] %v664_v45  ;;  %v668_v47 = vld [vmem:[%s20722_s7 + $0x378] sm:$0xff]  ;;  %v670_v48 = vld [vmem:[%s20722_s7 + $0x380] sm:$0xff] }
  0x50   : > { %667 = vst [vmem:[#allocation4 + $0x100] sm:$0xff] %v666_v46  ;;  %v672_v49 = vld [vmem:[%s20722_s7 + $0x388] sm:$0xff]  ;;  %669 = vst [vmem:[#allocation4 + $0x78] sm:$0xff] %v668_v47  ;;  %v674_v50 = vld [vmem:[%s20722_s7 + $0x390] sm:$0xff] }
  0x51   : > { %671 = vst [vmem:[#allocation4 + $0xec0] sm:$0xff] %v670_v48  ;;  %673 = vst [vmem:[#allocation4 + $0x438] sm:$0xff] %v672_v49  ;;  %v676_v51 = vld [vmem:[%s20722_s7 + $0x398] sm:$0xff]  ;;  %v678_v52 = vld [vmem:[%s20722_s7 + $0x3a0] sm:$0xff] }
  0x52   : > { %675 = vst [vmem:[#allocation4 + $0xca8] sm:$0xff] %v674_v50  ;;  %677 = vst [vmem:[#allocation4 + $0xaf8] sm:$0xff] %v676_v51  ;;  %v680_v53 = vld [vmem:[%s20722_s7 + $0x3a8] sm:$0xff]  ;;  %v682_v54 = vld [vmem:[%s20722_s7 + $0x3b0] sm:$0xff] }
  0x53   : > { %679 = vst [vmem:[#allocation4 + $0xa28] sm:$0xff] %v678_v52  ;;  %v684_v55 = vld [vmem:[%s20722_s7 + $0x3b8] sm:$0xff]  ;;  %681 = vst [vmem:[#allocation4 + $0xa20] sm:$0xff] %v680_v53  ;;  %v686_v56 = vld [vmem:[%s20722_s7 + $0x3c0] sm:$0xff] }
  0x54   : > { %683 = vst [vmem:[#allocation4 + $0xd50] sm:$0xff] %v682_v54  ;;  %685 = vst [vmem:[#allocation4 + $0xbb8] sm:$0xff] %v684_v55  ;;  %v688_v57 = vld [vmem:[%s20722_s7 + $0x3c8] sm:$0xff]  ;;  %v690_v58 = vld [vmem:[%s20722_s7 + $0x3d0] sm:$0xff] }
  0x55   : > { %687 = vst [vmem:[#allocation4 + $0x3d8] sm:$0xff] %v686_v56  ;;  %689 = vst [vmem:[#allocation4 + $0x5e0] sm:$0xff] %v688_v57  ;;  %v692_v59 = vld [vmem:[%s20722_s7 + $0x3d8] sm:$0xff]  ;;  %v694_v60 = vld [vmem:[%s20722_s7 + $0x3e0] sm:$0xff] }
  0x56   : > { %691 = vst [vmem:[#allocation4 + $0x980] sm:$0xff] %v690_v58  ;;  %v696_v61 = vld [vmem:[%s20722_s7 + $0x3e8] sm:$0xff]  ;;  %693 = vst [vmem:[#allocation4 + $0x990] sm:$0xff] %v692_v59  ;;  %v698_v62 = vld [vmem:[%s20722_s7 + $0x3f0] sm:$0xff] }
  0x57   : > { %695 = vst [vmem:[#allocation4 + $0xb10] sm:$0xff] %v694_v60  ;;  %697 = vst [vmem:[#allocation4 + $0x960] sm:$0xff] %v696_v61  ;;  %v700_v63 = vld [vmem:[%s20722_s7 + $0x3f8] sm:$0xff]  ;;  %v702_v0 = vld [vmem:[%s20722_s7 + $0x400] sm:$0xff] }
  0x58   : > { %699 = vst [vmem:[#allocation4 + $0x310] sm:$0xff] %v698_v62  ;;  %701 = vst [vmem:[#allocation4 + $0xd8] sm:$0xff] %v700_v63  ;;  %v704_v1 = vld [vmem:[%s20722_s7 + $0x408] sm:$0xff]  ;;  %v706_v2 = vld [vmem:[%s20722_s7 + $0x410] sm:$0xff] }
  0x59   : > { %703 = vst [vmem:[#allocation4 + $0x1c0] sm:$0xff] %v702_v0  ;;  %v708_v3 = vld [vmem:[%s20722_s7 + $0x418] sm:$0xff]  ;;  %705 = vst [vmem:[#allocation4 + $0xac8] sm:$0xff] %v704_v1  ;;  %v710_v4 = vld [vmem:[%s20722_s7 + $0x420] sm:$0xff] }
  0x5a   : > { %707 = vst [vmem:[#allocation4 + $0x820] sm:$0xff] %v706_v2  ;;  %709 = vst [vmem:[#allocation4 + $0x8c8] sm:$0xff] %v708_v3  ;;  %v712_v5 = vld [vmem:[%s20722_s7 + $0x428] sm:$0xff]  ;;  %v714_v6 = vld [vmem:[%s20722_s7 + $0x430] sm:$0xff] }
  0x5b   : > { %711 = vst [vmem:[#allocation4 + $0xe20] sm:$0xff] %v710_v4  ;;  %713 = vst [vmem:[#allocation4 + $0xb60] sm:$0xff] %v712_v5  ;;  %v716_v7 = vld [vmem:[%s20722_s7 + $0x438] sm:$0xff]  ;;  %v718_v8 = vld [vmem:[%s20722_s7 + $0x440] sm:$0xff] }
  0x5c   : > { %715 = vst [vmem:[#allocation4 + $0xed8] sm:$0xff] %v714_v6  ;;  %v720_v9 = vld [vmem:[%s20722_s7 + $0x448] sm:$0xff]  ;;  %717 = vst [vmem:[#allocation4 + $0xc80] sm:$0xff] %v716_v7  ;;  %v722_v10 = vld [vmem:[%s20722_s7 + $0x450] sm:$0xff] }
  0x5d   : > { %719 = vst [vmem:[#allocation4 + $0x950] sm:$0xff] %v718_v8  ;;  %721 = vst [vmem:[#allocation4 + $0x698] sm:$0xff] %v720_v9  ;;  %v724_v11 = vld [vmem:[%s20722_s7 + $0x458] sm:$0xff]  ;;  %v726_v12 = vld [vmem:[%s20722_s7 + $0x460] sm:$0xff] }
  0x5e   : > { %723 = vst [vmem:[#allocation4 + $0x2d0] sm:$0xff] %v722_v10  ;;  %725 = vst [vmem:[#allocation4 + $0xf18] sm:$0xff] %v724_v11  ;;  %v728_v13 = vld [vmem:[%s20722_s7 + $0x468] sm:$0xff]  ;;  %v730_v14 = vld [vmem:[%s20722_s7 + $0x470] sm:$0xff] }
  0x5f   : > { %727 = vst [vmem:[#allocation4 + $0xb90] sm:$0xff] %v726_v12  ;;  %v732_v15 = vld [vmem:[%s20722_s7 + $0x478] sm:$0xff]  ;;  %729 = vst [vmem:[#allocation4 + $0x458] sm:$0xff] %v728_v13  ;;  %v734_v16 = vld [vmem:[%s20722_s7 + $0x480] sm:$0xff] }
  0x60   : > { %731 = vst [vmem:[#allocation4 + $0xf20] sm:$0xff] %v730_v14  ;;  %733 = vst [vmem:[#allocation4 + $0x8] sm:$0xff] %v732_v15  ;;  %v736_v17 = vld [vmem:[%s20722_s7 + $0x488] sm:$0xff]  ;;  %v738_v18 = vld [vmem:[%s20722_s7 + $0x490] sm:$0xff] }
  0x61   : > { %735 = vst [vmem:[#allocation4 + $0xc40] sm:$0xff] %v734_v16  ;;  %737 = vst [vmem:[#allocation4 + $0xd48] sm:$0xff] %v736_v17  ;;  %v740_v19 = vld [vmem:[%s20722_s7 + $0x498] sm:$0xff]  ;;  %v742_v20 = vld [vmem:[%s20722_s7 + $0x4a0] sm:$0xff] }
  0x62   : > { %739 = vst [vmem:[#allocation4 + $0x7b8] sm:$0xff] %v738_v18  ;;  %v744_v21 = vld [vmem:[%s20722_s7 + $0x4a8] sm:$0xff]  ;;  %741 = vst [vmem:[#allocation4 + $0x6b0] sm:$0xff] %v740_v19  ;;  %v746_v22 = vld [vmem:[%s20722_s7 + $0x4b0] sm:$0xff] }
  0x63   : > { %743 = vst [vmem:[#allocation4 + $0x3d0] sm:$0xff] %v742_v20  ;;  %745 = vst [vmem:[#allocation4 + $0x228] sm:$0xff] %v744_v21  ;;  %v748_v23 = vld [vmem:[%s20722_s7 + $0x4b8] sm:$0xff]  ;;  %v750_v24 = vld [vmem:[%s20722_s7 + $0x4c0] sm:$0xff] }
  0x64   : > { %747 = vst [vmem:[#allocation4 + $0xd00] sm:$0xff] %v746_v22  ;;  %749 = vst [vmem:[#allocation4 + $0x498] sm:$0xff] %v748_v23  ;;  %v752_v25 = vld [vmem:[%s20722_s7 + $0x4c8] sm:$0xff]  ;;  %v754_v26 = vld [vmem:[%s20722_s7 + $0x4d0] sm:$0xff] }
  0x65   : > { %751 = vst [vmem:[#allocation4 + $0x688] sm:$0xff] %v750_v24  ;;  %v756_v27 = vld [vmem:[%s20722_s7 + $0x4d8] sm:$0xff]  ;;  %753 = vst [vmem:[#allocation4 + $0x5c0] sm:$0xff] %v752_v25  ;;  %v758_v28 = vld [vmem:[%s20722_s7 + $0x4e0] sm:$0xff] }
  0x66   : > { %755 = vst [vmem:[#allocation4 + $0x858] sm:$0xff] %v754_v26  ;;  %757 = vst [vmem:[#allocation4 + $0x478] sm:$0xff] %v756_v27  ;;  %v760_v29 = vld [vmem:[%s20722_s7 + $0x4e8] sm:$0xff]  ;;  %v762_v30 = vld [vmem:[%s20722_s7 + $0x4f0] sm:$0xff] }
  0x67   : > { %759 = vst [vmem:[#allocation4 + $0x6f8] sm:$0xff] %v758_v28  ;;  %761 = vst [vmem:[#allocation4 + $0xc70] sm:$0xff] %v760_v29  ;;  %v764_v31 = vld [vmem:[%s20722_s7 + $0x4f8] sm:$0xff]  ;;  %v766_v32 = vld [vmem:[%s20722_s7 + $0x500] sm:$0xff] }
  0x68   : > { %763 = vst [vmem:[#allocation4 + $0x780] sm:$0xff] %v762_v30  ;;  %v768_v33 = vld [vmem:[%s20722_s7 + $0x508] sm:$0xff]  ;;  %765 = vst [vmem:[#allocation4 + $0x1f8] sm:$0xff] %v764_v31  ;;  %v770_v34 = vld [vmem:[%s20722_s7 + $0x510] sm:$0xff] }
  0x69   : > { %767 = vst [vmem:[#allocation4 + $0xbc0] sm:$0xff] %v766_v32  ;;  %769 = vst [vmem:[#allocation4 + $0x788] sm:$0xff] %v768_v33  ;;  %v772_v35 = vld [vmem:[%s20722_s7 + $0x518] sm:$0xff]  ;;  %v774_v36 = vld [vmem:[%s20722_s7 + $0x520] sm:$0xff] }
  0x6a   : > { %771 = vst [vmem:[#allocation4 + $0x4b8] sm:$0xff] %v770_v34  ;;  %773 = vst [vmem:[#allocation4 + $0x4c8] sm:$0xff] %v772_v35  ;;  %v776_v37 = vld [vmem:[%s20722_s7 + $0x528] sm:$0xff]  ;;  %v778_v38 = vld [vmem:[%s20722_s7 + $0x530] sm:$0xff] }
  0x6b   : > { %775 = vst [vmem:[#allocation4 + $0x38] sm:$0xff] %v774_v36  ;;  %v780_v39 = vld [vmem:[%s20722_s7 + $0x538] sm:$0xff]  ;;  %777 = vst [vmem:[#allocation4 + $0x3b0] sm:$0xff] %v776_v37  ;;  %v782_v40 = vld [vmem:[%s20722_s7 + $0x540] sm:$0xff] }
  0x6c   : > { %779 = vst [vmem:[#allocation4 + $0x7c8] sm:$0xff] %v778_v38  ;;  %781 = vst [vmem:[#allocation4 + $0xd90] sm:$0xff] %v780_v39  ;;  %v784_v41 = vld [vmem:[%s20722_s7 + $0x548] sm:$0xff]  ;;  %v786_v42 = vld [vmem:[%s20722_s7 + $0x550] sm:$0xff] }
  0x6d   : > { %783 = vst [vmem:[#allocation4 + $0xba8] sm:$0xff] %v782_v40  ;;  %785 = vst [vmem:[#allocation4 + $0x9c8] sm:$0xff] %v784_v41  ;;  %v788_v43 = vld [vmem:[%s20722_s7 + $0x558] sm:$0xff]  ;;  %v790_v44 = vld [vmem:[%s20722_s7 + $0x560] sm:$0xff] }
  0x6e   : > { %787 = vst [vmem:[#allocation4 + $0x2f0] sm:$0xff] %v786_v42  ;;  %v792_v45 = vld [vmem:[%s20722_s7 + $0x568] sm:$0xff]  ;;  %789 = vst [vmem:[#allocation4 + $0x5d0] sm:$0xff] %v788_v43  ;;  %v794_v46 = vld [vmem:[%s20722_s7 + $0x570] sm:$0xff] }
  0x6f   : > { %791 = vst [vmem:[#allocation4 + $0xfe0] sm:$0xff] %v790_v44  ;;  %793 = vst [vmem:[#allocation4 + $0xb98] sm:$0xff] %v792_v45  ;;  %v796_v47 = vld [vmem:[%s20722_s7 + $0x578] sm:$0xff]  ;;  %v798_v48 = vld [vmem:[%s20722_s7 + $0x580] sm:$0xff] }
  0x70   : > { %795 = vst [vmem:[#allocation4 + $0x840] sm:$0xff] %v794_v46  ;;  %797 = vst [vmem:[#allocation4 + $0x768] sm:$0xff] %v796_v47  ;;  %v800_v49 = vld [vmem:[%s20722_s7 + $0x588] sm:$0xff]  ;;  %v802_v50 = vld [vmem:[%s20722_s7 + $0x590] sm:$0xff] }
  0x71   : > { %799 = vst [vmem:[#allocation4 + $0x568] sm:$0xff] %v798_v48  ;;  %v804_v51 = vld [vmem:[%s20722_s7 + $0x598] sm:$0xff]  ;;  %801 = vst [vmem:[#allocation4 + $0xb30] sm:$0xff] %v800_v49  ;;  %v806_v52 = vld [vmem:[%s20722_s7 + $0x5a0] sm:$0xff] }
  0x72   : > { %803 = vst [vmem:[#allocation4 + $0x9f8] sm:$0xff] %v802_v50  ;;  %805 = vst [vmem:[#allocation4 + $0x138] sm:$0xff] %v804_v51  ;;  %v808_v53 = vld [vmem:[%s20722_s7 + $0x5a8] sm:$0xff]  ;;  %v810_v54 = vld [vmem:[%s20722_s7 + $0x5b0] sm:$0xff] }
  0x73   : > { %807 = vst [vmem:[#allocation4 + $0xf00] sm:$0xff] %v806_v52  ;;  %809 = vst [vmem:[#allocation4 + $0xd08] sm:$0xff] %v808_v53  ;;  %v812_v55 = vld [vmem:[%s20722_s7 + $0x5b8] sm:$0xff]  ;;  %v814_v56 = vld [vmem:[%s20722_s7 + $0x5c0] sm:$0xff] }
  0x74   : > { %811 = vst [vmem:[#allocation4 + $0xe00] sm:$0xff] %v810_v54  ;;  %v816_v57 = vld [vmem:[%s20722_s7 + $0x5c8] sm:$0xff]  ;;  %813 = vst [vmem:[#allocation4 + $0xc28] sm:$0xff] %v812_v55  ;;  %v818_v58 = vld [vmem:[%s20722_s7 + $0x5d0] sm:$0xff] }
  0x75   : > { %815 = vst [vmem:[#allocation4 + $0x6e0] sm:$0xff] %v814_v56  ;;  %817 = vst [vmem:[#allocation4 + $0x970] sm:$0xff] %v816_v57  ;;  %v820_v59 = vld [vmem:[%s20722_s7 + $0x5d8] sm:$0xff]  ;;  %v822_v60 = vld [vmem:[%s20722_s7 + $0x5e0] sm:$0xff] }
  0x76   : > { %819 = vst [vmem:[#allocation4 + $0x628] sm:$0xff] %v818_v58  ;;  %821 = vst [vmem:[#allocation4 + $0xb50] sm:$0xff] %v820_v59  ;;  %v824_v61 = vld [vmem:[%s20722_s7 + $0x5e8] sm:$0xff]  ;;  %v826_v62 = vld [vmem:[%s20722_s7 + $0x5f0] sm:$0xff] }
  0x77   : > { %823 = vst [vmem:[#allocation4 + $0x920] sm:$0xff] %v822_v60  ;;  %v828_v63 = vld [vmem:[%s20722_s7 + $0x5f8] sm:$0xff]  ;;  %825 = vst [vmem:[#allocation4 + $0xef8] sm:$0xff] %v824_v61  ;;  %v830_v0 = vld [vmem:[%s20722_s7 + $0x600] sm:$0xff] }
  0x78   : > { %827 = vst [vmem:[#allocation4 + $0x370] sm:$0xff] %v826_v62  ;;  %829 = vst [vmem:[#allocation4 + $0x2e8] sm:$0xff] %v828_v63  ;;  %v832_v1 = vld [vmem:[%s20722_s7 + $0x608] sm:$0xff]  ;;  %v834_v2 = vld [vmem:[%s20722_s7 + $0x610] sm:$0xff] }
  0x79   : > { %831 = vst [vmem:[#allocation4 + $0x398] sm:$0xff] %v830_v0  ;;  %833 = vst [vmem:[#allocation4 + $0xe0] sm:$0xff] %v832_v1  ;;  %v836_v3 = vld [vmem:[%s20722_s7 + $0x618] sm:$0xff]  ;;  %v838_v4 = vld [vmem:[%s20722_s7 + $0x620] sm:$0xff] }
  0x7a   : > { %835 = vst [vmem:[#allocation4 + $0x1e0] sm:$0xff] %v834_v2  ;;  %v840_v5 = vld [vmem:[%s20722_s7 + $0x628] sm:$0xff]  ;;  %837 = vst [vmem:[#allocation4 + $0xf90] sm:$0xff] %v836_v3  ;;  %v842_v6 = vld [vmem:[%s20722_s7 + $0x630] sm:$0xff] }
  0x7b   : > { %839 = vst [vmem:[#allocation4 + $0x270] sm:$0xff] %v838_v4  ;;  %841 = vst [vmem:[#allocation4 + $0x8f8] sm:$0xff] %v840_v5  ;;  %v844_v7 = vld [vmem:[%s20722_s7 + $0x638] sm:$0xff]  ;;  %v846_v8 = vld [vmem:[%s20722_s7 + $0x640] sm:$0xff] }
  0x7c   : > { %843 = vst [vmem:[#allocation4 + $0x598] sm:$0xff] %v842_v6  ;;  %845 = vst [vmem:[#allocation4 + $0x750] sm:$0xff] %v844_v7  ;;  %v848_v9 = vld [vmem:[%s20722_s7 + $0x648] sm:$0xff]  ;;  %v850_v10 = vld [vmem:[%s20722_s7 + $0x650] sm:$0xff] }
  0x7d   : > { %847 = vst [vmem:[#allocation4 + $0xb08] sm:$0xff] %v846_v8  ;;  %v852_v11 = vld [vmem:[%s20722_s7 + $0x658] sm:$0xff]  ;;  %849 = vst [vmem:[#allocation4 + $0xde8] sm:$0xff] %v848_v9  ;;  %v854_v12 = vld [vmem:[%s20722_s7 + $0x660] sm:$0xff] }
  0x7e   : > { %851 = vst [vmem:[#allocation4 + $0x308] sm:$0xff] %v850_v10  ;;  %853 = vst [vmem:[#allocation4 + $0x9a8] sm:$0xff] %v852_v11  ;;  %v856_v13 = vld [vmem:[%s20722_s7 + $0x668] sm:$0xff]  ;;  %v858_v14 = vld [vmem:[%s20722_s7 + $0x670] sm:$0xff] }
  0x7f   : > { %855 = vst [vmem:[#allocation4 + $0xe98] sm:$0xff] %v854_v12  ;;  %857 = vst [vmem:[#allocation4 + $0x268] sm:$0xff] %v856_v13  ;;  %v860_v15 = vld [vmem:[%s20722_s7 + $0x678] sm:$0xff]  ;;  %v862_v16 = vld [vmem:[%s20722_s7 + $0x680] sm:$0xff] }
  0x80   : > { %859 = vst [vmem:[#allocation4 + $0x610] sm:$0xff] %v858_v14  ;;  %v864_v17 = vld [vmem:[%s20722_s7 + $0x688] sm:$0xff]  ;;  %861 = vst [vmem:[#allocation4 + $0x50] sm:$0xff] %v860_v15  ;;  %v866_v18 = vld [vmem:[%s20722_s7 + $0x690] sm:$0xff] }
  0x81   : > { %863 = vst [vmem:[#allocation4 + $0x6d0] sm:$0xff] %v862_v16  ;;  %865 = vst [vmem:[#allocation4 + $0xa60] sm:$0xff] %v864_v17  ;;  %v868_v19 = vld [vmem:[%s20722_s7 + $0x698] sm:$0xff]  ;;  %v870_v20 = vld [vmem:[%s20722_s7 + $0x6a0] sm:$0xff] }
  0x82   : > { %867 = vst [vmem:[#allocation4 + $0x470] sm:$0xff] %v866_v18  ;;  %869 = vst [vmem:[#allocation4 + $0x928] sm:$0xff] %v868_v19  ;;  %v872_v21 = vld [vmem:[%s20722_s7 + $0x6a8] sm:$0xff]  ;;  %v874_v22 = vld [vmem:[%s20722_s7 + $0x6b0] sm:$0xff] }
  0x83   : > { %871 = vst [vmem:[#allocation4 + $0x8a0] sm:$0xff] %v870_v20  ;;  %v876_v23 = vld [vmem:[%s20722_s7 + $0x6b8] sm:$0xff]  ;;  %873 = vst [vmem:[#allocation4 + $0xe88] sm:$0xff] %v872_v21  ;;  %v878_v24 = vld [vmem:[%s20722_s7 + $0x6c0] sm:$0xff] }
  0x84   : > { %875 = vst [vmem:[#allocation4 + $0xb68] sm:$0xff] %v874_v22  ;;  %877 = vst [vmem:[#allocation4 + $0x6a8] sm:$0xff] %v876_v23  ;;  %v880_v25 = vld [vmem:[%s20722_s7 + $0x6c8] sm:$0xff]  ;;  %v882_v26 = vld [vmem:[%s20722_s7 + $0x6d0] sm:$0xff] }
  0x85   : > { %879 = vst [vmem:[#allocation4 + $0xe50] sm:$0xff] %v878_v24  ;;  %881 = vst [vmem:[#allocation4 + $0x7c0] sm:$0xff] %v880_v25  ;;  %v884_v27 = vld [vmem:[%s20722_s7 + $0x6d8] sm:$0xff]  ;;  %v886_v28 = vld [vmem:[%s20722_s7 + $0x6e0] sm:$0xff] }
  0x86   : > { %883 = vst [vmem:[#allocation4 + $0xe90] sm:$0xff] %v882_v26  ;;  %v888_v29 = vld [vmem:[%s20722_s7 + $0x6e8] sm:$0xff]  ;;  %885 = vst [vmem:[#allocation4 + $0xc38] sm:$0xff] %v884_v27  ;;  %v890_v30 = vld [vmem:[%s20722_s7 + $0x6f0] sm:$0xff] }
  0x87   : > { %887 = vst [vmem:[#allocation4 + $0xb8] sm:$0xff] %v886_v28  ;;  %889 = vst [vmem:[#allocation4 + $0xc48] sm:$0xff] %v888_v29  ;;  %v892_v31 = vld [vmem:[%s20722_s7 + $0x6f8] sm:$0xff]  ;;  %v894_v32 = vld [vmem:[%s20722_s7 + $0x700] sm:$0xff] }
  0x88   : > { %891 = vst [vmem:[#allocation4 + $0xb20] sm:$0xff] %v890_v30  ;;  %893 = vst [vmem:[#allocation4 + $0x30] sm:$0xff] %v892_v31  ;;  %v896_v33 = vld [vmem:[%s20722_s7 + $0x708] sm:$0xff]  ;;  %v898_v34 = vld [vmem:[%s20722_s7 + $0x710] sm:$0xff] }
  0x89   : > { %895 = vst [vmem:[#allocation4 + $0xc8] sm:$0xff] %v894_v32  ;;  %v900_v35 = vld [vmem:[%s20722_s7 + $0x718] sm:$0xff]  ;;  %897 = vst [vmem:[#allocation4 + $0x2b8] sm:$0xff] %v896_v33  ;;  %v902_v36 = vld [vmem:[%s20722_s7 + $0x720] sm:$0xff] }
  0x8a   : > { %899 = vst [vmem:[#allocation4 + $0x2a8] sm:$0xff] %v898_v34  ;;  %901 = vst [vmem:[#allocation4 + $0xf78] sm:$0xff] %v900_v35  ;;  %v904_v37 = vld [vmem:[%s20722_s7 + $0x728] sm:$0xff]  ;;  %v906_v38 = vld [vmem:[%s20722_s7 + $0x730] sm:$0xff] }
  0x8b   : > { %903 = vst [vmem:[#allocation4 + $0x210] sm:$0xff] %v902_v36  ;;  %905 = vst [vmem:[#allocation4 + $0x998] sm:$0xff] %v904_v37  ;;  %v908_v39 = vld [vmem:[%s20722_s7 + $0x738] sm:$0xff]  ;;  %v910_v40 = vld [vmem:[%s20722_s7 + $0x740] sm:$0xff] }
  0x8c   : > { %907 = vst [vmem:[#allocation4 + $0xc88] sm:$0xff] %v906_v38  ;;  %v912_v41 = vld [vmem:[%s20722_s7 + $0x748] sm:$0xff]  ;;  %909 = vst [vmem:[#allocation4 + $0xab8] sm:$0xff] %v908_v39  ;;  %v914_v42 = vld [vmem:[%s20722_s7 + $0x750] sm:$0xff] }
  0x8d   : > { %911 = vst [vmem:[#allocation4 + $0x5a8] sm:$0xff] %v910_v40  ;;  %913 = vst [vmem:[#allocation4 + $0x668] sm:$0xff] %v912_v41  ;;  %v916_v43 = vld [vmem:[%s20722_s7 + $0x758] sm:$0xff]  ;;  %v918_v44 = vld [vmem:[%s20722_s7 + $0x760] sm:$0xff] }
  0x8e   : > { %915 = vst [vmem:[#allocation4 + $0xb18] sm:$0xff] %v914_v42  ;;  %917 = vst [vmem:[#allocation4 + $0x468] sm:$0xff] %v916_v43  ;;  %v920_v45 = vld [vmem:[%s20722_s7 + $0x768] sm:$0xff]  ;;  %v922_v46 = vld [vmem:[%s20722_s7 + $0x770] sm:$0xff] }
  0x8f   : > { %919 = vst [vmem:[#allocation4 + $0x578] sm:$0xff] %v918_v44  ;;  %v924_v47 = vld [vmem:[%s20722_s7 + $0x778] sm:$0xff]  ;;  %921 = vst [vmem:[#allocation4 + $0x600] sm:$0xff] %v920_v45  ;;  %v926_v48 = vld [vmem:[%s20722_s7 + $0x780] sm:$0xff] }
  0x90   : > { %923 = vst [vmem:[#allocation4 + $0x570] sm:$0xff] %v922_v46  ;;  %925 = vst [vmem:[#allocation4 + $0xb40] sm:$0xff] %v924_v47  ;;  %v928_v49 = vld [vmem:[%s20722_s7 + $0x788] sm:$0xff]  ;;  %v930_v50 = vld [vmem:[%s20722_s7 + $0x790] sm:$0xff] }
  0x91   : > { %927 = vst [vmem:[#allocation4 + $0x170] sm:$0xff] %v926_v48  ;;  %929 = vst [vmem:[#allocation4 + $0x838] sm:$0xff] %v928_v49  ;;  %v932_v51 = vld [vmem:[%s20722_s7 + $0x798] sm:$0xff]  ;;  %v934_v52 = vld [vmem:[%s20722_s7 + $0x7a0] sm:$0xff] }
  0x92   : > { %931 = vst [vmem:[#allocation4 + $0xcb8] sm:$0xff] %v930_v50  ;;  %v936_v53 = vld [vmem:[%s20722_s7 + $0x7a8] sm:$0xff]  ;;  %933 = vst [vmem:[#allocation4 + $0xe28] sm:$0xff] %v932_v51  ;;  %v938_v54 = vld [vmem:[%s20722_s7 + $0x7b0] sm:$0xff] }
  0x93   : > { %935 = vst [vmem:[#allocation4 + $0x500] sm:$0xff] %v934_v52  ;;  %937 = vst [vmem:[#allocation4 + $0xe60] sm:$0xff] %v936_v53  ;;  %v940_v55 = vld [vmem:[%s20722_s7 + $0x7b8] sm:$0xff]  ;;  %v942_v56 = vld [vmem:[%s20722_s7 + $0x7c0] sm:$0xff] }
  0x94   : > { %939 = vst [vmem:[#allocation4 + $0x8c0] sm:$0xff] %v938_v54  ;;  %941 = vst [vmem:[#allocation4 + $0xe08] sm:$0xff] %v940_v55  ;;  %v944_v57 = vld [vmem:[%s20722_s7 + $0x7c8] sm:$0xff]  ;;  %v946_v58 = vld [vmem:[%s20722_s7 + $0x7d0] sm:$0xff] }
  0x95   : > { %943 = vst [vmem:[#allocation4 + $0xb58] sm:$0xff] %v942_v56  ;;  %v948_v59 = vld [vmem:[%s20722_s7 + $0x7d8] sm:$0xff]  ;;  %945 = vst [vmem:[#allocation4 + $0x618] sm:$0xff] %v944_v57  ;;  %v950_v60 = vld [vmem:[%s20722_s7 + $0x7e0] sm:$0xff] }
  0x96   : > { %947 = vst [vmem:[#allocation4 + $0x200] sm:$0xff] %v946_v58  ;;  %949 = vst [vmem:[#allocation4 + $0x5b0] sm:$0xff] %v948_v59  ;;  %v952_v61 = vld [vmem:[%s20722_s7 + $0x7e8] sm:$0xff]  ;;  %v954_v62 = vld [vmem:[%s20722_s7 + $0x7f0] sm:$0xff] }
  0x97   : > { %951 = vst [vmem:[#allocation4 + $0x140] sm:$0xff] %v950_v60  ;;  %953 = vst [vmem:[#allocation4 + $0xc0] sm:$0xff] %v952_v61  ;;  %v956_v63 = vld [vmem:[%s20722_s7 + $0x7f8] sm:$0xff]  ;;  %v958_v0 = vld [vmem:[%s20722_s7 + $0x800] sm:$0xff] }
  0x98   : > { %955 = vst [vmem:[#allocation4 + $0xba0] sm:$0xff] %v954_v62  ;;  %v960_v1 = vld [vmem:[%s20722_s7 + $0x808] sm:$0xff]  ;;  %957 = vst [vmem:[#allocation4 + $0xd0] sm:$0xff] %v956_v63  ;;  %v962_v2 = vld [vmem:[%s20722_s7 + $0x810] sm:$0xff] }
  0x99   : > { %959 = vst [vmem:[#allocation4 + $0xd70] sm:$0xff] %v958_v0  ;;  %961 = vst [vmem:[#allocation4 + $0x448] sm:$0xff] %v960_v1  ;;  %v964_v3 = vld [vmem:[%s20722_s7 + $0x818] sm:$0xff]  ;;  %v966_v4 = vld [vmem:[%s20722_s7 + $0x820] sm:$0xff] }
  0x9a   : > { %963 = vst [vmem:[#allocation4 + $0x5a0] sm:$0xff] %v962_v2  ;;  %965 = vst [vmem:[#allocation4 + $0xc60] sm:$0xff] %v964_v3  ;;  %v968_v5 = vld [vmem:[%s20722_s7 + $0x828] sm:$0xff]  ;;  %v970_v6 = vld [vmem:[%s20722_s7 + $0x830] sm:$0xff] }
  0x9b   : > { %967 = vst [vmem:[#allocation4 + $0x360] sm:$0xff] %v966_v4  ;;  %v972_v7 = vld [vmem:[%s20722_s7 + $0x838] sm:$0xff]  ;;  %969 = vst [vmem:[#allocation4 + $0xde0] sm:$0xff] %v968_v5  ;;  %v974_v8 = vld [vmem:[%s20722_s7 + $0x840] sm:$0xff] }
  0x9c   : > { %971 = vst [vmem:[#allocation4 + $0x118] sm:$0xff] %v970_v6  ;;  %973 = vst [vmem:[#allocation4 + $0x690] sm:$0xff] %v972_v7  ;;  %v976_v9 = vld [vmem:[%s20722_s7 + $0x848] sm:$0xff]  ;;  %v978_v10 = vld [vmem:[%s20722_s7 + $0x850] sm:$0xff] }
  0x9d   : > { %975 = vst [vmem:[#allocation4 + $0xb48] sm:$0xff] %v974_v8  ;;  %977 = vst [vmem:[#allocation4 + $0xeb0] sm:$0xff] %v976_v9  ;;  %v980_v11 = vld [vmem:[%s20722_s7 + $0x858] sm:$0xff]  ;;  %v982_v12 = vld [vmem:[%s20722_s7 + $0x860] sm:$0xff] }
  0x9e   : > { %979 = vst [vmem:[#allocation4 + $0x860] sm:$0xff] %v978_v10  ;;  %v984_v13 = vld [vmem:[%s20722_s7 + $0x868] sm:$0xff]  ;;  %981 = vst [vmem:[#allocation4 + $0xcc8] sm:$0xff] %v980_v11  ;;  %v986_v14 = vld [vmem:[%s20722_s7 + $0x870] sm:$0xff] }
  0x9f   : > { %983 = vst [vmem:[#allocation4 + $0xff8] sm:$0xff] %v982_v12  ;;  %985 = vst [vmem:[#allocation4 + $0x758] sm:$0xff] %v984_v13  ;;  %v988_v15 = vld [vmem:[%s20722_s7 + $0x878] sm:$0xff]  ;;  %v990_v16 = vld [vmem:[%s20722_s7 + $0x880] sm:$0xff] }
  0xa0   : > { %987 = vst [vmem:[#allocation4 + $0x590] sm:$0xff] %v986_v14  ;;  %989 = vst [vmem:[#allocation4 + $0xb00] sm:$0xff] %v988_v15  ;;  %v992_v17 = vld [vmem:[%s20722_s7 + $0x888] sm:$0xff]  ;;  %v994_v18 = vld [vmem:[%s20722_s7 + $0x890] sm:$0xff] }
  0xa1   : > { %991 = vst [vmem:[#allocation4 + $0x6c8] sm:$0xff] %v990_v16  ;;  %v996_v19 = vld [vmem:[%s20722_s7 + $0x898] sm:$0xff]  ;;  %993 = vst [vmem:[#allocation4 + $0xee8] sm:$0xff] %v992_v17  ;;  %v998_v20 = vld [vmem:[%s20722_s7 + $0x8a0] sm:$0xff] }
  0xa2   : > { %995 = vst [vmem:[#allocation4 + $0x848] sm:$0xff] %v994_v18  ;;  %997 = vst [vmem:[#allocation4 + $0xe78] sm:$0xff] %v996_v19  ;;  %v1000_v21 = vld [vmem:[%s20722_s7 + $0x8a8] sm:$0xff]  ;;  %v1002_v22 = vld [vmem:[%s20722_s7 + $0x8b0] sm:$0xff] }
  0xa3   : > { %999 = vst [vmem:[#allocation4 + $0x640] sm:$0xff] %v998_v20  ;;  %1001 = vst [vmem:[#allocation4 + $0x258] sm:$0xff] %v1000_v21  ;;  %v1004_v23 = vld [vmem:[%s20722_s7 + $0x8b8] sm:$0xff]  ;;  %v1006_v24 = vld [vmem:[%s20722_s7 + $0x8c0] sm:$0xff] }
  0xa4   : > { %1003 = vst [vmem:[#allocation4 + $0x7f8] sm:$0xff] %v1002_v22  ;;  %v1008_v25 = vld [vmem:[%s20722_s7 + $0x8c8] sm:$0xff]  ;;  %1005 = vst [vmem:[#allocation4 + $0x278] sm:$0xff] %v1004_v23  ;;  %v1010_v26 = vld [vmem:[%s20722_s7 + $0x8d0] sm:$0xff] }
  0xa5   : > { %1007 = vst [vmem:[#allocation4 + $0x648] sm:$0xff] %v1006_v24  ;;  %1009 = vst [vmem:[#allocation4 + $0x120] sm:$0xff] %v1008_v25  ;;  %v1012_v27 = vld [vmem:[%s20722_s7 + $0x8d8] sm:$0xff]  ;;  %v1014_v28 = vld [vmem:[%s20722_s7 + $0x8e0] sm:$0xff] }
  0xa6   : > { %1011 = vst [vmem:[#allocation4 + $0x330] sm:$0xff] %v1010_v26  ;;  %1013 = vst [vmem:[#allocation4 + $0x718] sm:$0xff] %v1012_v27  ;;  %v1016_v29 = vld [vmem:[%s20722_s7 + $0x8e8] sm:$0xff]  ;;  %v1018_v30 = vld [vmem:[%s20722_s7 + $0x8f0] sm:$0xff] }
  0xa7   : > { %1015 = vst [vmem:[#allocation4 + $0x968] sm:$0xff] %v1014_v28  ;;  %v1020_v31 = vld [vmem:[%s20722_s7 + $0x8f8] sm:$0xff]  ;;  %1017 = vst [vmem:[#allocation4 + $0x7f0] sm:$0xff] %v1016_v29  ;;  %v1022_v32 = vld [vmem:[%s20722_s7 + $0x900] sm:$0xff] }
  0xa8   : > { %1019 = vst [vmem:[#allocation4 + $0x2f8] sm:$0xff] %v1018_v30  ;;  %1021 = vst [vmem:[#allocation4 + $0xc20] sm:$0xff] %v1020_v31  ;;  %v1024_v33 = vld [vmem:[%s20722_s7 + $0x908] sm:$0xff]  ;;  %v1026_v34 = vld [vmem:[%s20722_s7 + $0x910] sm:$0xff] }
  0xa9   : > { %1023 = vst [vmem:[#allocation4] sm:$0xff] %v1022_v32  ;;  %1025 = vst [vmem:[#allocation4 + $0xe8] sm:$0xff] %v1024_v33  ;;  %v1028_v35 = vld [vmem:[%s20722_s7 + $0x918] sm:$0xff]  ;;  %v1030_v36 = vld [vmem:[%s20722_s7 + $0x920] sm:$0xff] }
  0xaa   : > { %1027 = vst [vmem:[#allocation4 + $0xfd0] sm:$0xff] %v1026_v34  ;;  %v1032_v37 = vld [vmem:[%s20722_s7 + $0x928] sm:$0xff]  ;;  %1029 = vst [vmem:[#allocation4 + $0x8a8] sm:$0xff] %v1028_v35  ;;  %v1034_v38 = vld [vmem:[%s20722_s7 + $0x930] sm:$0xff] }
  0xab   : > { %1031 = vst [vmem:[#allocation4 + $0xad8] sm:$0xff] %v1030_v36  ;;  %1033 = vst [vmem:[#allocation4 + $0x878] sm:$0xff] %v1032_v37  ;;  %v1036_v39 = vld [vmem:[%s20722_s7 + $0x938] sm:$0xff]  ;;  %v1038_v40 = vld [vmem:[%s20722_s7 + $0x940] sm:$0xff] }
  0xac   : > { %1035 = vst [vmem:[#allocation4 + $0x80] sm:$0xff] %v1034_v38  ;;  %1037 = vst [vmem:[#allocation4 + $0xda8] sm:$0xff] %v1036_v39  ;;  %v1040_v41 = vld [vmem:[%s20722_s7 + $0x948] sm:$0xff]  ;;  %v1042_v42 = vld [vmem:[%s20722_s7 + $0x950] sm:$0xff] }
  0xad   : > { %1039 = vst [vmem:[#allocation4 + $0x670] sm:$0xff] %v1038_v40  ;;  %v1044_v43 = vld [vmem:[%s20722_s7 + $0x958] sm:$0xff]  ;;  %1041 = vst [vmem:[#allocation4 + $0xda0] sm:$0xff] %v1040_v41  ;;  %v1046_v44 = vld [vmem:[%s20722_s7 + $0x960] sm:$0xff] }
  0xae   : > { %1043 = vst [vmem:[#allocation4 + $0x530] sm:$0xff] %v1042_v42  ;;  %1045 = vst [vmem:[#allocation4 + $0x20] sm:$0xff] %v1044_v43  ;;  %v1048_v45 = vld [vmem:[%s20722_s7 + $0x968] sm:$0xff]  ;;  %v1050_v46 = vld [vmem:[%s20722_s7 + $0x970] sm:$0xff] }
  0xaf   : > { %1047 = vst [vmem:[#allocation4 + $0xf70] sm:$0xff] %v1046_v44  ;;  %1049 = vst [vmem:[#allocation4 + $0xeb8] sm:$0xff] %v1048_v45  ;;  %v1052_v47 = vld [vmem:[%s20722_s7 + $0x978] sm:$0xff]  ;;  %v1054_v48 = vld [vmem:[%s20722_s7 + $0x980] sm:$0xff] }
  0xb0   : > { %1051 = vst [vmem:[#allocation4 + $0x88] sm:$0xff] %v1050_v46  ;;  %v1056_v49 = vld [vmem:[%s20722_s7 + $0x988] sm:$0xff]  ;;  %1053 = vst [vmem:[#allocation4 + $0x318] sm:$0xff] %v1052_v47  ;;  %v1058_v50 = vld [vmem:[%s20722_s7 + $0x990] sm:$0xff] }
  0xb1   : > { %1055 = vst [vmem:[#allocation4 + $0x520] sm:$0xff] %v1054_v48  ;;  %1057 = vst [vmem:[#allocation4 + $0x430] sm:$0xff] %v1056_v49  ;;  %v1060_v51 = vld [vmem:[%s20722_s7 + $0x998] sm:$0xff]  ;;  %v1062_v52 = vld [vmem:[%s20722_s7 + $0x9a0] sm:$0xff] }
  0xb2   : > { %1059 = vst [vmem:[#allocation4 + $0x8b8] sm:$0xff] %v1058_v50  ;;  %1061 = vst [vmem:[#allocation4 + $0x4b0] sm:$0xff] %v1060_v51  ;;  %v1064_v53 = vld [vmem:[%s20722_s7 + $0x9a8] sm:$0xff]  ;;  %v1066_v54 = vld [vmem:[%s20722_s7 + $0x9b0] sm:$0xff] }
  0xb3   : > { %1063 = vst [vmem:[#allocation4 + $0xa38] sm:$0xff] %v1062_v52  ;;  %v1068_v55 = vld [vmem:[%s20722_s7 + $0x9b8] sm:$0xff]  ;;  %1065 = vst [vmem:[#allocation4 + $0x588] sm:$0xff] %v1064_v53  ;;  %v1070_v56 = vld [vmem:[%s20722_s7 + $0x9c0] sm:$0xff] }
  0xb4   : > { %1067 = vst [vmem:[#allocation4 + $0xd80] sm:$0xff] %v1066_v54  ;;  %1069 = vst [vmem:[#allocation4 + $0xa0] sm:$0xff] %v1068_v55  ;;  %v1072_v57 = vld [vmem:[%s20722_s7 + $0x9c8] sm:$0xff]  ;;  %v1074_v58 = vld [vmem:[%s20722_s7 + $0x9d0] sm:$0xff] }
  0xb5   : > { %1071 = vst [vmem:[#allocation4 + $0x550] sm:$0xff] %v1070_v56  ;;  %1073 = vst [vmem:[#allocation4 + $0xf98] sm:$0xff] %v1072_v57  ;;  %v1076_v59 = vld [vmem:[%s20722_s7 + $0x9d8] sm:$0xff]  ;;  %v1078_v60 = vld [vmem:[%s20722_s7 + $0x9e0] sm:$0xff] }
  0xb6   : > { %1075 = vst [vmem:[#allocation4 + $0x4f8] sm:$0xff] %v1074_v58  ;;  %v1080_v61 = vld [vmem:[%s20722_s7 + $0x9e8] sm:$0xff]  ;;  %1077 = vst [vmem:[#allocation4 + $0xce0] sm:$0xff] %v1076_v59  ;;  %v1082_v62 = vld [vmem:[%s20722_s7 + $0x9f0] sm:$0xff] }
  0xb7   : > { %1079 = vst [vmem:[#allocation4 + $0xfc8] sm:$0xff] %v1078_v60  ;;  %1081 = vst [vmem:[#allocation4 + $0xf48] sm:$0xff] %v1080_v61  ;;  %v1084_v63 = vld [vmem:[%s20722_s7 + $0x9f8] sm:$0xff]  ;;  %v1086_v0 = vld [vmem:[%s20722_s7 + $0xa00] sm:$0xff] }
  0xb8   : > { %1083 = vst [vmem:[#allocation4 + $0x828] sm:$0xff] %v1082_v62  ;;  %1085 = vst [vmem:[#allocation4 + $0xe40] sm:$0xff] %v1084_v63  ;;  %v1088_v1 = vld [vmem:[%s20722_s7 + $0xa08] sm:$0xff]  ;;  %v1090_v2 = vld [vmem:[%s20722_s7 + $0xa10] sm:$0xff] }
  0xb9   : > { %1087 = vst [vmem:[#allocation4 + $0x978] sm:$0xff] %v1086_v0  ;;  %v1092_v3 = vld [vmem:[%s20722_s7 + $0xa18] sm:$0xff]  ;;  %1089 = vst [vmem:[#allocation4 + $0x3e0] sm:$0xff] %v1088_v1  ;;  %v1094_v4 = vld [vmem:[%s20722_s7 + $0xa20] sm:$0xff] }
  0xba   : > { %1091 = vst [vmem:[#allocation4 + $0xf80] sm:$0xff] %v1090_v2  ;;  %1093 = vst [vmem:[#allocation4 + $0xf50] sm:$0xff] %v1092_v3  ;;  %v1096_v5 = vld [vmem:[%s20722_s7 + $0xa28] sm:$0xff]  ;;  %v1098_v6 = vld [vmem:[%s20722_s7 + $0xa30] sm:$0xff] }
  0xbb   : > { %1095 = vst [vmem:[#allocation4 + $0x1b0] sm:$0xff] %v1094_v4  ;;  %1097 = vst [vmem:[#allocation4 + $0xdc0] sm:$0xff] %v1096_v5  ;;  %v1100_v7 = vld [vmem:[%s20722_s7 + $0xa38] sm:$0xff]  ;;  %v1102_v8 = vld [vmem:[%s20722_s7 + $0xa40] sm:$0xff] }
  0xbc   : > { %1099 = vst [vmem:[#allocation4 + $0xfb0] sm:$0xff] %v1098_v6  ;;  %v1104_v9 = vld [vmem:[%s20722_s7 + $0xa48] sm:$0xff]  ;;  %1101 = vst [vmem:[#allocation4 + $0xdb8] sm:$0xff] %v1100_v7  ;;  %v1106_v10 = vld [vmem:[%s20722_s7 + $0xa50] sm:$0xff] }
  0xbd   : > { %1103 = vst [vmem:[#allocation4 + $0x350] sm:$0xff] %v1102_v8  ;;  %1105 = vst [vmem:[#allocation4 + $0x388] sm:$0xff] %v1104_v9  ;;  %v1108_v11 = vld [vmem:[%s20722_s7 + $0xa58] sm:$0xff]  ;;  %v1110_v12 = vld [vmem:[%s20722_s7 + $0xa60] sm:$0xff] }
  0xbe   : > { %1107 = vst [vmem:[#allocation4 + $0xa78] sm:$0xff] %v1106_v10  ;;  %1109 = vst [vmem:[#allocation4 + $0xcc0] sm:$0xff] %v1108_v11  ;;  %v1112_v13 = vld [vmem:[%s20722_s7 + $0xa68] sm:$0xff]  ;;  %v1114_v14 = vld [vmem:[%s20722_s7 + $0xa70] sm:$0xff] }
  0xbf   : > { %1111 = vst [vmem:[#allocation4 + $0xf40] sm:$0xff] %v1110_v12  ;;  %v1116_v15 = vld [vmem:[%s20722_s7 + $0xa78] sm:$0xff]  ;;  %1113 = vst [vmem:[#allocation4 + $0x908] sm:$0xff] %v1112_v13  ;;  %v1118_v16 = vld [vmem:[%s20722_s7 + $0xa80] sm:$0xff] }
  0xc0   : > { %1115 = vst [vmem:[#allocation4 + $0xc10] sm:$0xff] %v1114_v14  ;;  %1117 = vst [vmem:[#allocation4 + $0x1a0] sm:$0xff] %v1116_v15  ;;  %v1120_v17 = vld [vmem:[%s20722_s7 + $0xa88] sm:$0xff]  ;;  %v1122_v18 = vld [vmem:[%s20722_s7 + $0xa90] sm:$0xff] }
  0xc1   : > { %1119 = vst [vmem:[#allocation4 + $0x4d0] sm:$0xff] %v1118_v16  ;;  %1121 = vst [vmem:[#allocation4 + $0xfa0] sm:$0xff] %v1120_v17  ;;  %v1124_v19 = vld [vmem:[%s20722_s7 + $0xa98] sm:$0xff]  ;;  %v1126_v20 = vld [vmem:[%s20722_s7 + $0xaa0] sm:$0xff] }
  0xc2   : > { %1123 = vst [vmem:[#allocation4 + $0xcb0] sm:$0xff] %v1122_v18  ;;  %v1128_v21 = vld [vmem:[%s20722_s7 + $0xaa8] sm:$0xff]  ;;  %1125 = vst [vmem:[#allocation4 + $0x168] sm:$0xff] %v1124_v19  ;;  %v1130_v22 = vld [vmem:[%s20722_s7 + $0xab0] sm:$0xff] }
  0xc3   : > { %1127 = vst [vmem:[#allocation4 + $0xf28] sm:$0xff] %v1126_v20  ;;  %1129 = vst [vmem:[#allocation4 + $0xf88] sm:$0xff] %v1128_v21  ;;  %v1132_v23 = vld [vmem:[%s20722_s7 + $0xab8] sm:$0xff]  ;;  %v1134_v24 = vld [vmem:[%s20722_s7 + $0xac0] sm:$0xff] }
  0xc4   : > { %1131 = vst [vmem:[#allocation4 + $0xdc8] sm:$0xff] %v1130_v22  ;;  %1133 = vst [vmem:[#allocation4 + $0x560] sm:$0xff] %v1132_v23  ;;  %v1136_v25 = vld [vmem:[%s20722_s7 + $0xac8] sm:$0xff]  ;;  %v1138_v26 = vld [vmem:[%s20722_s7 + $0xad0] sm:$0xff] }
  0xc5   : > { %1135 = vst [vmem:[#allocation4 + $0x888] sm:$0xff] %v1134_v24  ;;  %v1140_v27 = vld [vmem:[%s20722_s7 + $0xad8] sm:$0xff]  ;;  %1137 = vst [vmem:[#allocation4 + $0x608] sm:$0xff] %v1136_v25  ;;  %v1142_v28 = vld [vmem:[%s20722_s7 + $0xae0] sm:$0xff] }
  0xc6   : > { %1139 = vst [vmem:[#allocation4 + $0x128] sm:$0xff] %v1138_v26  ;;  %1141 = vst [vmem:[#allocation4 + $0x178] sm:$0xff] %v1140_v27  ;;  %v1144_v29 = vld [vmem:[%s20722_s7 + $0xae8] sm:$0xff]  ;;  %v1146_v30 = vld [vmem:[%s20722_s7 + $0xaf0] sm:$0xff] }
  0xc7   : > { %1143 = vst [vmem:[#allocation4 + $0xf8] sm:$0xff] %v1142_v28  ;;  %1145 = vst [vmem:[#allocation4 + $0x8d0] sm:$0xff] %v1144_v29  ;;  %v1148_v31 = vld [vmem:[%s20722_s7 + $0xaf8] sm:$0xff]  ;;  %v1150_v32 = vld [vmem:[%s20722_s7 + $0xb00] sm:$0xff] }
  0xc8   : > { %1147 = vst [vmem:[#allocation4 + $0x130] sm:$0xff] %v1146_v30  ;;  %v1152_v33 = vld [vmem:[%s20722_s7 + $0xb08] sm:$0xff]  ;;  %1149 = vst [vmem:[#allocation4 + $0xa8] sm:$0xff] %v1148_v31  ;;  %v1154_v34 = vld [vmem:[%s20722_s7 + $0xb10] sm:$0xff] }
  0xc9   : > { %1151 = vst [vmem:[#allocation4 + $0x1d8] sm:$0xff] %v1150_v32  ;;  %1153 = vst [vmem:[#allocation4 + $0xe58] sm:$0xff] %v1152_v33  ;;  %v1156_v35 = vld [vmem:[%s20722_s7 + $0xb18] sm:$0xff]  ;;  %v1158_v36 = vld [vmem:[%s20722_s7 + $0xb20] sm:$0xff] }
  0xca   : > { %1155 = vst [vmem:[#allocation4 + $0x638] sm:$0xff] %v1154_v34  ;;  %1157 = vst [vmem:[#allocation4 + $0x870] sm:$0xff] %v1156_v35  ;;  %v1160_v37 = vld [vmem:[%s20722_s7 + $0xb28] sm:$0xff]  ;;  %v1162_v38 = vld [vmem:[%s20722_s7 + $0xb30] sm:$0xff] }
  0xcb   : > { %1159 = vst [vmem:[#allocation4 + $0xa40] sm:$0xff] %v1158_v36  ;;  %v1164_v39 = vld [vmem:[%s20722_s7 + $0xb38] sm:$0xff]  ;;  %1161 = vst [vmem:[#allocation4 + $0x958] sm:$0xff] %v1160_v37  ;;  %v1166_v40 = vld [vmem:[%s20722_s7 + $0xb40] sm:$0xff] }
  0xcc   : > { %1163 = vst [vmem:[#allocation4 + $0xbe0] sm:$0xff] %v1162_v38  ;;  %1165 = vst [vmem:[#allocation4 + $0xad0] sm:$0xff] %v1164_v39  ;;  %v1168_v41 = vld [vmem:[%s20722_s7 + $0xb48] sm:$0xff]  ;;  %v1170_v42 = vld [vmem:[%s20722_s7 + $0xb50] sm:$0xff] }
  0xcd   : > { %1167 = vst [vmem:[#allocation4 + $0xa18] sm:$0xff] %v1166_v40  ;;  %1169 = vst [vmem:[#allocation4 + $0x300] sm:$0xff] %v1168_v41  ;;  %v1172_v43 = vld [vmem:[%s20722_s7 + $0xb58] sm:$0xff]  ;;  %v1174_v44 = vld [vmem:[%s20722_s7 + $0xb60] sm:$0xff] }
  0xce   : > { %1171 = vst [vmem:[#allocation4 + $0xa10] sm:$0xff] %v1170_v42  ;;  %v1176_v45 = vld [vmem:[%s20722_s7 + $0xb68] sm:$0xff]  ;;  %1173 = vst [vmem:[#allocation4 + $0xd28] sm:$0xff] %v1172_v43  ;;  %v1178_v46 = vld [vmem:[%s20722_s7 + $0xb70] sm:$0xff] }
  0xcf   : > { %1175 = vst [vmem:[#allocation4 + $0x480] sm:$0xff] %v1174_v44  ;;  %1177 = vst [vmem:[#allocation4 + $0x240] sm:$0xff] %v1176_v45  ;;  %v1180_v47 = vld [vmem:[%s20722_s7 + $0xb78] sm:$0xff]  ;;  %v1182_v48 = vld [vmem:[%s20722_s7 + $0xb80] sm:$0xff] }
  0xd0   : > { %1179 = vst [vmem:[#allocation4 + $0xcf0] sm:$0xff] %v1178_v46  ;;  %1181 = vst [vmem:[#allocation4 + $0x48] sm:$0xff] %v1180_v47  ;;  %v1184_v49 = vld [vmem:[%s20722_s7 + $0xb88] sm:$0xff]  ;;  %v1186_v50 = vld [vmem:[%s20722_s7 + $0xb90] sm:$0xff] }
  0xd1   : > { %1183 = vst [vmem:[#allocation4 + $0x4e8] sm:$0xff] %v1182_v48  ;;  %v1188_v51 = vld [vmem:[%s20722_s7 + $0xb98] sm:$0xff]  ;;  %1185 = vst [vmem:[#allocation4 + $0x220] sm:$0xff] %v1184_v49  ;;  %v1190_v52 = vld [vmem:[%s20722_s7 + $0xba0] sm:$0xff] }
  0xd2   : > { %1187 = vst [vmem:[#allocation4 + $0x890] sm:$0xff] %v1186_v50  ;;  %1189 = vst [vmem:[#allocation4 + $0x3b8] sm:$0xff] %v1188_v51  ;;  %v1192_v53 = vld [vmem:[%s20722_s7 + $0xba8] sm:$0xff]  ;;  %v1194_v54 = vld [vmem:[%s20722_s7 + $0xbb0] sm:$0xff] }
  0xd3   : > { %1191 = vst [vmem:[#allocation4 + $0x3e8] sm:$0xff] %v1190_v52  ;;  %1193 = vst [vmem:[#allocation4 + $0xe10] sm:$0xff] %v1192_v53  ;;  %v1196_v55 = vld [vmem:[%s20722_s7 + $0xbb8] sm:$0xff]  ;;  %v1198_v56 = vld [vmem:[%s20722_s7 + $0xbc0] sm:$0xff] }
  0xd4   : > { %1195 = vst [vmem:[#allocation4 + $0x248] sm:$0xff] %v1194_v54  ;;  %v1200_v57 = vld [vmem:[%s20722_s7 + $0xbc8] sm:$0xff]  ;;  %1197 = vst [vmem:[#allocation4 + $0x3f0] sm:$0xff] %v1196_v55  ;;  %v1202_v58 = vld [vmem:[%s20722_s7 + $0xbd0] sm:$0xff] }
  0xd5   : > { %1199 = vst [vmem:[#allocation4 + $0x3c8] sm:$0xff] %v1198_v56  ;;  %1201 = vst [vmem:[#allocation4 + $0xc98] sm:$0xff] %v1200_v57  ;;  %v1204_v59 = vld [vmem:[%s20722_s7 + $0xbd8] sm:$0xff]  ;;  %v1206_v60 = vld [vmem:[%s20722_s7 + $0xbe0] sm:$0xff] }
  0xd6   : > { %1203 = vst [vmem:[#allocation4 + $0x280] sm:$0xff] %v1202_v58  ;;  %1205 = vst [vmem:[#allocation4 + $0xa08] sm:$0xff] %v1204_v59  ;;  %v1208_v61 = vld [vmem:[%s20722_s7 + $0xbe8] sm:$0xff]  ;;  %v1210_v62 = vld [vmem:[%s20722_s7 + $0xbf0] sm:$0xff] }
  0xd7   : > { %1207 = vst [vmem:[#allocation4 + $0x540] sm:$0xff] %v1206_v60  ;;  %v1212_v63 = vld [vmem:[%s20722_s7 + $0xbf8] sm:$0xff]  ;;  %1209 = vst [vmem:[#allocation4 + $0x378] sm:$0xff] %v1208_v61  ;;  %v1214_v0 = vld [vmem:[%s20722_s7 + $0xc00] sm:$0xff] }
  0xd8   : > { %1211 = vst [vmem:[#allocation4 + $0x7d8] sm:$0xff] %v1210_v62  ;;  %1213 = vst [vmem:[#allocation4 + $0x68] sm:$0xff] %v1212_v63  ;;  %v1216_v1 = vld [vmem:[%s20722_s7 + $0xc08] sm:$0xff]  ;;  %v1218_v2 = vld [vmem:[%s20722_s7 + $0xc10] sm:$0xff] }
  0xd9   : > { %1215 = vst [vmem:[#allocation4 + $0xd38] sm:$0xff] %v1214_v0  ;;  %1217 = vst [vmem:[#allocation4 + $0x190] sm:$0xff] %v1216_v1  ;;  %v1220_v3 = vld [vmem:[%s20722_s7 + $0xc18] sm:$0xff]  ;;  %v1222_v4 = vld [vmem:[%s20722_s7 + $0xc20] sm:$0xff] }
  0xda   : > { %1219 = vst [vmem:[#allocation4 + $0x548] sm:$0xff] %v1218_v2  ;;  %v1224_v5 = vld [vmem:[%s20722_s7 + $0xc28] sm:$0xff]  ;;  %1221 = vst [vmem:[#allocation4 + $0x1e8] sm:$0xff] %v1220_v3  ;;  %v1226_v6 = vld [vmem:[%s20722_s7 + $0xc30] sm:$0xff] }
  0xdb   : > { %1223 = vst [vmem:[#allocation4 + $0xc08] sm:$0xff] %v1222_v4  ;;  %1225 = vst [vmem:[#allocation4 + $0x2a0] sm:$0xff] %v1224_v5  ;;  %v1228_v7 = vld [vmem:[%s20722_s7 + $0xc38] sm:$0xff]  ;;  %v1230_v8 = vld [vmem:[%s20722_s7 + $0xc40] sm:$0xff] }
  0xdc   : > { %1227 = vst [vmem:[#allocation4 + $0x408] sm:$0xff] %v1226_v6  ;;  %1229 = vst [vmem:[#allocation4 + $0x7e8] sm:$0xff] %v1228_v7  ;;  %v1232_v9 = vld [vmem:[%s20722_s7 + $0xc48] sm:$0xff]  ;;  %v1234_v10 = vld [vmem:[%s20722_s7 + $0xc50] sm:$0xff] }
  0xdd   : > { %1231 = vst [vmem:[#allocation4 + $0xc68] sm:$0xff] %v1230_v8  ;;  %v1236_v11 = vld [vmem:[%s20722_s7 + $0xc58] sm:$0xff]  ;;  %1233 = vst [vmem:[#allocation4 + $0x658] sm:$0xff] %v1232_v9  ;;  %v1238_v12 = vld [vmem:[%s20722_s7 + $0xc60] sm:$0xff] }
  0xde   : > { %1235 = vst [vmem:[#allocation4 + $0xf60] sm:$0xff] %v1234_v10  ;;  %1237 = vst [vmem:[#allocation4 + $0xfc0] sm:$0xff] %v1236_v11  ;;  %v1240_v13 = vld [vmem:[%s20722_s7 + $0xc68] sm:$0xff]  ;;  %v1242_v14 = vld [vmem:[%s20722_s7 + $0xc70] sm:$0xff] }
  0xdf   : > { %1239 = vst [vmem:[#allocation4 + $0x5e8] sm:$0xff] %v1238_v12  ;;  %1241 = vst [vmem:[#allocation4 + $0x440] sm:$0xff] %v1240_v13  ;;  %v1244_v15 = vld [vmem:[%s20722_s7 + $0xc78] sm:$0xff]  ;;  %v1246_v16 = vld [vmem:[%s20722_s7 + $0xc80] sm:$0xff] }
  0xe0   : > { %1243 = vst [vmem:[#allocation4 + $0xff0] sm:$0xff] %v1242_v14  ;;  %v1248_v17 = vld [vmem:[%s20722_s7 + $0xc88] sm:$0xff]  ;;  %1245 = vst [vmem:[#allocation4 + $0x720] sm:$0xff] %v1244_v15  ;;  %v1250_v18 = vld [vmem:[%s20722_s7 + $0xc90] sm:$0xff] }
  0xe1   : > { %1247 = vst [vmem:[#allocation4 + $0x5d8] sm:$0xff] %v1246_v16  ;;  %1249 = vst [vmem:[#allocation4 + $0xb70] sm:$0xff] %v1248_v17  ;;  %v1252_v19 = vld [vmem:[%s20722_s7 + $0xc98] sm:$0xff]  ;;  %v1254_v20 = vld [vmem:[%s20722_s7 + $0xca0] sm:$0xff] }
  0xe2   : > { %1251 = vst [vmem:[#allocation4 + $0x2c8] sm:$0xff] %v1250_v18  ;;  %1253 = vst [vmem:[#allocation4 + $0x738] sm:$0xff] %v1252_v19  ;;  %v1256_v21 = vld [vmem:[%s20722_s7 + $0xca8] sm:$0xff]  ;;  %v1258_v22 = vld [vmem:[%s20722_s7 + $0xcb0] sm:$0xff] }
  0xe3   : > { %1255 = vst [vmem:[#allocation4 + $0x808] sm:$0xff] %v1254_v20  ;;  %v1260_v23 = vld [vmem:[%s20722_s7 + $0xcb8] sm:$0xff]  ;;  %1257 = vst [vmem:[#allocation4 + $0x60] sm:$0xff] %v1256_v21  ;;  %v1262_v24 = vld [vmem:[%s20722_s7 + $0xcc0] sm:$0xff] }
  0xe4   : > { %1259 = vst [vmem:[#allocation4 + $0x6c0] sm:$0xff] %v1258_v22  ;;  %1261 = vst [vmem:[#allocation4 + $0xae8] sm:$0xff] %v1260_v23  ;;  %v1264_v25 = vld [vmem:[%s20722_s7 + $0xcc8] sm:$0xff]  ;;  %v1266_v26 = vld [vmem:[%s20722_s7 + $0xcd0] sm:$0xff] }
  0xe5   : > { %1263 = vst [vmem:[#allocation4 + $0xfb8] sm:$0xff] %v1262_v24  ;;  %1265 = vst [vmem:[#allocation4 + $0xb0] sm:$0xff] %v1264_v25  ;;  %v1268_v27 = vld [vmem:[%s20722_s7 + $0xcd8] sm:$0xff]  ;;  %v1270_v28 = vld [vmem:[%s20722_s7 + $0xce0] sm:$0xff] }
  0xe6   : > { %1267 = vst [vmem:[#allocation4 + $0xdd8] sm:$0xff] %v1266_v26  ;;  %v1272_v29 = vld [vmem:[%s20722_s7 + $0xce8] sm:$0xff]  ;;  %1269 = vst [vmem:[#allocation4 + $0xa30] sm:$0xff] %v1268_v27  ;;  %v1274_v30 = vld [vmem:[%s20722_s7 + $0xcf0] sm:$0xff] }
  0xe7   : > { %1271 = vst [vmem:[#allocation4 + $0x1d0] sm:$0xff] %v1270_v28  ;;  %1273 = vst [vmem:[#allocation4 + $0xdd0] sm:$0xff] %v1272_v29  ;;  %v1276_v31 = vld [vmem:[%s20722_s7 + $0xcf8] sm:$0xff]  ;;  %v1278_v32 = vld [vmem:[%s20722_s7 + $0xd00] sm:$0xff] }
  0xe8   : > { %1275 = vst [vmem:[#allocation4 + $0x3a0] sm:$0xff] %v1274_v30  ;;  %1277 = vst [vmem:[#allocation4 + $0x9b8] sm:$0xff] %v1276_v31  ;;  %v1280_v33 = vld [vmem:[%s20722_s7 + $0xd08] sm:$0xff]  ;;  %v1282_v34 = vld [vmem:[%s20722_s7 + $0xd10] sm:$0xff] }
  0xe9   : > { %1279 = vst [vmem:[#allocation4 + $0x198] sm:$0xff] %v1278_v32  ;;  %v1284_v35 = vld [vmem:[%s20722_s7 + $0xd18] sm:$0xff]  ;;  %1281 = vst [vmem:[#allocation4 + $0xcd0] sm:$0xff] %v1280_v33  ;;  %v1286_v36 = vld [vmem:[%s20722_s7 + $0xd20] sm:$0xff] }
  0xea   : > { %1283 = vst [vmem:[#allocation4 + $0x5f0] sm:$0xff] %v1282_v34  ;;  %1285 = vst [vmem:[#allocation4 + $0x7a0] sm:$0xff] %v1284_v35  ;;  %v1288_v37 = vld [vmem:[%s20722_s7 + $0xd28] sm:$0xff]  ;;  %v1290_v38 = vld [vmem:[%s20722_s7 + $0xd30] sm:$0xff] }
  0xeb   : > { %1287 = vst [vmem:[#allocation4 + $0x1f0] sm:$0xff] %v1286_v36  ;;  %1289 = vst [vmem:[#allocation4 + $0xd88] sm:$0xff] %v1288_v37  ;;  %v1292_v39 = vld [vmem:[%s20722_s7 + $0xd38] sm:$0xff]  ;;  %v1294_v40 = vld [vmem:[%s20722_s7 + $0xd40] sm:$0xff] }
  0xec   : > { %1291 = vst [vmem:[#allocation4 + $0xef0] sm:$0xff] %v1290_v38  ;;  %v1296_v41 = vld [vmem:[%s20722_s7 + $0xd48] sm:$0xff]  ;;  %1293 = vst [vmem:[#allocation4 + $0x148] sm:$0xff] %v1292_v39  ;;  %v1298_v42 = vld [vmem:[%s20722_s7 + $0xd50] sm:$0xff] }
  0xed   : > { %1295 = vst [vmem:[#allocation4 + $0x6b8] sm:$0xff] %v1294_v40  ;;  %1297 = vst [vmem:[#allocation4 + $0xf58] sm:$0xff] %v1296_v41  ;;  %v1300_v43 = vld [vmem:[%s20722_s7 + $0xd58] sm:$0xff]  ;;  %v1302_v44 = vld [vmem:[%s20722_s7 + $0xd60] sm:$0xff] }
  0xee   : > { %1299 = vst [vmem:[#allocation4 + $0xa70] sm:$0xff] %v1298_v42  ;;  %1301 = vst [vmem:[#allocation4 + $0xe70] sm:$0xff] %v1300_v43  ;;  %v1304_v45 = vld [vmem:[%s20722_s7 + $0xd68] sm:$0xff]  ;;  %v1306_v46 = vld [vmem:[%s20722_s7 + $0xd70] sm:$0xff] }
  0xef   : > { %1303 = vst [vmem:[#allocation4 + $0x7d0] sm:$0xff] %v1302_v44  ;;  %v1308_v47 = vld [vmem:[%s20722_s7 + $0xd78] sm:$0xff]  ;;  %1305 = vst [vmem:[#allocation4 + $0xe18] sm:$0xff] %v1304_v45  ;;  %v1310_v48 = vld [vmem:[%s20722_s7 + $0xd80] sm:$0xff] }
  0xf0   : > { %1307 = vst [vmem:[#allocation4 + $0x518] sm:$0xff] %v1306_v46  ;;  %1309 = vst [vmem:[#allocation4 + $0x9f0] sm:$0xff] %v1308_v47  ;;  %v1312_v49 = vld [vmem:[%s20722_s7 + $0xd88] sm:$0xff]  ;;  %v1314_v50 = vld [vmem:[%s20722_s7 + $0xd90] sm:$0xff] }
  0xf1   : > { %1311 = vst [vmem:[#allocation4 + $0x6a0] sm:$0xff] %v1310_v48  ;;  %1313 = vst [vmem:[#allocation4 + $0xf0] sm:$0xff] %v1312_v49  ;;  %v1316_v51 = vld [vmem:[%s20722_s7 + $0xd98] sm:$0xff]  ;;  %v1318_v52 = vld [vmem:[%s20722_s7 + $0xda0] sm:$0xff] }
  0xf2   : > { %1315 = vst [vmem:[#allocation4 + $0x218] sm:$0xff] %v1314_v50  ;;  %v1320_v53 = vld [vmem:[%s20722_s7 + $0xda8] sm:$0xff]  ;;  %1317 = vst [vmem:[#allocation4 + $0x58] sm:$0xff] %v1316_v51  ;;  %v1322_v54 = vld [vmem:[%s20722_s7 + $0xdb0] sm:$0xff] }
  0xf3   : > { %1319 = vst [vmem:[#allocation4 + $0x28] sm:$0xff] %v1318_v52  ;;  %1321 = vst [vmem:[#allocation4 + $0xc18] sm:$0xff] %v1320_v53  ;;  %v1324_v55 = vld [vmem:[%s20722_s7 + $0xdb8] sm:$0xff]  ;;  %v1326_v56 = vld [vmem:[%s20722_s7 + $0xdc0] sm:$0xff] }
  0xf4   : > { %1323 = vst [vmem:[#allocation4 + $0x290] sm:$0xff] %v1322_v54  ;;  %1325 = vst [vmem:[#allocation4 + $0x4e0] sm:$0xff] %v1324_v55  ;;  %v1328_v57 = vld [vmem:[%s20722_s7 + $0xdc8] sm:$0xff]  ;;  %v1330_v58 = vld [vmem:[%s20722_s7 + $0xdd0] sm:$0xff] }
  0xf5   : > { %1327 = vst [vmem:[#allocation4 + $0x10] sm:$0xff] %v1326_v56  ;;  %v1332_v59 = vld [vmem:[%s20722_s7 + $0xdd8] sm:$0xff]  ;;  %1329 = vst [vmem:[#allocation4 + $0xa68] sm:$0xff] %v1328_v57  ;;  %v1334_v60 = vld [vmem:[%s20722_s7 + $0xde0] sm:$0xff] }
  0xf6   : > { %1331 = vst [vmem:[#allocation4 + $0xf30] sm:$0xff] %v1330_v58  ;;  %1333 = vst [vmem:[#allocation4 + $0x680] sm:$0xff] %v1332_v59  ;;  %v1336_v61 = vld [vmem:[%s20722_s7 + $0xde8] sm:$0xff]  ;;  %v1338_v62 = vld [vmem:[%s20722_s7 + $0xdf0] sm:$0xff] }
  0xf7   : > { %1335 = vst [vmem:[#allocation4 + $0x108] sm:$0xff] %v1334_v60  ;;  %1337 = vst [vmem:[#allocation4 + $0x778] sm:$0xff] %v1336_v61  ;;  %v1340_v63 = vld [vmem:[%s20722_s7 + $0xdf8] sm:$0xff]  ;;  %v1342_v0 = vld [vmem:[%s20722_s7 + $0xe00] sm:$0xff] }
  0xf8   : > { %1339 = vst [vmem:[#allocation4 + $0x368] sm:$0xff] %v1338_v62  ;;  %v1344_v1 = vld [vmem:[%s20722_s7 + $0xe08] sm:$0xff]  ;;  %1341 = vst [vmem:[#allocation4 + $0x110] sm:$0xff] %v1340_v63  ;;  %v1346_v2 = vld [vmem:[%s20722_s7 + $0xe10] sm:$0xff] }
  0xf9   : > { %1343 = vst [vmem:[#allocation4 + $0xaa0] sm:$0xff] %v1342_v0  ;;  %1345 = vst [vmem:[#allocation4 + $0xee0] sm:$0xff] %v1344_v1  ;;  %v1348_v3 = vld [vmem:[%s20722_s7 + $0xe18] sm:$0xff]  ;;  %v1350_v4 = vld [vmem:[%s20722_s7 + $0xe20] sm:$0xff] }
  0xfa   : > { %1347 = vst [vmem:[#allocation4 + $0x260] sm:$0xff] %v1346_v2  ;;  %1349 = vst [vmem:[#allocation4 + $0x3a8] sm:$0xff] %v1348_v3  ;;  %v1352_v5 = vld [vmem:[%s20722_s7 + $0xe28] sm:$0xff]  ;;  %v1354_v6 = vld [vmem:[%s20722_s7 + $0xe30] sm:$0xff] }
  0xfb   : > { %1351 = vst [vmem:[#allocation4 + $0xf68] sm:$0xff] %v1350_v4  ;;  %v1356_v7 = vld [vmem:[%s20722_s7 + $0xe38] sm:$0xff]  ;;  %1353 = vst [vmem:[#allocation4 + $0x880] sm:$0xff] %v1352_v5  ;;  %v1358_v8 = vld [vmem:[%s20722_s7 + $0xe40] sm:$0xff] }
  0xfc   : > { %1355 = vst [vmem:[#allocation4 + $0x4f0] sm:$0xff] %v1354_v6  ;;  %1357 = vst [vmem:[#allocation4 + $0x850] sm:$0xff] %v1356_v7  ;;  %v1360_v9 = vld [vmem:[%s20722_s7 + $0xe48] sm:$0xff]  ;;  %v1362_v10 = vld [vmem:[%s20722_s7 + $0xe50] sm:$0xff] }
  0xfd   : > { %1359 = vst [vmem:[#allocation4 + $0xd10] sm:$0xff] %v1358_v8  ;;  %1361 = vst [vmem:[#allocation4 + $0xb38] sm:$0xff] %v1360_v9  ;;  %v1364_v11 = vld [vmem:[%s20722_s7 + $0xe58] sm:$0xff]  ;;  %v1366_v12 = vld [vmem:[%s20722_s7 + $0xe60] sm:$0xff] }
  0xfe   : > { %1363 = vst [vmem:[#allocation4 + $0x8f0] sm:$0xff] %v1362_v10  ;;  %v1368_v13 = vld [vmem:[%s20722_s7 + $0xe68] sm:$0xff]  ;;  %1365 = vst [vmem:[#allocation4 + $0x798] sm:$0xff] %v1364_v11  ;;  %v1370_v14 = vld [vmem:[%s20722_s7 + $0xe70] sm:$0xff] }
  0xff   : > { %1367 = vst [vmem:[#allocation4 + $0x238] sm:$0xff] %v1366_v12  ;;  %1369 = vst [vmem:[#allocation4 + $0xa00] sm:$0xff] %v1368_v13  ;;  %v1372_v15 = vld [vmem:[%s20722_s7 + $0xe78] sm:$0xff]  ;;  %v1374_v16 = vld [vmem:[%s20722_s7 + $0xe80] sm:$0xff] }
 0x100   : > { %1371 = vst [vmem:[#allocation4 + $0xd18] sm:$0xff] %v1370_v14  ;;  %1373 = vst [vmem:[#allocation4 + $0xd40] sm:$0xff] %v1372_v15  ;;  %v1376_v17 = vld [vmem:[%s20722_s7 + $0xe88] sm:$0xff]  ;;  %v1378_v18 = vld [vmem:[%s20722_s7 + $0xe90] sm:$0xff] }
 0x101   : > { %1375 = vst [vmem:[#allocation4 + $0xa80] sm:$0xff] %v1374_v16  ;;  %v1380_v19 = vld [vmem:[%s20722_s7 + $0xe98] sm:$0xff]  ;;  %1377 = vst [vmem:[#allocation4 + $0x2b0] sm:$0xff] %v1376_v17  ;;  %v1382_v20 = vld [vmem:[%s20722_s7 + $0xea0] sm:$0xff] }
 0x102   : > { %1379 = vst [vmem:[#allocation4 + $0x740] sm:$0xff] %v1378_v18  ;;  %1381 = vst [vmem:[#allocation4 + $0xaa8] sm:$0xff] %v1380_v19  ;;  %v1384_v21 = vld [vmem:[%s20722_s7 + $0xea8] sm:$0xff]  ;;  %v1386_v22 = vld [vmem:[%s20722_s7 + $0xeb0] sm:$0xff] }
 0x103   : > { %1383 = vst [vmem:[#allocation4 + $0xfa8] sm:$0xff] %v1382_v20  ;;  %1385 = vst [vmem:[#allocation4 + $0xa98] sm:$0xff] %v1384_v21  ;;  %v1388_v23 = vld [vmem:[%s20722_s7 + $0xeb8] sm:$0xff]  ;;  %v1390_v24 = vld [vmem:[%s20722_s7 + $0xec0] sm:$0xff] }
 0x104   : > { %1387 = vst [vmem:[#allocation4 + $0xc78] sm:$0xff] %v1386_v22  ;;  %v1392_v25 = vld [vmem:[%s20722_s7 + $0xec8] sm:$0xff]  ;;  %1389 = vst [vmem:[#allocation4 + $0x2d8] sm:$0xff] %v1388_v23  ;;  %v1394_v26 = vld [vmem:[%s20722_s7 + $0xed0] sm:$0xff] }
 0x105   : > { %1391 = vst [vmem:[#allocation4 + $0xc30] sm:$0xff] %v1390_v24  ;;  %1393 = vst [vmem:[#allocation4 + $0xf10] sm:$0xff] %v1392_v25  ;;  %v1396_v27 = vld [vmem:[%s20722_s7 + $0xed8] sm:$0xff]  ;;  %v1398_v28 = vld [vmem:[%s20722_s7 + $0xee0] sm:$0xff] }
 0x106   : > { %1395 = vst [vmem:[#allocation4 + $0x460] sm:$0xff] %v1394_v26  ;;  %1397 = vst [vmem:[#allocation4 + $0x898] sm:$0xff] %v1396_v27  ;;  %v1400_v29 = vld [vmem:[%s20722_s7 + $0xee8] sm:$0xff]  ;;  %v1402_v30 = vld [vmem:[%s20722_s7 + $0xef0] sm:$0xff] }
 0x107   : > { %1399 = vst [vmem:[#allocation4 + $0x538] sm:$0xff] %v1398_v28  ;;  %v1404_v31 = vld [vmem:[%s20722_s7 + $0xef8] sm:$0xff]  ;;  %1401 = vst [vmem:[#allocation4 + $0x328] sm:$0xff] %v1400_v29  ;;  %v1406_v32 = vld [vmem:[%s20722_s7 + $0xf00] sm:$0xff] }
 0x108   : > { %1403 = vst [vmem:[#allocation4 + $0xa50] sm:$0xff] %v1402_v30  ;;  %1405 = vst [vmem:[#allocation4 + $0x7b0] sm:$0xff] %v1404_v31  ;;  %v1408_v33 = vld [vmem:[%s20722_s7 + $0xf08] sm:$0xff]  ;;  %v1410_v34 = vld [vmem:[%s20722_s7 + $0xf10] sm:$0xff] }
 0x109   : > { %1407 = vst [vmem:[#allocation4 + $0xdf8] sm:$0xff] %v1406_v32  ;;  %1409 = vst [vmem:[#allocation4 + $0x9a0] sm:$0xff] %v1408_v33  ;;  %v1412_v35 = vld [vmem:[%s20722_s7 + $0xf18] sm:$0xff]  ;;  %v1414_v36 = vld [vmem:[%s20722_s7 + $0xf20] sm:$0xff] }
 0x10a   : > { %1411 = vst [vmem:[#allocation4 + $0xe38] sm:$0xff] %v1410_v34  ;;  %v1416_v37 = vld [vmem:[%s20722_s7 + $0xf28] sm:$0xff]  ;;  %1413 = vst [vmem:[#allocation4 + $0x390] sm:$0xff] %v1412_v35  ;;  %v1418_v38 = vld [vmem:[%s20722_s7 + $0xf30] sm:$0xff] }
 0x10b   : > { %1415 = vst [vmem:[#allocation4 + $0x7e0] sm:$0xff] %v1414_v36  ;;  %1417 = vst [vmem:[#allocation4 + $0x900] sm:$0xff] %v1416_v37  ;;  %v1420_v39 = vld [vmem:[%s20722_s7 + $0xf38] sm:$0xff]  ;;  %v1422_v40 = vld [vmem:[%s20722_s7 + $0xf40] sm:$0xff] }
 0x10c   : > { %1419 = vst [vmem:[#allocation4 + $0x4c0] sm:$0xff] %v1418_v38  ;;  %1421 = vst [vmem:[#allocation4 + $0x710] sm:$0xff] %v1420_v39  ;;  %v1424_v41 = vld [vmem:[%s20722_s7 + $0xf48] sm:$0xff]  ;;  %v1426_v42 = vld [vmem:[%s20722_s7 + $0xf50] sm:$0xff] }
 0x10d   : > { %1423 = vst [vmem:[#allocation4 + $0x508] sm:$0xff] %v1422_v40  ;;  %v1428_v43 = vld [vmem:[%s20722_s7 + $0xf58] sm:$0xff]  ;;  %1425 = vst [vmem:[#allocation4 + $0x9e8] sm:$0xff] %v1424_v41  ;;  %v1430_v44 = vld [vmem:[%s20722_s7 + $0xf60] sm:$0xff] }
 0x10e   : > { %1427 = vst [vmem:[#allocation4 + $0x938] sm:$0xff] %v1426_v42  ;;  %1429 = vst [vmem:[#allocation4 + $0x558] sm:$0xff] %v1428_v43  ;;  %v1432_v45 = vld [vmem:[%s20722_s7 + $0xf68] sm:$0xff]  ;;  %v1434_v46 = vld [vmem:[%s20722_s7 + $0xf70] sm:$0xff] }
 0x10f   : > { %1431 = vst [vmem:[#allocation4 + $0xac0] sm:$0xff] %v1430_v44  ;;  %1433 = vst [vmem:[#allocation4 + $0x930] sm:$0xff] %v1432_v45  ;;  %v1436_v47 = vld [vmem:[%s20722_s7 + $0xf78] sm:$0xff]  ;;  %v1438_v48 = vld [vmem:[%s20722_s7 + $0xf80] sm:$0xff] }
 0x110   : > { %1435 = vst [vmem:[#allocation4 + $0x988] sm:$0xff] %v1434_v46  ;;  %v1440_v49 = vld [vmem:[%s20722_s7 + $0xf88] sm:$0xff]  ;;  %1437 = vst [vmem:[#allocation4 + $0x348] sm:$0xff] %v1436_v47  ;;  %v1442_v50 = vld [vmem:[%s20722_s7 + $0xf90] sm:$0xff] }
 0x111   : > { %1439 = vst [vmem:[#allocation4 + $0xc90] sm:$0xff] %v1438_v48  ;;  %1441 = vst [vmem:[#allocation4 + $0xce8] sm:$0xff] %v1440_v49  ;;  %v1444_v51 = vld [vmem:[%s20722_s7 + $0xf98] sm:$0xff]  ;;  %v1446_v52 = vld [vmem:[%s20722_s7 + $0xfa0] sm:$0xff] }
 0x112   : > { %1443 = vst [vmem:[#allocation4 + $0xcf8] sm:$0xff] %v1442_v50  ;;  %1445 = vst [vmem:[#allocation4 + $0x1a8] sm:$0xff] %v1444_v51  ;;  %v1448_v53 = vld [vmem:[%s20722_s7 + $0xfa8] sm:$0xff]  ;;  %v1450_v54 = vld [vmem:[%s20722_s7 + $0xfb0] sm:$0xff] }
 0x113   : > { %1447 = vst [vmem:[#allocation4 + $0x4a8] sm:$0xff] %v1446_v52  ;;  %v1452_v55 = vld [vmem:[%s20722_s7 + $0xfb8] sm:$0xff]  ;;  %1449 = vst [vmem:[#allocation4 + $0x40] sm:$0xff] %v1448_v53  ;;  %v1454_v56 = vld [vmem:[%s20722_s7 + $0xfc0] sm:$0xff] }
 0x114   : > { %1451 = vst [vmem:[#allocation4 + $0x1c8] sm:$0xff] %v1450_v54  ;;  %1453 = vst [vmem:[#allocation4 + $0xfe8] sm:$0xff] %v1452_v55  ;;  %v1456_v57 = vld [vmem:[%s20722_s7 + $0xfc8] sm:$0xff]  ;;  %v1458_v58 = vld [vmem:[%s20722_s7 + $0xfd0] sm:$0xff] }
 0x115   : > { %1455 = vst [vmem:[#allocation4 + $0xd98] sm:$0xff] %v1454_v56  ;;  %1457 = vst [vmem:[#allocation4 + $0x150] sm:$0xff] %v1456_v57  ;;  %v1460_v59 = vld [vmem:[%s20722_s7 + $0xfd8] sm:$0xff]  ;;  %v1462_v60 = vld [vmem:[%s20722_s7 + $0xfe0] sm:$0xff] }
 0x116   : > { %1459 = vst [vmem:[#allocation4 + $0x400] sm:$0xff] %v1458_v58  ;;  %v1464_v61 = vld [vmem:[%s20722_s7 + $0xfe8] sm:$0xff]  ;;  %1461 = vst [vmem:[#allocation4 + $0x298] sm:$0xff] %v1460_v59  ;;  %v1466_v62 = vld [vmem:[%s20722_s7 + $0xff0] sm:$0xff] }
 0x117   : > { %1463 = vst [vmem:[#allocation4 + $0x730] sm:$0xff] %v1462_v60  ;;  %1465 = vst [vmem:[#allocation4 + $0x3c0] sm:$0xff] %v1464_v61  ;;  %v1468_v63 = vld [vmem:[%s20722_s7 + $0xff8] sm:$0xff] }
 0x118   : > { %1467 = vst [vmem:[#allocation4 + $0x2c0] sm:$0xff] %v1466_v62  ;;  %1469 = vst [vmem:[#allocation4 + $0x4a0] sm:$0xff] %v1468_v63 }
 0x119   : > { %1477 = vsyncadd [#allocation5], 65536  ;;  %v20733_v0 = vmov 0   ;;  %s18293_s14 = smov 0  }
 0x11a   : > { %1478 = vst [vmem:[#allocation2] sm:$0xf] %v20733_v0  ;;  %1479 = vst [vmem:[#allocation2 + $0x4] sm:$0xf] %v20733_v0 }
 0x11b   : > { %1480 = vst [vmem:[#allocation2 + $0x8] sm:$0xf] %v20733_v0  ;;  %1481 = vst [vmem:[#allocation2 + $0xc] sm:$0xf] %v20733_v0 }
 0x11c   : > { %1482 = vst [vmem:[#allocation2 + $0x10] sm:$0xf] %v20733_v0  ;;  %1483 = vst [vmem:[#allocation2 + $0x14] sm:$0xf] %v20733_v0 }
 0x11d   : > { %1484 = vst [vmem:[#allocation2 + $0x18] sm:$0xf] %v20733_v0  ;;  %1485 = vst [vmem:[#allocation2 + $0x1c] sm:$0xf] %v20733_v0 }
 0x11e   : > { %1486 = vst [vmem:[#allocation2 + $0x20] sm:$0xf] %v20733_v0  ;;  %1487 = vst [vmem:[#allocation2 + $0x24] sm:$0xf] %v20733_v0 }
 0x11f   : > { %1488 = vst [vmem:[#allocation2 + $0x28] sm:$0xf] %v20733_v0  ;;  %1489 = vst [vmem:[#allocation2 + $0x2c] sm:$0xf] %v20733_v0 }
 0x120   : > { %1490 = vst [vmem:[#allocation2 + $0x30] sm:$0xf] %v20733_v0  ;;  %1491 = vst [vmem:[#allocation2 + $0x34] sm:$0xf] %v20733_v0 }
 0x121   : > { %1492 = vst [vmem:[#allocation2 + $0x38] sm:$0xf] %v20733_v0  ;;  %1493 = vst [vmem:[#allocation2 + $0x3c] sm:$0xf] %v20733_v0 }
 0x122   : > { %1494 = vst [vmem:[#allocation2 + $0x40] sm:$0xf] %v20733_v0  ;;  %1495 = vst [vmem:[#allocation2 + $0x44] sm:$0xf] %v20733_v0 }
 0x123   : > { %1496 = vst [vmem:[#allocation2 + $0x48] sm:$0xf] %v20733_v0  ;;  %1497 = vst [vmem:[#allocation2 + $0x4c] sm:$0xf] %v20733_v0 }
 0x124   : > { %1498 = vst [vmem:[#allocation2 + $0x50] sm:$0xf] %v20733_v0  ;;  %1499 = vst [vmem:[#allocation2 + $0x54] sm:$0xf] %v20733_v0 }
 0x125   : > { %1500 = vst [vmem:[#allocation2 + $0x58] sm:$0xf] %v20733_v0  ;;  %1501 = vst [vmem:[#allocation2 + $0x5c] sm:$0xf] %v20733_v0 }
 0x126   : > { %1502 = vst [vmem:[#allocation2 + $0x60] sm:$0xf] %v20733_v0  ;;  %1503 = vst [vmem:[#allocation2 + $0x64] sm:$0xf] %v20733_v0 }
 0x127   : > { %1504 = vst [vmem:[#allocation2 + $0x68] sm:$0xf] %v20733_v0  ;;  %1505 = vst [vmem:[#allocation2 + $0x6c] sm:$0xf] %v20733_v0 }
 0x128   : > { %1506 = vst [vmem:[#allocation2 + $0x70] sm:$0xf] %v20733_v0  ;;  %1507 = vst [vmem:[#allocation2 + $0x74] sm:$0xf] %v20733_v0 }
 0x129   : > { %1508 = vst [vmem:[#allocation2 + $0x78] sm:$0xf] %v20733_v0  ;;  %1509 = vst [vmem:[#allocation2 + $0x7c] sm:$0xf] %v20733_v0 }
 0x12a   : > { %1510 = vst [vmem:[#allocation2 + $0x80] sm:$0xf] %v20733_v0  ;;  %1511 = vst [vmem:[#allocation2 + $0x84] sm:$0xf] %v20733_v0 }
 0x12b   : > { %1512 = vst [vmem:[#allocation2 + $0x88] sm:$0xf] %v20733_v0  ;;  %1513 = vst [vmem:[#allocation2 + $0x8c] sm:$0xf] %v20733_v0 }
 0x12c   : > { %1514 = vst [vmem:[#allocation2 + $0x90] sm:$0xf] %v20733_v0  ;;  %1515 = vst [vmem:[#allocation2 + $0x94] sm:$0xf] %v20733_v0 }
 0x12d   : > { %1516 = vst [vmem:[#allocation2 + $0x98] sm:$0xf] %v20733_v0  ;;  %1517 = vst [vmem:[#allocation2 + $0x9c] sm:$0xf] %v20733_v0 }
 0x12e   : > { %1518 = vst [vmem:[#allocation2 + $0xa0] sm:$0xf] %v20733_v0  ;;  %1519 = vst [vmem:[#allocation2 + $0xa4] sm:$0xf] %v20733_v0 }
 0x12f   : > { %1520 = vst [vmem:[#allocation2 + $0xa8] sm:$0xf] %v20733_v0  ;;  %1521 = vst [vmem:[#allocation2 + $0xac] sm:$0xf] %v20733_v0 }
 0x130   : > { %1522 = vst [vmem:[#allocation2 + $0xb0] sm:$0xf] %v20733_v0  ;;  %1523 = vst [vmem:[#allocation2 + $0xb4] sm:$0xf] %v20733_v0 }
 0x131   : > { %1524 = vst [vmem:[#allocation2 + $0xb8] sm:$0xf] %v20733_v0  ;;  %1525 = vst [vmem:[#allocation2 + $0xbc] sm:$0xf] %v20733_v0 }
 0x132   : > { %1526 = vst [vmem:[#allocation2 + $0xc0] sm:$0xf] %v20733_v0  ;;  %1527 = vst [vmem:[#allocation2 + $0xc4] sm:$0xf] %v20733_v0 }
 0x133   : > { %1528 = vst [vmem:[#allocation2 + $0xc8] sm:$0xf] %v20733_v0  ;;  %1529 = vst [vmem:[#allocation2 + $0xcc] sm:$0xf] %v20733_v0 }
 0x134   : > { %1530 = vst [vmem:[#allocation2 + $0xd0] sm:$0xf] %v20733_v0  ;;  %1531 = vst [vmem:[#allocation2 + $0xd4] sm:$0xf] %v20733_v0 }
 0x135   : > { %1532 = vst [vmem:[#allocation2 + $0xd8] sm:$0xf] %v20733_v0  ;;  %1533 = vst [vmem:[#allocation2 + $0xdc] sm:$0xf] %v20733_v0 }
 0x136   : > { %1534 = vst [vmem:[#allocation2 + $0xe0] sm:$0xf] %v20733_v0  ;;  %1535 = vst [vmem:[#allocation2 + $0xe4] sm:$0xf] %v20733_v0 }
 0x137   : > { %1536 = vst [vmem:[#allocation2 + $0xe8] sm:$0xf] %v20733_v0  ;;  %1537 = vst [vmem:[#allocation2 + $0xec] sm:$0xf] %v20733_v0 }
 0x138   : > { %1538 = vst [vmem:[#allocation2 + $0xf0] sm:$0xf] %v20733_v0  ;;  %1539 = vst [vmem:[#allocation2 + $0xf4] sm:$0xf] %v20733_v0 }
 0x139   : > { %1540 = vst [vmem:[#allocation2 + $0xf8] sm:$0xf] %v20733_v0  ;;  %1541 = vst [vmem:[#allocation2 + $0xfc] sm:$0xf] %v20733_v0 }
 0x13a   : > { %1542 = vst [vmem:[#allocation2 + $0x100] sm:$0xf] %v20733_v0  ;;  %1543 = vst [vmem:[#allocation2 + $0x104] sm:$0xf] %v20733_v0 }
 0x13b   : > { %1544 = vst [vmem:[#allocation2 + $0x108] sm:$0xf] %v20733_v0  ;;  %1545 = vst [vmem:[#allocation2 + $0x10c] sm:$0xf] %v20733_v0 }
 0x13c   : > { %1546 = vst [vmem:[#allocation2 + $0x110] sm:$0xf] %v20733_v0  ;;  %1547 = vst [vmem:[#allocation2 + $0x114] sm:$0xf] %v20733_v0 }
 0x13d   : > { %1548 = vst [vmem:[#allocation2 + $0x118] sm:$0xf] %v20733_v0  ;;  %1549 = vst [vmem:[#allocation2 + $0x11c] sm:$0xf] %v20733_v0 }
 0x13e   : > { %1550 = vst [vmem:[#allocation2 + $0x120] sm:$0xf] %v20733_v0  ;;  %1551 = vst [vmem:[#allocation2 + $0x124] sm:$0xf] %v20733_v0 }
 0x13f   : > { %1552 = vst [vmem:[#allocation2 + $0x128] sm:$0xf] %v20733_v0  ;;  %1553 = vst [vmem:[#allocation2 + $0x12c] sm:$0xf] %v20733_v0 }
 0x140   : > { %1554 = vst [vmem:[#allocation2 + $0x130] sm:$0xf] %v20733_v0  ;;  %1555 = vst [vmem:[#allocation2 + $0x134] sm:$0xf] %v20733_v0 }
 0x141   : > { %1556 = vst [vmem:[#allocation2 + $0x138] sm:$0xf] %v20733_v0  ;;  %1557 = vst [vmem:[#allocation2 + $0x13c] sm:$0xf] %v20733_v0 }
 0x142   : > { %1558 = vst [vmem:[#allocation2 + $0x140] sm:$0xf] %v20733_v0  ;;  %1559 = vst [vmem:[#allocation2 + $0x144] sm:$0xf] %v20733_v0 }
 0x143   : > { %1560 = vst [vmem:[#allocation2 + $0x148] sm:$0xf] %v20733_v0  ;;  %1561 = vst [vmem:[#allocation2 + $0x14c] sm:$0xf] %v20733_v0 }
 0x144   : > { %1562 = vst [vmem:[#allocation2 + $0x150] sm:$0xf] %v20733_v0  ;;  %1563 = vst [vmem:[#allocation2 + $0x154] sm:$0xf] %v20733_v0 }
 0x145   : > { %1564 = vst [vmem:[#allocation2 + $0x158] sm:$0xf] %v20733_v0  ;;  %1565 = vst [vmem:[#allocation2 + $0x15c] sm:$0xf] %v20733_v0 }
 0x146   : > { %1566 = vst [vmem:[#allocation2 + $0x160] sm:$0xf] %v20733_v0  ;;  %1567 = vst [vmem:[#allocation2 + $0x164] sm:$0xf] %v20733_v0 }
 0x147   : > { %1568 = vst [vmem:[#allocation2 + $0x168] sm:$0xf] %v20733_v0  ;;  %1569 = vst [vmem:[#allocation2 + $0x16c] sm:$0xf] %v20733_v0 }
 0x148   : > { %1570 = vst [vmem:[#allocation2 + $0x170] sm:$0xf] %v20733_v0  ;;  %1571 = vst [vmem:[#allocation2 + $0x174] sm:$0xf] %v20733_v0 }
 0x149   : > { %1572 = vst [vmem:[#allocation2 + $0x178] sm:$0xf] %v20733_v0  ;;  %1573 = vst [vmem:[#allocation2 + $0x17c] sm:$0xf] %v20733_v0 }
 0x14a   : > { %1574 = vst [vmem:[#allocation2 + $0x180] sm:$0xf] %v20733_v0  ;;  %1575 = vst [vmem:[#allocation2 + $0x184] sm:$0xf] %v20733_v0 }
 0x14b   : > { %1576 = vst [vmem:[#allocation2 + $0x188] sm:$0xf] %v20733_v0  ;;  %1577 = vst [vmem:[#allocation2 + $0x18c] sm:$0xf] %v20733_v0 }
 0x14c   : > { %1578 = vst [vmem:[#allocation2 + $0x190] sm:$0xf] %v20733_v0  ;;  %1579 = vst [vmem:[#allocation2 + $0x194] sm:$0xf] %v20733_v0 }
 0x14d   : > { %1580 = vst [vmem:[#allocation2 + $0x198] sm:$0xf] %v20733_v0  ;;  %1581 = vst [vmem:[#allocation2 + $0x19c] sm:$0xf] %v20733_v0 }
 0x14e   : > { %1582 = vst [vmem:[#allocation2 + $0x1a0] sm:$0xf] %v20733_v0  ;;  %1583 = vst [vmem:[#allocation2 + $0x1a4] sm:$0xf] %v20733_v0 }
 0x14f   : > { %1584 = vst [vmem:[#allocation2 + $0x1a8] sm:$0xf] %v20733_v0  ;;  %1585 = vst [vmem:[#allocation2 + $0x1ac] sm:$0xf] %v20733_v0 }
 0x150 LB: >> { %v15580_v1 = vld [vmem:[%s20716_s1 + $0x8] sm:$0xff]   ;;  %v15581_v2 = vld [vmem:[%s20716_s1] sm:$0xff]   ;;  %s13355_s23 = sshll.u32 %s16508_s14, 8  ;;  %vm1732_vm0 = vcmask 261120   ;;  %v16515_v19 = vmov 1983009808   ;;  %v2010_v21 = vlaneseq  ;;  %s16508_s14 = sphi %s18293_s14, %s1591_s14  }
 0x151   : >> { %15293 = vmatprep.subr.bf16.mxu0 %v15580_v1  ;;  %15517 = vmatprep.subr.bf16.mxu1 %v15580_v1  ;;  %s1593_s30 = sshra.s32 %s13355_s23, 3  ;;  %v2008_v20 = vunpack.c.l.s4 %v16515_v19  ;;  %v18345_v24 = vld [vmem:[%s20717_s2] ss:$0 sm:$0xff]  ;;  %vm2678_vm1 = vcmask 1041408   ;;  %vm3961_vm2 = vcmask 1041409   ;;  %vm3963_vm3 = vcmask 1042434  }
 0x152   : >> { %15294 = vmatpush3.bf16.msra.mxu0 %v15580_v1  ;;  %15519 = vmatpush3.bf16.msra.mxu1 %v15580_v1  ;;  %s13356_s15 = sshll.u32 %s1593_s30, 2  ;;  %v18340_v23 = vshrl.u32 %v2010_v21, 7  ;;  %vm3965_vm4 = vcmask 1043459   ;;  %vm3967_vm5 = vcmask 1044484   ;;  %vm3969_vm6 = vcmask 1045509   ;;  %s14773_s22 = sshll.u32 %s16508_s14, 5 }
 0x153   : >> { %15295 = vmatprep.subr.bf16.mxu0 %v15581_v2  ;;  %15518 = vmatprep.subr.bf16.mxu1 %v15581_v2  ;;  %s18306_s17 = scalar_lea.vmem %s16688_s24, %s13356_s15  ;;  %v2009_v22 = vunpack.c.0.s8 %v2008_v20  ;;  %vm3971_vm7 = vcmask 1046534   ;;  %vm3973_vm8 = vcmask 1047559   ;;  %s18675_s23 = scalar_lea.vmem [#allocation2], %s14773_s22  ;;  %vm4112_vm9 = vcmask 1040384  }
 0x154   : >> { %v15582_v3 = vld [vmem:[%s18306_s17] sm:$0xff]   ;;  %v15584_v5 = vld [vmem:[%s18306_s17 + $0x8] sm:$0xff]   ;;  %v15586_v7 = vld [vmem:[%s18306_s17 + $0x10] sm:$0xff]   ;;  %20751 = vst [vmem:[#allocation15_spill] sm:$0xff] %v18340_v23  ;;  %vm4113_vm10 = vsmask.f32 256 }
 0x155   : >> { %v15583_v4 = vld [vmem:[%s18306_s17 + $0x40] sm:$0xff]   ;;  %15297 = vmatprep.mubr.msk.bf16.mxu0 %vm1732_vm0, %v15582_v3  ;;  %v15585_v6 = vld [vmem:[%s18306_s17 + $0x48] sm:$0xff]   ;;  %v15587_v8 = vld [vmem:[%s18306_s17 + $0x50] sm:$0xff]   ;;  %v18349_v27 = vsub.s32 %v2009_v22, %v18340_v23  ;;  %vm4217_vm11 = vcmask 1047552   ;;  %vm4218_vm12 = vsmask.f32 7424 }
 0x156   : >> { %15296 = vmatpush3.bf16.msra.mxu0 %v15581_v2  ;;  %15520 = vmatpush3.bf16.msra.mxu1 %v15581_v2  ;;  %v15588_v9 = vld [vmem:[%s18306_s17 + $0x18] sm:$0xff]   ;;  %v15590_v11 = vld [vmem:[%s18306_s17 + $0x20] sm:$0xff]   ;;  %v15592_v13 = vld [vmem:[%s18306_s17 + $0x28] sm:$0xff]   ;;  %s1591_s14 = sadd.s32 1, %s16508_s14  }
 0x157   : >> { %15313 = vmatprep.mubr.msk.bf16.mxu1 %vm1732_vm0, %v15583_v4  ;;  %v15589_v10 = vld [vmem:[%s18306_s17 + $0x58] sm:$0xff]   ;;  %v15591_v12 = vld [vmem:[%s18306_s17 + $0x60] sm:$0xff]   ;;  %v15593_v14 = vld [vmem:[%s18306_s17 + $0x68] sm:$0xff]   ;;  %p1588_p11 = scmp.ge.s32.totalorder %s1591_s14, 4  }
 0x158   : >> { %v15594_v15 = vld [vmem:[%s18306_s17 + $0x30] sm:$0xff]   ;;  %v15596_v17 = vld [vmem:[%s18306_s17 + $0x38] sm:$0xff]   ;;  %vm18781_vm13 = vmand %vm4217_vm11, %vm4218_vm12  ;;  %s19367_s24 = smov (%p1588_p11), 0  }
 0x159   : >> { %15298 = vmatmul.mubr.msk.bf16.vlgmr.msra.gmra.mxu0 %vm1732_vm0, %v15584_v5  ;;  %15314 = vmatmul.mubr.msk.bf16.vlgmr.msra.gmra.mxu1 %vm1732_vm0, %v15585_v6  ;;  %v15595_v16 = vld [vmem:[%s18306_s17 + $0x70] sm:$0xff]   ;;  %v15597_v18 = vld [vmem:[%s18306_s17 + $0x78] sm:$0xff]   ;;  %vm18800_vm14 = vmand %vm4112_vm9, %vm4113_vm10 }
 0x15a   : >> { %15301 = vmatprep.mubr.msk.bf16.mxu0 %vm1732_vm0, %v15586_v7  ;;  %15317 = vmatprep.mubr.msk.bf16.mxu1 %vm1732_vm0, %v15587_v8 }
 0x161   : >> { %15302 = vmatmul.mubr.msk.bf16.gmra.mxu0 %vm1732_vm0, %v15588_v9  ;;  %15318 = vmatmul.mubr.msk.bf16.gmra.mxu1 %vm1732_vm0, %v15589_v10 }
 0x162   : >> { %15305 = vmatprep.mubr.msk.bf16.mxu0 %vm1732_vm0, %v15590_v11  ;;  %15321 = vmatprep.mubr.msk.bf16.mxu1 %vm1732_vm0, %v15591_v12 }
 0x169   : >> { %15306 = vmatmul.mubr.msk.bf16.gmra.mxu0 %vm1732_vm0, %v15592_v13  ;;  %15322 = vmatmul.mubr.msk.bf16.gmra.mxu1 %vm1732_vm0, %v15593_v14 }
 0x16a   : >> { %15309 = vmatprep.mubr.msk.bf16.mxu0 %vm1732_vm0, %v15594_v15  ;;  %15325 = vmatprep.mubr.msk.bf16.mxu1 %vm1732_vm0, %v15595_v16 }
 0x171   : >> { %15310 = vmatmul.mubr.msk.bf16.gmra.mxu0 %vm1732_vm0, %v15596_v17  ;;  %15326 = vmatmul.mubr.msk.bf16.gmra.mxu1 %vm1732_vm0, %v15597_v18 }
 0x219   : >> { %v15299_v25 = vpop.f32.mrf.mxu0  ;;  %v15315_v28 = vpop.f32.mrf.mxu1 }
 0x21a   : >> { %v1824_v26 = vadd.f32 %v15299_v25, %v18345_v24  ;;  %v1888_v29 = vadd.f32 %v15315_v28, %v18345_v24 }
 0x21b   : >> { %v1815_v32 = vpop.f32.mrf.mxu0  ;;  %v1879_v55 = vpop.f32.mrf.mxu1 }
 0x21c   : >> { %v1944_v30 = vmax.f32 %v1824_v26, 0.0  ;;  %v1960_v31 = vmax.f32 %v1888_v29, 0.0  ;;  %v1816_v40 = vadd.f32 %v18345_v24, %v1815_v32  ;;  %v1880_v2 = vadd.f32 %v18345_v24, %v1879_v55 }
 0x21d   : >> { %v15300_v11 = vpop.f32.mrf.mxu0  ;;  %v15316_v12 = vpop.f32.mrf.mxu1 }
 0x21e   : >> { %v2040_v33 = vcombine.high %v1944_v30, %v1944_v30  ;;  %v2047_v34 = vrot.slane %v1944_v30, %v18349_v27  ;;  %v2312_v35 = vcombine.high %v1960_v31, %v1960_v31  ;;  %v2319_v36 = vrot.slane %v1960_v31, %v18349_v27 }
 0x21f   : >> { %v1942_v63 = vmax.f32 %v1816_v40, 0.0  ;;  %v1958_v14 = vmax.f32 %v1880_v2, 0.0  ;;  %v1827_v20 = vadd.f32 %v15300_v11, %v18345_v24  ;;  %v18369_v21 = vadd.f32 %v15316_v12, %v18345_v24 }
 0x220   : >> { %v2054_v37 = vrot.slane %v2040_v33, %v18349_v27  ;;  %v2055_v38 = vcombine.high %v2047_v34, %v2047_v34  ;;  %v2735_v39 = vsel %vm2678_vm1, %v2047_v34, -inf  ;;  %v2326_v42 = vrot.slane %v2312_v35, %v18349_v27 }
 0x221   : >> { %v2736_v41 = vrot.slane %v2735_v39, 4  ;;  %v2327_v43 = vcombine.high %v2319_v36, %v2319_v36  ;;  %v3183_v44 = vsel %vm2678_vm1, %v2319_v36, -inf  ;;  %v2006_v10 = vcombine.high %v1942_v63, %v1942_v63 }
 0x222   : >> { %v2056_v45 = vcombine.high %v2054_v37, %v2054_v37  ;;  %v2742_v46 = vsel %vm2678_vm1, %v2055_v38, -inf  ;;  %v2749_v47 = vsel %vm2678_vm1, %v2054_v37, -inf  ;;  %v3184_v48 = vrot.slane %v3183_v44, 4 }
 0x223   : >> { %v2737_v49 = vmax.f32 %v2735_v39, %v2736_v41  ;;  %v2743_v50 = vrot.slane %v2742_v46, 4  ;;  %v2750_v51 = vrot.slane %v2749_v47, 4  ;;  %v3190_v54 = vsel %vm2678_vm1, %v2327_v43, -inf }
 0x224   : >> { %v2756_v52 = vsel %vm2678_vm1, %v2056_v45, -inf  ;;  %v3185_v53 = vmax.f32 %v3183_v44, %v3184_v48  ;;  %v2328_v58 = vcombine.high %v2326_v42, %v2326_v42  ;;  %v3197_v59 = vsel %vm2678_vm1, %v2326_v42, -inf }
 0x225   : >> { %v2738_v56 = vrot.slane %v2737_v49, 2  ;;  %v2744_v57 = vmax.f32 %v2742_v46, %v2743_v50  ;;  %v2751_v60 = vmax.f32 %v2749_v47, %v2750_v51  ;;  %v2757_v61 = vrot.slane %v2756_v52, 4 }
 0x226   : >> { %v3186_v62 = vrot.slane %v3185_v53, 2  ;;  %v3191_v1 = vrot.slane %v3190_v54, 4  ;;  %v3198_v4 = vrot.slane %v3197_v59, 4  ;;  %v3204_v6 = vsel %vm2678_vm1, %v2328_v58, -inf }
 0x227   : >> { %v2739_v3 = vmax.f32 %v2737_v49, %v2738_v56  ;;  %v2745_v5 = vrot.slane %v2744_v57, 2  ;;  %v2752_v7 = vrot.slane %v2751_v60, 2  ;;  %v2758_v8 = vmax.f32 %v2756_v52, %v2757_v61 }
 0x228   : >> { %v3187_v9 = vmax.f32 %v3185_v53, %v3186_v62  ;;  %v3192_v13 = vmax.f32 %v3190_v54, %v3191_v1  ;;  %v3199_v16 = vmax.f32 %v3197_v59, %v3198_v4  ;;  %v3205_v17 = vrot.slane %v3204_v6, 4 }
 0x229   : >> { %v2740_v15 = vrot.slane %v2739_v3, 1  ;;  %v2746_v18 = vmax.f32 %v2744_v57, %v2745_v5  ;;  %v2013_v19 = vrot.slane %v1942_v63, %v18349_v27  ;;  %v2753_v22 = vmax.f32 %v2751_v60, %v2752_v7 }
 0x22a   : >> { %v2759_v25 = vrot.slane %v2758_v8, 2  ;;  %v3188_v26 = vrot.slane %v3187_v9, 1  ;;  %v2020_v28 = vrot.slane %v2006_v10, %v18349_v27  ;;  %v3193_v29 = vrot.slane %v3192_v13, 2 }
 0x22b   : >> { %v2021_v30 = vcombine.high %v2013_v19, %v2013_v19  ;;  %v2679_v31 = vsel %vm2678_vm1, %v2013_v19, -inf  ;;  %v2278_v32 = vcombine.high %v1958_v14, %v1958_v14  ;;  %v18373_v33 = vmax.f32 %v2739_v3, %v2740_v15 }
 0x22c   : >> { %v3200_v34 = vrot.slane %v3199_v16, 2  ;;  %v3206_v35 = vmax.f32 %v3204_v6, %v3205_v17  ;;  %v2022_v36 = vcombine.high %v2020_v28, %v2020_v28  ;;  %v2680_v37 = vrot.slane %v2679_v31, 4 }
 0x22d   : >> { %v2686_v38 = vsel %vm2678_vm1, %v2021_v30, -inf  ;;  %v2693_v39 = vsel %vm2678_vm1, %v2020_v28, -inf  ;;  %v2285_v40 = vrot.slane %v1958_v14, %v18349_v27  ;;  %v2760_v41 = vmax.f32 %v2758_v8, %v2759_v25 }
 0x22e   : >> { %v2687_v42 = vrot.slane %v2686_v38, 4  ;;  %v2694_v43 = vrot.slane %v2693_v39, 4  ;;  %v2700_v44 = vsel %vm2678_vm1, %v2022_v36, -inf  ;;  %v2681_v45 = vmax.f32 %v2679_v31, %v2680_v37 }
 0x22f   : >> { %v2701_v46 = vrot.slane %v2700_v44, 4  ;;  %v2292_v47 = vrot.slane %v2278_v32, %v18349_v27  ;;  %v2293_v48 = vcombine.high %v2285_v40, %v2285_v40  ;;  %v3194_v49 = vmax.f32 %v3192_v13, %v3193_v29 }
 0x230   : >> { %v2688_v50 = vmax.f32 %v2686_v38, %v2687_v42  ;;  %v2695_v51 = vmax.f32 %v2693_v39, %v2694_v43  ;;  %v3127_v52 = vsel %vm2678_vm1, %v2285_v40, -inf  ;;  %v3207_v53 = vrot.slane %v3206_v35, 2 }
 0x231   : >> { %v2682_v54 = vrot.slane %v2681_v45, 2  ;;  %v2702_v55 = vmax.f32 %v2700_v44, %v2701_v46  ;;  %v2294_v56 = vcombine.high %v2292_v47, %v2292_v47  ;;  %v3128_v58 = vrot.slane %v3127_v52, 4 }
 0x232   : >> { %v2689_v57 = vrot.slane %v2688_v50, 2  ;;  %v3134_v59 = vsel %vm2678_vm1, %v2293_v48, -inf  ;;  %v3141_v60 = vsel %vm2678_vm1, %v2292_v47, -inf  ;;  %v2747_v61 = vrot.slane %v2746_v18, 1 }
 0x233   : >> { %v2754_v62 = vrot.slane %v2753_v22, 1  ;;  %v3201_v63 = vmax.f32 %v3199_v16, %v3200_v34  ;;  %v2696_v1 = vrot.slane %v2695_v51, 2  ;;  %v2761_v2 = vrot.slane %v2760_v41, 1 }
 0x234   : >> { %v3195_v3 = vrot.slane %v3194_v49, 1  ;;  %v3135_v4 = vrot.slane %v3134_v59, 4  ;;  %v3142_v5 = vrot.slane %v3141_v60, 4  ;;  %v18383_v6 = vmax.f32 %v3187_v9, %v3188_v26 }
 0x235   : >> { %v3208_v7 = vmax.f32 %v3206_v35, %v3207_v53  ;;  %v2683_v8 = vmax.f32 %v2681_v45, %v2682_v54  ;;  %v1945_v10 = vmax.f32 %v1827_v20, 0.0  ;;  %v2690_v11 = vmax.f32 %v2688_v50, %v2689_v57 }
 0x236   : >> { %v2703_v12 = vrot.slane %v2702_v55, 2  ;;  %v3129_v13 = vmax.f32 %v3127_v52, %v3128_v58  ;;  %v3148_v14 = vsel %vm2678_vm1, %v2294_v56, -inf  ;;  %v18386_v15 = vmax.f32 %v2746_v18, %v2747_v61 }
 0x237   : >> { %v18388_v17 = vmax.f32 %v2753_v22, %v2754_v62  ;;  %v3202_v16 = vrot.slane %v3201_v63, 1  ;;  %v2697_v19 = vmax.f32 %v2695_v51, %v2696_v1  ;;  %v18390_v25 = vmax.f32 %v2760_v41, %v2761_v2  ;;  %v1818_v51 = vpop.f32.mrf.mxu0 }
 0x238   : >> { %v18392_v28 = vmax.f32 %v3194_v49, %v3195_v3  ;;  %v3136_v9 = vmax.f32 %v3134_v59, %v3135_v4  ;;  %v3143_v26 = vmax.f32 %v3141_v60, %v3142_v5  ;;  %v3209_v29 = vrot.slane %v3208_v7, 1 }
 0x239   : >> { %v2684_v30 = vrot.slane %v2683_v8, 1  ;;  %v3149_v20 = vrot.slane %v3148_v14, 4  ;;  %v2057_v31 = vcombine.high %v1945_v10, %v1945_v10  ;;  %v2691_v32 = vrot.slane %v2690_v11, 1 }
 0x23a   : >> { %v2704_v34 = vmax.f32 %v2702_v55, %v2703_v12  ;;  %v3130_v35 = vrot.slane %v3129_v13, 2  ;;  %v2064_v18 = vrot.slane %v1945_v10, %v18349_v27  ;;  %v18395_v36 = vmax.f32 %v3201_v63, %v3202_v16 }
 0x23b   : >> { %v2698_v22 = vrot.slane %v2697_v19, 1  ;;  %v2071_v37 = vrot.slane %v2057_v31, %v18349_v27  ;;  %v1961_v38 = vmax.f32 %v18369_v21, 0.0  ;;  %v3137_v39 = vrot.slane %v3136_v9, 2 }
 0x23c   : >> { %v3144_v40 = vrot.slane %v3143_v26, 2  ;;  %v2072_v41 = vcombine.high %v2064_v18, %v2064_v18  ;;  %v2763_v42 = vsel %vm2678_vm1, %v2064_v18, -inf  ;;  %v18400_v43 = vmax.f32 %v3208_v7, %v3209_v29 }
 0x23d   : >> { %v18402_v44 = vmax.f32 %v2683_v8, %v2684_v30  ;;  %v3150_v45 = vmax.f32 %v3148_v14, %v3149_v20  ;;  %v2073_v46 = vcombine.high %v2071_v37, %v2071_v37  ;;  %v18404_v47 = vmax.f32 %v2690_v11, %v2691_v32 }
 0x23e   : >> { %v2705_v48 = vrot.slane %v2704_v34, 1  ;;  %v3131_v49 = vmax.f32 %v3129_v13, %v3130_v35  ;;  %v2777_v50 = vsel %vm2678_vm1, %v2071_v37, -inf  ;;  %v2764_v52 = vrot.slane %v2763_v42, 4 }
 0x23f   : >> { %v2770_v21 = vsel %vm2678_vm1, %v2072_v41, -inf  ;;  %v2784_v53 = vsel %vm2678_vm1, %v2073_v46, -inf  ;;  %v2329_v54 = vcombine.high %v1961_v38, %v1961_v38  ;;  %v18409_v55 = vmax.f32 %v2697_v19, %v2698_v22  ;;  %v1882_v46 = vpop.f32.mrf.mxu1 }
 0x240   : >> { %v3138_v56 = vmax.f32 %v3136_v9, %v3137_v39  ;;  %v3145_v57 = vmax.f32 %v3143_v26, %v3144_v40  ;;  %v2336_v58 = vrot.slane %v1961_v38, %v18349_v27  ;;  %v3151_v59 = vrot.slane %v3150_v45, 2 }
 0x241   : >> { %v2778_v60 = vrot.slane %v2777_v50, 4  ;;  %v2343_v61 = vrot.slane %v2329_v54, %v18349_v27  ;;  %v1819_v62 = vadd.f32 %v18345_v24, %v1818_v51  ;;  %v2771_v63 = vrot.slane %v2770_v21, 4 }
 0x242   : >> { %v2785_v1 = vrot.slane %v2784_v53, 4  ;;  %v2344_v2 = vcombine.high %v2336_v58, %v2336_v58  ;;  %v3211_v3 = vsel %vm2678_vm1, %v2336_v58, -inf  ;;  %v3132_v4 = vrot.slane %v3131_v49, 1 }
 0x243   : >> { %v2765_v5 = vmax.f32 %v2763_v42, %v2764_v52  ;;  %v2345_v7 = vcombine.high %v2343_v61, %v2343_v61  ;;  %v3212_v8 = vrot.slane %v3211_v3, 4  ;;  %v3139_v10 = vrot.slane %v3138_v56, 1 }
 0x244   : >> { %v3146_v11 = vrot.slane %v3145_v57, 1  ;;  %v3218_v12 = vsel %vm2678_vm1, %v2344_v2, -inf  ;;  %v3225_v13 = vsel %vm2678_vm1, %v2343_v61, -inf  ;;  %v3152_v14 = vmax.f32 %v3150_v45, %v3151_v59 }
 0x245   : >> { %v2779_v16 = vmax.f32 %v2777_v50, %v2778_v60  ;;  %v3219_v19 = vrot.slane %v3218_v12, 4  ;;  %v1943_v9 = vmax.f32 %v1819_v62, 0.0  ;;  %v2772_v26 = vmax.f32 %v2770_v21, %v2771_v63 }
 0x246   : >> { %v2786_v29 = vmax.f32 %v2784_v53, %v2785_v1  ;;  %v3226_v30 = vrot.slane %v3225_v13, 4  ;;  %v3232_v20 = vsel %vm2678_vm1, %v2345_v7, -inf  ;;  %v18418_v31 = vmax.f32 %v2704_v34, %v2705_v48 }
 0x247   : >> { %v2766_v32 = vrot.slane %v2765_v5, 2  ;;  %v3213_v35 = vmax.f32 %v3211_v3, %v3212_v8  ;;  %v3220_v18 = vmax.f32 %v3218_v12, %v3219_v19  ;;  %v18420_v22 = vmax.f32 %v3131_v49, %v3132_v4 }
 0x248   : >> { %v18422_v37 = vmax.f32 %v3138_v56, %v3139_v10  ;;  %v3227_v38 = vmax.f32 %v3225_v13, %v3226_v30  ;;  %v3233_v39 = vrot.slane %v3232_v20, 4  ;;  %v18424_v40 = vmax.f32 %v3145_v57, %v3146_v11  ;;  %v15303_v10 = vpop.f32.mrf.mxu0 }
 0x249   : >> { %v3153_v41 = vrot.slane %v3152_v14, 1  ;;  %v2780_v42 = vrot.slane %v2779_v16, 2  ;;  %v2023_v45 = vcombine.high %v1943_v9, %v1943_v9  ;;  %v2773_v50 = vrot.slane %v2772_v26, 2 }
 0x24a   : >> { %v2787_v51 = vrot.slane %v2786_v29, 2  ;;  %v3234_v52 = vmax.f32 %v3232_v20, %v3233_v39  ;;  %v2030_v34 = vrot.slane %v1943_v9, %v18349_v27  ;;  %v2767_v48 = vmax.f32 %v2765_v5, %v2766_v32 }
 0x24b   : >> { %v3214_v21 = vrot.slane %v3213_v35, 2  ;;  %v3221_v53 = vrot.slane %v3220_v18, 2  ;;  %v2037_v49 = vrot.slane %v2023_v45, %v18349_v27  ;;  %v3228_v54 = vrot.slane %v3227_v38, 2 }
 0x24c   : >> { %v2038_v56 = vcombine.high %v2030_v34, %v2030_v34  ;;  %v2707_v58 = vsel %vm2678_vm1, %v2030_v34, -inf  ;;  %v1883_v57 = vadd.f32 %v18345_v24, %v1882_v46  ;;  %v2781_v59 = vmax.f32 %v2779_v16, %v2780_v42 }
 0x24d   : >> { %v3235_v60 = vrot.slane %v3234_v52, 2  ;;  %v2039_v61 = vcombine.high %v2037_v49, %v2037_v49  ;;  %v2708_v62 = vrot.slane %v2707_v58, 4  ;;  %v2774_v63 = vmax.f32 %v2772_v26, %v2773_v50 }
 0x24e   : >> { %v2788_v1 = vmax.f32 %v2786_v29, %v2787_v51  ;;  %v2714_v2 = vsel %vm2678_vm1, %v2038_v56, -inf  ;;  %v2721_v3 = vsel %vm2678_vm1, %v2037_v49, -inf  ;;  %v3215_v4 = vmax.f32 %v3213_v35, %v3214_v21 }
 0x24f   : >> { %v2709_v5 = vmax.f32 %v2707_v58, %v2708_v62  ;;  %v2715_v7 = vrot.slane %v2714_v2, 4  ;;  %v2722_v8 = vrot.slane %v2721_v3, 4  ;;  %v3222_v11 = vmax.f32 %v3220_v18, %v3221_v53 }
 0x250   : >> { %v3229_v12 = vmax.f32 %v3227_v38, %v3228_v54  ;;  %v2728_v13 = vsel %vm2678_vm1, %v2039_v61, -inf  ;;  %v1959_v19 = vmax.f32 %v1883_v57, 0.0  ;;  %v3236_v16 = vmax.f32 %v3234_v52, %v3235_v60 }
 0x251   : >> { %v2710_v9 = vrot.slane %v2709_v5, 2  ;;  %v2716_v30 = vmax.f32 %v2714_v2, %v2715_v7  ;;  %v2723_v20 = vmax.f32 %v2721_v3, %v2722_v8  ;;  %v2729_v26 = vrot.slane %v2728_v13, 4 }
 0x252   : >> { %v2295_v29 = vcombine.high %v1959_v19, %v1959_v19  ;;  %v2302_v32 = vrot.slane %v1959_v19, %v18349_v27  ;;  %v1840_v39 = vadd.f32 %v15303_v10, %v18345_v24  ;;  %v18435_v35 = vmax.f32 %v3152_v14, %v3153_v41 }
 0x253   : >> { %v2768_v42 = vrot.slane %v2767_v48, 1  ;;  %v2775_v45 = vrot.slane %v2774_v63, 1  ;;  %v2782_v46 = vrot.slane %v2781_v59, 1  ;;  %v2789_v18 = vrot.slane %v2788_v1, 1 }
 0x254   : >> { %v2711_v38 = vmax.f32 %v2709_v5, %v2710_v9  ;;  %v2717_v50 = vrot.slane %v2716_v30, 2  ;;  %v2724_v51 = vrot.slane %v2723_v20, 2  ;;  %v3216_v34 = vrot.slane %v3215_v4, 1  ;;  %v15319_v5 = vpop.f32.mrf.mxu1 }
 0x255   : >> { %v3223_v52 = vrot.slane %v3222_v11, 1  ;;  %v3230_v21 = vrot.slane %v3229_v12, 1  ;;  %v2309_v53 = vrot.slane %v2295_v29, %v18349_v27  ;;  %v3237_v49 = vrot.slane %v3236_v16, 1 }
 0x256   : >> { %v2730_v54 = vmax.f32 %v2728_v13, %v2729_v26  ;;  %v3155_v56 = vsel %vm2678_vm1, %v2302_v32, -inf  ;;  %v1948_v58 = vmax.f32 %v1840_v39, 0.0  ;;  %v18439_v57 = vmax.f32 %v2767_v48, %v2768_v42 }
 0x257   : >> { %v18441_v14 = vmax.f32 %v2774_v63, %v2775_v45  ;;  %v18443_v41 = vmax.f32 %v2781_v59, %v2782_v46  ;;  %v2310_v60 = vcombine.high %v2302_v32, %v2302_v32  ;;  %v18445_v61 = vmax.f32 %v2788_v1, %v2789_v18 }
 0x258   : >> { %v2712_v62 = vrot.slane %v2711_v38, 1  ;;  %v2718_v2 = vmax.f32 %v2716_v30, %v2717_v50  ;;  %v2725_v3 = vmax.f32 %v2723_v20, %v2724_v51  ;;  %v18447_v7 = vmax.f32 %v3215_v4, %v3216_v34 }
 0x259   : >> { %v18449_v8 = vmax.f32 %v3222_v11, %v3223_v52  ;;  %v2311_v10 = vcombine.high %v2309_v53, %v2309_v53  ;;  %v3156_v13 = vrot.slane %v3155_v56, 4  ;;  %v18451_v19 = vmax.f32 %v3229_v12, %v3230_v21 }
 0x25a   : >> { %v18453_v48 = vmax.f32 %v3236_v16, %v3237_v49  ;;  %v2731_v63 = vrot.slane %v2730_v54, 2  ;;  %v2108_v59 = vcombine.high %v1948_v58, %v1948_v58  ;;  %v3162_v9 = vsel %vm2678_vm1, %v2310_v60, -inf }
 0x25b   : >> { %20752 = vst [vmem:[#allocation16_spill] sm:$0xff] %v18449_v8  ;;  %20753 = vst [vmem:[#allocation17_spill] sm:$0xff] %v18451_v19  ;;  %v3169_v1 = vsel %vm2678_vm1, %v2309_v53, -inf  ;;  %v2115_v30 = vrot.slane %v1948_v58, %v18349_v27  ;;  %v1904_v20 = vadd.f32 %v15319_v5, %v18345_v24  ;;  %v18459_v4 = vmax.f32 %v2711_v38, %v2712_v62 }
 0x25c   : >> { %20754 = vst [vmem:[#allocation18_spill] sm:$0xff] %v18453_v48  ;;  %v2719_v11 = vrot.slane %v2718_v2, 1  ;;  %v2726_v26 = vrot.slane %v2725_v3, 1  ;;  %v2122_v29 = vrot.slane %v2108_v59, %v18349_v27  ;;  %v3157_v12 = vmax.f32 %v3155_v56, %v3156_v13 }
 0x25d   : >> { %20755 = vst [vmem:[#allocation19_spill] sm:$0xff] %v18459_v4  ;;  %v3176_v16 = vsel %vm2678_vm1, %v2311_v10, -inf  ;;  %v2123_v32 = vcombine.high %v2115_v30, %v2115_v30  ;;  %v2847_v39 = vsel %vm2678_vm1, %v2115_v30, -inf  ;;  %v18464_v42 = vmax.f32 %v2730_v54, %v2731_v63 }
 0x25e   : >> { %v3163_v45 = vrot.slane %v3162_v9, 4  ;;  %v3170_v46 = vrot.slane %v3169_v1, 4  ;;  %v2124_v18 = vcombine.high %v2122_v29, %v2122_v29  ;;  %v2848_v50 = vrot.slane %v2847_v39, 4 }
 0x25f   : >> { %v2854_v51 = vsel %vm2678_vm1, %v2123_v32, -inf  ;;  %v2861_v38 = vsel %vm2678_vm1, %v2122_v29, -inf  ;;  %v1964_v34 = vmax.f32 %v1904_v20, 0.0  ;;  %v18468_v52 = vmax.f32 %v2718_v2, %v2719_v11 }
 0x260   : >> { %v18470_v21 = vmax.f32 %v2725_v3, %v2726_v26  ;;  %v3177_v53 = vrot.slane %v3176_v16, 4  ;;  %v2855_v49 = vrot.slane %v2854_v51, 4  ;;  %v3158_v56 = vrot.slane %v3157_v12, 2 }
 0x261   : >> { %20756 = vst [vmem:[#allocation20_spill] sm:$0xff] %v18468_v52  ;;  %v2849_v58 = vmax.f32 %v2847_v39, %v2848_v50  ;;  %v2862_v60 = vrot.slane %v2861_v38, 4  ;;  %v2868_v54 = vsel %vm2678_vm1, %v2124_v18, -inf  ;;  %v3164_v5 = vmax.f32 %v3162_v9, %v3163_v45 }
 0x262   : >> { %20757 = vst [vmem:[#allocation21_spill] sm:$0xff] %v18470_v21  ;;  %v2856_v10 = vmax.f32 %v2854_v51, %v2855_v49  ;;  %v2869_v13 = vrot.slane %v2868_v54, 4  ;;  %v3171_v63 = vmax.f32 %v3169_v1, %v3170_v46  ;;  %v2380_v20 = vcombine.high %v1964_v34, %v1964_v34 }
 0x263   : >> { %v2850_v59 = vrot.slane %v2849_v58, 2  ;;  %v2863_v30 = vmax.f32 %v2861_v38, %v2862_v60  ;;  %v3178_v2 = vmax.f32 %v3176_v16, %v3177_v53  ;;  %v2387_v26 = vrot.slane %v1964_v34, %v18349_v27  ;;  %v1831_v60 = vpop.f32.mrf.mxu0 }
 0x264   : >> { %v2857_v11 = vrot.slane %v2856_v10, 2  ;;  %v2870_v3 = vmax.f32 %v2868_v54, %v2869_v13  ;;  %v3159_v29 = vmax.f32 %v3157_v12, %v3158_v56  ;;  %v2394_v50 = vrot.slane %v2380_v20, %v18349_v27 }
 0x265   : >> { %v2851_v32 = vmax.f32 %v2849_v58, %v2850_v59  ;;  %v2864_v39 = vrot.slane %v2863_v30, 2  ;;  %v2395_v62 = vcombine.high %v2387_v26, %v2387_v26  ;;  %v3295_v9 = vsel %vm2678_vm1, %v2387_v26, -inf }
 0x266   : >> { %v2858_v18 = vmax.f32 %v2856_v10, %v2857_v11  ;;  %v2871_v0 = vrot.slane %v2870_v3, 2  ;;  %v3165_v45 = vrot.slane %v3164_v5, 2  ;;  %v2396_v46 = vcombine.high %v2394_v50, %v2394_v50 }
 0x267   : >> { %v2865_v1 = vmax.f32 %v2863_v30, %v2864_v39  ;;  %v3296_v51 = vrot.slane %v3295_v9, 4  ;;  %v3172_v38 = vrot.slane %v3171_v63, 2  ;;  %v3179_v16 = vrot.slane %v3178_v2, 2 }
 0x268   : >> { %v3302_v53 = vsel %vm2678_vm1, %v2395_v62, -inf  ;;  %v3309_v34 = vsel %vm2678_vm1, %v2394_v50, -inf  ;;  %v2852_v12 = vrot.slane %v2851_v32, 1  ;;  %v2872_v49 = vmax.f32 %v2870_v3, %v2871_v0 }
 0x269   : >> { %v3297_v56 = vmax.f32 %v3295_v9, %v3296_v51  ;;  %v3303_v58 = vrot.slane %v3302_v53, 4  ;;  %v2859_v54 = vrot.slane %v2858_v18, 1  ;;  %v2866_v10 = vrot.slane %v2865_v1, 1  ;;  %v1895_v9 = vpop.f32.mrf.mxu1 }
 0x26a   : >> { %v3310_v13 = vrot.slane %v3309_v34, 4  ;;  %v3316_v59 = vsel %vm2678_vm1, %v2396_v46, -inf  ;;  %v3160_v20 = vrot.slane %v3159_v29, 1  ;;  %v3166_v30 = vmax.f32 %v3164_v5, %v3165_v45 }
 0x26b   : >> { %v3298_v11 = vrot.slane %v3297_v56, 2  ;;  %v3304_v26 = vmax.f32 %v3302_v53, %v3303_v58  ;;  %v3173_v39 = vmax.f32 %v3171_v63, %v3172_v38  ;;  %v3317_v21 = vrot.slane %v3316_v59, 4 }
 0x26c   : >> { %v3311_v23 = vmax.f32 %v3309_v34, %v3310_v13  ;;  %v1832_v62 = vadd.f32 %v18345_v24, %v1831_v60  ;;  %v2853_v50 = vmax.f32 %v2851_v32, %v2852_v12  ;;  %v2873_v52 = vrot.slane %v2872_v49, 1 }
 0x26d   : >> { %v3299_v0 = vmax.f32 %v3297_v56, %v3298_v11  ;;  %v3305_v3 = vrot.slane %v3304_v26, 2  ;;  %v2860_v51 = vmax.f32 %v2858_v18, %v2859_v54  ;;  %v2867_v4 = vmax.f32 %v2865_v1, %v2866_v10 }
 0x26e   : >> { %v3312_v48 = vrot.slane %v3311_v23, 2  ;;  %v3318_v19 = vmax.f32 %v3316_v59, %v3317_v21  ;;  %v3167_v8 = vrot.slane %v3166_v30, 1  ;;  %v18481_v46 = vmax.f32 %v3178_v2, %v3179_v16 }
 0x26f   : >> { %v3300_v5 = vrot.slane %v3299_v0, 1  ;;  %v3306_v45 = vmax.f32 %v3304_v26, %v3305_v3  ;;  %v3174_v53 = vrot.slane %v3173_v39, 1  ;;  %v1896_v34 = vadd.f32 %v18345_v24, %v1895_v9 }
 0x270   : >> { %v3313_v63 = vmax.f32 %v3311_v23, %v3312_v48  ;;  %v3319_v38 = vrot.slane %v3318_v19, 2  ;;  %v2874_v58 = vmax.f32 %v2872_v49, %v2873_v52  ;;  %v3583_v32 = vmax.f32 %v18373_v33, %v2853_v50 }
 0x271   : >> { %v3307_v12 = vrot.slane %v3306_v45, 1  ;;  %v1946_v56 = vmax.f32 %v1832_v62, 0.0  ;;  %v20758_v18 = vrot.slane %v18464_v42, 1  ;;  %v18490_v21 = vmax.f32 %v3159_v29, %v3160_v20 }
 0x272   : >> { %v3584_v2 = vmax.f32 %v18386_v15, %v2860_v51  ;;  %v18494_v16 = vmax.f32 %v18388_v17, %v2867_v4  ;;  %v18496_v23 = vmax.f32 %v3166_v30, %v3167_v8  ;;  %v3181_v48 = vrot.slane %v18481_v46, 1 }
 0x273   : >> { %v18488_v1 = vmax.f32 %v18464_v42, %v20758_v18  ;;  %v3301_v52 = vmax.f32 %v3299_v0, %v3300_v5  ;;  %v3314_v33 = vrot.slane %v3313_v63, 1  ;;  %v3308_v49 = vmax.f32 %v3306_v45, %v3307_v12 }
 0x274   : >> { %v3320_v60 = vmax.f32 %v3318_v19, %v3319_v38  ;;  %v2074_v54 = vcombine.high %v1946_v56, %v1946_v56  ;;  %v2081_v10 = vrot.slane %v1946_v56, %v18349_v27  ;;  %v18500_v42 = vmax.f32 %v3173_v39, %v3174_v53 }
 0x275   : >> { %v18503_v29 = vmax.f32 %v18390_v25, %v2874_v58  ;;  %v3647_v15 = vpack.c.bf16 %v3583_v32, %v3583_v32  ;;  %v1962_v13 = vmax.f32 %v1896_v34, 0.0  ;;  %v3648_v17 = vpack.c.bf16 %v3584_v2, %v3584_v2 }
 0x276   : >> { %v3649_v8 = vpack.c.bf16 %v18494_v16, %v18494_v16  ;;  %v2088_v4 = vrot.slane %v2074_v54, %v18349_v27  ;;  %v2089_v59 = vcombine.high %v2081_v10, %v2081_v10  ;;  %v3315_v20 = vmax.f32 %v3313_v63, %v3314_v33 }
 0x277   : >> { %v18509_v19 = vmax.f32 %v18383_v6, %v3301_v52  ;;  %v2791_v30 = vsel %vm2678_vm1, %v2081_v10, -inf  ;;  %v2346_v11 = vcombine.high %v1962_v13, %v1962_v13  ;;  %v3321_v26 = vrot.slane %v3320_v60, 1 }
 0x278   : >> { %v18513_v25 = vmax.f32 %v18392_v28, %v3308_v49  ;;  %v2090_v39 = vcombine.high %v2088_v4, %v2088_v4  ;;  %v2792_v62 = vrot.slane %v2791_v30, 4  ;;  %v18515_v50 = vunpack.c.l.b16 %v3647_v15 }
 0x279   : >> { %v2798_v0 = vsel %vm2678_vm1, %v2089_v59, -inf  ;;  %v2805_v3 = vsel %vm2678_vm1, %v2088_v4, -inf  ;;  %v2353_v9 = vrot.slane %v1962_v13, %v18349_v27  ;;  %v3650_v6 = vpack.c.bf16 %v18503_v29, %v18503_v29 }
 0x27a   : >> { %v18522_v51 = vunpack.c.l.b16 %v3648_v17  ;;  %v2793_v5 = vmax.f32 %v2791_v30, %v2792_v62  ;;  %v2799_v45 = vrot.slane %v2798_v0, 4  ;;  %v3679_v28 = vpack.c.bf16 %v18509_v19, %v18509_v19 }
 0x27b   : >> { %v2806_v53 = vrot.slane %v2805_v3, 4  ;;  %v2812_v63 = vsel %vm2678_vm1, %v2090_v39, -inf  ;;  %v2360_v38 = vrot.slane %v2346_v11, %v18349_v27  ;;  %v3322_v34 = vmax.f32 %v3320_v60, %v3321_v26 }
 0x27c   : >> { %v18529_v58 = vmax.f32 %v18395_v36, %v3315_v20  ;;  %v3680_v32 = vpack.c.bf16 %v18513_v25, %v18513_v25  ;;  %v2794_v12 = vrot.slane %v2793_v5, 2  ;;  %v2800_v56 = vmax.f32 %v2798_v0, %v2799_v45  ;;  %v15304_v25 = vpop.f32.mrf.mxu0 }
 0x27d   : >> { %v2807_v18 = vmax.f32 %v2805_v3, %v2806_v53  ;;  %v2813_v2 = vrot.slane %v2812_v63, 4  ;;  %v2361_v52 = vcombine.high %v2353_v9, %v2353_v9  ;;  %v2362_v49 = vcombine.high %v2360_v38, %v2360_v38 }
 0x27e   : >> { %v2795_v33 = vmax.f32 %v2793_v5, %v2794_v12  ;;  %v3239_v54 = vsel %vm2678_vm1, %v2353_v9, -inf  ;;  %v3253_v10 = vsel %vm2678_vm1, %v2360_v38, -inf  ;;  %v2801_v15 = vrot.slane %v2800_v56, 2 }
 0x27f   : >> { %v2808_v60 = vrot.slane %v2807_v18, 2  ;;  %v2814_v13 = vmax.f32 %v2812_v63, %v2813_v2  ;;  %v3240_v36 = vrot.slane %v3239_v54, 4  ;;  %v3246_v4 = vsel %vm2678_vm1, %v2361_v52, -inf }
 0x280   : >> { %v2796_v17 = vrot.slane %v2795_v33, 1  ;;  %v3254_v59 = vrot.slane %v3253_v10, 4  ;;  %v3260_v20 = vsel %vm2678_vm1, %v2362_v49, -inf  ;;  %v2802_v19 = vmax.f32 %v2800_v56, %v2801_v15 }
 0x281   : >> { %v2809_v30 = vmax.f32 %v2807_v18, %v2808_v60  ;;  %v2815_v11 = vrot.slane %v2814_v13, 2  ;;  %v3241_v26 = vmax.f32 %v3239_v54, %v3240_v36  ;;  %v3247_v62 = vrot.slane %v3246_v4, 4 }
 0x282   : >> { %v2797_v39 = vmax.f32 %v2795_v33, %v2796_v17  ;;  %v3255_v0 = vmax.f32 %v3253_v10, %v3254_v59  ;;  %v3261_v3 = vrot.slane %v3260_v20, 4  ;;  %v2803_v9 = vrot.slane %v2802_v19, 1 }
 0x283   : >> { %v2810_v5 = vrot.slane %v2809_v30, 1  ;;  %v2816_v45 = vmax.f32 %v2814_v13, %v2815_v11  ;;  %v3242_v53 = vrot.slane %v3241_v26, 2  ;;  %v3248_v63 = vmax.f32 %v3246_v4, %v3247_v62 }
 0x284   : >> { %v3256_v38 = vrot.slane %v3255_v0, 2  ;;  %v3262_v12 = vmax.f32 %v3260_v20, %v3261_v3  ;;  %v1843_v2 = vadd.f32 %v15304_v25, %v18345_v24  ;;  %v2804_v52 = vmax.f32 %v2802_v19, %v2803_v9 }
 0x285   : >> { %v2811_v56 = vmax.f32 %v2809_v30, %v2810_v5  ;;  %v2817_v18 = vrot.slane %v2816_v45, 1  ;;  %v3243_v49 = vmax.f32 %v3241_v26, %v3242_v53  ;;  %v3618_v54 = vmax.f32 %v18400_v43, %v3322_v34 }
 0x286   : >> { %v3249_v15 = vrot.slane %v3248_v63, 2  ;;  %v3257_v33 = vmax.f32 %v3255_v0, %v3256_v38  ;;  %v3263_v60 = vrot.slane %v3262_v12, 2  ;;  %v3681_v10 = vpack.c.bf16 %v18529_v58, %v18529_v58 }
 0x287   : >> { %v18541_v36 = vunpack.c.l.b16 %v3680_v32  ;;  %v3575_v13 = vmax.f32 %v18402_v44, %v2797_v39  ;;  %v3576_v17 = vmax.f32 %v18404_v47, %v2804_v52  ;;  %v18548_v24 = vunpack.c.l.b16 %v3649_v8 }
 0x288   : >> { %v2818_v4 = vmax.f32 %v2816_v45, %v2817_v18  ;;  %v3577_v43 = vmax.f32 %v18409_v55, %v2811_v56  ;;  %v3250_v34 = vmax.f32 %v3248_v63, %v3249_v15  ;;  %v3975_v59 = vsel %vm3961_vm2, %v18522_v51, %v18515_v50 }
 0x289   : >> { %v18554_v58 = vunpack.c.l.b16 %v3679_v28  ;;  %v3244_v32 = vrot.slane %v3243_v49, 1  ;;  %v3264_v20 = vmax.f32 %v3262_v12, %v3263_v60  ;;  %v3682_v44 = vpack.c.bf16 %v3618_v54, %v3618_v54 }
 0x28a   : >> { %v3640_v19 = vpack.c.bf16 %v3576_v17, %v3576_v17  ;;  %v3258_v47 = vrot.slane %v3257_v33, 1  ;;  %v1949_v30 = vmax.f32 %v1843_v2, 0.0  ;;  %v18559_v16 = vmax.f32 %v18481_v46, %v3181_v48 }
 0x28b   : >> { %v18561_v8 = vunpack.c.l.b16 %v3681_v10  ;;  %v4003_v55 = vsel %vm3961_vm2, %v18541_v36, %v18554_v58  ;;  %v3639_v11 = vpack.c.bf16 %v3575_v13, %v3575_v13  ;;  %v3578_v28 = vmax.f32 %v18418_v31, %v2818_v4 }
 0x28c   : >> { %v3641_v26 = vpack.c.bf16 %v3577_v43, %v3577_v43  ;;  %v3251_v25 = vrot.slane %v3250_v34, 1  ;;  %v2125_v39 = vcombine.high %v1949_v30, %v1949_v30  ;;  %v18570_v62 = vunpack.c.l.b16 %v3650_v6 }
 0x28d   : >> { %v18574_v46 = vsel %vm3963_vm3, %v18548_v24, %v3975_v59  ;;  %v3245_v48 = vmax.f32 %v3243_v49, %v3244_v32  ;;  %v3265_v0 = vrot.slane %v3264_v20, 1  ;;  %v18579_v3 = vsel %vm3961_vm2, %v18548_v24, %v18522_v51 }
 0x28e   : >> { %v18581_v31 = vunpack.c.l.b16 %v3682_v44  ;;  %v3770_v9 = vunpack.c.l.b16 %v3640_v19  ;;  %v3259_v5 = vmax.f32 %v3257_v33, %v3258_v47  ;;  %v18585_v29 = vsel %vm3963_vm3, %v18561_v8, %v4003_v55  ;;  %v15320_v19 = vpop.f32.mrf.mxu1 }
 0x28f   : >> { %v18590_v6 = vsel %vm3961_vm2, %v18561_v8, %v18541_v36  ;;  %v2132_v45 = vrot.slane %v1949_v30, %v18349_v27  ;;  %v2139_v53 = vrot.slane %v2125_v39, %v18349_v27  ;;  %v3642_v63 = vpack.c.bf16 %v3578_v28, %v3578_v28  ;;  %v1834_v28 = vpop.f32.mrf.mxu0 }
 0x290   : >> { %v3769_v38 = vunpack.c.l.b16 %v3639_v11  ;;  %v3771_v12 = vunpack.c.l.b16 %v3641_v26  ;;  %v3252_v2 = vmax.f32 %v3250_v34, %v3251_v25  ;;  %v3266_v52 = vmax.f32 %v3264_v20, %v3265_v0 }
 0x291   : >> { %v3607_v56 = vmax.f32 %v18420_v22, %v3245_v48  ;;  %v2140_v18 = vcombine.high %v2132_v45, %v2132_v45  ;;  %v2141_v49 = vcombine.high %v2139_v53, %v2139_v53  ;;  %v3609_v15 = vmax.f32 %v18424_v40, %v3259_v5 }
 0x292   : >> { %v3962_v54 = vsel %vm3961_vm2, %v3770_v9, %v3769_v38  ;;  %v2875_v33 = vsel %vm2678_vm1, %v2132_v45, -inf  ;;  %v2889_v60 = vsel %vm2678_vm1, %v2139_v53, -inf  ;;  %v18601_v43 = vunpack.c.l.b16 %v3642_v63 }
 0x293   : >> { %v2876_v10 = vrot.slane %v2875_v33, 4  ;;  %v2882_v13 = vsel %vm2678_vm1, %v2140_v18, -inf  ;;  %v2890_v17 = vrot.slane %v2889_v60, 4  ;;  %v2896_v4 = vsel %vm2678_vm1, %v2141_v49, -inf }
 0x294   : >> { %v4052_v22 = vsel %vm3963_vm3, %v3770_v9, %v3769_v38  ;;  %v18605_v34 = vmax.f32 %v18422_v37, %v3252_v2  ;;  %v2883_v59 = vrot.slane %v2882_v13, 4  ;;  %v18608_v40 = vsel %vm3961_vm2, %v3771_v12, %v3770_v9  ;;  %v18624_v9 = vld [vmem:[%s20717_s2] ss:$0 sm:$0xff] }
 0x295   : >> { %v18611_v32 = vmax.f32 %v18435_v35, %v3266_v52  ;;  %v2877_v20 = vmax.f32 %v2875_v33, %v2876_v10  ;;  %v2891_v44 = vmax.f32 %v2889_v60, %v2890_v17  ;;  %v18614_v47 = vsel %vm3963_vm3, %v3771_v12, %v3962_v54 }
 0x296   : >> { %v3671_v30 = vpack.c.bf16 %v3607_v56, %v3607_v56  ;;  %v2884_v55 = vmax.f32 %v2882_v13, %v2883_v59  ;;  %v2897_v11 = vrot.slane %v2896_v4, 4  ;;  %v18617_v37 = vsel %vm3965_vm4, %v3771_v12, %v4052_v22 }
 0x297   : >> { %v3673_v26 = vpack.c.bf16 %v3609_v15, %v3609_v15  ;;  %v2878_v25 = vrot.slane %v2877_v20, 2  ;;  %v2892_v39 = vrot.slane %v2891_v44, 2  ;;  %v3672_v35 = vpack.c.bf16 %v18605_v34, %v18605_v34 }
 0x298   : >> { %v2885_v48 = vrot.slane %v2884_v55, 2  ;;  %v2898_v0 = vmax.f32 %v2896_v4, %v2897_v11  ;;  %v1907_v5 = vadd.f32 %v18624_v9, %v15320_v19  ;;  %v3674_v45 = vpack.c.bf16 %v18611_v32, %v18611_v32 }
 0x299   : >> { %v2879_v53 = vmax.f32 %v2877_v20, %v2878_v25  ;;  %v2893_v63 = vmax.f32 %v2891_v44, %v2892_v39  ;;  %v1835_v38 = vadd.f32 %v18624_v9, %v1834_v28  ;;  %v18630_v12 = vunpack.c.l.b16 %v3671_v30 }
 0x29a   : >> { %v2886_v2 = vmax.f32 %v2884_v55, %v2885_v48  ;;  %v2899_v52 = vrot.slane %v2898_v0, 2  ;;  %v1965_v56 = vmax.f32 %v1907_v5, 0.0  ;;  %v18632_v18 = vunpack.c.l.b16 %v3673_v26 }
 0x29b   : >> { %v2880_v49 = vrot.slane %v2879_v53, 1  ;;  %v2894_v54 = vrot.slane %v2893_v63, 1  ;;  %v1947_v15 = vmax.f32 %v1835_v38, 0.0  ;;  %v3977_v22 = vsel %vm3965_vm4, %v18570_v62, %v18574_v46 }
 0x29c   : >> { %v2887_v33 = vrot.slane %v2886_v2, 1  ;;  %v2900_v60 = vmax.f32 %v2898_v0, %v2899_v52  ;;  %v2397_v10 = vcombine.high %v1965_v56, %v1965_v56  ;;  %v2404_v13 = vrot.slane %v1965_v56, %v18349_v27 }
 0x29d   : >> { %v2881_v17 = vmax.f32 %v2879_v53, %v2880_v49  ;;  %v2895_v4 = vmax.f32 %v2893_v63, %v2894_v54  ;;  %v2091_v28 = vcombine.high %v1947_v15, %v1947_v15 }
 0x29e   : >> { %v2888_v59 = vmax.f32 %v2886_v2, %v2887_v33  ;;  %v2901_v20 = vrot.slane %v2900_v60, 1  ;;  %v2411_v44 = vrot.slane %v2397_v10, %v18349_v27  ;;  %v2412_v19 = vcombine.high %v2404_v13, %v2404_v13 }
 0x29f   : >> { %v3587_v30 = vmax.f32 %v18439_v57, %v2881_v17  ;;  %v3589_v55 = vmax.f32 %v18443_v41, %v2895_v4  ;;  %v3323_v11 = vsel %vm2678_vm1, %v2404_v13, -inf  ;;  %v2098_v17 = vrot.slane %v1947_v15, %v18349_v27 }
 0x2a0   : >> { %v2902_v26 = vmax.f32 %v2900_v60, %v2901_v20  ;;  %v3588_v25 = vmax.f32 %v18441_v14, %v2888_v59  ;;  %v2413_v39 = vcombine.high %v2411_v44, %v2411_v44  ;;  %v3324_v48 = vrot.slane %v3323_v11, 4 }
 0x2a1   : >> { %v3651_v0 = vpack.c.bf16 %v3587_v30, %v3587_v30  ;;  %v3653_v5 = vpack.c.bf16 %v3589_v55, %v3589_v55  ;;  %v3330_v46 = vsel %vm2678_vm1, %v2412_v19, -inf  ;;  %v3337_v53 = vsel %vm2678_vm1, %v2411_v44, -inf }
 0x2a2   : >> { %v3590_v63 = vmax.f32 %v18445_v61, %v2902_v26  ;;  %v3652_v57 = vpack.c.bf16 %v3588_v25, %v3588_v25  ;;  %v3325_v38 = vmax.f32 %v3323_v11, %v3324_v48  ;;  %v3331_v41 = vrot.slane %v3330_v46, 4 }
 0x2a3   : >> { %v18646_v2 = vunpack.c.l.b16 %v3651_v0  ;;  %v18648_v52 = vunpack.c.l.b16 %v3653_v5  ;;  %v3338_v56 = vrot.slane %v3337_v53, 4  ;;  %v3344_v14 = vsel %vm2678_vm1, %v2413_v39, -inf }
 0x2a4   : >> { %v3654_v49 = vpack.c.bf16 %v3590_v63, %v3590_v63  ;;  %v18651_v54 = vunpack.c.l.b16 %v3652_v57  ;;  %v3326_v33 = vrot.slane %v3325_v38, 2  ;;  %v3332_v60 = vmax.f32 %v3330_v46, %v3331_v41 }
 0x2a5   : >> { %v3978_v10 = vsel %vm3967_vm5, %v18646_v2, %v3977_v22  ;;  %v3339_v61 = vmax.f32 %v3337_v53, %v3338_v56  ;;  %v3345_v13 = vrot.slane %v3344_v14, 4  ;;  %v2105_v44 = vrot.slane %v2091_v28, %v18349_v27 }
 0x2a6   : >> { %v18657_v4 = vunpack.c.l.b16 %v3654_v49  ;;  %v3979_v59 = vsel %vm3969_vm6, %v18651_v54, %v3978_v10  ;;  %v3327_v20 = vmax.f32 %v3325_v38, %v3326_v33  ;;  %v18665_v19 = vunpack.c.l.b16 %v3672_v35 }
 0x2a7   : >> { %v3980_v22 = vsel %vm3971_vm7, %v18648_v52, %v3979_v59  ;;  %v3333_v30 = vrot.slane %v3332_v60, 2  ;;  %v3340_v55 = vrot.slane %v3339_v61, 2  ;;  %v3346_v26 = vmax.f32 %v3344_v14, %v3345_v13 }
 0x2a8   : >> { %v3981_v15 = vsel %vm3973_vm8, %v18657_v4, %v3980_v22  ;;  %v3328_v11 = vrot.slane %v3327_v20, 1  ;;  %v4005_v25 = vsel %vm3965_vm4, %v18581_v31, %v18585_v29  ;;  %v2106_v34 = vcombine.high %v2098_v17, %v2098_v17 }
 0x2a9   : >> { %v4025_v28 = vpack.c.b16 %v3981_v15, %v3981_v15  ;;  %v3334_v39 = vmax.f32 %v3332_v60, %v3333_v30  ;;  %v3341_v48 = vmax.f32 %v3339_v61, %v3340_v55  ;;  %v3347_v0 = vrot.slane %v3346_v26, 2  ;;  %v20760_v30 = vld [vmem:[#allocation17_spill] sm:$0xff] }
 0x2aa   : >> { %v3329_v35 = vmax.f32 %v3327_v20, %v3328_v11  ;;  %v2107_v5 = vcombine.high %v2105_v44, %v2105_v44  ;;  %v2819_v46 = vsel %vm2678_vm1, %v2098_v17, -inf  ;;  %v2826_v38 = vsel %vm2678_vm1, %v2106_v34, -inf  ;;  %v20759_v20 = vld [vmem:[#allocation16_spill] sm:$0xff] }
 0x2ab   : >> { %13460 = vst [vmem:[%s18675_s23 + $0x9c] sm:$0xf] %v4025_v28  ;;  %v3335_v53 = vrot.slane %v3334_v39, 1  ;;  %v3342_v63 = vrot.slane %v3341_v48, 1  ;;  %v2820_v57 = vrot.slane %v2819_v46, 4  ;;  %v3348_v41 = vmax.f32 %v3346_v26, %v3347_v0 }
 0x2ac   : >> { %v3619_v29 = vmax.f32 %v18447_v7, %v3329_v35  ;;  %v2827_v56 = vrot.slane %v2826_v38, 4  ;;  %v2833_v14 = vsel %vm2678_vm1, %v2105_v44, -inf  ;;  %v2840_v59 = vsel %vm2678_vm1, %v2107_v5, -inf  ;;  %v20761_v5 = vld [vmem:[#allocation18_spill] sm:$0xff] }
 0x2ad   : >> { %v3336_v49 = vmax.f32 %v3334_v39, %v3335_v53  ;;  %v3343_v33 = vmax.f32 %v3341_v48, %v3342_v63  ;;  %v2821_v60 = vmax.f32 %v2819_v46, %v2820_v57  ;;  %v2834_v10 = vrot.slane %v2833_v14, 4 }
 0x2ae   : >> { %v3349_v61 = vrot.slane %v3348_v41, 1  ;;  %v3683_v13 = vpack.c.bf16 %v3619_v29, %v3619_v29  ;;  %v2828_v17 = vmax.f32 %v2826_v38, %v2827_v56  ;;  %v2841_v44 = vrot.slane %v2840_v59, 4 }
 0x2af   : >> { %v3620_v22 = vmax.f32 %v20759_v20, %v3336_v49  ;;  %v3621_v55 = vmax.f32 %v20760_v30, %v3343_v33  ;;  %v2822_v15 = vrot.slane %v2821_v60, 2  ;;  %v2835_v11 = vmax.f32 %v2833_v14, %v2834_v10 }
 0x2b0   : >> { %v3350_v26 = vmax.f32 %v3348_v41, %v3349_v61  ;;  %v18684_v7 = vunpack.c.l.b16 %v3683_v13  ;;  %v2829_v28 = vrot.slane %v2828_v17, 2  ;;  %v4165_v0 = vsel %vm3963_vm3, %v18570_v62, %v18579_v3 }
 0x2b1   : >> { %v3684_v39 = vpack.c.bf16 %v3620_v22, %v3620_v22  ;;  %v3685_v48 = vpack.c.bf16 %v3621_v55, %v3621_v55  ;;  %v2823_v34 = vmax.f32 %v2821_v60, %v2822_v15  ;;  %v2836_v35 = vrot.slane %v2835_v11, 2  ;;  %v20762_v22 = vld [vmem:[#allocation19_spill] sm:$0xff]  ;;  %v1898_v55 = vpop.f32.mrf.mxu1 }
 0x2b2   : >> { %v3622_v46 = vmax.f32 %v20761_v5, %v3350_v26  ;;  %v4006_v53 = vsel %vm3967_vm5, %v18684_v7, %v4005_v25  ;;  %v2830_v63 = vmax.f32 %v2828_v17, %v2829_v28  ;;  %v18699_v56 = vunpack.c.l.b16 %v3674_v45  ;;  %v20763_v28 = vld [vmem:[#allocation20_spill] sm:$0xff] }
 0x2b3   : >> { %v18692_v57 = vunpack.c.l.b16 %v3684_v39  ;;  %v18694_v38 = vunpack.c.l.b16 %v3685_v48  ;;  %v2824_v41 = vrot.slane %v2823_v34, 1  ;;  %v2837_v29 = vmax.f32 %v2835_v11, %v2836_v35  ;;  %v20764_v48 = vld [vmem:[#allocation21_spill] sm:$0xff] }
 0x2b4   : >> { %v3686_v14 = vpack.c.bf16 %v3622_v46, %v3622_v46  ;;  %v2831_v49 = vrot.slane %v2830_v63, 1  ;;  %v2842_v3 = vmax.f32 %v2840_v59, %v2841_v44  ;;  %v4166_v33 = vsel %vm3965_vm4, %v18646_v2, %v4165_v0 }
 0x2b5   : >> { %v4007_v25 = vsel %vm3969_vm6, %v18692_v57, %v4006_v53  ;;  %v2825_v60 = vmax.f32 %v2823_v34, %v2824_v41  ;;  %v2838_v10 = vrot.slane %v2837_v29, 1  ;;  %v3996_v61 = vsel %vm3961_vm2, %v18665_v19, %v18630_v12 }
 0x2b6   : >> { %v18708_v13 = vunpack.c.l.b16 %v3686_v14  ;;  %v4008_v32 = vsel %vm3971_vm7, %v18694_v38, %v4007_v25  ;;  %v2832_v45 = vmax.f32 %v2830_v63, %v2831_v49  ;;  %v18715_v17 = vsel %vm3963_vm3, %v18665_v19, %v18630_v12 }
 0x2b7   : >> { %v2839_v59 = vmax.f32 %v2837_v29, %v2838_v10  ;;  %v2843_v20 = vrot.slane %v2842_v3, 2  ;;  %v3579_v30 = vmax.f32 %v20762_v22, %v2825_v60  ;;  %v18721_v15 = vsel %vm3961_vm2, %v18632_v18, %v18665_v19 }
 0x2b8   : >> { %v4167_v11 = vsel %vm3967_vm5, %v18651_v54, %v4166_v33  ;;  %v4009_v26 = vsel %vm3973_vm8, %v18708_v13, %v4008_v32  ;;  %v3580_v12 = vmax.f32 %v20763_v28, %v2832_v45  ;;  %v3966_v5 = vsel %vm3965_vm4, %v18601_v43, %v18614_v47 }
 0x2b9   : >> { %v4029_v44 = vpack.c.b16 %v4009_v26, %v4009_v26  ;;  %v2844_v39 = vmax.f32 %v2842_v3, %v2843_v20  ;;  %v3581_v34 = vmax.f32 %v20764_v48, %v2839_v59  ;;  %v3643_v35 = vpack.c.bf16 %v3579_v30, %v3579_v30  ;;  %v15307_v26 = vpop.f32.mrf.mxu0 }
 0x2ba   : >> { %v3644_v0 = vpack.c.bf16 %v3580_v12, %v3580_v12  ;;  %v4054_v19 = vsel %vm3967_vm5, %v18601_v43, %v18617_v37  ;;  %v1899_v46 = vadd.f32 %v18624_v9, %v1898_v55  ;;  %v4158_v29 = vsel %vm3963_vm3, %v18601_v43, %v18608_v40 }
 0x2bb   : >> { %13464 = vst [vmem:[%s18675_s23 + $0xac] sm:$0xf] %v4029_v44  ;;  %v2845_v53 = vrot.slane %v2844_v39, 1  ;;  %v3645_v63 = vpack.c.bf16 %v3581_v34, %v3581_v34  ;;  %v3773_v41 = vunpack.c.l.b16 %v3643_v35  ;;  %v4168_v14 = vsel %vm3969_vm6, %v18648_v52, %v4167_v11 }
 0x2bc   : >> { %v4191_v47 = vsel %vm3963_vm3, %v18581_v31, %v18590_v6  ;;  %v3774_v49 = vunpack.c.l.b16 %v3644_v0  ;;  %v1963_v3 = vmax.f32 %v1899_v46, 0.0  ;;  %v18747_v37 = vsel %vm3963_vm3, %v18632_v18, %v3996_v61 }
 0x2bd   : >> { %v2846_v33 = vmax.f32 %v2844_v39, %v2845_v53  ;;  %v3775_v25 = vunpack.c.l.b16 %v3645_v63  ;;  %v3968_v60 = vsel %vm3967_vm5, %v3773_v41, %v3966_v5  ;;  %v4055_v43 = vsel %vm3969_vm6, %v3773_v41, %v4054_v19 }
 0x2be   : >> { %v3970_v10 = vsel %vm3969_vm6, %v3774_v49, %v3968_v60  ;;  %v4159_v40 = vsel %vm3965_vm4, %v3773_v41, %v4158_v29  ;;  %v2363_v32 = vcombine.high %v1963_v3, %v1963_v3  ;;  %v4169_v6 = vsel %vm3971_vm7, %v18657_v4, %v4168_v14 }
 0x2bf   : >> { %v18757_v45 = vsel %vm3965_vm4, %v18684_v7, %v4191_v47  ;;  %v3582_v61 = vmax.f32 %v18488_v1, %v2846_v33  ;;  %v4160_v59 = vsel %vm3967_vm5, %v3774_v49, %v4159_v40  ;;  %v2370_v20 = vrot.slane %v1963_v3, %v18349_v27 }
 0x2c0   : >> { %v2377_v22 = vrot.slane %v2363_v32, %v18349_v27  ;;  %v3972_v55 = vsel %vm3971_vm7, %v3775_v25, %v3970_v10  ;;  %v4056_v4 = vsel %vm3971_vm7, %v3774_v49, %v4055_v43  ;;  %v4161_v11 = vsel %vm3969_vm6, %v3775_v25, %v4160_v59 }
 0x2c1   : >> { %v3646_v30 = vpack.c.bf16 %v3582_v61, %v3582_v61  ;;  %v2378_v28 = vcombine.high %v2370_v20, %v2370_v20  ;;  %v3267_v1 = vsel %vm2678_vm1, %v2370_v20, -inf  ;;  %v4057_v35 = vsel %vm3973_vm8, %v3775_v25, %v4056_v4 }
 0x2c2   : >> { %v2379_v12 = vcombine.high %v2377_v22, %v2377_v22  ;;  %v3281_v44 = vsel %vm2678_vm1, %v2377_v22, -inf  ;;  %v3268_v48 = vrot.slane %v3267_v1, 4  ;;  %v1856_v19 = vadd.f32 %v18624_v9, %v15307_v26 }
 0x2c3   : >> { %v3776_v39 = vunpack.c.l.b16 %v3646_v30  ;;  %v3282_v34 = vrot.slane %v3281_v44, 4  ;;  %v3274_v0 = vsel %vm2678_vm1, %v2378_v28, -inf  ;;  %v20765_v49 = vmov 0 }
 0x2c4   : >> { %v3288_v5 = vsel %vm2678_vm1, %v2379_v12, -inf  ;;  %v3269_v41 = vmax.f32 %v3267_v1, %v3268_v48  ;;  %v20766_v49 = vsel %vm18781_vm13, 4294967295, %v20765_v49  ;;  %v3275_v3 = vrot.slane %v3274_v0, 4 }
 0x2c5   : >> { %v3974_v46 = vsel %vm3973_vm8, %v3776_v39, %v3972_v55  ;;  %v4058_v53 = vsel %vm3961_vm2, %v18515_v50, %v3776_v39  ;;  %v4162_v63 = vsel %vm3971_vm7, %v3776_v39, %v4161_v11  ;;  %20767 = vst [vmem:[#allocation16_spill] sm:$0xff] %v20766_v49  ;;  %v3283_v10 = vmax.f32 %v3281_v44, %v3282_v34 }
 0x2c6   : >> { %v4024_v29 = vpack.c.b16 %v3974_v46, %v3974_v46  ;;  %v4059_v14 = vsel %vm3963_vm3, %v18522_v51, %v4058_v53  ;;  %v4163_v47 = vsel %vm3973_vm8, %v18515_v50, %v4162_v63  ;;  %v3270_v60 = vrot.slane %v3269_v41, 2 }
 0x2c7   : >> { %v4060_v33 = vsel %vm3965_vm4, %v18548_v24, %v4059_v14  ;;  %v4209_v25 = vpack.c.b16 %v4169_v6, %v4163_v47  ;;  %v3276_v51 = vmax.f32 %v3274_v0, %v3275_v3  ;;  %v3289_v40 = vrot.slane %v3288_v5, 4  ;;  %v1847_v47 = vpop.f32.mrf.mxu0 }
 0x2c8   : >> { %13459 = vst [vmem:[%s18675_s23 + $0x98] sm:$0xf] %v4024_v29  ;;  %v4061_v43 = vsel %vm3967_vm5, %v18570_v62, %v4060_v33  ;;  %v1952_v50 = vmax.f32 %v1856_v19, 0.0  ;;  %v3271_v59 = vmax.f32 %v3269_v41, %v3270_v60  ;;  %v3284_v24 = vrot.slane %v3283_v10, 2 }
 0x2c9   : >> { %v4062_v32 = vsel %vm3969_vm6, %v18646_v2, %v4061_v43  ;;  %v4220_v61 = vsel %vm18781_vm13, %v4209_v25, 0  ;;  %v3277_v30 = vrot.slane %v3276_v51, 2  ;;  %v20768_v55 = vmov 0 }
 0x2ca   : >> { %v4063_v6 = vsel %vm3971_vm7, %v18651_v54, %v4062_v32  ;;  %v13485_v20 = vcombine.low %v4220_v61, %v4220_v61  ;;  %v13486_v22 = vcombine.high %v4220_v61, %v4220_v61  ;;  %v20769_v55 = vsel %vm18800_vm14, 4294967295, %v20768_v55 }
 0x2cb   : >> { %v4064_v62 = vsel %vm3973_vm8, %v18648_v52, %v4063_v6  ;;  %20770 = vst [vmem:[#allocation22_spill] sm:$0xff] %v20769_v55  ;;  %v3272_v2 = vrot.slane %v3271_v59, 1  ;;  %v3285_v4 = vmax.f32 %v3283_v10, %v3284_v24  ;;  %v3290_v11 = vmax.f32 %v3288_v5, %v3289_v40  ;;  %v15323_v5 = vpop.f32.mrf.mxu1 }
 0x2cc   : >> { %v4104_v26 = vpack.c.b16 %v4064_v62, %v4057_v35  ;;  %13496 = vst [vmem:[%s18675_s23 + $0x128] sm:$0xf] %v13485_v20  ;;  %13497 = vst [vmem:[%s18675_s23 + $0x12c] sm:$0xf] %v13486_v22  ;;  %v3278_v28 = vmax.f32 %v3276_v51, %v3277_v30  ;;  %v2176_v54 = vcombine.high %v1952_v50, %v1952_v50 }
 0x2cd   : >> { %v2183_v12 = vrot.slane %v1952_v50, %v18349_v27  ;;  %v4193_v52 = vsel %vm3967_vm5, %v18692_v57, %v18757_v45  ;;  %v3273_v1 = vmax.f32 %v3271_v59, %v3272_v2  ;;  %v3286_v44 = vrot.slane %v3285_v4, 1 }
 0x2ce   : >> { %v3291_v39 = vrot.slane %v3290_v11, 2  ;;  %v4079_v48 = vsel %vm3965_vm4, %v18632_v18, %v18715_v17  ;;  %v4115_v34 = vsel %vm18800_vm14, 0, %v4104_v26  ;;  %v3279_v35 = vrot.slane %v3278_v28, 1 }
 0x2cf   : >> { %v2191_v0 = vcombine.high %v2183_v12, %v2183_v12  ;;  %v13467_v19 = vcombine.low %v4115_v34, %v4115_v34  ;;  %v13468_v46 = vcombine.high %v4115_v34, %v4115_v34  ;;  %v3287_v53 = vmax.f32 %v3285_v4, %v3286_v44 }
 0x2d0   : >> { %v3292_v63 = vmax.f32 %v3290_v11, %v3291_v39  ;;  %v4194_v45 = vsel %vm3969_vm6, %v18694_v38, %v4193_v52  ;;  %v3280_v41 = vmax.f32 %v3278_v28, %v3279_v35  ;;  %v3611_v29 = vmax.f32 %v18490_v21, %v3273_v1 }
 0x2d1   : >> { %v2190_v14 = vrot.slane %v2176_v54, %v18349_v27  ;;  %13477 = vst [vmem:[%s18675_s23 + $0x8] sm:$0xf] %v13467_v19  ;;  %13478 = vst [vmem:[%s18675_s23 + $0xc] sm:$0xf] %v13468_v46  ;;  %v3613_v17 = vmax.f32 %v18500_v42, %v3287_v53  ;;  %v2959_v3 = vsel %vm2678_vm1, %v2183_v12, -inf  ;;  %v1920_v33 = vadd.f32 %v18624_v9, %v15323_v5 }
 0x2d2   : >> { %v3293_v18 = vrot.slane %v3292_v63, 1  ;;  %v3612_v25 = vmax.f32 %v18496_v23, %v3280_v41  ;;  %v3675_v60 = vpack.c.bf16 %v3611_v29, %v3611_v29  ;;  %v3998_v10 = vsel %vm3965_vm4, %v18699_v56, %v18747_v37  ;;  %v1911_v23 = vpop.f32.mrf.mxu1 }
 0x2d3   : >> { %v2966_v21 = vsel %vm2678_vm1, %v2191_v0, -inf  ;;  %v3677_v51 = vpack.c.bf16 %v3613_v17, %v3613_v17  ;;  %v4184_v40 = vsel %vm3963_vm3, %v18699_v56, %v18721_v15  ;;  %v1848_v42 = vadd.f32 %v18624_v9, %v1847_v47 }
 0x2d4   : >> { %v3294_v43 = vmax.f32 %v3292_v63, %v3293_v18  ;;  %v3676_v50 = vpack.c.bf16 %v3612_v25, %v3612_v25  ;;  %v3805_v32 = vunpack.c.l.b16 %v3675_v60  ;;  %v2192_v61 = vcombine.high %v2190_v14, %v2190_v14 }
 0x2d5   : >> { %v2960_v59 = vrot.slane %v2959_v3, 4  ;;  %v3807_v6 = vunpack.c.l.b16 %v3677_v51  ;;  %v2967_v20 = vrot.slane %v2966_v21, 4  ;;  %v1968_v37 = vmax.f32 %v1920_v33, 0.0 }
 0x2d6   : >> { %v3614_v24 = vmax.f32 %v18559_v16, %v3294_v43  ;;  %v3806_v22 = vunpack.c.l.b16 %v3676_v50  ;;  %v3999_v30 = vsel %vm3967_vm5, %v3805_v32, %v3998_v10  ;;  %v4185_v62 = vsel %vm3965_vm4, %v3805_v32, %v4184_v40 }
 0x2d7   : >> { %v2973_v2 = vsel %vm2678_vm1, %v2190_v14, -inf  ;;  %v4195_v15 = vsel %vm3971_vm7, %v18708_v13, %v4194_v45  ;;  %v4080_v11 = vsel %vm3967_vm5, %v18699_v56, %v4079_v48  ;;  %v18842_v26 = vadd.f32 %v18624_v9, %v1911_v23 }
 0x2d8   : >> { %v3678_v4 = vpack.c.bf16 %v3614_v24, %v3614_v24  ;;  %v4000_v16 = vsel %vm3969_vm6, %v3806_v22, %v3999_v30  ;;  %v4186_v28 = vsel %vm3967_vm5, %v3806_v22, %v4185_v62  ;;  %v2961_v54 = vmax.f32 %v2959_v3, %v2960_v59 }
 0x2d9   : >> { %v2980_v12 = vsel %vm2678_vm1, %v2192_v61, -inf  ;;  %v4001_v1 = vsel %vm3971_vm7, %v3807_v6, %v4000_v16  ;;  %v4187_v44 = vsel %vm3969_vm6, %v3807_v6, %v4186_v28  ;;  %v2974_v13 = vrot.slane %v2973_v2, 4 }
 0x2da   : >> { %v3808_v52 = vunpack.c.l.b16 %v3678_v4  ;;  %v4081_v39 = vsel %vm3969_vm6, %v3805_v32, %v4080_v11  ;;  %v2968_v56 = vmax.f32 %v2966_v21, %v2967_v20  ;;  %v2448_v48 = vcombine.high %v1968_v37, %v1968_v37 }
 0x2db   : >> { %v1950_v34 = vmax.f32 %v1848_v42, 0.0  ;;  %v2455_v19 = vrot.slane %v1968_v37, %v18349_v27  ;;  %v2981_v45 = vrot.slane %v2980_v12, 4  ;;  %v2962_v14 = vrot.slane %v2961_v54, 2 }
 0x2dc   : >> { %v4002_v35 = vsel %vm3973_vm8, %v3808_v52, %v4001_v1  ;;  %v4084_v0 = vsel %vm3961_vm2, %v18554_v58, %v3808_v52  ;;  %v4188_v5 = vsel %vm3971_vm7, %v3808_v52, %v4187_v44  ;;  %v2975_v47 = vmax.f32 %v2973_v2, %v2974_v13 }
 0x2dd   : >> { %v4028_v46 = vpack.c.b16 %v4002_v35, %v4002_v35  ;;  %v4085_v53 = vsel %vm3963_vm3, %v18541_v36, %v4084_v0  ;;  %v4189_v63 = vsel %vm3973_vm8, %v18554_v58, %v4188_v5  ;;  %v4082_v18 = vsel %vm3971_vm7, %v3806_v22, %v4081_v39 }
 0x2de   : >> { %v4086_v41 = vsel %vm3965_vm4, %v18561_v8, %v4085_v53  ;;  %v4211_v29 = vpack.c.b16 %v4195_v15, %v4189_v63  ;;  %v2462_v3 = vrot.slane %v2448_v48, %v18349_v27  ;;  %v2463_v36 = vcombine.high %v2455_v19, %v2455_v19 }
 0x2df   : >> { %13463 = vst [vmem:[%s18675_s23 + $0xa8] sm:$0xf] %v4028_v46  ;;  %v4087_v17 = vsel %vm3967_vm5, %v18581_v31, %v4086_v41  ;;  %v2969_v33 = vrot.slane %v2968_v56, 2  ;;  %v3407_v25 = vsel %vm2678_vm1, %v2455_v19, -inf  ;;  %v2982_v31 = vmax.f32 %v2980_v12, %v2981_v45 }
 0x2e0   : >> { %v4088_v58 = vsel %vm3969_vm6, %v18684_v7, %v4087_v17  ;;  %v4222_v8 = vsel %vm18781_vm13, %v4211_v29, 0  ;;  %v4083_v43 = vsel %vm3973_vm8, %v3807_v6, %v4082_v18  ;;  %v2464_v40 = vcombine.high %v2462_v3, %v2462_v3 }
 0x2e1   : >> { %v4089_v60 = vsel %vm3971_vm7, %v18692_v57, %v4088_v58  ;;  %v13489_v10 = vcombine.low %v4222_v8, %v4222_v8  ;;  %v13490_v21 = vcombine.high %v4222_v8, %v4222_v8  ;;  %v3408_v42 = vrot.slane %v3407_v25, 4 }
 0x2e2   : >> { %v4090_v51 = vsel %vm3973_vm8, %v18694_v38, %v4089_v60  ;;  %v2976_v50 = vrot.slane %v2975_v47, 2  ;;  %v3414_v32 = vsel %vm2678_vm1, %v2463_v36, -inf  ;;  %v3421_v61 = vsel %vm2678_vm1, %v2462_v3, -inf }
 0x2e3   : >> { %v4106_v7 = vpack.c.b16 %v4090_v51, %v4083_v43  ;;  %13500 = vst [vmem:[%s18675_s23 + $0x138] sm:$0xf] %v13489_v10  ;;  %13501 = vst [vmem:[%s18675_s23 + $0x13c] sm:$0xf] %v13490_v21  ;;  %v3409_v59 = vmax.f32 %v3407_v25, %v3408_v42  ;;  %v3415_v57 = vrot.slane %v3414_v32, 4  ;;  %v3422_v23 = vrot.slane %v3421_v61, 4  ;;  %v15324_v25 = vpop.f32.mrf.mxu1 }
 0x2e4   : >> { %v3428_v24 = vsel %vm2678_vm1, %v2464_v40, -inf  ;;  %v2142_v20 = vcombine.high %v1950_v34, %v1950_v34  ;;  %v2149_v37 = vrot.slane %v1950_v34, %v18349_v27  ;;  %v2963_v62 = vmax.f32 %v2961_v54, %v2962_v14 }
 0x2e5   : >> { %v4117_v38 = vsel %vm18800_vm14, 0, %v4106_v7  ;;  %v3429_v6 = vrot.slane %v3428_v24, 4  ;;  %v3416_v2 = vmax.f32 %v3414_v32, %v3415_v57  ;;  %v2970_v15 = vmax.f32 %v2968_v56, %v2969_v33  ;;  %v15308_v33 = vpop.f32.mrf.mxu0 }
 0x2e6   : >> { %v13471_v22 = vcombine.low %v4117_v38, %v4117_v38  ;;  %v13472_v30 = vcombine.high %v4117_v38, %v4117_v38  ;;  %v2977_v4 = vmax.f32 %v2975_v47, %v2976_v50  ;;  %v2983_v11 = vrot.slane %v2982_v31, 2 }
 0x2e7   : >> { %v2156_v16 = vrot.slane %v2142_v20, %v18349_v27  ;;  %v3423_v28 = vmax.f32 %v3421_v61, %v3422_v23  ;;  %v2903_v12 = vsel %vm2678_vm1, %v2149_v37, -inf  ;;  %v3410_v52 = vrot.slane %v3409_v59, 2 }
 0x2e8   : >> { %13481 = vst [vmem:[%s18675_s23 + $0x18] sm:$0xf] %v13471_v22  ;;  %13482 = vst [vmem:[%s18675_s23 + $0x1c] sm:$0xf] %v13472_v30  ;;  %v3417_v1 = vrot.slane %v3416_v2, 2  ;;  %v3430_v44 = vmax.f32 %v3428_v24, %v3429_v6  ;;  %v2157_v13 = vcombine.high %v2149_v37, %v2149_v37  ;;  %v2964_v39 = vrot.slane %v2963_v62, 1 }
 0x2e9   : >> { %v2904_v48 = vrot.slane %v2903_v12, 4  ;;  %v1966_v34 = vmax.f32 %v18842_v26, 0.0  ;;  %v2971_v54 = vrot.slane %v2970_v15, 1  ;;  %v2978_v35 = vrot.slane %v2977_v4, 1 }
 0x2ea   : >> { %v2984_v56 = vmax.f32 %v2982_v31, %v2983_v11  ;;  %v2158_v0 = vcombine.high %v2156_v16, %v2156_v16  ;;  %v3424_v5 = vrot.slane %v3423_v28, 2  ;;  %v3411_v19 = vmax.f32 %v3409_v59, %v3410_v52 }
 0x2eb   : >> { %v3418_v46 = vmax.f32 %v3416_v2, %v3417_v1  ;;  %v3431_v53 = vrot.slane %v3430_v44, 2  ;;  %v2910_v63 = vsel %vm2678_vm1, %v2157_v13, -inf  ;;  %v18890_v45 = vmax.f32 %v2963_v62, %v2964_v39 }
 0x2ec   : >> { %v2905_v41 = vmax.f32 %v2903_v12, %v2904_v48  ;;  %v2917_v29 = vsel %vm2678_vm1, %v2156_v16, -inf  ;;  %v2414_v14 = vcombine.high %v1966_v34, %v1966_v34  ;;  %v18893_v47 = vmax.f32 %v2970_v15, %v2971_v54 }
 0x2ed   : >> { %v18895_v18 = vmax.f32 %v2977_v4, %v2978_v35  ;;  %v2985_v26 = vrot.slane %v2984_v56, 1  ;;  %v2924_v17 = vsel %vm2678_vm1, %v2158_v0, -inf  ;;  %v3425_v3 = vmax.f32 %v3423_v28, %v3424_v5 }
 0x2ee   : >> { %v2911_v36 = vrot.slane %v2910_v63, 4  ;;  %v2421_v58 = vrot.slane %v1966_v34, %v18349_v27  ;;  %v2428_v8 = vrot.slane %v2414_v14, %v18349_v27  ;;  %v3412_v60 = vrot.slane %v3411_v19, 1 }
 0x2ef   : >> { %v3419_v10 = vrot.slane %v3418_v46, 1  ;;  %v3432_v21 = vmax.f32 %v3430_v44, %v3431_v53  ;;  %v2918_v31 = vrot.slane %v2917_v29, 4  ;;  %v2906_v43 = vrot.slane %v2905_v41, 2 }
 0x2f0   : >> { %v2925_v51 = vrot.slane %v2924_v17, 4  ;;  %v2429_v40 = vcombine.high %v2421_v58, %v2421_v58  ;;  %v2430_v42 = vcombine.high %v2428_v8, %v2428_v8  ;;  %v3351_v7 = vsel %vm2678_vm1, %v2421_v58, -inf }
 0x2f1   : >> { %v3365_v50 = vsel %vm2678_vm1, %v2428_v8, -inf  ;;  %v1859_v32 = vadd.f32 %v18624_v9, %v15308_v33  ;;  %v1923_v61 = vadd.f32 %v18624_v9, %v15324_v25  ;;  %v3426_v59 = vrot.slane %v3425_v3, 1 }
 0x2f2   : >> { %v2912_v57 = vmax.f32 %v2910_v63, %v2911_v36  ;;  %v3352_v23 = vrot.slane %v3351_v7, 4  ;;  %v3358_v24 = vsel %vm2678_vm1, %v2429_v40, -inf  ;;  %v18905_v38 = vmax.f32 %v2984_v56, %v2985_v26 }
 0x2f3   : >> { %v3433_v6 = vrot.slane %v3432_v21, 1  ;;  %v3359_v20 = vrot.slane %v3358_v24, 4  ;;  %v3372_v37 = vsel %vm2678_vm1, %v2430_v42, -inf  ;;  %v18908_v22 = vmax.f32 %v3411_v19, %v3412_v60 }
 0x2f4   : >> { %v2907_v30 = vmax.f32 %v2905_v41, %v2906_v43  ;;  %v2919_v62 = vmax.f32 %v2917_v29, %v2918_v31  ;;  %v3366_v2 = vrot.slane %v3365_v50, 4  ;;  %v2926_v15 = vmax.f32 %v2924_v17, %v2925_v51 }
 0x2f5   : >> { %v3373_v4 = vrot.slane %v3372_v37, 4  ;;  %v1953_v11 = vmax.f32 %v1859_v32, 0.0  ;;  %v1969_v16 = vmax.f32 %v1923_v61, 0.0  ;;  %v18910_v28 = vmax.f32 %v3418_v46, %v3419_v10  ;;  %v1850_v61 = vpop.f32.mrf.mxu0 }
 0x2f6   : >> { %v18912_v12 = vmax.f32 %v3425_v3, %v3426_v59  ;;  %v2913_v52 = vrot.slane %v2912_v57, 2  ;;  %v3353_v1 = vmax.f32 %v3351_v7, %v3352_v23  ;;  %v18914_v44 = vmax.f32 %v3432_v21, %v3433_v6 }
 0x2f7   : >> { %v3360_v13 = vmax.f32 %v3358_v24, %v3359_v20  ;;  %v2193_v39 = vcombine.high %v1953_v11, %v1953_v11  ;;  %v2200_v48 = vrot.slane %v1953_v11, %v18349_v27  ;;  %v2908_v34 = vrot.slane %v2907_v30, 1 }
 0x2f8   : >> { %v2920_v54 = vrot.slane %v2919_v62, 2  ;;  %v3367_v35 = vmax.f32 %v3365_v50, %v3366_v2  ;;  %v2465_v56 = vcombine.high %v1969_v16, %v1969_v16  ;;  %v2927_v0 = vrot.slane %v2926_v15, 2 }
 0x2f9   : >> { %v3374_v5 = vmax.f32 %v3372_v37, %v3373_v4  ;;  %v2207_v19 = vrot.slane %v2193_v39, %v18349_v27  ;;  %v2208_v46 = vcombine.high %v2200_v48, %v2200_v48  ;;  %v2914_v53 = vmax.f32 %v2912_v57, %v2913_v52 }
 0x2fa   : >> { %v3354_v63 = vrot.slane %v3353_v1, 2  ;;  %v2987_v41 = vsel %vm2678_vm1, %v2200_v48, -inf  ;;  %v2472_v29 = vrot.slane %v1969_v16, %v18349_v27  ;;  %v3361_v14 = vrot.slane %v3360_v13, 2 }
 0x2fb   : >> { %v2209_v26 = vcombine.high %v2207_v19, %v2207_v19  ;;  %v2988_v17 = vrot.slane %v2987_v41, 4  ;;  %v2479_v3 = vrot.slane %v2465_v56, %v18349_v27  ;;  %v2921_v36 = vmax.f32 %v2919_v62, %v2920_v54 }
 0x2fc   : >> { %v3368_v58 = vrot.slane %v3367_v35, 2  ;;  %v2994_v8 = vsel %vm2678_vm1, %v2208_v46, -inf  ;;  %v3001_v33 = vsel %vm2678_vm1, %v2207_v19, -inf  ;;  %v18923_v25 = vmax.f32 %v2907_v30, %v2908_v34 }
 0x2fd   : >> { %v2928_v60 = vmax.f32 %v2926_v15, %v2927_v0  ;;  %v3375_v10 = vrot.slane %v3374_v5, 2  ;;  %v2989_v21 = vmax.f32 %v2987_v41, %v2988_v17  ;;  %v2995_v31 = vrot.slane %v2994_v8, 4  ;;  %v1914_v17 = vpop.f32.mrf.mxu1 }
 0x2fe   : >> { %v3002_v43 = vrot.slane %v3001_v33, 4  ;;  %v3008_v51 = vsel %vm2678_vm1, %v2209_v26, -inf  ;;  %v2480_v40 = vcombine.high %v2472_v29, %v2472_v29  ;;  %v2915_v42 = vrot.slane %v2914_v53, 1 }
 0x2ff   : >> { %v3355_v7 = vmax.f32 %v3353_v1, %v3354_v63  ;;  %v3362_v50 = vmax.f32 %v3360_v13, %v3361_v14  ;;  %v2481_v32 = vcombine.high %v2479_v3, %v2479_v3  ;;  %v2922_v59 = vrot.slane %v2921_v36, 1 }
 0x300   : >> { %v3369_v57 = vmax.f32 %v3367_v35, %v3368_v58  ;;  %v3009_v23 = vrot.slane %v3008_v51, 4  ;;  %v3435_v24 = vsel %vm2678_vm1, %v2472_v29, -inf  ;;  %v3376_v6 = vmax.f32 %v3374_v5, %v3375_v10 }
 0x301   : >> { %v2990_v20 = vrot.slane %v2989_v21, 2  ;;  %v3442_v37 = vsel %vm2678_vm1, %v2480_v40, -inf  ;;  %v3449_v30 = vsel %vm2678_vm1, %v2479_v3, -inf  ;;  %v2929_v62 = vrot.slane %v2928_v60, 1 }
 0x302   : >> { %v2996_v2 = vmax.f32 %v2994_v8, %v2995_v31  ;;  %v3003_v15 = vmax.f32 %v3001_v33, %v3002_v43  ;;  %v1851_v4 = vadd.f32 %v18624_v9, %v1850_v61  ;;  %v3356_v11 = vrot.slane %v3355_v7, 1 }
 0x303   : >> { %v3363_v16 = vrot.slane %v3362_v50, 1  ;;  %v3436_v52 = vrot.slane %v3435_v24, 4  ;;  %v3456_v1 = vsel %vm2678_vm1, %v2481_v32, -inf  ;;  %v3370_v13 = vrot.slane %v3369_v57, 1 }
 0x304   : >> { %v3010_v39 = vmax.f32 %v3008_v51, %v3009_v23  ;;  %v3443_v48 = vrot.slane %v3442_v37, 4  ;;  %v3450_v34 = vrot.slane %v3449_v30, 4  ;;  %v18931_v54 = vmax.f32 %v2914_v53, %v2915_v42 }
 0x305   : >> { %v18933_v35 = vmax.f32 %v2921_v36, %v2922_v59  ;;  %v3377_v56 = vrot.slane %v3376_v6, 1  ;;  %v2991_v0 = vmax.f32 %v2989_v21, %v2990_v20  ;;  %v18935_v5 = vmax.f32 %v2928_v60, %v2929_v62 }
 0x306   : >> { %v2997_v19 = vrot.slane %v2996_v2, 2  ;;  %v3004_v46 = vrot.slane %v3003_v15, 2  ;;  %v3457_v63 = vrot.slane %v3456_v1, 4  ;;  %v18937_v41 = vmax.f32 %v3355_v7, %v3356_v11 }
 0x307   : >> { %v18939_v29 = vmax.f32 %v3362_v50, %v3363_v16  ;;  %v3437_v14 = vmax.f32 %v3435_v24, %v3436_v52  ;;  %v1951_v26 = vmax.f32 %v1851_v4, 0.0  ;;  %v18941_v3 = vmax.f32 %v3369_v57, %v3370_v13 }
 0x308   : >> { %v3011_v53 = vrot.slane %v3010_v39, 2  ;;  %v3444_v58 = vmax.f32 %v3442_v37, %v3443_v48  ;;  %v3451_v36 = vmax.f32 %v3449_v30, %v3450_v34  ;;  %v18943_v8 = vmax.f32 %v3376_v6, %v3377_v56  ;;  %v15311_v37 = vpop.f32.mrf.mxu0 }
 0x309   : >> { %v2992_v33 = vrot.slane %v2991_v0, 1  ;;  %v2159_v60 = vcombine.high %v1951_v26, %v1951_v26  ;;  %v2166_v10 = vrot.slane %v1951_v26, %v18349_v27  ;;  %v2998_v21 = vmax.f32 %v2996_v2, %v2997_v19 }
 0x30a   : >> { %20771 = vst [vmem:[#allocation17_spill] sm:$0xff] %v18943_v8  ;;  %v3005_v31 = vmax.f32 %v3003_v15, %v3004_v46  ;;  %v3458_v43 = vmax.f32 %v3456_v1, %v3457_v63  ;;  %v1915_v51 = vadd.f32 %v18624_v9, %v1914_v17  ;;  %v3438_v40 = vrot.slane %v3437_v14, 2 }
 0x30b   : >> { %v2173_v42 = vrot.slane %v2159_v60, %v18349_v27  ;;  %v2174_v7 = vcombine.high %v2166_v10, %v2166_v10  ;;  %v2931_v50 = vsel %vm2678_vm1, %v2166_v10, -inf  ;;  %v3012_v32 = vmax.f32 %v3010_v39, %v3011_v53 }
 0x30c   : >> { %v3445_v61 = vrot.slane %v3444_v58, 2  ;;  %v3452_v59 = vrot.slane %v3451_v36, 2  ;;  %v2932_v57 = vrot.slane %v2931_v50, 4  ;;  %v1967_v20 = vmax.f32 %v1915_v51, 0.0 }
 0x30d   : >> { %v2175_v23 = vcombine.high %v2173_v42, %v2173_v42  ;;  %v2938_v24 = vsel %vm2678_vm1, %v2174_v7, -inf  ;;  %v2945_v6 = vsel %vm2678_vm1, %v2173_v42, -inf  ;;  %v3459_v30 = vrot.slane %v3458_v43, 2 }
 0x30e   : >> { %v2933_v62 = vmax.f32 %v2931_v50, %v2932_v57  ;;  %v2939_v2 = vrot.slane %v2938_v24, 4  ;;  %v2946_v15 = vrot.slane %v2945_v6, 4  ;;  %v3439_v4 = vmax.f32 %v3437_v14, %v3438_v40 }
 0x30f   : >> { %v2952_v11 = vsel %vm2678_vm1, %v2175_v23, -inf  ;;  %v2431_v16 = vcombine.high %v1967_v20, %v1967_v20  ;;  %v2438_v52 = vrot.slane %v1967_v20, %v18349_v27  ;;  %v3446_v1 = vmax.f32 %v3444_v58, %v3445_v61 }
 0x310   : >> { %v3453_v13 = vmax.f32 %v3451_v36, %v3452_v59  ;;  %v2934_v39 = vrot.slane %v2933_v62, 2  ;;  %v1872_v48 = vadd.f32 %v18624_v9, %v15311_v37  ;;  %v2999_v34 = vrot.slane %v2998_v21, 1 }
 0x311   : >> { %v2940_v56 = vmax.f32 %v2938_v24, %v2939_v2  ;;  %v2947_v19 = vmax.f32 %v2945_v6, %v2946_v15  ;;  %v2953_v46 = vrot.slane %v2952_v11, 4  ;;  %v3006_v63 = vrot.slane %v3005_v31, 1 }
 0x312   : >> { %v3013_v26 = vrot.slane %v3012_v32, 1  ;;  %v3460_v17 = vmax.f32 %v3458_v43, %v3459_v30  ;;  %v3379_v53 = vsel %vm2678_vm1, %v2438_v52, -inf  ;;  %v3440_v14 = vrot.slane %v3439_v4, 1 }
 0x313   : >> { %v2935_v60 = vmax.f32 %v2933_v62, %v2934_v39  ;;  %v2445_v10 = vrot.slane %v2431_v16, %v18349_v27  ;;  %v2446_v51 = vcombine.high %v2438_v52, %v2438_v52  ;;  %v18956_v40 = vmax.f32 %v2991_v0, %v2992_v33 }
 0x314   : >> { %v3447_v58 = vrot.slane %v3446_v1, 1  ;;  %v3454_v36 = vrot.slane %v3453_v13, 1  ;;  %v1956_v42 = vmax.f32 %v1872_v48, 0.0  ;;  %v2941_v9 = vrot.slane %v2940_v56, 2  ;;  %v18982_v48 = vld [vmem:[%s20717_s2] ss:$0 sm:$0xff] }
 0x315   : >> { %v2948_v7 = vrot.slane %v2947_v19, 2  ;;  %v2954_v50 = vmax.f32 %v2952_v11, %v2953_v46  ;;  %v3380_v61 = vrot.slane %v3379_v53, 4  ;;  %v18958_v59 = vmax.f32 %v2998_v21, %v2999_v34  ;;  %v15327_v21 = vpop.f32.mrf.mxu1 }
 0x316   : >> { %v18960_v57 = vmax.f32 %v3005_v31, %v3006_v63  ;;  %v18962_v43 = vmax.f32 %v3012_v32, %v3013_v26  ;;  %v3461_v23 = vrot.slane %v3460_v17, 1  ;;  %v18964_v24 = vmax.f32 %v3439_v4, %v3440_v14 }
 0x317   : >> { %v2936_v6 = vrot.slane %v2935_v60, 1  ;;  %v2447_v20 = vcombine.high %v2445_v10, %v2445_v10  ;;  %v3386_v0 = vsel %vm2678_vm1, %v2446_v51, -inf  ;;  %v18967_v33 = vmax.f32 %v3446_v1, %v3447_v58 }
 0x318   : >> { %v18969_v37 = vmax.f32 %v3453_v13, %v3454_v36  ;;  %v3393_v30 = vsel %vm2678_vm1, %v2445_v10, -inf  ;;  %v2244_v62 = vcombine.high %v1956_v42, %v1956_v42  ;;  %v2942_v2 = vmax.f32 %v2940_v56, %v2941_v9 }
 0x319   : >> { %v2949_v31 = vmax.f32 %v2947_v19, %v2948_v7  ;;  %v2955_v15 = vrot.slane %v2954_v50, 2  ;;  %v3381_v32 = vmax.f32 %v3379_v53, %v3380_v61  ;;  %v18972_v11 = vmax.f32 %v3460_v17, %v3461_v23 }
 0x31a   : >> { %20772 = vst [vmem:[#allocation18_spill] sm:$0xff] %v18969_v37  ;;  %v3387_v4 = vrot.slane %v3386_v0, 4  ;;  %v2251_v16 = vrot.slane %v1956_v42, %v18349_v27  ;;  %v2258_v52 = vrot.slane %v2244_v62, %v18349_v27  ;;  %v18976_v39 = vmax.f32 %v2935_v60, %v2936_v6 }
 0x31b   : >> { %20773 = vst [vmem:[#allocation19_spill] sm:$0xff] %v18972_v11  ;;  %v3394_v1 = vrot.slane %v3393_v30, 4  ;;  %v3400_v13 = vsel %vm2678_vm1, %v2447_v20, -inf  ;;  %v1936_v34 = vadd.f32 %v18982_v48, %v15327_v21  ;;  %v2943_v26 = vrot.slane %v2942_v2, 1 }
 0x31c   : >> { %20774 = vst [vmem:[#allocation20_spill] sm:$0xff] %v18976_v39  ;;  %v2259_v56 = vcombine.high %v2251_v16, %v2251_v16  ;;  %v2260_v19 = vcombine.high %v2258_v52, %v2258_v52  ;;  %v3071_v46 = vsel %vm2678_vm1, %v2251_v16, -inf  ;;  %v3085_v63 = vsel %vm2678_vm1, %v2258_v52, -inf  ;;  %v1863_v16 = vpop.f32.mrf.mxu0 }
 0x31d   : >> { %v2950_v17 = vrot.slane %v2949_v31, 1  ;;  %v2956_v53 = vmax.f32 %v2954_v50, %v2955_v15  ;;  %v3382_v14 = vrot.slane %v3381_v32, 2  ;;  %v3072_v60 = vrot.slane %v3071_v46, 4 }
 0x31e   : >> { %v3078_v10 = vsel %vm2678_vm1, %v2259_v56, -inf  ;;  %v3086_v51 = vrot.slane %v3085_v63, 4  ;;  %v3092_v58 = vsel %vm2678_vm1, %v2260_v19, -inf  ;;  %v3388_v36 = vmax.f32 %v3386_v0, %v3387_v4 }
 0x31f   : >> { %v3395_v42 = vmax.f32 %v3393_v30, %v3394_v1  ;;  %v3401_v9 = vrot.slane %v3400_v13, 4  ;;  %v3079_v7 = vrot.slane %v3078_v10, 4  ;;  %v3073_v61 = vmax.f32 %v3071_v46, %v3072_v60 }
 0x320   : >> { %v3087_v23 = vmax.f32 %v3085_v63, %v3086_v51  ;;  %v3093_v6 = vrot.slane %v3092_v58, 4  ;;  %v1972_v20 = vmax.f32 %v1936_v34, 0.0  ;;  %v18989_v62 = vmax.f32 %v2942_v2, %v2943_v26 }
 0x321   : >> { %v18991_v21 = vmax.f32 %v2949_v31, %v2950_v17  ;;  %v2957_v50 = vrot.slane %v2956_v53, 1  ;;  %v3080_v15 = vmax.f32 %v3078_v10, %v3079_v7  ;;  %v3074_v52 = vrot.slane %v3073_v61, 2 }
 0x322   : >> { %20775 = vst [vmem:[#allocation21_spill] sm:$0xff] %v18989_v62  ;;  %v3088_v56 = vrot.slane %v3087_v23, 2  ;;  %v3094_v55 = vmax.f32 %v3092_v58, %v3093_v6  ;;  %v2516_v49 = vcombine.high %v1972_v20, %v1972_v20  ;;  %v3383_v19 = vmax.f32 %v3381_v32, %v3382_v14 }
 0x323   : >> { %20776 = vst [vmem:[#allocation23_spill] sm:$0xff] %v18991_v21  ;;  %v3389_v0 = vrot.slane %v3388_v36, 2  ;;  %v3081_v30 = vrot.slane %v3080_v15, 2  ;;  %v2523_v4 = vrot.slane %v1972_v20, %v18349_v27  ;;  %v3396_v1 = vrot.slane %v3395_v42, 2 }
 0x324   : >> { %v3095_v46 = vrot.slane %v3094_v55, 2  ;;  %v2530_v34 = vrot.slane %v2516_v49, %v18349_v27  ;;  %v1864_v2 = vadd.f32 %v18982_v48, %v1863_v16  ;;  %v3402_v31 = vmax.f32 %v3400_v13, %v3401_v9 }
 0x325   : >> { %v3075_v63 = vmax.f32 %v3073_v61, %v3074_v52  ;;  %v2531_v26 = vcombine.high %v2523_v4, %v2523_v4  ;;  %v3519_v17 = vsel %vm2678_vm1, %v2523_v4, -inf  ;;  %v18997_v60 = vmax.f32 %v2956_v53, %v2957_v50  ;;  %v1927_v4 = vpop.f32.mrf.mxu1 }
 0x326   : >> { %v3082_v10 = vmax.f32 %v3080_v15, %v3081_v30  ;;  %v3089_v51 = vmax.f32 %v3087_v23, %v3088_v56  ;;  %v2532_v32 = vcombine.high %v2530_v34, %v2530_v34  ;;  %v3390_v14 = vmax.f32 %v3388_v36, %v3389_v0 }
 0x327   : >> { %20777 = vst [vmem:[#allocation24_spill] sm:$0xff] %v18997_v60  ;;  %v3520_v58 = vrot.slane %v3519_v17, 4  ;;  %v3526_v7 = vsel %vm2678_vm1, %v2531_v26, -inf  ;;  %v3533_v6 = vsel %vm2678_vm1, %v2530_v34, -inf  ;;  %v3397_v20 = vmax.f32 %v3395_v42, %v3396_v1 }
 0x328   : >> { %v3096_v49 = vmax.f32 %v3094_v55, %v3095_v46  ;;  %v3527_v21 = vrot.slane %v3526_v7, 4  ;;  %v1954_v16 = vmax.f32 %v1864_v2, 0.0  ;;  %v3076_v13 = vrot.slane %v3075_v63, 1 }
 0x329   : >> { %v3521_v9 = vmax.f32 %v3519_v17, %v3520_v58  ;;  %v3534_v61 = vrot.slane %v3533_v6, 4  ;;  %v3540_v52 = vsel %vm2678_vm1, %v2532_v32, -inf  ;;  %v3384_v53 = vrot.slane %v3383_v19, 1 }
 0x32a   : >> { %v3083_v50 = vrot.slane %v3082_v10, 1  ;;  %v3090_v15 = vrot.slane %v3089_v51, 1  ;;  %v3528_v23 = vmax.f32 %v3526_v7, %v3527_v21  ;;  %v3403_v56 = vrot.slane %v3402_v31, 2 }
 0x32b   : >> { %v3522_v36 = vrot.slane %v3521_v9, 2  ;;  %v3535_v0 = vmax.f32 %v3533_v6, %v3534_v61  ;;  %v3541_v30 = vrot.slane %v3540_v52, 4  ;;  %v3391_v26 = vrot.slane %v3390_v14, 1 }
 0x32c   : >> { %v3097_v34 = vrot.slane %v3096_v49, 1  ;;  %v3529_v42 = vrot.slane %v3528_v23, 2  ;;  %v2210_v55 = vcombine.high %v1954_v16, %v1954_v16  ;;  %v3398_v1 = vrot.slane %v3397_v20, 1 }
 0x32d   : >> { %v3077_v46 = vmax.f32 %v3075_v63, %v3076_v13  ;;  %v3536_v2 = vrot.slane %v3535_v0, 2  ;;  %v3542_v17 = vmax.f32 %v3540_v52, %v3541_v30  ;;  %v3084_v58 = vmax.f32 %v3082_v10, %v3083_v50 }
 0x32e   : >> { %v3091_v60 = vmax.f32 %v3089_v51, %v3090_v15  ;;  %v3530_v32 = vmax.f32 %v3528_v23, %v3529_v42  ;;  %v1928_v62 = vadd.f32 %v18982_v48, %v1927_v4  ;;  %v19003_v39 = vmax.f32 %v3383_v19, %v3384_v53 }
 0x32f   : >> { %v19005_v21 = vmax.f32 %v3402_v31, %v3403_v56  ;;  %v3523_v7 = vmax.f32 %v3521_v9, %v3522_v36  ;;  %v3537_v6 = vmax.f32 %v3535_v0, %v3536_v2  ;;  %v3098_v61 = vmax.f32 %v3096_v49, %v3097_v34 }
 0x330   : >> { %v3543_v8 = vrot.slane %v3542_v17, 2  ;;  %v2217_v11 = vrot.slane %v1954_v16, %v18349_v27  ;;  %v2224_v37 = vrot.slane %v2210_v55, %v18349_v27  ;;  %v19009_v63 = vmax.f32 %v3390_v14, %v3391_v26 }
 0x331   : >> { %v19011_v13 = vmax.f32 %v3397_v20, %v3398_v1  ;;  %v3599_v10 = vmax.f32 %v18890_v45, %v3077_v46  ;;  %v3531_v51 = vrot.slane %v3530_v32, 1  ;;  %v3600_v19 = vmax.f32 %v18893_v47, %v3084_v58 }
 0x332   : >> { %v19016_v31 = vmax.f32 %v18895_v18, %v3091_v60  ;;  %v2225_v9 = vcombine.high %v2217_v11, %v2217_v11  ;;  %v1970_v52 = vmax.f32 %v1928_v62, 0.0  ;;  %v3524_v49 = vrot.slane %v3523_v7, 1 }
 0x333   : >> { %v3538_v53 = vrot.slane %v3537_v6, 1  ;;  %v2226_v50 = vcombine.high %v2224_v37, %v2224_v37  ;;  %v3015_v16 = vsel %vm2678_vm1, %v2217_v11, -inf  ;;  %v19020_v14 = vmax.f32 %v18905_v38, %v3098_v61 }
 0x334   : >> { %v3544_v20 = vmax.f32 %v3542_v17, %v3543_v8  ;;  %v3016_v15 = vrot.slane %v3015_v16, 4  ;;  %v3022_v45 = vsel %vm2678_vm1, %v2225_v9, -inf  ;;  %v3663_v23 = vpack.c.bf16 %v3599_v10, %v3599_v10 }
 0x335   : >> { %v3532_v56 = vmax.f32 %v3530_v32, %v3531_v51  ;;  %v3023_v47 = vrot.slane %v3022_v45, 4  ;;  %v3029_v18 = vsel %vm2678_vm1, %v2224_v37, -inf  ;;  %v3664_v60 = vpack.c.bf16 %v3600_v19, %v3600_v19 }
 0x336   : >> { %v3665_v62 = vpack.c.bf16 %v19016_v31, %v19016_v31  ;;  %v3017_v36 = vmax.f32 %v3015_v16, %v3016_v15  ;;  %v3030_v0 = vrot.slane %v3029_v18, 4  ;;  %v3525_v30 = vmax.f32 %v3523_v7, %v3524_v49 }
 0x337   : >> { %v3539_v11 = vmax.f32 %v3537_v6, %v3538_v53  ;;  %v3024_v4 = vmax.f32 %v3022_v45, %v3023_v47  ;;  %v3036_v38 = vsel %vm2678_vm1, %v2226_v50, -inf  ;;  %v3666_v8 = vpack.c.bf16 %v19020_v14, %v19020_v14 }
 0x338   : >> { %v3545_v26 = vrot.slane %v3544_v20, 1  ;;  %v3018_v34 = vrot.slane %v3017_v36, 2  ;;  %v3031_v42 = vmax.f32 %v3029_v18, %v3030_v0  ;;  %v3632_v55 = vmax.f32 %v18910_v28, %v3532_v56  ;;  %v15312_v18 = vpop.f32.mrf.mxu0 }
 0x339   : >> { %v3025_v37 = vrot.slane %v3024_v4, 2  ;;  %v3037_v1 = vrot.slane %v3036_v38, 4  ;;  %v2482_v46 = vcombine.high %v1970_v52, %v1970_v52  ;;  %v19030_v2 = vunpack.c.l.b16 %v3663_v23 }
 0x33a   : >> { %v19032_v17 = vunpack.c.l.b16 %v3664_v60  ;;  %v3019_v58 = vmax.f32 %v3017_v36, %v3018_v34  ;;  %v3032_v32 = vrot.slane %v3031_v42, 2  ;;  %v3631_v7 = vmax.f32 %v18908_v22, %v3525_v30 }
 0x33b   : >> { %v3633_v6 = vmax.f32 %v18912_v12, %v3539_v11  ;;  %v3026_v61 = vmax.f32 %v3024_v4, %v3025_v37  ;;  %v3038_v10 = vmax.f32 %v3036_v38, %v3037_v1  ;;  %v3546_v51 = vmax.f32 %v3544_v20, %v3545_v26 }
 0x33c   : >> { %v3020_v19 = vrot.slane %v3019_v58, 1  ;;  %v3033_v31 = vmax.f32 %v3031_v42, %v3032_v32  ;;  %v2489_v28 = vrot.slane %v1970_v52, %v18349_v27  ;;  %v3696_v9 = vpack.c.bf16 %v3632_v55, %v3632_v55 }
 0x33d   : >> { %v3027_v49 = vrot.slane %v3026_v61, 1  ;;  %v3039_v53 = vrot.slane %v3038_v10, 2  ;;  %v2496_v50 = vrot.slane %v2482_v46, %v18349_v27  ;;  %v3695_v20 = vpack.c.bf16 %v3631_v7, %v3631_v7 }
 0x33e   : >> { %v3021_v16 = vmax.f32 %v3019_v58, %v3020_v19  ;;  %v3034_v15 = vrot.slane %v3033_v31, 1  ;;  %v2497_v45 = vcombine.high %v2489_v28, %v2489_v28  ;;  %v3463_v23 = vsel %vm2678_vm1, %v2489_v28, -inf }
 0x33f   : >> { %v3028_v22 = vmax.f32 %v3026_v61, %v3027_v49  ;;  %v3040_v56 = vmax.f32 %v3038_v10, %v3039_v53  ;;  %v2498_v12 = vcombine.high %v2496_v50, %v2496_v50  ;;  %v3464_v47 = vrot.slane %v3463_v23, 4 }
 0x340   : >> { %v3035_v60 = vmax.f32 %v3033_v31, %v3034_v15  ;;  %v3470_v36 = vsel %vm2678_vm1, %v2497_v45, -inf  ;;  %v3477_v52 = vsel %vm2678_vm1, %v2496_v50, -inf  ;;  %v3697_v0 = vpack.c.bf16 %v3633_v6, %v3633_v6 }
 0x341   : >> { %v3592_v30 = vmax.f32 %v18931_v54, %v3028_v22  ;;  %v3465_v11 = vmax.f32 %v3463_v23, %v3464_v47  ;;  %v3471_v4 = vrot.slane %v3470_v36, 4  ;;  %v19042_v38 = vunpack.c.l.b16 %v3696_v9 }
 0x342   : >> { %v3478_v26 = vrot.slane %v3477_v52, 4  ;;  %v3484_v34 = vsel %vm2678_vm1, %v2498_v12, -inf  ;;  %v1875_v42 = vadd.f32 %v18982_v48, %v15312_v18  ;;  %v3634_v55 = vmax.f32 %v18914_v44, %v3546_v51 }
 0x343   : >> { %v3041_v37 = vrot.slane %v3040_v56, 1  ;;  %v3591_v1 = vmax.f32 %v18923_v25, %v3021_v16  ;;  %v3466_v46 = vrot.slane %v3465_v11, 2  ;;  %v19048_v58 = vunpack.c.l.b16 %v3665_v62 }
 0x344   : >> { %v3989_v54 = vsel %vm3961_vm2, %v19032_v17, %v19030_v2  ;;  %v19053_v32 = vunpack.c.l.b16 %v3695_v20  ;;  %v3593_v7 = vmax.f32 %v18933_v35, %v3035_v60  ;;  %v19056_v6 = vunpack.c.l.b16 %v3697_v0 }
 0x345   : >> { %v3656_v61 = vpack.c.bf16 %v3592_v30, %v3592_v30  ;;  %v3472_v10 = vmax.f32 %v3470_v36, %v3471_v4  ;;  %v3485_v19 = vrot.slane %v3484_v34, 4  ;;  %v3405_v44 = vrot.slane %v19005_v21, 1 }
 0x346   : >> { %v4017_v25 = vsel %vm3961_vm2, %v19042_v38, %v19053_v32  ;;  %v3479_v62 = vmax.f32 %v3477_v52, %v3478_v26  ;;  %v1957_v51 = vmax.f32 %v1875_v42, 0.0  ;;  %v3698_v31 = vpack.c.bf16 %v3634_v55, %v3634_v55 }
 0x347   : >> { %v3042_v28 = vmax.f32 %v3040_v56, %v3041_v37  ;;  %v3655_v9 = vpack.c.bf16 %v3591_v1, %v3591_v1  ;;  %v3467_v49 = vmax.f32 %v3465_v11, %v3466_v46  ;;  %v19065_v35 = vunpack.c.l.b16 %v3666_v8 }
 0x348   : >> { %v3990_v53 = vsel %vm3963_vm3, %v19048_v58, %v3989_v54  ;;  %v4177_v50 = vsel %vm3961_vm2, %v19048_v58, %v19032_v17  ;;  %v3657_v16 = vpack.c.bf16 %v3593_v7, %v3593_v7  ;;  %v19074_v15 = vsel %vm3963_vm3, %v19056_v6, %v4017_v25 }
 0x349   : >> { %v3786_v45 = vunpack.c.l.b16 %v3656_v61  ;;  %v3473_v23 = vrot.slane %v3472_v10, 2  ;;  %v3486_v22 = vmax.f32 %v3484_v34, %v3485_v19  ;;  %v19079_v14 = vsel %vm3961_vm2, %v19056_v6, %v19042_v38 }
 0x34a   : >> { %v3480_v8 = vrot.slane %v3479_v62, 2  ;;  %v2261_v56 = vcombine.high %v1957_v51, %v1957_v51  ;;  %v2268_v12 = vrot.slane %v1957_v51, %v18349_v27  ;;  %v19082_v47 = vunpack.c.l.b16 %v3698_v31  ;;  %v15328_v51 = vpop.f32.mrf.mxu1 }
 0x34b   : >> { %v3594_v18 = vmax.f32 %v18935_v5, %v3042_v28  ;;  %v3785_v20 = vunpack.c.l.b16 %v3655_v9  ;;  %v3468_v60 = vrot.slane %v3467_v49, 1  ;;  %v3787_v36 = vunpack.c.l.b16 %v3657_v16 }
 0x34c   : >> { %v2275_v52 = vrot.slane %v2261_v56, %v18349_v27  ;;  %v2276_v0 = vcombine.high %v2268_v12, %v2268_v12  ;;  %v3099_v30 = vsel %vm2678_vm1, %v2268_v12, -inf  ;;  %v3474_v4 = vmax.f32 %v3472_v10, %v3473_v23 }
 0x34d   : >> { %v3982_v11 = vsel %vm3961_vm2, %v3786_v45, %v3785_v20  ;;  %v3487_v26 = vrot.slane %v3486_v22, 2  ;;  %v3100_v34 = vrot.slane %v3099_v30, 4  ;;  %v3481_v42 = vmax.f32 %v3479_v62, %v3480_v8 }
 0x34e   : >> { %v2277_v55 = vcombine.high %v2275_v52, %v2275_v52  ;;  %v3106_v37 = vsel %vm2678_vm1, %v2276_v0, -inf  ;;  %v3113_v1 = vsel %vm2678_vm1, %v2275_v52, -inf  ;;  %v3658_v5 = vpack.c.bf16 %v3594_v18, %v3594_v18 }
 0x34f   : >> { %v4065_v46 = vsel %vm3963_vm3, %v3786_v45, %v3785_v20  ;;  %v3469_v54 = vmax.f32 %v3467_v49, %v3468_v60  ;;  %v3101_v7 = vmax.f32 %v3099_v30, %v3100_v34  ;;  %v19092_v61 = vsel %vm3963_vm3, %v3787_v36, %v3982_v11  ;;  %v1866_v30 = vpop.f32.mrf.mxu0 }
 0x350   : >> { %v3107_v19 = vrot.slane %v3106_v37, 4  ;;  %v3114_v25 = vrot.slane %v3113_v1, 4  ;;  %v3120_v10 = vsel %vm2678_vm1, %v2277_v55, -inf  ;;  %v3475_v31 = vrot.slane %v3474_v4, 1 }
 0x351   : >> { %v3488_v62 = vmax.f32 %v3486_v22, %v3487_v26  ;;  %v3102_v28 = vrot.slane %v3101_v7, 2  ;;  %v3121_v9 = vrot.slane %v3120_v10, 4  ;;  %v19096_v16 = vsel %vm3965_vm4, %v3787_v36, %v4065_v46 }
 0x352   : >> { %v3482_v23 = vrot.slane %v3481_v42, 1  ;;  %v3108_v8 = vmax.f32 %v3106_v37, %v3107_v19  ;;  %v3115_v56 = vmax.f32 %v3113_v1, %v3114_v25  ;;  %v19099_v49 = vmax.f32 %v18937_v41, %v3469_v54 }
 0x353   : >> { %v3103_v12 = vmax.f32 %v3101_v7, %v3102_v28  ;;  %v3122_v18 = vmax.f32 %v3120_v10, %v3121_v9  ;;  %v1939_v20 = vadd.f32 %v18982_v48, %v15328_v51  ;;  %v19102_v60 = vunpack.c.l.b16 %v3658_v5 }
 0x354   : >> { %v19105_v52 = vsel %vm3961_vm2, %v3787_v36, %v3786_v45  ;;  %v3109_v22 = vrot.slane %v3108_v8, 2  ;;  %v3116_v0 = vrot.slane %v3115_v56, 2  ;;  %v3476_v11 = vmax.f32 %v3474_v4, %v3475_v31 }
 0x355   : >> { %v3489_v26 = vrot.slane %v3488_v62, 1  ;;  %v3991_v34 = vsel %vm3965_vm4, %v19065_v35, %v3990_v53  ;;  %v19111_v41 = vsel %vm3963_vm3, %v19065_v35, %v4177_v50  ;;  %v3104_v55 = vrot.slane %v3103_v12, 1 }
 0x356   : >> { %v3110_v37 = vmax.f32 %v3108_v8, %v3109_v22  ;;  %v3117_v1 = vmax.f32 %v3115_v56, %v3116_v0  ;;  %v3123_v5 = vrot.slane %v3122_v18, 2  ;;  %v3483_v46 = vmax.f32 %v3481_v42, %v3482_v23 }
 0x357   : >> { %v3687_v45 = vpack.c.bf16 %v19099_v49, %v19099_v49  ;;  %v1973_v36 = vmax.f32 %v1939_v20, 0.0  ;;  %v1867_v54 = vadd.f32 %v18982_v48, %v1866_v30  ;;  %v3105_v4 = vmax.f32 %v3103_v12, %v3104_v55 }
 0x358   : >> { %v3111_v7 = vrot.slane %v3110_v37, 1  ;;  %v3118_v19 = vrot.slane %v3117_v1, 1  ;;  %v3124_v25 = vmax.f32 %v3122_v18, %v3123_v5  ;;  %v19116_v53 = vmax.f32 %v3488_v62, %v3489_v26 }
 0x359   : >> { %v19119_v50 = vmax.f32 %v18939_v29, %v3476_v11  ;;  %v2533_v10 = vcombine.high %v1973_v36, %v1973_v36  ;;  %v2540_v51 = vrot.slane %v1973_v36, %v18349_v27  ;;  %v3603_v9 = vmax.f32 %v18956_v40, %v3105_v4 }
 0x35a   : >> { %v3112_v31 = vmax.f32 %v3110_v37, %v3111_v7  ;;  %v3119_v42 = vmax.f32 %v3117_v1, %v3118_v19  ;;  %v3125_v28 = vrot.slane %v3124_v25, 1  ;;  %v1955_v49 = vmax.f32 %v1867_v54, 0.0 }
 0x35b   : >> { %v2547_v23 = vrot.slane %v2533_v10, %v18349_v27  ;;  %v2548_v8 = vcombine.high %v2540_v51, %v2540_v51  ;;  %v3547_v56 = vsel %vm2678_vm1, %v2540_v51, -inf  ;;  %v3667_v18 = vpack.c.bf16 %v3603_v9, %v3603_v9 }
 0x35c   : >> { %v3126_v12 = vmax.f32 %v3124_v25, %v3125_v28  ;;  %v3604_v62 = vmax.f32 %v18958_v59, %v3112_v31  ;;  %v3605_v29 = vmax.f32 %v18960_v57, %v3119_v42  ;;  %v3548_v22 = vrot.slane %v3547_v56, 4 }
 0x35d   : >> { %v2549_v20 = vcombine.high %v2547_v23, %v2547_v23  ;;  %v3554_v0 = vsel %vm2678_vm1, %v2548_v8, -inf  ;;  %v3561_v30 = vsel %vm2678_vm1, %v2547_v23, -inf  ;;  %v19130_v55 = vunpack.c.l.b16 %v3667_v18 }
 0x35e   : >> { %v3606_v40 = vmax.f32 %v18962_v43, %v3126_v12  ;;  %v3668_v11 = vpack.c.bf16 %v3604_v62, %v3604_v62  ;;  %v3669_v26 = vpack.c.bf16 %v3605_v29, %v3605_v29  ;;  %v3549_v37 = vmax.f32 %v3547_v56, %v3548_v22 }
 0x35f   : >> { %v3555_v1 = vrot.slane %v3554_v0, 4  ;;  %v3562_v5 = vrot.slane %v3561_v30, 4  ;;  %v3568_v59 = vsel %vm2678_vm1, %v2549_v20, -inf  ;;  %v3992_v4 = vsel %vm3967_vm5, %v19130_v55, %v3991_v34 }
 0x360   : >> { %v3670_v36 = vpack.c.bf16 %v3606_v40, %v3606_v40  ;;  %v19133_v57 = vunpack.c.l.b16 %v3668_v11  ;;  %v19135_v54 = vunpack.c.l.b16 %v3669_v26  ;;  %v19140_v7 = vmax.f32 %v18941_v3, %v3483_v46 }
 0x361   : >> { %v3550_v43 = vrot.slane %v3549_v37, 2  ;;  %v3556_v19 = vmax.f32 %v3554_v0, %v3555_v1  ;;  %v3563_v25 = vmax.f32 %v3561_v30, %v3562_v5  ;;  %v3569_v31 = vrot.slane %v3568_v59, 4 }
 0x362   : >> { %v19142_v10 = vunpack.c.l.b16 %v3670_v36  ;;  %v3993_v51 = vsel %vm3969_vm6, %v19133_v57, %v3992_v4  ;;  %v2227_v42 = vcombine.high %v1955_v49, %v1955_v49  ;;  %v19146_v28 = vunpack.c.l.b16 %v3687_v45 }
 0x363   : >> { %v3994_v9 = vsel %vm3971_vm7, %v19135_v54, %v3993_v51  ;;  %v3551_v34 = vmax.f32 %v3549_v37, %v3550_v43  ;;  %v3557_v23 = vrot.slane %v3556_v19, 2  ;;  %v3688_v3 = vpack.c.bf16 %v19119_v50, %v19119_v50 }
 0x364   : >> { %v3995_v46 = vsel %vm3973_vm8, %v19142_v10, %v3994_v9  ;;  %v3564_v8 = vrot.slane %v3563_v25, 2  ;;  %v3570_v56 = vmax.f32 %v3568_v59, %v3569_v31  ;;  %v2234_v45 = vrot.slane %v1955_v49, %v18349_v27 }
 0x365   : >> { %v4027_v12 = vpack.c.b16 %v3995_v46, %v3995_v46  ;;  %v3552_v62 = vrot.slane %v3551_v34, 1  ;;  %v3558_v29 = vmax.f32 %v3556_v19, %v3557_v23  ;;  %v4019_v22 = vsel %vm3965_vm4, %v19082_v47, %v19074_v15  ;;  %v20778_v23 = vld [vmem:[#allocation18_spill] sm:$0xff] }
 0x366   : >> { %v3565_v18 = vmax.f32 %v3563_v25, %v3564_v8  ;;  %v3571_v20 = vrot.slane %v3570_v56, 2  ;;  %v2241_v0 = vrot.slane %v2227_v42, %v18349_v27  ;;  %v2242_v40 = vcombine.high %v2234_v45, %v2234_v45 }
 0x367   : >> { %13462 = vst [vmem:[%s18675_s23 + $0xa4] sm:$0xf] %v4027_v12  ;;  %v3553_v50 = vmax.f32 %v3551_v34, %v3552_v62  ;;  %v3559_v30 = vrot.slane %v3558_v29, 1  ;;  %v3043_v11 = vsel %vm2678_vm1, %v2234_v45, -inf  ;;  %v20779_v45 = vld [vmem:[#allocation19_spill] sm:$0xff] }
 0x368   : >> { %v3566_v26 = vrot.slane %v3565_v18, 1  ;;  %v3572_v37 = vmax.f32 %v3570_v56, %v3571_v20  ;;  %v2243_v1 = vcombine.high %v2241_v0, %v2241_v0  ;;  %v3044_v5 = vrot.slane %v3043_v11, 4 }
 0x369   : >> { %v3560_v59 = vmax.f32 %v3558_v29, %v3559_v30  ;;  %v3635_v49 = vmax.f32 %v18964_v24, %v3553_v50  ;;  %v3050_v36 = vsel %vm2678_vm1, %v2242_v40, -inf  ;;  %v3057_v4 = vsel %vm2678_vm1, %v2241_v0, -inf }
 0x36a   : >> { %v3567_v15 = vmax.f32 %v3565_v18, %v3566_v26  ;;  %v3573_v43 = vrot.slane %v3572_v37, 1  ;;  %v3045_v19 = vmax.f32 %v3043_v11, %v3044_v5  ;;  %v3051_v25 = vrot.slane %v3050_v36, 4 }
 0x36b   : >> { %v3636_v51 = vmax.f32 %v18967_v33, %v3560_v59  ;;  %v3699_v31 = vpack.c.bf16 %v3635_v49, %v3635_v49  ;;  %v3058_v42 = vrot.slane %v3057_v4, 4  ;;  %v3064_v9 = vsel %vm2678_vm1, %v2243_v1, -inf  ;;  %v20780_v33 = vld [vmem:[#allocation17_spill] sm:$0xff] }
 0x36c   : >> { %v3574_v34 = vmax.f32 %v3572_v37, %v3573_v43  ;;  %v3637_v46 = vmax.f32 %v20778_v23, %v3567_v15  ;;  %v3046_v8 = vrot.slane %v3045_v19, 2  ;;  %v3052_v56 = vmax.f32 %v3050_v36, %v3051_v25  ;;  %v1930_v15 = vpop.f32.mrf.mxu1 }
 0x36d   : >> { %v3700_v24 = vpack.c.bf16 %v3636_v51, %v3636_v51  ;;  %v19167_v12 = vunpack.c.l.b16 %v3699_v31  ;;  %v3059_v62 = vmax.f32 %v3057_v4, %v3058_v42  ;;  %v3065_v29 = vrot.slane %v3064_v9, 4 }
 0x36e   : >> { %v3638_v18 = vmax.f32 %v20779_v45, %v3574_v34  ;;  %v3701_v20 = vpack.c.bf16 %v3637_v46, %v3637_v46  ;;  %v3047_v0 = vmax.f32 %v3045_v19, %v3046_v8  ;;  %v3053_v50 = vrot.slane %v3052_v56, 2  ;;  %v20781_v34 = vld [vmem:[#allocation20_spill] sm:$0xff] }
 0x36f   : >> { %v19172_v30 = vmax.f32 %v20780_v33, %v19116_v53  ;;  %v19174_v40 = vunpack.c.l.b16 %v3700_v24  ;;  %v4020_v11 = vsel %vm3967_vm5, %v19167_v12, %v4019_v22  ;;  %v3060_v26 = vrot.slane %v3059_v62, 2  ;;  %v20783_v33 = vld [vmem:[#allocation23_spill] sm:$0xff] }
 0x370   : >> { %v3702_v37 = vpack.c.bf16 %v3638_v18, %v3638_v18  ;;  %v19178_v1 = vunpack.c.l.b16 %v3701_v20  ;;  %v3048_v5 = vrot.slane %v3047_v0, 1  ;;  %v3054_v59 = vmax.f32 %v3052_v56, %v3053_v50 }
 0x371   : >> { %v3689_v49 = vpack.c.bf16 %v19140_v7, %v19140_v7  ;;  %v4021_v36 = vsel %vm3969_vm6, %v19174_v40, %v4020_v11  ;;  %v3061_v4 = vmax.f32 %v3059_v62, %v3060_v26  ;;  %v3066_v53 = vmax.f32 %v3064_v9, %v3065_v29 }
 0x372   : >> { %v19184_v43 = vunpack.c.l.b16 %v3688_v3  ;;  %v19186_v19 = vunpack.c.l.b16 %v3702_v37  ;;  %v4022_v22 = vsel %vm3971_vm7, %v19178_v1, %v4021_v36  ;;  %v3049_v25 = vmax.f32 %v3047_v0, %v3048_v5  ;;  %v20782_v0 = vld [vmem:[#allocation21_spill] sm:$0xff] }
 0x373   : >> { %v4179_v51 = vsel %vm3965_vm4, %v19130_v55, %v19111_v41  ;;  %v3055_v7 = vrot.slane %v3054_v59, 1  ;;  %v3062_v31 = vrot.slane %v3061_v4, 1  ;;  %v3067_v42 = vrot.slane %v3066_v53, 2 }
 0x374   : >> { %v3690_v9 = vpack.c.bf16 %v19172_v30, %v19172_v30  ;;  %v4023_v3 = vsel %vm3973_vm8, %v19186_v19, %v4022_v22  ;;  %v3595_v23 = vmax.f32 %v20781_v34, %v3049_v25  ;;  %v1931_v46 = vadd.f32 %v18982_v48, %v1930_v15  ;;  %v20784_v25 = vld [vmem:[#allocation24_spill] sm:$0xff] }
 0x375   : >> { %v4031_v8 = vpack.c.b16 %v4023_v3, %v4023_v3  ;;  %v3056_v56 = vmax.f32 %v3054_v59, %v3055_v7  ;;  %v3063_v24 = vmax.f32 %v3061_v4, %v3062_v31  ;;  %v3068_v62 = vmax.f32 %v3066_v53, %v3067_v42 }
 0x376   : >> { %v4180_v41 = vsel %vm3967_vm5, %v19133_v57, %v4179_v51  ;;  %v3659_v29 = vpack.c.bf16 %v3595_v23, %v3595_v23  ;;  %v3984_v45 = vsel %vm3965_vm4, %v19102_v60, %v19092_v61  ;;  %v1971_v18 = vmax.f32 %v1931_v46, 0.0 }
 0x377   : >> { %13466 = vst [vmem:[%s18675_s23 + $0xb4] sm:$0xf] %v4031_v8  ;;  %v3069_v20 = vrot.slane %v3068_v62, 1  ;;  %v3596_v50 = vmax.f32 %v20782_v0, %v3056_v56  ;;  %v3597_v11 = vmax.f32 %v20783_v33, %v3063_v24  ;;  %v4171_v48 = vsel %vm3963_vm3, %v19102_v60, %v19105_v52 }
 0x378   : >> { %v19210_v26 = vunpack.c.l.b16 %v3689_v49  ;;  %v3789_v37 = vunpack.c.l.b16 %v3659_v29  ;;  %v2499_v5 = vcombine.high %v1971_v18, %v1971_v18  ;;  %v2506_v59 = vrot.slane %v1971_v18, %v18349_v27 }
 0x379   : >> { %v4181_v61 = vsel %vm3969_vm6, %v19135_v54, %v4180_v41  ;;  %v3070_v36 = vmax.f32 %v3068_v62, %v3069_v20  ;;  %v3660_v4 = vpack.c.bf16 %v3596_v50, %v3596_v50  ;;  %v3661_v53 = vpack.c.bf16 %v3597_v11, %v3597_v11 }
 0x37a   : >> { %v3985_v15 = vsel %vm3967_vm5, %v3789_v37, %v3984_v45  ;;  %v4067_v22 = vsel %vm3967_vm5, %v19102_v60, %v19096_v16  ;;  %v4172_v52 = vsel %vm3965_vm4, %v3789_v37, %v4171_v48  ;;  %v2513_v49 = vrot.slane %v2499_v5, %v18349_v27 }
 0x37b   : >> { %v3598_v51 = vmax.f32 %v20784_v25, %v3070_v36  ;;  %v3790_v7 = vunpack.c.l.b16 %v3660_v4  ;;  %v3791_v31 = vunpack.c.l.b16 %v3661_v53  ;;  %v2514_v42 = vcombine.high %v2506_v59, %v2506_v59 }
 0x37c   : >> { %v4010_v3 = vsel %vm3961_vm2, %v19184_v43, %v19146_v28  ;;  %v2515_v34 = vcombine.high %v2513_v49, %v2513_v49  ;;  %v3491_v23 = vsel %vm2678_vm1, %v2506_v59, -inf  ;;  %v3505_v46 = vsel %vm2678_vm1, %v2513_v49, -inf }
 0x37d   : >> { %v3662_v8 = vpack.c.bf16 %v3598_v51, %v3598_v51  ;;  %v3986_v16 = vsel %vm3969_vm6, %v3790_v7, %v3985_v15  ;;  %v4068_v60 = vsel %vm3969_vm6, %v3789_v37, %v4067_v22  ;;  %v4173_v56 = vsel %vm3967_vm5, %v3790_v7, %v4172_v52 }
 0x37e   : >> { %v4182_v24 = vsel %vm3971_vm7, %v19142_v10, %v4181_v61  ;;  %v3987_v62 = vsel %vm3971_vm7, %v3791_v31, %v3986_v16  ;;  %v4174_v41 = vsel %vm3969_vm6, %v3791_v31, %v4173_v56  ;;  %v3492_v29 = vrot.slane %v3491_v23, 4 }
 0x37f   : >> { %v3792_v45 = vunpack.c.l.b16 %v3662_v8  ;;  %v3498_v18 = vsel %vm2678_vm1, %v2514_v42, -inf  ;;  %v3506_v20 = vrot.slane %v3505_v46, 4  ;;  %v3512_v0 = vsel %vm2678_vm1, %v2515_v34, -inf }
 0x380   : >> { %v4069_v50 = vsel %vm3971_vm7, %v3790_v7, %v4068_v60  ;;  %v3493_v33 = vmax.f32 %v3491_v23, %v3492_v29  ;;  %v3499_v11 = vrot.slane %v3498_v18, 4  ;;  %v3513_v48 = vrot.slane %v3512_v0, 4 }
 0x381   : >> { %v3988_v37 = vsel %vm3973_vm8, %v3792_v45, %v3987_v62  ;;  %v4071_v10 = vsel %vm3961_vm2, %v19030_v2, %v3792_v45  ;;  %v4175_v5 = vsel %vm3971_vm7, %v3792_v45, %v4174_v41  ;;  %v3507_v59 = vmax.f32 %v3505_v46, %v3506_v20 }
 0x382   : >> { %v4026_v61 = vpack.c.b16 %v3988_v37, %v3988_v37  ;;  %v4072_v36 = vsel %vm3963_vm3, %v19032_v17, %v4071_v10  ;;  %v4176_v4 = vsel %vm3973_vm8, %v19030_v2, %v4175_v5  ;;  %v3494_v53 = vrot.slane %v3493_v33, 2 }
 0x383   : >> { %v4073_v15 = vsel %vm3965_vm4, %v19048_v58, %v4072_v36  ;;  %v4210_v22 = vpack.c.b16 %v4182_v24, %v4176_v4  ;;  %v3500_v52 = vmax.f32 %v3498_v18, %v3499_v11  ;;  %v3508_v49 = vrot.slane %v3507_v59, 2 }
 0x384   : >> { %13461 = vst [vmem:[%s18675_s23 + $0xa0] sm:$0xf] %v4026_v61  ;;  %v4070_v25 = vsel %vm3973_vm8, %v3791_v31, %v4069_v50  ;;  %v4074_v51 = vsel %vm3967_vm5, %v19065_v35, %v4073_v15  ;;  %v3495_v7 = vmax.f32 %v3493_v33, %v3494_v53  ;;  %v3514_v42 = vmax.f32 %v3512_v0, %v3513_v48 }
 0x385   : >> { %v4075_v17 = vsel %vm3969_vm6, %v19130_v55, %v4074_v51  ;;  %v4221_v34 = vsel %vm18781_vm13, %v4210_v22, 0  ;;  %v3501_v58 = vrot.slane %v3500_v52, 2  ;;  %v3509_v23 = vmax.f32 %v3507_v59, %v3508_v49 }
 0x386   : >> { %v4076_v46 = vsel %vm3971_vm7, %v19133_v57, %v4075_v17  ;;  %v13487_v8 = vcombine.low %v4221_v34, %v4221_v34  ;;  %v13488_v31 = vcombine.high %v4221_v34, %v4221_v34  ;;  %v3496_v16 = vrot.slane %v3495_v7, 1 }
 0x387   : >> { %v4077_v35 = vsel %vm3973_vm8, %v19135_v54, %v4076_v46  ;;  %v3502_v60 = vmax.f32 %v3500_v52, %v3501_v58  ;;  %v3510_v56 = vrot.slane %v3509_v23, 1  ;;  %v3515_v24 = vrot.slane %v3514_v42, 2 }
 0x388   : >> { %v3406_v55 = vmax.f32 %v19005_v21, %v3405_v44  ;;  %v3820_v62 = vunpack.c.l.b16 %v3690_v9  ;;  %v4105_v41 = vpack.c.b16 %v4077_v35, %v4070_v25  ;;  %13498 = vst [vmem:[%s18675_s23 + $0x130] sm:$0xf] %v13487_v8  ;;  %13499 = vst [vmem:[%s18675_s23 + $0x134] sm:$0xf] %v13488_v31  ;;  %v3497_v57 = vmax.f32 %v3495_v7, %v3496_v16 }
 0x389   : >> { %v4204_v29 = vsel %vm3963_vm3, %v19082_v47, %v19079_v14  ;;  %v3503_v54 = vrot.slane %v3502_v60, 1  ;;  %v3511_v45 = vmax.f32 %v3509_v23, %v3510_v56  ;;  %v3516_v18 = vmax.f32 %v3514_v42, %v3515_v24 }
 0x38a   : >> { %v4011_v21 = vsel %vm3963_vm3, %v19210_v26, %v4010_v3  ;;  %v4196_v44 = vsel %vm3961_vm2, %v19210_v26, %v19184_v43  ;;  %v4116_v9 = vsel %vm18800_vm14, 0, %v4105_v41  ;;  %v3627_v20 = vmax.f32 %v19003_v39, %v3497_v57 }
 0x38b   : >> { %v13469_v0 = vcombine.low %v4116_v9, %v4116_v9  ;;  %v13470_v50 = vcombine.high %v4116_v9, %v4116_v9  ;;  %v3504_v14 = vmax.f32 %v3502_v60, %v3503_v54  ;;  %v3517_v33 = vrot.slane %v3516_v18, 1 }
 0x38c   : >> { %v4091_v11 = vsel %vm3963_vm3, %v19184_v43, %v19146_v28  ;;  %v4205_v3 = vsel %vm3965_vm4, %v19167_v12, %v4204_v29  ;;  %v3629_v48 = vmax.f32 %v19011_v13, %v3511_v45  ;;  %v3691_v37 = vpack.c.bf16 %v3627_v20, %v3627_v20 }
 0x38d   : >> { %13479 = vst [vmem:[%s18675_s23 + $0x10] sm:$0xf] %v13469_v0  ;;  %13480 = vst [vmem:[%s18675_s23 + $0x14] sm:$0xf] %v13470_v50  ;;  %v3518_v10 = vmax.f32 %v3516_v18, %v3517_v33  ;;  %v3628_v5 = vmax.f32 %v19009_v63, %v3504_v14  ;;  %v4012_v39 = vsel %vm3965_vm4, %v3820_v62, %v4011_v21 }
 0x38e   : >> { %v4197_v59 = vsel %vm3963_vm3, %v3820_v62, %v4196_v44  ;;  %v3693_v61 = vpack.c.bf16 %v3629_v48, %v3629_v48  ;;  %v3821_v36 = vunpack.c.l.b16 %v3691_v37  ;;  %v4092_v28 = vsel %vm3965_vm4, %v19210_v26, %v4091_v11 }
 0x38f   : >> { %v3630_v43 = vmax.f32 %v3406_v55, %v3518_v10  ;;  %v3692_v4 = vpack.c.bf16 %v3628_v5, %v3628_v5  ;;  %v4206_v13 = vsel %vm3967_vm5, %v19174_v40, %v4205_v3  ;;  %v4093_v49 = vsel %vm3967_vm5, %v3820_v62, %v4092_v28 }
 0x390   : >> { %v3823_v53 = vunpack.c.l.b16 %v3693_v61  ;;  %v4013_v15 = vsel %vm3967_vm5, %v3821_v36, %v4012_v39  ;;  %v4198_v22 = vsel %vm3965_vm4, %v3821_v36, %v4197_v59  ;;  %v4207_v25 = vsel %vm3969_vm6, %v19178_v1, %v4206_v13 }
 0x391   : >> { %v3694_v63 = vpack.c.bf16 %v3630_v43, %v3630_v43  ;;  %v3822_v52 = vunpack.c.l.b16 %v3692_v4  ;;  %v4094_v58 = vsel %vm3969_vm6, %v3821_v36, %v4093_v49  ;;  %v4208_v8 = vsel %vm3971_vm7, %v19186_v19, %v4207_v25 }
 0x393   : >> { %v3824_v51 = vunpack.c.l.b16 %v3694_v63  ;;  %v4014_v26 = vsel %vm3969_vm6, %v3822_v52, %v4013_v15  ;;  %v4199_v7 = vsel %vm3967_vm5, %v3822_v52, %v4198_v22  ;;  %v4095_v24 = vsel %vm3971_vm7, %v3822_v52, %v4094_v58 }
 0x394   : >> { %v4015_v42 = vsel %vm3971_vm7, %v3823_v53, %v4014_v26  ;;  %v4200_v17 = vsel %vm3969_vm6, %v3823_v53, %v4199_v7  ;;  %v4096_v41 = vsel %vm3973_vm8, %v3823_v53, %v4095_v24 }
 0x395   : >> { %v4016_v34 = vsel %vm3973_vm8, %v3824_v51, %v4015_v42  ;;  %v4097_v23 = vsel %vm3961_vm2, %v19053_v32, %v3824_v51  ;;  %v4201_v46 = vsel %vm3971_vm7, %v3824_v51, %v4200_v17 }
 0x396   : >> { %v4030_v31 = vpack.c.b16 %v4016_v34, %v4016_v34  ;;  %v4098_v16 = vsel %vm3963_vm3, %v19042_v38, %v4097_v23  ;;  %v4202_v35 = vsel %vm3973_vm8, %v19053_v32, %v4201_v46 }
 0x397   : >> { %v4099_v60 = vsel %vm3965_vm4, %v19056_v6, %v4098_v16  ;;  %v4212_v56 = vpack.c.b16 %v4208_v8, %v4202_v35 }
 0x398   : >> { %13465 = vst [vmem:[%s18675_s23 + $0xb0] sm:$0xf] %v4030_v31  ;;  %v4100_v19 = vsel %vm3967_vm5, %v19082_v47, %v4099_v60 }
 0x399   : >> { %v4101_v55 = vsel %vm3969_vm6, %v19167_v12, %v4100_v19  ;;  %v4223_v38 = vsel %vm18781_vm13, %v4212_v56, 0 }
 0x39a   : >> { %v4102_v32 = vsel %vm3971_vm7, %v19174_v40, %v4101_v55  ;;  %v13491_v62 = vcombine.low %v4223_v38, %v4223_v38  ;;  %v13492_v6 = vcombine.high %v4223_v38, %v4223_v38  ;;  %v20787_v40 = vmov (%p1588_p11), 0  }
 0x39b   : >> { %v4103_v57 = vsel %vm3973_vm8, %v19178_v1, %v4102_v32  ;;  %4263 = vst [vmem:[#allocation3] sm:$0xf] (%p1588_p11), %v20787_v40  ;;  %4264 = vst [vmem:[#allocation3 + $0x4] sm:$0xf] (%p1588_p11), %v20787_v40 }
 0x39c   : >> { %v4107_v29 = vpack.c.b16 %v4103_v57, %v4096_v41  ;;  %13502 = vst [vmem:[%s18675_s23 + $0x140] sm:$0xf] %v13491_v62  ;;  %13503 = vst [vmem:[%s18675_s23 + $0x144] sm:$0xf] %v13492_v6 }
 0x39d   : > { %1590 = sbr.rel (!%p1588_p11) target bundleno = 336 (0x150), region = 187  ;;  %4265 = vst [vmem:[#allocation3 + $0x8] sm:$0xf] (%p1588_p11), %v20787_v40  ;;  %4266 = vst [vmem:[#allocation3 + $0xc] sm:$0xf] (%p1588_p11), %v20787_v40 }
 0x39e   : >> { %v4118_v47 = vsel %vm18800_vm14, 0, %v4107_v29  ;;  %4267 = vst [vmem:[#allocation3 + $0x10] sm:$0xf] (%p1588_p11), %v20787_v40  ;;  %4268 = vst [vmem:[#allocation3 + $0x14] sm:$0xf] (%p1588_p11), %v20787_v40 }
 0x39f   : >> { %v13473_v12 = vcombine.low %v4118_v47, %v4118_v47  ;;  %v13474_v54 = vcombine.high %v4118_v47, %v4118_v47  ;;  %4269 = vst [vmem:[#allocation3 + $0x18] sm:$0xf] (%p1588_p11), %v20787_v40  ;;  %4270 = vst [vmem:[#allocation3 + $0x1c] sm:$0xf] (%p1588_p11), %v20787_v40 }
 0x3a0   : > { %4271 = vst [vmem:[#allocation3 + $0x20] sm:$0xf] (%p1588_p11), %v20787_v40  ;;  %4272 = vst [vmem:[#allocation3 + $0x24] sm:$0xf] (%p1588_p11), %v20787_v40 }
 0x3a1   : >> { %13483 = vst [vmem:[%s18675_s23 + $0x20] sm:$0xf] %v13473_v12  ;;  %13484 = vst [vmem:[%s18675_s23 + $0x24] sm:$0xf] %v13474_v54 }
 0x3a2   : > { %4273 = vst [vmem:[#allocation3 + $0x28] sm:$0xf] %v20787_v40  ;;  %4274 = vst [vmem:[#allocation3 + $0x2c] sm:$0xf] %v20787_v40 }
 0x3a3   : > { %4275 = vst [vmem:[#allocation3 + $0x30] sm:$0xf] %v20787_v40  ;;  %4276 = vst [vmem:[#allocation3 + $0x34] sm:$0xf] %v20787_v40 }
 0x3a4   : > { %4277 = vst [vmem:[#allocation3 + $0x38] sm:$0xf] %v20787_v40  ;;  %4278 = vst [vmem:[#allocation3 + $0x3c] sm:$0xf] %v20787_v40 }
 0x3a5   : > { %4279 = vst [vmem:[#allocation3 + $0x40] sm:$0xf] %v20787_v40  ;;  %4280 = vst [vmem:[#allocation3 + $0x44] sm:$0xf] %v20787_v40 }
 0x3a6   : > { %4281 = vst [vmem:[#allocation3 + $0x48] sm:$0xf] %v20787_v40  ;;  %4282 = vst [vmem:[#allocation3 + $0x4c] sm:$0xf] %v20787_v40 }
 0x3a7   : > { %4283 = vst [vmem:[#allocation3 + $0x50] sm:$0xf] %v20787_v40  ;;  %4284 = vst [vmem:[#allocation3 + $0x54] sm:$0xf] %v20787_v40 }
 0x3a8   : > { %4285 = vst [vmem:[#allocation3 + $0x58] sm:$0xf] %v20787_v40  ;;  %4286 = vst [vmem:[#allocation3 + $0x5c] sm:$0xf] %v20787_v40 }
 0x3a9   : > { %4287 = vst [vmem:[#allocation3 + $0x60] sm:$0xf] %v20787_v40  ;;  %4288 = vst [vmem:[#allocation3 + $0x64] sm:$0xf] %v20787_v40 }
 0x3aa   : > { %4289 = vst [vmem:[#allocation3 + $0x68] sm:$0xf] %v20787_v40  ;;  %4290 = vst [vmem:[#allocation3 + $0x6c] sm:$0xf] %v20787_v40 }
 0x3ab   : > { %4291 = vst [vmem:[#allocation3 + $0x70] sm:$0xf] %v20787_v40  ;;  %4292 = vst [vmem:[#allocation3 + $0x74] sm:$0xf] %v20787_v40 }
 0x3ac LB: >> { %v15600_v1 = vld [vmem:[%s20718_s3 + $0x138] sm:$0xff]   ;;  %v15603_v18 = vld [vmem:[%s20718_s3 + $0x130] sm:$0xff]   ;;  %v15606_v30 = vld [vmem:[%s20718_s3 + $0x128] sm:$0xff]   ;;  %s14778_s20 = sshll.u32 %s16512_s24, 6  ;;  %vm7242_vm15 = vcmask 1043456   ;;  %s14823_s22 = sshll.u32 %s16512_s24, 4  ;;  %s16512_s24 = sphi %s19367_s24, %s4298_s24  }
 0x3ad   : >> { %v15601_v2 = vld [vmem:[%s20718_s3 + $0x178] sm:$0xff]   ;;  %14844 = vmatprep.subr.bf16.mxu0 %v15600_v1  ;;  %v15604_v21 = vld [vmem:[%s20718_s3 + $0x170] sm:$0xff]   ;;  %v15607_v9 = vld [vmem:[%s20718_s3 + $0x168] sm:$0xff]   ;;  %s19442_s23 = scalar_lea.vmem [#allocation2], %s14778_s20  ;;  %vm7243_vm0 = vsmask.f32 3328 }
 0x3ae   : >> { %v15602_v45 = vld [vmem:[%s20718_s3 + $0xf8] sm:$0xff]   ;;  %15329 = vmatprep.subr.bf16.mxu1 %v15601_v2  ;;  %v15605_v44 = vld [vmem:[%s20718_s3 + $0xf0] sm:$0xff]   ;;  %v15608_v20 = vld [vmem:[%s20718_s3 + $0xe8] sm:$0xff]   ;;  %s19840_s30 = scalar_lea.vmem [#allocation3], %s14823_s22  ;;  %s4298_s24 = sadd.s32 1, %s16512_s24  }
 0x3af   : >> { %14845 = vmatpush3.bf16.msra.mxu0 %v15602_v45  ;;  %15330 = vmatpush3.bf16.msra.mxu1 %v15601_v2  ;;  %v15609_v0 = vld [vmem:[%s20718_s3 + $0x120] sm:$0xff]   ;;  %v15612_v33 = vld [vmem:[%s20718_s3 + $0x118] sm:$0xff]   ;;  %v15615_v48 = vld [vmem:[%s20718_s3 + $0x110] sm:$0xff]   ;;  %p4295_p12 = scmp.ge.s32.totalorder %s4298_s24, 2  }
 0x3b0   : >> { %14846 = vmatprep.subr.bf16.mxu0 %v15603_v18  ;;  %15331 = vmatprep.subr.bf16.mxu1 %v15604_v21  ;;  %v15610_v50 = vld [vmem:[%s20718_s3 + $0x160] sm:$0xff]   ;;  %v15613_v11 = vld [vmem:[%s20718_s3 + $0x158] sm:$0xff]   ;;  %v15616_v37 = vld [vmem:[%s20718_s3 + $0x150] sm:$0xff]  }
 0x3b1   : >> { %v15611_v14 = vld [vmem:[%s20718_s3 + $0xe0] sm:$0xff]   ;;  %v15614_v3 = vld [vmem:[%s20718_s3 + $0xd8] sm:$0xff]   ;;  %v15617_v10 = vld [vmem:[%s20718_s3 + $0xd0] sm:$0xff]  }
 0x3b2   : >> { %v15618_v5 = vld [vmem:[%s20718_s3 + $0x108] sm:$0xff]   ;;  %v15621_v61 = vld [vmem:[%s20718_s3 + $0x100] sm:$0xff]   ;;  %v15624_v28 = vld [vmem:[%s19442_s23 + $0x98] sm:$0xff]  }
 0x3b3   : >> { %14847 = vmatpush3.bf16.msra.mxu0 %v15605_v44  ;;  %15332 = vmatpush3.bf16.msra.mxu1 %v15604_v21  ;;  %v15619_v39 = vld [vmem:[%s20718_s3 + $0x148] sm:$0xff]   ;;  %v15622_v36 = vld [vmem:[%s20718_s3 + $0x140] sm:$0xff]   ;;  %v15628_v13 = vld [vmem:[%s20718_s3 + $0x78] sm:$0xff]  }
 0x3b4   : >> { %14848 = vmatprep.subr.bf16.mxu0 %v15606_v30  ;;  %15333 = vmatprep.subr.bf16.mxu1 %v15607_v9  ;;  %v15620_v59 = vld [vmem:[%s20718_s3 + $0xc8] sm:$0xff]   ;;  %v15623_v4 = vld [vmem:[%s20718_s3 + $0xc0] sm:$0xff]   ;;  %v15629_v15 = vld [vmem:[%s20718_s3 + $0xb8] sm:$0xff]  }
 0x3b5   : >> { %v15625_v43 = vld [vmem:[%s19442_s23 + $0x128] sm:$0xff]   ;;  %4976 = vmatprep.mubr.bf16.mxu0 %v15624_v28  ;;  %v15627_v22 = vld [vmem:[%s19442_s23 + $0x130] sm:$0xff]   ;;  %v15630_v63 = vld [vmem:[%s20718_s3 + $0x38] sm:$0xff]  }
 0x3b6   : >> { %15345 = vmatprep.mubr.bf16.mxu1 %v15625_v43  ;;  %v15626_v53 = vld [vmem:[%s19442_s23 + $0x8] sm:$0xff]   ;;  %v15631_v52 = vld [vmem:[%s20718_s3 + $0x70] sm:$0xff]   ;;  %v15633_v49 = vld [vmem:[%s19442_s23 + $0xa0] sm:$0xff]  }
 0x3b7   : >> { %14849 = vmatpush3.bf16.msra.mxu0 %v15608_v20  ;;  %15334 = vmatpush3.bf16.msra.mxu1 %v15607_v9  ;;  %v15634_v25 = vld [vmem:[%s19442_s23 + $0x138] sm:$0xff]   ;;  %v15632_v51 = vld [vmem:[%s20718_s3 + $0x30] sm:$0xff]   ;;  %v15637_v7 = vld [vmem:[%s20718_s3 + $0x68] sm:$0xff]  }
 0x3b8   : >> { %14850 = vmatprep.subr.bf16.mxu0 %v15609_v0  ;;  %15335 = vmatprep.subr.bf16.mxu1 %v15610_v50  ;;  %v15635_v26 = vld [vmem:[%s19442_s23 + $0x10] sm:$0xff]   ;;  %v15636_v17 = vld [vmem:[%s19442_s23 + $0x140] sm:$0xff]   ;;  %v15639_v34 = vld [vmem:[%s20718_s3 + $0x28] sm:$0xff]  }
 0x3b9   : >> { %v15638_v42 = vld [vmem:[%s20718_s3 + $0xb0] sm:$0xff]   ;;  %v15640_v58 = vld [vmem:[%s20718_s3 + $0x60] sm:$0xff]   ;;  %v15642_v23 = vld [vmem:[%s19442_s23 + $0xa8] sm:$0xff]  }
 0x3ba   : >> { %v15643_v46 = vld [vmem:[%s19442_s23 + $0x148] sm:$0xff]   ;;  %v15641_v8 = vld [vmem:[%s20718_s3 + $0x20] sm:$0xff]   ;;  %v15644_v31 = vld [vmem:[%s19442_s23 + $0x18] sm:$0xff]  }
 0x3bb   : >> { %14851 = vmatpush3.bf16.msra.mxu0 %v15611_v14  ;;  %15336 = vmatpush3.bf16.msra.mxu1 %v15610_v50  ;;  %v15645_v16 = vld [vmem:[%s19442_s23 + $0x150] sm:$0xff]   ;;  %v15646_v35 = vld [vmem:[%s20718_s3 + $0x58] sm:$0xff]   ;;  %v15647_v60 = vld [vmem:[%s20718_s3 + $0xa8] sm:$0xff]  }
 0x3bc   : >> { %14852 = vmatprep.subr.bf16.mxu0 %v15612_v33  ;;  %15337 = vmatprep.subr.bf16.mxu1 %v15613_v11  ;;  %v15648_v56 = vld [vmem:[%s20718_s3 + $0x18] sm:$0xff]   ;;  %v15649_v24 = vld [vmem:[%s20718_s3 + $0x50] sm:$0xff]   ;;  %v15653_v32 = vld [vmem:[%s19442_s23 + $0x20] sm:$0xff]  }
 0x3bd   : >> { %v15650_v19 = vld [vmem:[%s20718_s3 + $0x10] sm:$0xff]   ;;  %v15652_v38 = vld [vmem:[%s19442_s23 + $0x158] sm:$0xff]   ;;  %v15654_v62 = vld [vmem:[%s19442_s23 + $0x160] sm:$0xff]  }
 0x3be   : >> { %v15651_v55 = vld [vmem:[%s19442_s23 + $0xb0] sm:$0xff]   ;;  %v15655_v6 = vld [vmem:[%s20718_s3 + $0x48] sm:$0xff]   ;;  %v15656_v41 = vld [vmem:[%s20718_s3 + $0xa0] sm:$0xff]  }
 0x3bf   : >> { %14853 = vmatpush3.bf16.msra.mxu0 %v15614_v3  ;;  %15338 = vmatpush3.bf16.msra.mxu1 %v15613_v11  ;;  %v15657_v57 = vld [vmem:[%s20718_s3 + $0x8] sm:$0xff]   ;;  %v15658_v29 = vld [vmem:[%s20718_s3 + $0x40] sm:$0xff]   ;;  %v15660_v12 = vld [vmem:[%s19442_s23 + $0xb8] sm:$0xff]  }
 0x3c0   : >> { %14854 = vmatprep.subr.bf16.mxu0 %v15615_v48  ;;  %15339 = vmatprep.subr.bf16.mxu1 %v15616_v37  ;;  %v15659_v47 = vld [vmem:[%s20718_s3] sm:$0xff]   ;;  %v15661_v54 = vld [vmem:[%s19442_s23 + $0x90] sm:$0xff]   ;;  %v15662_v40 = vld [vmem:[%s19442_s23 + $0x28] sm:$0xff]  }
 0x3c1   : >> { %v15663_v1 = vld [vmem:[%s19442_s23] sm:$0xff]   ;;  %v15664_v2 = vld [vmem:[%s20718_s3 + $0x98] sm:$0xff]   ;;  %v15667_v21 = vld [vmem:[%s19442_s23 + $0x30] sm:$0xff]  }
 0x3c2   : >> { %v15665_v45 = vld [vmem:[%s19442_s23 + $0xc0] sm:$0xff]   ;;  %v15666_v18 = vld [vmem:[%s19442_s23 + $0x98] sm:$0xff]   ;;  %v15669_v44 = vld [vmem:[%s20718_s3 + $0x90] sm:$0xff]  }
 0x3c3   : >> { %14855 = vmatpush3.bf16.msra.mxu0 %v15617_v10  ;;  %15340 = vmatpush3.bf16.msra.mxu1 %v15616_v37  ;;  %v15668_v30 = vld [vmem:[%s19442_s23 + $0x8] sm:$0xff]   ;;  %v15671_v20 = vld [vmem:[%s19442_s23 + $0xa0] sm:$0xff]   ;;  %v15672_v50 = vld [vmem:[%s19442_s23 + $0x38] sm:$0xff]  }
 0x3c4   : >> { %14856 = vmatprep.subr.bf16.mxu0 %v15618_v5  ;;  %15341 = vmatprep.subr.bf16.mxu1 %v15619_v39  ;;  %v15670_v9 = vld [vmem:[%s19442_s23 + $0xc8] sm:$0xff]   ;;  %v15673_v14 = vld [vmem:[%s19442_s23 + $0x10] sm:$0xff]   ;;  %v15679_v11 = vld [vmem:[%s20718_s3 + $0x80] sm:$0xff]  }
 0x3c5   : >> { %v15674_v0 = vld [vmem:[%s20718_s3 + $0x88] sm:$0xff]   ;;  %v15675_v33 = vld [vmem:[%s19442_s23 + $0xd0] sm:$0xff]   ;;  %v15684_v48 = vld [vmem:[%s20718_s3 + $0x1f8] sm:$0xff]  }
 0x3c6   : >> { %v15676_v3 = vld [vmem:[%s19442_s23 + $0xa8] sm:$0xff]   ;;  %v15677_v37 = vld [vmem:[%s19442_s23 + $0x40] sm:$0xff]   ;;  %v15678_v10 = vld [vmem:[%s19442_s23 + $0x18] sm:$0xff]  }
 0x3c7   : >> { %14857 = vmatpush3.bf16.msra.mxu0 %v15620_v59  ;;  %15342 = vmatpush3.bf16.msra.mxu1 %v15619_v39  ;;  %v15686_v5 = vld [vmem:[%s20718_s3 + $0x238] sm:$0xff]   ;;  %v15680_v39 = vld [vmem:[%s19442_s23 + $0xb0] sm:$0xff]   ;;  %v15681_v59 = vld [vmem:[%s19442_s23 + $0x120] sm:$0xff]  }
 0x3c8   : >> { %14858 = vmatprep.subr.bf16.mxu0 %v15621_v61  ;;  %15343 = vmatprep.subr.bf16.mxu1 %v15622_v36  ;;  %v15689_v61 = vld [vmem:[%s20718_s3 + $0x230] sm:$0xff]   ;;  %v15683_v28 = vld [vmem:[%s19442_s23 + $0x128] sm:$0xff]   ;;  %v15685_v43 = vld [vmem:[%s20718_s3 + $0x1b8] sm:$0xff]  }
 0x3c9   : >> { %vm19832_vm9 = vmand %vm7242_vm15, %vm7243_vm0 }
 0x3cb   : >> { %14859 = vmatpush3.bf16.msra.mxu0 %v15623_v4  ;;  %15344 = vmatpush3.bf16.msra.mxu1 %v15622_v36  ;;  %v15682_v36 = vld [vmem:[%s19442_s23 + $0x20] sm:$0xff]   ;;  %v15687_v4 = vld [vmem:[%s20718_s3 + $0x1f0] sm:$0xff]  }
 0x3cc   : >> { %14924 = vmatprep.subr.bf16.mxu1 %v15628_v13  ;;  %15361 = vmatprep.subr.bf16.mxu0 %v15629_v15  ;;  %v15690_v13 = vld [vmem:[%s19442_s23 + $0xb8] sm:$0xff]  }
 0x3ce   : >> { %4977 = vmatmul.mubr.bf16.vlgmr.msra.gmra.mxu0 %v15626_v53  ;;  %15346 = vmatmul.mubr.bf16.vlgmr.msra.gmra.mxu1 %v15627_v22  ;;  %v15696_v53 = vld [vmem:[%s20718_s3 + $0x228] sm:$0xff]   ;;  %v15699_v22 = vld [vmem:[%s20718_s3 + $0x220] sm:$0xff]  }
 0x3cf   : >> { %14925 = vmatpush3.bf16.msra.mxu1 %v15630_v63  ;;  %15362 = vmatpush3.bf16.msra.mxu0 %v15629_v15  ;;  %v15691_v15 = vld [vmem:[%s19442_s23 + $0x130] sm:$0xff]  }
 0x3d0   : >> { %14926 = vmatprep.subr.bf16.mxu1 %v15631_v52  ;;  %4984 = vmatprep.mubr.bf16.mxu0 %v15633_v49  ;;  %v15688_v63 = vld [vmem:[%s20718_s3 + $0x1b0] sm:$0xff]   ;;  %v15692_v52 = vld [vmem:[%s19442_s23 + $0x28] sm:$0xff]   ;;  %v15693_v49 = vld [vmem:[%s19442_s23 + $0x138] sm:$0xff]  }
 0x3d1   : >> { %15349 = vmatprep.mubr.bf16.mxu1 %v15634_v25  ;;  %15363 = vmatprep.subr.bf16.mxu0 %v15638_v42  ;;  %v15694_v25 = vld [vmem:[%s20718_s3 + $0x1e8] sm:$0xff]  }
 0x3d3   : >> { %14927 = vmatpush3.bf16.msra.mxu1 %v15632_v51  ;;  %15364 = vmatpush3.bf16.msra.mxu0 %v15638_v42  ;;  %v15695_v51 = vld [vmem:[%s20718_s3 + $0x1a8] sm:$0xff]   ;;  %v15701_v42 = vld [vmem:[%s19442_s23 + $0x140] sm:$0xff]  }
 0x3d4   : >> { %14928 = vmatprep.subr.bf16.mxu1 %v15637_v7  ;;  %15365 = vmatprep.subr.bf16.mxu0 %v15647_v60  ;;  %v15700_v7 = vld [vmem:[%s19442_s23 + $0xc0] sm:$0xff]  }
 0x3d6   : >> { %4985 = vmatmul.mubr.bf16.gmra.mxu0 %v15635_v26  ;;  %15350 = vmatmul.mubr.bf16.gmra.mxu1 %v15636_v17  ;;  %v15697_v26 = vld [vmem:[%s20718_s3 + $0x1e0] sm:$0xff]   ;;  %v15706_v17 = vld [vmem:[%s20718_s3 + $0x218] sm:$0xff]  }
 0x3d7   : >> { %14929 = vmatpush3.bf16.msra.mxu1 %v15639_v34  ;;  %4992 = vmatprep.mubr.bf16.mxu0 %v15642_v23  ;;  %v15698_v34 = vld [vmem:[%s20718_s3 + $0x1a0] sm:$0xff]   ;;  %v15702_v23 = vld [vmem:[%s19442_s23 + $0x30] sm:$0xff]  }
 0x3d8   : >> { %14930 = vmatprep.subr.bf16.mxu1 %v15640_v58  ;;  %15353 = vmatprep.mubr.bf16.mxu1 %v15643_v46  ;;  %v15704_v58 = vld [vmem:[%s20718_s3 + $0x1d8] sm:$0xff]   ;;  %v15703_v46 = vld [vmem:[%s19442_s23 + $0x148] sm:$0xff]  }
 0x3d9   : >> { %15366 = vmatpush3.bf16.msra.mxu0 %v15647_v60  ;;  %v15711_v60 = vld [vmem:[%s19442_s23 + $0x150] sm:$0xff]  }
 0x3da   : >> { %15367 = vmatprep.subr.bf16.mxu0 %v15656_v41 }
 0x3db   : >> { %14931 = vmatpush3.bf16.msra.mxu1 %v15641_v8  ;;  %v15709_v8 = vld [vmem:[%s20718_s3 + $0x210] sm:$0xff]  }
 0x3dc   : >> { %14932 = vmatprep.subr.bf16.mxu1 %v15646_v35  ;;  %v15710_v35 = vld [vmem:[%s19442_s23 + $0xc8] sm:$0xff]  }
 0x3dd   : >> { %15368 = vmatpush3.bf16.msra.mxu0 %v15656_v41  ;;  %v15720_v41 = vld [vmem:[%s19442_s23 + $0xa0] sm:$0xff]  }
 0x3de   : >> { %4993 = vmatmul.mubr.bf16.gmra.mxu0 %v15644_v31  ;;  %15354 = vmatmul.mubr.bf16.gmra.mxu1 %v15645_v16  ;;  %v15705_v31 = vld [vmem:[%s20718_s3 + $0x198] sm:$0xff]   ;;  %v15707_v16 = vld [vmem:[%s20718_s3 + $0x1d0] sm:$0xff]  }
 0x3df   : >> { %14933 = vmatpush3.bf16.msra.mxu1 %v15648_v56  ;;  %5000 = vmatprep.mubr.bf16.mxu0 %v15651_v55  ;;  %v15708_v56 = vld [vmem:[%s20718_s3 + $0x190] sm:$0xff]   ;;  %v15713_v55 = vld [vmem:[%s19442_s23 + $0x158] sm:$0xff]  }
 0x3e0   : >> { %14934 = vmatprep.subr.bf16.mxu1 %v15649_v24  ;;  %15357 = vmatprep.mubr.bf16.mxu1 %v15652_v38  ;;  %v15716_v24 = vld [vmem:[%s20718_s3 + $0x208] sm:$0xff]  }
 0x3e1   : >> { %15369 = vmatprep.subr.bf16.mxu0 %v15664_v2  ;;  %v15714_v38 = vld [vmem:[%s20718_s3 + $0x1c8] sm:$0xff]  }
 0x3e2   : >> { %15370 = vmatpush3.bf16.msra.mxu0 %v15664_v2  ;;  %v15726_v2 = vld [vmem:[%s19442_s23 + $0xb0] sm:$0xff]  }
 0x3e3   : >> { %14935 = vmatpush3.bf16.msra.mxu1 %v15650_v19  ;;  %15371 = vmatprep.subr.bf16.mxu0 %v15669_v44  ;;  %v15712_v19 = vld [vmem:[%s19442_s23 + $0x38] sm:$0xff]  }
 0x3e4   : >> { %14936 = vmatprep.subr.bf16.mxu1 %v15655_v6  ;;  %v15719_v6 = vld [vmem:[%s20718_s3 + $0x200] sm:$0xff]  }
 0x3e6   : >> { %5001 = vmatmul.mubr.bf16.gmra.mxu0 %v15653_v32  ;;  %15358 = vmatmul.mubr.bf16.gmra.mxu1 %v15654_v62  ;;  %v15715_v32 = vld [vmem:[%s20718_s3 + $0x188] sm:$0xff]   ;;  %v15717_v62 = vld [vmem:[%s20718_s3 + $0x1c0] sm:$0xff]  }
 0x3e7   : >> { %14937 = vmatpush3.bf16.msra.mxu1 %v15657_v57  ;;  %5008 = vmatprep.mubr.bf16.mxu0 %v15660_v12  ;;  %v15722_v57 = vld [vmem:[%s19442_s23 + $0x130] sm:$0xff]   ;;  %v15723_v12 = vld [vmem:[%s19442_s23 + $0x138] sm:$0xff]  }
 0x3e8   : >> { %14938 = vmatprep.subr.bf16.mxu1 %v15658_v29  ;;  %5314 = vmatprep.mubr.bf16.mxu1 %v15661_v54  ;;  %v15718_v29 = vld [vmem:[%s20718_s3 + $0x180] sm:$0xff]   ;;  %v15724_v54 = vld [vmem:[%s19442_s23 + $0xa8] sm:$0xff]  }
 0x3e9   : >> { %15372 = vmatpush3.bf16.msra.mxu0 %v15669_v44  ;;  %v15735_v44 = vld [vmem:[%s19442_s23 + $0x158] sm:$0xff]  }
 0x3ea   : >> { %15373 = vmatprep.subr.bf16.mxu0 %v15674_v0 }
 0x3eb   : >> { %14939 = vmatpush3.bf16.msra.mxu1 %v15659_v47  ;;  %v15721_v47 = vld [vmem:[%s19442_s23 + $0x10] sm:$0xff]  }
 0x3ec   : >> { %15393 = vmatprep.subr.bf16.mxu1 %v15686_v5 }
 0x3ed   : >> { %15374 = vmatpush3.bf16.msra.mxu0 %v15674_v0  ;;  %v15741_v0 = vld [vmem:[%s19442_s23 + $0x168] sm:$0xff]  }
 0x3ee   : >> { %5009 = vmatmul.mubr.bf16.gmra.mxu0 %v15662_v40  ;;  %5315 = vmatmul.mubr.bf16.vlgmr.msra.gmra.mxu1 %v15663_v1  ;;  %v15728_v40 = vld [vmem:[%s19442_s23 + $0x140] sm:$0xff]   ;;  %v15725_v1 = vld [vmem:[%s19442_s23 + $0x18] sm:$0xff]  }
 0x3ef   : >> { %5016 = vmatprep.mubr.bf16.mxu0 %v15665_v45  ;;  %5322 = vmatprep.mubr.bf16.mxu1 %v15666_v18  ;;  %v15729_v45 = vld [vmem:[%s19442_s23 + $0x148] sm:$0xff]   ;;  %v15734_v18 = vld [vmem:[%s19442_s23 + $0x150] sm:$0xff]  }
 0x3f0   : >> { %15375 = vmatprep.subr.bf16.mxu0 %v15679_v11  ;;  %15394 = vmatpush3.bf16.msra.mxu1 %v15686_v5 }
 0x3f1   : >> { %15376 = vmatpush3.bf16.msra.mxu0 %v15679_v11  ;;  %15395 = vmatprep.subr.bf16.mxu1 %v15689_v61  ;;  %v15737_v11 = vld [vmem:[%s19442_s23 + $0x38] sm:$0xff]  }
 0x3f2   : >> { %15004 = vmatprep.subr.bf16.mxu0 %v15684_v48  ;;  %v15739_v48 = vld [vmem:[%s19442_s23 + $0x40] sm:$0xff]  }
 0x3f4   : >> { %15396 = vmatpush3.bf16.msra.mxu1 %v15689_v61 }
 0x3f5   : >> { %15397 = vmatprep.subr.bf16.mxu1 %v15696_v53 }
 0x3f6   : >> { %5017 = vmatmul.mubr.bf16.gmra.mxu0 %v15667_v21  ;;  %5323 = vmatmul.mubr.bf16.gmra.mxu1 %v15668_v30  ;;  %v15727_v21 = vld [vmem:[%s19442_s23 + $0x20] sm:$0xff]   ;;  %v15730_v30 = vld [vmem:[%s19442_s23 + $0xb8] sm:$0xff]  }
 0x3f7   : >> { %5024 = vmatprep.mubr.bf16.mxu0 %v15670_v9  ;;  %5330 = vmatprep.mubr.bf16.mxu1 %v15671_v20  ;;  %v15740_v9 = vld [vmem:[%s19442_s23 + $0x160] sm:$0xff]   ;;  %v15731_v20 = vld [vmem:[%s19442_s23 + $0x28] sm:$0xff]  }
 0x3f8   : >> { %15398 = vmatpush3.bf16.msra.mxu1 %v15696_v53 }
 0x3f9   : >> { %15399 = vmatprep.subr.bf16.mxu1 %v15699_v22 }
 0x3fc   : >> { %15400 = vmatpush3.bf16.msra.mxu1 %v15699_v22 }
 0x3fd   : >> { %15401 = vmatprep.subr.bf16.mxu1 %v15706_v17 }
 0x3fe   : >> { %5025 = vmatmul.mubr.bf16.gmra.mxu0 %v15672_v50  ;;  %5331 = vmatmul.mubr.bf16.gmra.mxu1 %v15673_v14  ;;  %v15732_v50 = vld [vmem:[%s19442_s23 + $0xc0] sm:$0xff]   ;;  %v15733_v14 = vld [vmem:[%s19442_s23 + $0x30] sm:$0xff]  }
 0x3ff   : >> { %5032 = vmatprep.mubr.bf16.mxu0 %v15675_v33  ;;  %5338 = vmatprep.mubr.bf16.mxu1 %v15676_v3  ;;  %v15736_v33 = vld [vmem:[%s19442_s23 + $0xc8] sm:$0xff]   ;;  %v15738_v3 = vld [vmem:[%s19442_s23 + $0xd0] sm:$0xff]  }
 0x400   : >> { %15402 = vmatpush3.bf16.msra.mxu1 %v15706_v17 }
 0x401   : >> { %15403 = vmatprep.subr.bf16.mxu1 %v15709_v8 }
 0x404   : >> { %15404 = vmatpush3.bf16.msra.mxu1 %v15709_v8 }
 0x405   : >> { %15405 = vmatprep.subr.bf16.mxu1 %v15716_v24 }
 0x406   : >> { %5033 = vmatmul.mubr.bf16.gmra.mxu0 %v15677_v37  ;;  %5339 = vmatmul.mubr.bf16.gmra.mxu1 %v15678_v10  ;;  %v15742_v37 = vld [vmem:[%s19442_s23 + $0xd8] sm:$0xff]   ;;  %v15743_v10 = vld [vmem:[%s19442_s23 + $0x48] sm:$0xff]  }
 0x407   : >> { %5346 = vmatprep.mubr.bf16.mxu1 %v15680_v39  ;;  %15377 = vmatprep.mubr.bf16.mxu0 %v15681_v59 }
 0x408   : >> { %15406 = vmatpush3.bf16.msra.mxu1 %v15716_v24 }
 0x409   : >> { %15407 = vmatprep.subr.bf16.mxu1 %v15719_v6 }
 0x40c   : >> { %15408 = vmatpush3.bf16.msra.mxu1 %v15719_v6 }
 0x40e   : >> { %5347 = vmatmul.mubr.bf16.gmra.mxu1 %v15682_v36  ;;  %15378 = vmatmul.mubr.bf16.vlgmr.msra.gmra.mxu0 %v15683_v28 }
 0x40f   : >> { %15005 = vmatpush3.bf16.msra.mxu0 %v15685_v43  ;;  %5354 = vmatprep.mubr.bf16.mxu1 %v15690_v13 }
 0x410   : >> { %15006 = vmatprep.subr.bf16.mxu0 %v15687_v4  ;;  %15381 = vmatprep.mubr.bf16.mxu0 %v15691_v15 }
 0x413   : >> { %15007 = vmatpush3.bf16.msra.mxu0 %v15688_v63 }
 0x414   : >> { %15008 = vmatprep.subr.bf16.mxu0 %v15694_v25 }
 0x416   : >> { %5355 = vmatmul.mubr.bf16.gmra.mxu1 %v15692_v52  ;;  %15382 = vmatmul.mubr.bf16.gmra.mxu0 %v15693_v49 }
 0x417   : >> { %15009 = vmatpush3.bf16.msra.mxu0 %v15695_v51  ;;  %5362 = vmatprep.mubr.bf16.mxu1 %v15700_v7 }
 0x418   : >> { %15010 = vmatprep.subr.bf16.mxu0 %v15697_v26  ;;  %15385 = vmatprep.mubr.bf16.mxu0 %v15701_v42 }
 0x41b   : >> { %15011 = vmatpush3.bf16.msra.mxu0 %v15698_v34 }
 0x41c   : >> { %15012 = vmatprep.subr.bf16.mxu0 %v15704_v58 }
 0x41e   : >> { %5363 = vmatmul.mubr.bf16.gmra.mxu1 %v15702_v23  ;;  %15386 = vmatmul.mubr.bf16.gmra.mxu0 %v15703_v46 }
 0x41f   : >> { %15013 = vmatpush3.bf16.msra.mxu0 %v15705_v31  ;;  %5370 = vmatprep.mubr.bf16.mxu1 %v15710_v35 }
 0x420   : >> { %15014 = vmatprep.subr.bf16.mxu0 %v15707_v16  ;;  %15389 = vmatprep.mubr.bf16.mxu0 %v15711_v60 }
 0x423   : >> { %15015 = vmatpush3.bf16.msra.mxu0 %v15708_v56 }
 0x424   : >> { %15016 = vmatprep.subr.bf16.mxu0 %v15714_v38 }
 0x426   : >> { %5371 = vmatmul.mubr.bf16.gmra.mxu1 %v15712_v19  ;;  %15390 = vmatmul.mubr.bf16.gmra.mxu0 %v15713_v55 }
 0x427   : >> { %15017 = vmatpush3.bf16.msra.mxu0 %v15715_v32  ;;  %5903 = vmatprep.mubr.bf16.mxu0 %v15720_v41 }
 0x428   : >> { %15018 = vmatprep.subr.bf16.mxu0 %v15717_v62  ;;  %15409 = vmatprep.mubr.bf16.mxu1 %v15722_v57 }
 0x42b   : >> { %15019 = vmatpush3.bf16.msra.mxu0 %v15718_v29 }
 0x42e   : >> { %5904 = vmatmul.mubr.bf16.vlgmr.msra.gmra.mxu0 %v15721_v47  ;;  %15410 = vmatmul.mubr.bf16.vlgmr.msra.gmra.mxu1 %v15723_v12 }
 0x42f   : >> { %5911 = vmatprep.mubr.bf16.mxu0 %v15724_v54  ;;  %15413 = vmatprep.mubr.bf16.mxu1 %v15728_v40 }
 0x436   : >> { %5912 = vmatmul.mubr.bf16.gmra.mxu0 %v15725_v1  ;;  %15414 = vmatmul.mubr.bf16.gmra.mxu1 %v15729_v45 }
 0x437   : >> { %5919 = vmatprep.mubr.bf16.mxu0 %v15726_v2  ;;  %15417 = vmatprep.mubr.bf16.mxu1 %v15734_v18 }
 0x43e   : >> { %5920 = vmatmul.mubr.bf16.gmra.mxu0 %v15727_v21  ;;  %15418 = vmatmul.mubr.bf16.gmra.mxu1 %v15735_v44 }
 0x43f   : >> { %5927 = vmatprep.mubr.bf16.mxu0 %v15730_v30  ;;  %15421 = vmatprep.mubr.bf16.mxu1 %v15740_v9 }
 0x446   : >> { %5928 = vmatmul.mubr.bf16.gmra.mxu0 %v15731_v20  ;;  %15422 = vmatmul.mubr.bf16.gmra.mxu1 %v15741_v0 }
 0x447   : >> { %5935 = vmatprep.mubr.bf16.mxu0 %v15732_v50 }
 0x44e   : >> { %5936 = vmatmul.mubr.bf16.gmra.mxu0 %v15733_v14 }
 0x44f   : >> { %5943 = vmatprep.mubr.bf16.mxu0 %v15736_v33 }
 0x456   : >> { %5944 = vmatmul.mubr.bf16.gmra.mxu0 %v15737_v11 }
 0x457   : >> { %5951 = vmatprep.mubr.bf16.mxu0 %v15738_v3 }
 0x45e   : >> { %5952 = vmatmul.mubr.bf16.gmra.mxu0 %v15739_v48 }
 0x45f   : >> { %5959 = vmatprep.mubr.bf16.mxu0 %v15742_v37 }
 0x466   : >> { %5960 = vmatmul.mubr.bf16.gmra.mxu0 %v15743_v10 }
 0x48e   : >> { %v14860_v5 = vpop.f32.mrf.mxu0  ;;  %v15347_v39 = vpop.f32.mrf.mxu1 }
 0x490   : >> { %v14861_v59 = vpop.f32.mrf.mxu0  ;;  %v5075_v61 = vpop.f32.mrf.mxu1 }
 0x491   : >> { %v14862_v36 = vadd.f32 %v14861_v59, %v14860_v5 }
 0x492   : >> { %v14863_v28 = vpop.f32.mrf.mxu0  ;;  %v15348_v43 = vpop.f32.mrf.mxu1 }
 0x493   : >> { %v19663_v4 = vadd.f32 %v14862_v36, %v5075_v61 }
 0x494   : >> { %v14864_v13 = vpop.f32.mrf.mxu0  ;;  %v5078_v53 = vpop.f32.mrf.mxu1 }
 0x495   : >> { %v14865_v15 = vadd.f32 %v14864_v13, %v14863_v28 }
 0x496   : >> { %v14866_v22 = vpop.f32.mrf.mxu0  ;;  %v15351_v63 = vpop.f32.mrf.mxu1 }
 0x497   : >> { %v19665_v52 = vadd.f32 %v14865_v15, %v5078_v53 }
 0x498   : >> { %v14867_v49 = vpop.f32.mrf.mxu0  ;;  %v5091_v25 = vpop.f32.mrf.mxu1 }
 0x499   : >> { %v14868_v51 = vadd.f32 %v14867_v49, %v14866_v22 }
 0x49a   : >> { %v14869_v26 = vpop.f32.mrf.mxu0  ;;  %v15352_v7 = vpop.f32.mrf.mxu1 }
 0x49b   : >> { %v19667_v42 = vadd.f32 %v15347_v39, %v14868_v51 }
 0x49c   : >> { %v14870_v17 = vpop.f32.mrf.mxu0  ;;  %v5094_v34 = vpop.f32.mrf.mxu1 }
 0x49d   : >> { %v14871_v58 = vadd.f32 %v14870_v17, %v14869_v26 }
 0x49e   : >> { %v14872_v23 = vpop.f32.mrf.mxu0  ;;  %v15355_v46 = vpop.f32.mrf.mxu1 }
 0x49f   : >> { %v19669_v8 = vadd.f32 %v15348_v43, %v14871_v58 }
 0x4a0   : >> { %v14873_v31 = vpop.f32.mrf.mxu0  ;;  %v5107_v16 = vpop.f32.mrf.mxu1 }
 0x4a1   : >> { %v14874_v35 = vadd.f32 %v14873_v31, %v14872_v23 }
 0x4a2   : >> { %v14875_v60 = vpop.f32.mrf.mxu0  ;;  %v15356_v56 = vpop.f32.mrf.mxu1 }
 0x4a3   : >> { %v5092_v24 = vadd.f32 %v14874_v35, %v5091_v25 }
 0x4a4   : >> { %v14876_v19 = vpop.f32.mrf.mxu0  ;;  %v5110_v55 = vpop.f32.mrf.mxu1 }
 0x4a5   : >> { %v14877_v38 = vadd.f32 %v14876_v19, %v14875_v60 }
 0x4a6   : >> { %v14878_v32 = vpop.f32.mrf.mxu0  ;;  %v15359_v62 = vpop.f32.mrf.mxu1 }
 0x4a7   : >> { %v5095_v6 = vadd.f32 %v14877_v38, %v5094_v34 }
 0x4a8   : >> { %v14879_v41 = vpop.f32.mrf.mxu0  ;;  %v5123_v57 = vpop.f32.mrf.mxu1 }
 0x4a9   : >> { %v14880_v29 = vadd.f32 %v14879_v41, %v14878_v32 }
 0x4aa   : >> { %v14881_v47 = vpop.f32.mrf.mxu0  ;;  %v15360_v12 = vpop.f32.mrf.mxu1 }
 0x4ab   : >> { %v5100_v54 = vadd.f32 %v15351_v63, %v14880_v29 }
 0x4ac   : >> { %v14882_v40 = vpop.f32.mrf.mxu0  ;;  %v5126_v1 = vpop.f32.mrf.mxu1 }
 0x4ad   : >> { %v14883_v2 = vadd.f32 %v14882_v40, %v14881_v47 }
 0x4ae   : >> { %v14884_v45 = vpop.f32.mrf.mxu0  ;;  %v19671_v18 = vpop.f32.mrf.mxu1 }
 0x4af   : >> { %v5103_v21 = vadd.f32 %v15352_v7, %v14883_v2 }
 0x4b0   : >> { %v14885_v44 = vpop.f32.mrf.mxu0  ;;  %v19673_v30 = vpop.f32.mrf.mxu1 }
 0x4b1   : >> { %v14886_v9 = vadd.f32 %v14885_v44, %v14884_v45 }
 0x4b2   : >> { %v14887_v20 = vpop.f32.mrf.mxu0  ;;  %v19675_v0 = vpop.f32.mrf.mxu1 }
 0x4b3   : >> { %v5108_v50 = vadd.f32 %v14886_v9, %v5107_v16 }
 0x4b4   : >> { %v14888_v14 = vpop.f32.mrf.mxu0  ;;  %v19677_v33 = vpop.f32.mrf.mxu1 }
 0x4b5   : >> { %v14889_v11 = vadd.f32 %v14888_v14, %v14887_v20 }
 0x4b6   : >> { %v14890_v3 = vpop.f32.mrf.mxu0  ;;  %v19679_v48 = vpop.f32.mrf.mxu1 }
 0x4b7   : >> { %v5111_v37 = vadd.f32 %v14889_v11, %v5110_v55 }
 0x4b8   : >> { %v14891_v10 = vpop.f32.mrf.mxu0  ;;  %v19681_v5 = vpop.f32.mrf.mxu1 }
 0x4b9   : >> { %v14892_v39 = vadd.f32 %v14891_v10, %v14890_v3 }
 0x4ba   : >> { %v14893_v59 = vpop.f32.mrf.mxu0  ;;  %v19683_v61 = vpop.f32.mrf.mxu1 }
 0x4bb   : >> { %v5116_v36 = vadd.f32 %v15355_v46, %v14892_v39 }
 0x4bc   : >> { %v14894_v28 = vpop.f32.mrf.mxu0  ;;  %v19685_v43 = vpop.f32.mrf.mxu1 }
 0x4bd   : >> { %v14895_v13 = vadd.f32 %v14894_v28, %v14893_v59 }
 0x4be   : >> { %v14896_v53 = vpop.f32.mrf.mxu0  ;;  %v14952_v15 = vpop.f32.mrf.mxu1 }
 0x4bf   : >> { %v5119_v22 = vadd.f32 %v15356_v56, %v14895_v13 }
 0x4c0   : >> { %v14897_v63 = vpop.f32.mrf.mxu0  ;;  %v14953_v49 = vpop.f32.mrf.mxu1 }
 0x4c1   : >> { %v14898_v25 = vadd.f32 %v14897_v63, %v14896_v53  ;;  %v14954_v51 = vadd.f32 %v14953_v49, %v14952_v15 }
 0x4c2   : >> { %v14899_v26 = vpop.f32.mrf.mxu0  ;;  %v14955_v7 = vpop.f32.mrf.mxu1 }
 0x4c3   : >> { %v5124_v17 = vadd.f32 %v14898_v25, %v5123_v57  ;;  %v5333_v34 = vadd.f32 %v14954_v51, %v5092_v24 }
 0x4c4   : >> { %v14900_v58 = vpop.f32.mrf.mxu0  ;;  %v14956_v23 = vpop.f32.mrf.mxu1 }
 0x4c5   : >> { %v14901_v31 = vadd.f32 %v14900_v58, %v14899_v26  ;;  %v14957_v16 = vadd.f32 %v14956_v23, %v14955_v7 }
 0x4c6   : >> { %v14902_v46 = vpop.f32.mrf.mxu0  ;;  %v14958_v35 = vpop.f32.mrf.mxu1 }
 0x4c7   : >> { %v5127_v60 = vadd.f32 %v14901_v31, %v5126_v1  ;;  %v5336_v19 = vadd.f32 %v14957_v16, %v5095_v6 }
 0x4c8   : >> { %v14903_v55 = vpop.f32.mrf.mxu0  ;;  %v14959_v38 = vpop.f32.mrf.mxu1 }
 0x4c9   : >> { %v14904_v32 = vadd.f32 %v14903_v55, %v14902_v46  ;;  %v14960_v56 = vadd.f32 %v14959_v38, %v14958_v35 }
 0x4ca   : >> { %v14905_v41 = vpop.f32.mrf.mxu0  ;;  %v14961_v29 = vpop.f32.mrf.mxu1 }
 0x4cb   : >> { %v5132_v47 = vadd.f32 %v15359_v62, %v14904_v32  ;;  %v5341_v40 = vadd.f32 %v14960_v56, %v5100_v54 }
 0x4cc   : >> { %v14906_v2 = vpop.f32.mrf.mxu0  ;;  %v14962_v45 = vpop.f32.mrf.mxu1 }
 0x4cd   : >> { %v14907_v57 = vadd.f32 %v14906_v2, %v14905_v41  ;;  %v14963_v24 = vadd.f32 %v14962_v45, %v14961_v29 }
 0x4ce   : >> { %v14964_v44 = vpop.f32.mrf.mxu1  ;;  %v19687_v9 = vpop.f32.mrf.mxu0 }
 0x4cf   : >> { %v5135_v20 = vadd.f32 %v15360_v12, %v14907_v57  ;;  %v5344_v14 = vadd.f32 %v14963_v24, %v5103_v21 }
 0x4d0   : >> { %v14965_v11 = vpop.f32.mrf.mxu1  ;;  %v19689_v1 = vpop.f32.mrf.mxu0 }
 0x4d1   : >> { %v14966_v6 = vadd.f32 %v14965_v11, %v14964_v44 }
 0x4d2   : >> { %v14967_v3 = vpop.f32.mrf.mxu1  ;;  %v19691_v10 = vpop.f32.mrf.mxu0 }
 0x4d3   : >> { %v5349_v39 = vadd.f32 %v14966_v6, %v5108_v50 }
 0x4d4   : >> { %v14968_v59 = vpop.f32.mrf.mxu1  ;;  %v19693_v62 = vpop.f32.mrf.mxu0 }
 0x4d5   : >> { %v14969_v54 = vadd.f32 %v14968_v59, %v14967_v3 }
 0x4d6   : >> { %v14970_v28 = vpop.f32.mrf.mxu1  ;;  %v15383_v13 = vpop.f32.mrf.mxu0 }
 0x4d7   : >> { %v19695_v53 = vadd.f32 %v15383_v13, %v5341_v40  ;;  %v5352_v15 = vadd.f32 %v14969_v54, %v5111_v37 }
 0x4d8   : >> { %v14971_v63 = vpop.f32.mrf.mxu1  ;;  %v5429_v12 = vpop.f32.mrf.mxu0 }
 0x4d9   : >> { %v14972_v21 = vadd.f32 %v14971_v63, %v14970_v28  ;;  %v19697_v49 = vadd.f32 %v5429_v12, %v5333_v34 }
 0x4da   : >> { %v14973_v25 = vpop.f32.mrf.mxu1  ;;  %v15384_v51 = vpop.f32.mrf.mxu0 }
 0x4db   : >> { %v19699_v26 = vadd.f32 %v15384_v51, %v5344_v14  ;;  %v5357_v7 = vadd.f32 %v14972_v21, %v5116_v36 }
 0x4dc   : >> { %v14974_v50 = vpop.f32.mrf.mxu1  ;;  %v5432_v58 = vpop.f32.mrf.mxu0 }
 0x4dd   : >> { %v14975_v23 = vadd.f32 %v14974_v50, %v14973_v25  ;;  %v19701_v31 = vadd.f32 %v5432_v58, %v5336_v19 }
 0x4de   : >> { %v14976_v16 = vpop.f32.mrf.mxu1  ;;  %v15387_v46 = vpop.f32.mrf.mxu0 }
 0x4df   : >> { %v19703_v35 = vadd.f32 %v15387_v46, %v5357_v7  ;;  %v5360_v37 = vadd.f32 %v14975_v23, %v5119_v22  ;;  %v14945_v7 = vadd.f32 %v19677_v33, %v19675_v0  ;;  %v19728_v46 = vld [vmem:[%s20719_s4] ss:$0 sm:$0xff] }
 0x4e0   : >> { %v14977_v55 = vpop.f32.mrf.mxu1  ;;  %v5445_v38 = vpop.f32.mrf.mxu0 }
 0x4e1   : >> { %v14978_v32 = vadd.f32 %v14977_v55, %v14976_v16  ;;  %v19705_v34 = vadd.f32 %v5445_v38, %v5349_v39  ;;  %v5320_v55 = vadd.f32 %v14945_v7, %v19665_v52 }
 0x4e2   : >> { %v14979_v56 = vpop.f32.mrf.mxu1  ;;  %v15388_v41 = vpop.f32.mrf.mxu0 }
 0x4e3   : >> { %v19707_v29 = vadd.f32 %v15388_v41, %v5360_v37  ;;  %v5365_v36 = vadd.f32 %v14978_v32, %v5124_v17  ;;  %v14942_v17 = vadd.f32 %v19673_v30, %v19671_v18  ;;  %v5417_v32 = vadd.f32 %v19693_v62, %v5320_v55 }
 0x4e4   : >> { %v14980_v40 = vpop.f32.mrf.mxu1  ;;  %v5448_v2 = vpop.f32.mrf.mxu0  ;;  %v14951_v41 = vadd.f32 %v19685_v43, %v19683_v61 }
 0x4e5   : >> { %v14981_v45 = vadd.f32 %v14980_v40, %v14979_v56  ;;  %v19709_v19 = vadd.f32 %v5448_v2, %v5352_v15 }
 0x4e6   : >> { %v14982_v57 = vpop.f32.mrf.mxu1  ;;  %v15391_v24 = vpop.f32.mrf.mxu0 }
 0x4e7   : >> { %v5368_v44 = vadd.f32 %v14981_v45, %v5127_v60 }
 0x4e8   : >> { %v14983_v14 = vpop.f32.mrf.mxu1  ;;  %v5461_v22 = vpop.f32.mrf.mxu0 }
 0x4e9   : >> { %v14984_v11 = vadd.f32 %v14983_v14, %v14982_v57  ;;  %v19711_v6 = vadd.f32 %v5461_v22, %v5365_v36  ;;  %v5328_v14 = vadd.f32 %v14951_v41, %v19669_v8 }
 0x4ea   : >> { %v14985_v3 = vpop.f32.mrf.mxu1  ;;  %v15392_v39 = vpop.f32.mrf.mxu0 }
 0x4eb   : >> { %v5373_v59 = vadd.f32 %v14984_v11, %v5132_v47  ;;  %v5317_v47 = vadd.f32 %v14942_v17, %v19663_v4  ;;  %v14948_v4 = vadd.f32 %v19681_v5, %v19679_v48 }
 0x4ec   : >> { %v14986_v54 = vpop.f32.mrf.mxu1  ;;  %v5464_v28 = vpop.f32.mrf.mxu0 }
 0x4ed   : >> { %v19715_v13 = vadd.f32 %v15391_v24, %v5373_v59  ;;  %v14987_v15 = vadd.f32 %v14986_v54, %v14985_v3  ;;  %v19717_v63 = vadd.f32 %v5464_v28, %v5368_v44  ;;  %v5414_v30 = vadd.f32 %v19689_v1, %v5317_v47 }
 0x4ee   : >> { %v15020_v12 = vpop.f32.mrf.mxu0  ;;  %v15411_v60 = vpop.f32.mrf.mxu1  ;;  %v5325_v52 = vadd.f32 %v14948_v4, %v19667_v42  ;;  %v19745_v42 = vadd.f32 %v19691_v10, %v5328_v14 }
 0x4ef   : >> { %v5376_v21 = vadd.f32 %v14987_v15, %v5135_v20 }
 0x4f0   : >> { %v15021_v25 = vpop.f32.mrf.mxu0  ;;  %v6002_v51 = vpop.f32.mrf.mxu1  ;;  %v5422_v62 = vadd.f32 %v19687_v9, %v5325_v52 }
 0x4f1   : >> { %v19722_v50 = vadd.f32 %v15392_v39, %v5376_v21  ;;  %v15022_v58 = vadd.f32 %v15021_v25, %v15020_v12 }
 0x4f2   : >> { %v15023_v23 = vpop.f32.mrf.mxu0  ;;  %v15412_v18 = vpop.f32.mrf.mxu1 }
 0x4f3   : >> { %v6003_v16 = vadd.f32 %v15022_v58, %v6002_v51 }
 0x4f4   : >> { %v15024_v20 = vpop.f32.mrf.mxu0  ;;  %v6005_v37 = vpop.f32.mrf.mxu1 }
 0x4f5   : >> { %v6065_v0 = vadd.f32 %v6003_v16, %v5414_v30  ;;  %v15025_v33 = vadd.f32 %v15024_v20, %v15023_v23 }
 0x4f6   : >> { %v15026_v38 = vpop.f32.mrf.mxu0  ;;  %v19757_v52 = vpop.f32.mrf.mxu1 }
 0x4f7   : >> { %v6088_v1 = vadd.f32 %v19728_v46, %v6065_v0  ;;  %v6006_v56 = vadd.f32 %v15025_v33, %v6005_v37 }
 0x4f8   : >> { %v15027_v36 = vpop.f32.mrf.mxu0 }
 0x4f9   : >> { %v6104_v40 = vmax.f32 %v6088_v1, 0.0  ;;  %v6066_v2 = vadd.f32 %v6006_v56, %v5417_v32  ;;  %v15028_v45 = vadd.f32 %v15027_v36, %v15026_v38 }
 0x4fa   : >> { %v15029_v57 = vpop.f32.mrf.mxu0 }
 0x4fb   : >> { %v6136_v24 = vcombine.high %v6104_v40, %v6104_v40  ;;  %v6143_v44 = vrot.slane %v6104_v40, %v18349_v27  ;;  %v6089_v48 = vadd.f32 %v19728_v46, %v6066_v2  ;;  %v6011_v5 = vadd.f32 %v15411_v60, %v15028_v45 }
 0x4fc   : >> { %v15030_v22 = vpop.f32.mrf.mxu0 }
 0x4fd   : >> { %v6150_v61 = vrot.slane %v6136_v24, %v18349_v27  ;;  %v6151_v43 = vcombine.high %v6143_v44, %v6143_v44  ;;  %v6473_v11 = vsel %vm2678_vm1, %v6143_v44, -inf  ;;  %v6105_v3 = vmax.f32 %v6089_v48, 0.0 }
 0x4fe   : >> { %v6474_v39 = vrot.slane %v6473_v11, 4  ;;  %v6067_v59 = vadd.f32 %v6011_v5, %v5422_v62  ;;  %v15031_v54 = vadd.f32 %v15030_v22, %v15029_v57  ;;  %v15032_v32 = vpop.f32.mrf.mxu0 }
 0x4ff   : >> { %v6152_v28 = vcombine.high %v6150_v61, %v6150_v61  ;;  %v6480_v17 = vsel %vm2678_vm1, %v6151_v43, -inf  ;;  %v6487_v9 = vsel %vm2678_vm1, %v6150_v61, -inf  ;;  %v6153_v15 = vcombine.high %v6105_v3, %v6105_v3 }
 0x500   : >> { %v6475_v8 = vmax.f32 %v6473_v11, %v6474_v39  ;;  %v6481_v12 = vrot.slane %v6480_v17, 4  ;;  %v6488_v60 = vrot.slane %v6487_v9, 4  ;;  %v6160_v21 = vrot.slane %v6105_v3, %v18349_v27  ;;  %v15033_v61 = vpop.f32.mrf.mxu0 }
 0x501   : >> { %v6494_v25 = vsel %vm2678_vm1, %v6152_v28, -inf  ;;  %v6167_v51 = vrot.slane %v6153_v15, %v18349_v27  ;;  %v6090_v10 = vadd.f32 %v19728_v46, %v6067_v59  ;;  %v6014_v7 = vadd.f32 %v15412_v18, %v15031_v54 }
 0x502   : >> { %v6476_v47 = vrot.slane %v6475_v8, 2  ;;  %v6482_v58 = vmax.f32 %v6480_v17, %v6481_v12  ;;  %v6489_v23 = vmax.f32 %v6487_v9, %v6488_v60  ;;  %v6495_v30 = vrot.slane %v6494_v25, 4  ;;  %v6018_v9 = vpop.f32.mrf.mxu1 }
 0x503   : >> { %v6168_v16 = vcombine.high %v6160_v21, %v6160_v21  ;;  %v6169_v20 = vcombine.high %v6167_v51, %v6167_v51  ;;  %v6501_v37 = vsel %vm2678_vm1, %v6160_v21, -inf  ;;  %v6515_v55 = vsel %vm2678_vm1, %v6167_v51, -inf }
 0x504   : >> { %v6477_v0 = vmax.f32 %v6475_v8, %v6476_v47  ;;  %v6483_v33 = vrot.slane %v6482_v58, 2  ;;  %v6490_v4 = vrot.slane %v6489_v23, 2  ;;  %v6496_v38 = vmax.f32 %v6494_v25, %v6495_v30 }
 0x505   : >> { %v6502_v1 = vrot.slane %v6501_v37, 4  ;;  %v6508_v56 = vsel %vm2678_vm1, %v6168_v16, -inf  ;;  %v6516_v41 = vrot.slane %v6515_v55, 4  ;;  %v6522_v18 = vsel %vm2678_vm1, %v6169_v20, -inf }
 0x506   : >> { %v6478_v36 = vrot.slane %v6477_v0, 1  ;;  %v6484_v40 = vmax.f32 %v6482_v58, %v6483_v33  ;;  %v6491_v2 = vmax.f32 %v6489_v23, %v6490_v4  ;;  %v6497_v45 = vrot.slane %v6496_v38, 2  ;;  %v15035_v58 = vpop.f32.mrf.mxu0  ;;  %v19772_v33 = vpop.f32.mrf.mxu1 }
 0x507   : >> { %v6503_v57 = vmax.f32 %v6501_v37, %v6502_v1  ;;  %v6509_v24 = vrot.slane %v6508_v56, 4  ;;  %v6517_v44 = vmax.f32 %v6515_v55, %v6516_v41  ;;  %v6523_v48 = vrot.slane %v6522_v18, 4 }
 0x508   : >> { %v19759_v5 = vmax.f32 %v6477_v0, %v6478_v36  ;;  %v6485_v62 = vrot.slane %v6484_v40, 1  ;;  %v6492_v14 = vrot.slane %v6491_v2, 1  ;;  %v6498_v22 = vmax.f32 %v6496_v38, %v6497_v45  ;;  %v15036_v36 = vpop.f32.mrf.mxu0 }
 0x509   : >> { %v6504_v43 = vrot.slane %v6503_v57, 2  ;;  %v6510_v11 = vmax.f32 %v6508_v56, %v6509_v24  ;;  %v6518_v3 = vrot.slane %v6517_v44, 2  ;;  %v6524_v39 = vmax.f32 %v6522_v18, %v6523_v48 }
 0x50a   : >> { %v19761_v59 = vmax.f32 %v6484_v40, %v6485_v62  ;;  %v19763_v54 = vmax.f32 %v6491_v2, %v6492_v14  ;;  %v6499_v28 = vrot.slane %v6498_v22, 1  ;;  %v6106_v17 = vmax.f32 %v6090_v10, 0.0  ;;  %v6021_v14 = vpop.f32.mrf.mxu1 }
 0x50b   : >> { %v6505_v15 = vmax.f32 %v6503_v57, %v6504_v43  ;;  %v6511_v8 = vrot.slane %v6510_v11, 2  ;;  %v6519_v12 = vmax.f32 %v6517_v44, %v6518_v3  ;;  %v6525_v60 = vrot.slane %v6524_v39, 2 }
 0x50c   : >> { %v19765_v21 = vmax.f32 %v6498_v22, %v6499_v28  ;;  %v6170_v25 = vcombine.high %v6106_v17, %v6106_v17  ;;  %v6177_v51 = vrot.slane %v6106_v17, %v18349_v27  ;;  %v6068_v47 = vadd.f32 %v6014_v7, %v19745_v42 }
 0x50d   : >> { %v6506_v23 = vrot.slane %v6505_v15, 1  ;;  %v6512_v30 = vmax.f32 %v6510_v11, %v6511_v8  ;;  %v6520_v16 = vrot.slane %v6519_v12, 1  ;;  %v6526_v20 = vmax.f32 %v6524_v39, %v6525_v60 }
 0x50e   : >> { %v6184_v37 = vrot.slane %v6170_v25, %v18349_v27  ;;  %v6185_v10 = vcombine.high %v6177_v51, %v6177_v51  ;;  %v6529_v55 = vsel %vm2678_vm1, %v6177_v51, -inf  ;;  %v6091_v0 = vadd.f32 %v19728_v46, %v6068_v47 }
 0x50f   : >> { %v19774_v4 = vmax.f32 %v6505_v15, %v6506_v23  ;;  %v6513_v38 = vrot.slane %v6512_v30, 1  ;;  %v19776_v1 = vmax.f32 %v6519_v12, %v6520_v16  ;;  %v6527_v42 = vrot.slane %v6526_v20, 1 }
 0x510   : >> { %v6186_v7 = vcombine.high %v6184_v37, %v6184_v37  ;;  %v6530_v56 = vrot.slane %v6529_v55, 4  ;;  %v6536_v41 = vsel %vm2678_vm1, %v6185_v10, -inf  ;;  %v6543_v18 = vsel %vm2678_vm1, %v6184_v37, -inf }
 0x511   : >> { %v19780_v40 = vmax.f32 %v6512_v30, %v6513_v38  ;;  %v19782_v2 = vmax.f32 %v6526_v20, %v6527_v42  ;;  %v6537_v45 = vrot.slane %v6536_v41, 4  ;;  %v6544_v57 = vrot.slane %v6543_v18, 4 }
 0x512   : >> { %v6531_v24 = vmax.f32 %v6529_v55, %v6530_v56  ;;  %v6550_v44 = vsel %vm2678_vm1, %v6186_v7, -inf  ;;  %v6107_v48 = vmax.f32 %v6091_v0, 0.0  ;;  %v15034_v62 = vadd.f32 %v15033_v61, %v15032_v32  ;;  %v15038_v7 = vpop.f32.mrf.mxu0 }
 0x513   : >> { %v6538_v22 = vmax.f32 %v6536_v41, %v6537_v45  ;;  %v6545_v43 = vmax.f32 %v6543_v18, %v6544_v57  ;;  %v6551_v11 = vrot.slane %v6550_v44, 4  ;;  %v15037_v3 = vadd.f32 %v15036_v36, %v15035_v58 }
 0x514   : >> { %v6532_v39 = vrot.slane %v6531_v24, 2  ;;  %v6187_v28 = vcombine.high %v6107_v48, %v6107_v48  ;;  %v6194_v17 = vrot.slane %v6107_v48, %v18349_v27  ;;  %v6019_v15 = vadd.f32 %v15034_v62, %v6018_v9 }
 0x515   : >> { %v6539_v8 = vrot.slane %v6538_v22, 2  ;;  %v6546_v12 = vrot.slane %v6545_v43, 2  ;;  %v6552_v60 = vmax.f32 %v6550_v44, %v6551_v11  ;;  %v19786_v25 = vadd.f32 %v15037_v3, %v6021_v14 }
 0x516   : >> { %v6533_v51 = vmax.f32 %v6531_v24, %v6532_v39  ;;  %v6201_v47 = vrot.slane %v6187_v28, %v18349_v27  ;;  %v6202_v23 = vcombine.high %v6194_v17, %v6194_v17  ;;  %v6557_v32 = vsel %vm2678_vm1, %v6194_v17, -inf  ;;  %v15039_v28 = vpop.f32.mrf.mxu0 }
 0x517   : >> { %v6540_v61 = vmax.f32 %v6538_v22, %v6539_v8  ;;  %v6547_v30 = vmax.f32 %v6545_v43, %v6546_v12  ;;  %v6553_v16 = vrot.slane %v6552_v60, 2  ;;  %v6558_v58 = vrot.slane %v6557_v32, 4 }
 0x518   : >> { %v6534_v20 = vrot.slane %v6533_v51, 1  ;;  %v6203_v37 = vcombine.high %v6201_v47, %v6201_v47  ;;  %v6564_v10 = vsel %vm2678_vm1, %v6202_v23, -inf  ;;  %v6571_v9 = vsel %vm2678_vm1, %v6201_v47, -inf }
 0x519   : >> { %v6541_v55 = vrot.slane %v6540_v61, 1  ;;  %v6548_v0 = vrot.slane %v6547_v30, 1  ;;  %v6554_v38 = vmax.f32 %v6552_v60, %v6553_v16  ;;  %v6559_v42 = vmax.f32 %v6557_v32, %v6558_v58 }
 0x51a   : >> { %v6535_v56 = vmax.f32 %v6533_v51, %v6534_v20  ;;  %v6565_v41 = vrot.slane %v6564_v10, 4  ;;  %v6572_v18 = vrot.slane %v6571_v9, 4  ;;  %v6578_v36 = vsel %vm2678_vm1, %v6203_v37, -inf }
 0x51b   : >> { %v6542_v45 = vmax.f32 %v6540_v61, %v6541_v55  ;;  %v6549_v57 = vmax.f32 %v6547_v30, %v6548_v0  ;;  %v6555_v24 = vrot.slane %v6554_v38, 1  ;;  %v6560_v44 = vrot.slane %v6559_v42, 2 }
 0x51c   : >> { %v6921_v48 = vmax.f32 %v19759_v5, %v6535_v56  ;;  %v6566_v62 = vmax.f32 %v6564_v10, %v6565_v41  ;;  %v6573_v14 = vmax.f32 %v6571_v9, %v6572_v18  ;;  %v6579_v22 = vrot.slane %v6578_v36, 4 }
 0x51d   : >> { %v6556_v43 = vmax.f32 %v6554_v38, %v6555_v24  ;;  %v6922_v11 = vmax.f32 %v19761_v59, %v6542_v45  ;;  %v6923_v3 = vmax.f32 %v19763_v54, %v6549_v57  ;;  %v6561_v39 = vmax.f32 %v6559_v42, %v6560_v44  ;;  %v15041_v54 = vpop.f32.mrf.mxu0 }
 0x51e   : >> { %v6953_v17 = vpack.c.bf16 %v6921_v48, %v6921_v48  ;;  %v6567_v8 = vrot.slane %v6566_v62, 2  ;;  %v6574_v12 = vrot.slane %v6573_v14, 2  ;;  %v6580_v60 = vmax.f32 %v6578_v36, %v6579_v22 }
 0x51f   : >> { %v6924_v51 = vmax.f32 %v19765_v21, %v6556_v43  ;;  %v6954_v47 = vpack.c.bf16 %v6922_v11, %v6922_v11  ;;  %v6955_v23 = vpack.c.bf16 %v6923_v3, %v6923_v3  ;;  %v6562_v32 = vrot.slane %v6561_v39, 1  ;;  %v15042_v44 = vpop.f32.mrf.mxu0 }
 0x520   : >> { %v7019_v5 = vunpack.c.l.b16 %v6953_v17  ;;  %v6568_v61 = vmax.f32 %v6566_v62, %v6567_v8  ;;  %v6575_v30 = vmax.f32 %v6573_v14, %v6574_v12  ;;  %v6581_v16 = vrot.slane %v6580_v60, 2 }
 0x521   : >> { %v6956_v58 = vpack.c.bf16 %v6924_v51, %v6924_v51  ;;  %v7020_v20 = vunpack.c.l.b16 %v6954_v47  ;;  %v7021_v59 = vunpack.c.l.b16 %v6955_v23  ;;  %v6563_v37 = vmax.f32 %v6561_v39, %v6562_v32 }
 0x522   : >> { %v6569_v10 = vrot.slane %v6568_v61, 1  ;;  %v6576_v9 = vrot.slane %v6575_v30, 1  ;;  %v6582_v55 = vmax.f32 %v6580_v60, %v6581_v16  ;;  %v6069_v0 = vadd.f32 %v6019_v15, %v19697_v49 }
 0x523   : >> { %v7022_v38 = vunpack.c.l.b16 %v6956_v58  ;;  %v7116_v21 = vsel %vm3961_vm2, %v7020_v20, %v7019_v5  ;;  %v7165_v42 = vsel %vm3963_vm3, %v7020_v20, %v7019_v5  ;;  %v7210_v56 = vsel %vm3961_vm2, %v7021_v59, %v7020_v20 }
 0x524   : >> { %v7118_v41 = vsel %vm3963_vm3, %v7021_v59, %v7116_v21  ;;  %v7166_v18 = vsel %vm3965_vm4, %v7021_v59, %v7165_v42  ;;  %v6570_v36 = vmax.f32 %v6568_v61, %v6569_v10  ;;  %v6577_v45 = vmax.f32 %v6575_v30, %v6576_v9 }
 0x525   : >> { %v7120_v57 = vsel %vm3965_vm4, %v7022_v38, %v7118_v41  ;;  %v7167_v24 = vsel %vm3967_vm5, %v7022_v38, %v7166_v18  ;;  %v6583_v49 = vrot.slane %v6582_v55, 1  ;;  %v6925_v15 = vmax.f32 %v19774_v4, %v6563_v37  ;;  %v15746_v41 = vld [vmem:[%s20720_s5 + $0xf8] sm:$0xff] (%p4295_p12)  }
 0x526   : >> { %v6926_v48 = vmax.f32 %v19780_v40, %v6570_v36  ;;  %v6927_v62 = vmax.f32 %v19776_v1, %v6577_v45  ;;  %v7211_v14 = vsel %vm3963_vm3, %v7022_v38, %v7210_v56  ;;  %v6092_v22 = vadd.f32 %v19728_v46, %v6069_v0  ;;  %v15747_v38 = vld [vmem:[%s20720_s5 + $0x178] sm:$0xff] (%p4295_p12)  }
 0x527   : >> { %v6584_v43 = vmax.f32 %v6582_v55, %v6583_v49  ;;  %v6957_v11 = vpack.c.bf16 %v6925_v15, %v6925_v15  ;;  %v6070_v3 = vadd.f32 %v19786_v25, %v19701_v31  ;;  %v15040_v39 = vadd.f32 %v15039_v28, %v15038_v7  ;;  %15425 = vmatprep.subr.bf16.mxu1 (%p4295_p12), %v15747_v38 }
 0x528   : >> { %v6958_v17 = vpack.c.bf16 %v6926_v48, %v6926_v48  ;;  %v6959_v8 = vpack.c.bf16 %v6927_v62, %v6927_v62  ;;  %v6108_v12 = vmax.f32 %v6092_v22, 0.0  ;;  %v15043_v4 = vadd.f32 %v15042_v44, %v15041_v54  ;;  %15426 = vmatpush3.bf16.msra.mxu1 (%p4295_p12), %v15747_v38  ;;  %v15810_v38 = vld [vmem:[%s20720_s5 + $0x238] sm:$0xff] (%p4295_p12)  }
 0x529   : >> { %v6928_v60 = vmax.f32 %v19782_v2, %v6584_v43  ;;  %v7023_v40 = vunpack.c.l.b16 %v6957_v11  ;;  %v6093_v1 = vadd.f32 %v19728_v46, %v6070_v3  ;;  %v6027_v51 = vadd.f32 %v19757_v52, %v15040_v39 }
 0x52a   : >> { %v7024_v47 = vunpack.c.l.b16 %v6958_v17  ;;  %v7025_v23 = vunpack.c.l.b16 %v6959_v8  ;;  %v6204_v32 = vcombine.high %v6108_v12, %v6108_v12  ;;  %v6211_v5 = vrot.slane %v6108_v12, %v18349_v27 }
 0x52b   : >> { %v6960_v61 = vpack.c.bf16 %v6928_v60, %v6928_v60  ;;  %v7122_v31 = vsel %vm3967_vm5, %v7023_v40, %v7120_v57  ;;  %v7168_v25 = vsel %vm3969_vm6, %v7023_v40, %v7167_v24  ;;  %v7212_v7 = vsel %vm3965_vm4, %v7023_v40, %v7211_v14 }
 0x52c   : >> { %v7124_v2 = vsel %vm3969_vm6, %v7024_v47, %v7122_v31  ;;  %v7169_v28 = vsel %vm3971_vm7, %v7024_v47, %v7168_v25  ;;  %v7213_v30 = vsel %vm3967_vm5, %v7024_v47, %v7212_v7  ;;  %v6218_v52 = vrot.slane %v6204_v32, %v18349_v27 }
 0x52d   : >> { %v7026_v16 = vunpack.c.l.b16 %v6960_v61  ;;  %v7126_v58 = vsel %vm3971_vm7, %v7025_v23, %v7124_v2  ;;  %v7170_v20 = vsel %vm3973_vm8, %v7025_v23, %v7169_v28  ;;  %v7214_v59 = vsel %vm3969_vm6, %v7025_v23, %v7213_v30  ;;  %v19857_v30 = vpop.f32.mrf.mxu1 }
 0x52e   : >> { %v7189_v37 = vpack.c.b16 %v7170_v20, %v7170_v20  ;;  %v6219_v54 = vcombine.high %v6211_v5, %v6211_v5  ;;  %v6220_v10 = vcombine.high %v6218_v52, %v6218_v52  ;;  %v6585_v9 = vsel %vm2678_vm1, %v6211_v5, -inf  ;;  %v15044_v5 = vpop.f32.mrf.mxu0 }
 0x52f   : >> { %v7128_v55 = vsel %vm3973_vm8, %v7026_v16, %v7126_v58  ;;  %v7215_v0 = vsel %vm3971_vm7, %v7026_v16, %v7214_v59  ;;  %v6586_v21 = vrot.slane %v6585_v9, 4  ;;  %v6599_v42 = vsel %vm2678_vm1, %v6218_v52, -inf }
 0x530   : >> { %v7150_v56 = vpack.c.b16 %v7128_v55, %v7128_v55  ;;  %v7200_v18 = vsel %vm18800_vm14, 0, %v7189_v37  ;;  %v7234_v36 = vpack.c.b16 %v7215_v0, %v7215_v0  ;;  %v6592_v45 = vsel %vm2678_vm1, %v6219_v54, -inf }
 0x531   : >> { %13936 = vst [vmem:[%s19840_s30 + $0x4] sm:$0xf] %v7200_v18  ;;  %v6587_v57 = vmax.f32 %v6585_v9, %v6586_v21  ;;  %v6593_v24 = vrot.slane %v6592_v45, 4  ;;  %v6600_v49 = vrot.slane %v6599_v42, 4  ;;  %v6606_v15 = vsel %vm2678_vm1, %v6220_v10, -inf  ;;  %v15045_v10 = vpop.f32.mrf.mxu0 }
 0x532   : >> { %13930 = vst [vmem:[%s19840_s30 + $0x2c] sm:$0xf] %v7150_v56  ;;  %v7245_v44 = vsel %vm19832_vm9, %v7234_v36, 0  ;;  %v6607_v48 = vrot.slane %v6606_v15, 4  ;;  %v6109_v62 = vmax.f32 %v6093_v1, 0.0  ;;  %v6071_v14 = vadd.f32 %v6027_v51, %v19695_v53 }
 0x533   : >> { %13942 = vst [vmem:[%s19840_s30 + $0x54] sm:$0xf] %v7245_v44  ;;  %v6588_v22 = vrot.slane %v6587_v57, 2  ;;  %v6594_v43 = vmax.f32 %v6592_v45, %v6593_v24  ;;  %v6601_v11 = vmax.f32 %v6599_v42, %v6600_v49  ;;  %v6030_v3 = vadd.f32 %v19772_v33, %v15043_v4  ;;  %v6034_v45 = vpop.f32.mrf.mxu1 }
 0x534   : >> { %v6608_v39 = vmax.f32 %v6606_v15, %v6607_v48  ;;  %v6221_v17 = vcombine.high %v6109_v62, %v6109_v62  ;;  %v6228_v8 = vrot.slane %v6109_v62, %v18349_v27  ;;  %v6094_v12 = vadd.f32 %v19728_v46, %v6071_v14 }
 0x535   : >> { %v6589_v60 = vmax.f32 %v6587_v57, %v6588_v22  ;;  %v6595_v40 = vrot.slane %v6594_v43, 2  ;;  %v6602_v47 = vrot.slane %v6601_v11, 2  ;;  %v6072_v23 = vadd.f32 %v6030_v3, %v19699_v26 }
 0x536   : >> { %v6609_v1 = vrot.slane %v6608_v39, 2  ;;  %v6235_v53 = vrot.slane %v6221_v17, %v18349_v27  ;;  %v6236_v51 = vcombine.high %v6228_v8, %v6228_v8  ;;  %v6613_v32 = vsel %vm2678_vm1, %v6228_v8, -inf }
 0x537   : >> { %v6590_v61 = vrot.slane %v6589_v60, 1  ;;  %v6596_v33 = vmax.f32 %v6594_v43, %v6595_v40  ;;  %v6603_v4 = vmax.f32 %v6601_v11, %v6602_v47  ;;  %v6614_v31 = vrot.slane %v6613_v32, 4 }
 0x538   : >> { %v6610_v25 = vmax.f32 %v6608_v39, %v6609_v1  ;;  %v6237_v7 = vcombine.high %v6235_v53, %v6235_v53  ;;  %v6620_v2 = vsel %vm2678_vm1, %v6236_v51, -inf  ;;  %v6627_v28 = vsel %vm2678_vm1, %v6235_v53, -inf }
 0x539   : >> { %v19859_v26 = vmax.f32 %v6589_v60, %v6590_v61  ;;  %v6597_v52 = vrot.slane %v6596_v33, 1  ;;  %v6604_v16 = vrot.slane %v6603_v4, 1  ;;  %v6615_v58 = vmax.f32 %v6613_v32, %v6614_v31 }
 0x53a   : >> { %v6611_v20 = vrot.slane %v6610_v25, 1  ;;  %v6621_v59 = vrot.slane %v6620_v2, 4  ;;  %v6628_v37 = vrot.slane %v6627_v28, 4  ;;  %v6634_v54 = vsel %vm2678_vm1, %v6237_v7, -inf }
 0x53b   : >> { %v19862_v9 = vmax.f32 %v6596_v33, %v6597_v52  ;;  %v19864_v55 = vmax.f32 %v6603_v4, %v6604_v16  ;;  %v6616_v0 = vrot.slane %v6615_v58, 2  ;;  %v6635_v21 = vrot.slane %v6634_v54, 4 }
 0x53c   : >> { %v19866_v42 = vmax.f32 %v6610_v25, %v6611_v20  ;;  %v6622_v56 = vmax.f32 %v6620_v2, %v6621_v59  ;;  %v6629_v18 = vmax.f32 %v6627_v28, %v6628_v37  ;;  %v6110_v36 = vmax.f32 %v6094_v12, 0.0 }
 0x53d   : >> { %v6617_v57 = vmax.f32 %v6615_v58, %v6616_v0  ;;  %v6636_v24 = vmax.f32 %v6634_v54, %v6635_v21  ;;  %v6095_v49 = vadd.f32 %v19728_v46, %v6072_v23  ;;  %v15046_v15 = vadd.f32 %v15045_v10, %v15044_v5  ;;  %v19887_v10 = vpop.f32.mrf.mxu0 }
 0x53e   : >> { %v6623_v44 = vrot.slane %v6622_v56, 2  ;;  %v6630_v48 = vrot.slane %v6629_v18, 2  ;;  %v6238_v62 = vcombine.high %v6110_v36, %v6110_v36  ;;  %v6245_v14 = vrot.slane %v6110_v36, %v18349_v27 }
 0x53f   : >> { %v6618_v22 = vrot.slane %v6617_v57, 1  ;;  %v6637_v43 = vrot.slane %v6636_v24, 2  ;;  %v6111_v11 = vmax.f32 %v6095_v49, 0.0  ;;  %v19870_v3 = vadd.f32 %v15046_v15, %v6034_v45 }
 0x540   : >> { %v6624_v39 = vmax.f32 %v6622_v56, %v6623_v44  ;;  %v6631_v17 = vmax.f32 %v6629_v18, %v6630_v48  ;;  %v6252_v8 = vrot.slane %v6238_v62, %v18349_v27  ;;  %v6253_v12 = vcombine.high %v6245_v14, %v6245_v14 }
 0x541   : >> { %v19873_v60 = vmax.f32 %v6617_v57, %v6618_v22  ;;  %v6638_v40 = vmax.f32 %v6636_v24, %v6637_v43  ;;  %v6641_v47 = vsel %vm2678_vm1, %v6245_v14, -inf  ;;  %v6255_v23 = vcombine.high %v6111_v11, %v6111_v11 }
 0x542   : >> { %v6625_v1 = vrot.slane %v6624_v39, 1  ;;  %v6632_v53 = vrot.slane %v6631_v17, 1  ;;  %v6254_v51 = vcombine.high %v6252_v8, %v6252_v8  ;;  %v6642_v32 = vrot.slane %v6641_v47, 4 }
 0x543   : >> { %v6639_v5 = vrot.slane %v6638_v40, 1  ;;  %v6648_v61 = vsel %vm2678_vm1, %v6253_v12, -inf  ;;  %v6655_v33 = vsel %vm2678_vm1, %v6252_v8, -inf  ;;  %v6262_v4 = vrot.slane %v6111_v11, %v18349_v27  ;;  %v19893_v11 = vpop.f32.mrf.mxu0 }
 0x544   : >> { %v19879_v31 = vmax.f32 %v6624_v39, %v6625_v1  ;;  %v19881_v25 = vmax.f32 %v6631_v17, %v6632_v53  ;;  %v6643_v7 = vmax.f32 %v6641_v47, %v6642_v32  ;;  %v6649_v2 = vrot.slane %v6648_v61, 4 }
 0x545   : >> { %v19883_v28 = vmax.f32 %v6638_v40, %v6639_v5  ;;  %v6656_v52 = vrot.slane %v6655_v33, 4  ;;  %v6662_v16 = vsel %vm2678_vm1, %v6254_v51, -inf  ;;  %v6269_v58 = vrot.slane %v6255_v23, %v18349_v27 }
 0x546   : >> { %v6644_v20 = vrot.slane %v6643_v7, 2  ;;  %v6650_v59 = vmax.f32 %v6648_v61, %v6649_v2  ;;  %v6663_v37 = vrot.slane %v6662_v16, 4  ;;  %v6270_v54 = vcombine.high %v6262_v4, %v6262_v4  ;;  %v15050_v2 = vpop.f32.mrf.mxu0 }
 0x547   : >> { %v6657_v0 = vmax.f32 %v6655_v33, %v6656_v52  ;;  %v6271_v21 = vcombine.high %v6269_v58, %v6269_v58  ;;  %v6669_v56 = vsel %vm2678_vm1, %v6262_v4, -inf  ;;  %v6683_v18 = vsel %vm2678_vm1, %v6269_v58, -inf }
 0x548   : >> { %v6645_v36 = vmax.f32 %v6643_v7, %v6644_v20  ;;  %v6651_v45 = vrot.slane %v6650_v59, 2  ;;  %v6664_v57 = vmax.f32 %v6662_v16, %v6663_v37  ;;  %v6670_v24 = vrot.slane %v6669_v56, 4 }
 0x549   : >> { %v6658_v49 = vrot.slane %v6657_v0, 2  ;;  %v6676_v15 = vsel %vm2678_vm1, %v6270_v54, -inf  ;;  %v6684_v44 = vrot.slane %v6683_v18, 4  ;;  %v6690_v48 = vsel %vm2678_vm1, %v6271_v21, -inf }
 0x54a   : >> { %v6646_v62 = vrot.slane %v6645_v36, 1  ;;  %v6652_v14 = vmax.f32 %v6650_v59, %v6651_v45  ;;  %v6665_v22 = vrot.slane %v6664_v57, 2  ;;  %v6671_v43 = vmax.f32 %v6669_v56, %v6670_v24 }
 0x54b   : >> { %v6659_v39 = vmax.f32 %v6657_v0, %v6658_v49  ;;  %v6677_v17 = vrot.slane %v6676_v15, 4  ;;  %v6685_v8 = vmax.f32 %v6683_v18, %v6684_v44  ;;  %v6691_v12 = vrot.slane %v6690_v48, 4  ;;  %v15051_v49 = vpop.f32.mrf.mxu0 }
 0x54c   : >> { %v6647_v40 = vmax.f32 %v6645_v36, %v6646_v62  ;;  %v6653_v47 = vrot.slane %v6652_v14, 1  ;;  %v6666_v23 = vmax.f32 %v6664_v57, %v6665_v22  ;;  %v6672_v1 = vrot.slane %v6671_v43, 2 }
 0x54d   : >> { %v6660_v53 = vrot.slane %v6659_v39, 1  ;;  %v6678_v51 = vmax.f32 %v6676_v15, %v6677_v17  ;;  %v6686_v32 = vrot.slane %v6685_v8, 2  ;;  %v6692_v5 = vmax.f32 %v6690_v48, %v6691_v12 }
 0x54e   : >> { %v6654_v61 = vmax.f32 %v6652_v14, %v6653_v47  ;;  %v6667_v33 = vrot.slane %v6666_v23, 1  ;;  %v6929_v4 = vmax.f32 %v19859_v26, %v6647_v40  ;;  %v6673_v7 = vmax.f32 %v6671_v43, %v6672_v1  ;;  %v15053_v1 = vpop.f32.mrf.mxu0 }
 0x54f   : >> { %v6661_v52 = vmax.f32 %v6659_v39, %v6660_v53  ;;  %v6679_v16 = vrot.slane %v6678_v51, 2  ;;  %v6687_v58 = vmax.f32 %v6685_v8, %v6686_v32  ;;  %v6693_v20 = vrot.slane %v6692_v5, 2  ;;  %v19903_v8 = vpop.f32.mrf.mxu1 }
 0x550   : >> { %v6668_v59 = vmax.f32 %v6666_v23, %v6667_v33  ;;  %v6930_v37 = vmax.f32 %v19862_v9, %v6654_v61  ;;  %v6961_v54 = vpack.c.bf16 %v6929_v4, %v6929_v4  ;;  %v6674_v0 = vrot.slane %v6673_v7, 1 }
 0x551   : >> { %v6931_v21 = vmax.f32 %v19864_v55, %v6661_v52  ;;  %v6680_v56 = vmax.f32 %v6678_v51, %v6679_v16  ;;  %v6688_v18 = vrot.slane %v6687_v58, 1  ;;  %v6694_v36 = vmax.f32 %v6692_v5, %v6693_v20  ;;  %v6037_v52 = vpop.f32.mrf.mxu1 }
 0x552   : >> { %v6932_v45 = vmax.f32 %v19866_v42, %v6668_v59  ;;  %v6962_v57 = vpack.c.bf16 %v6930_v37, %v6930_v37  ;;  %v7027_v26 = vunpack.c.l.b16 %v6961_v54  ;;  %v6675_v24 = vmax.f32 %v6673_v7, %v6674_v0  ;;  %v15054_v59 = vpop.f32.mrf.mxu0 }
 0x553   : >> { %v6963_v15 = vpack.c.bf16 %v6931_v21, %v6931_v21  ;;  %v6681_v44 = vrot.slane %v6680_v56, 1  ;;  %v6689_v48 = vmax.f32 %v6687_v58, %v6688_v18  ;;  %v6695_v62 = vrot.slane %v6694_v36, 1 }
 0x554   : >> { %v6964_v14 = vpack.c.bf16 %v6932_v45, %v6932_v45  ;;  %v7028_v22 = vunpack.c.l.b16 %v6962_v57  ;;  %v6933_v9 = vmax.f32 %v19873_v60, %v6675_v24  ;;  %v6073_v55 = vadd.f32 %v19870_v3, %v19705_v34 }
 0x555   : >> { %v7029_v43 = vunpack.c.l.b16 %v6963_v15  ;;  %v6682_v39 = vmax.f32 %v6680_v56, %v6681_v44  ;;  %v6696_v17 = vmax.f32 %v6694_v36, %v6695_v62  ;;  %v6935_v42 = vmax.f32 %v19881_v25, %v6689_v48 }
 0x556   : >> { %v7030_v12 = vunpack.c.l.b16 %v6964_v14  ;;  %v7129_v40 = vsel %vm3961_vm2, %v7028_v22, %v7027_v26  ;;  %v7171_v47 = vsel %vm3963_vm3, %v7028_v22, %v7027_v26  ;;  %v6965_v23 = vpack.c.bf16 %v6933_v9, %v6933_v9 }
 0x557   : >> { %v7130_v53 = vsel %vm3963_vm3, %v7029_v43, %v7129_v40  ;;  %v7172_v60 = vsel %vm3965_vm4, %v7029_v43, %v7171_v47  ;;  %v7216_v34 = vsel %vm3961_vm2, %v7029_v43, %v7028_v22  ;;  %v6934_v3 = vmax.f32 %v19879_v31, %v6682_v39 }
 0x558   : >> { %v7131_v51 = vsel %vm3965_vm4, %v7030_v12, %v7130_v53  ;;  %v7173_v25 = vsel %vm3967_vm5, %v7030_v12, %v7172_v60  ;;  %v6936_v32 = vmax.f32 %v19883_v28, %v6696_v17  ;;  %v6967_v5 = vpack.c.bf16 %v6935_v42, %v6935_v42  ;;  %v15056_v42 = vpop.f32.mrf.mxu0 }
 0x559   : >> { %v6966_v61 = vpack.c.bf16 %v6934_v3, %v6934_v3  ;;  %v7031_v33 = vunpack.c.l.b16 %v6965_v23  ;;  %v7217_v4 = vsel %vm3963_vm3, %v7030_v12, %v7216_v34  ;;  %v6096_v7 = vadd.f32 %v19728_v46, %v6073_v55 }
 0x55a   : >> { %v6968_v16 = vpack.c.bf16 %v6936_v32, %v6936_v32  ;;  %v7033_v58 = vunpack.c.l.b16 %v6967_v5  ;;  %v15049_v20 = vadd.f32 %v19893_v11, %v19887_v10  ;;  %v15052_v31 = vadd.f32 %v15051_v49, %v15050_v2 }
 0x55b   : >> { %v7032_v37 = vunpack.c.l.b16 %v6966_v61  ;;  %v7132_v54 = vsel %vm3967_vm5, %v7031_v33, %v7131_v51  ;;  %v7174_v28 = vsel %vm3969_vm6, %v7031_v33, %v7173_v25  ;;  %v7218_v0 = vsel %vm3965_vm4, %v7031_v33, %v7217_v4  ;;  %v15057_v33 = vpop.f32.mrf.mxu0 }
 0x55c   : >> { %v7034_v21 = vunpack.c.l.b16 %v6968_v16  ;;  %v6112_v56 = vmax.f32 %v6096_v7, 0.0  ;;  %v6038_v18 = vadd.f32 %v15049_v20, %v6037_v52  ;;  %v6043_v36 = vadd.f32 %v19857_v30, %v15052_v31 }
 0x55d   : >> { %v7133_v45 = vsel %vm3969_vm6, %v7032_v37, %v7132_v54  ;;  %v7175_v57 = vsel %vm3971_vm7, %v7032_v37, %v7174_v28  ;;  %v7219_v10 = vsel %vm3967_vm5, %v7032_v37, %v7218_v0  ;;  %v15055_v11 = vadd.f32 %v15054_v59, %v15053_v1 }
 0x55e   : >> { %v7134_v2 = vsel %vm3971_vm7, %v7033_v58, %v7133_v45  ;;  %v7176_v26 = vsel %vm3973_vm8, %v7033_v58, %v7175_v57  ;;  %v7220_v24 = vsel %vm3969_vm6, %v7033_v58, %v7219_v10  ;;  %v6272_v49 = vcombine.high %v6112_v56, %v6112_v56 }
 0x55f   : >> { %v7135_v15 = vsel %vm3973_vm8, %v7034_v21, %v7134_v2  ;;  %v7190_v44 = vpack.c.b16 %v7176_v26, %v7176_v26  ;;  %v7221_v30 = vsel %vm3971_vm7, %v7034_v21, %v7220_v24  ;;  %v6279_v48 = vrot.slane %v6112_v56, %v18349_v27 }
 0x560   : >> { %v7151_v62 = vpack.c.b16 %v7135_v15, %v7135_v15  ;;  %v7235_v14 = vpack.c.b16 %v7221_v30, %v7221_v30  ;;  %v6286_v22 = vrot.slane %v6272_v49, %v18349_v27  ;;  %v6074_v9 = vadd.f32 %v6038_v18, %v19709_v19 }
 0x561   : >> { %v7201_v55 = vsel %vm18800_vm14, 0, %v7190_v44  ;;  %v6287_v43 = vcombine.high %v6279_v48, %v6279_v48  ;;  %v6697_v39 = vsel %vm2678_vm1, %v6279_v48, -inf  ;;  %v6075_v17 = vadd.f32 %v6043_v36, %v19703_v35 }
 0x562   : >> { %13931 = vst [vmem:[%s19840_s30 + $0x30] sm:$0xf] %v7151_v62  ;;  %13937 = vst [vmem:[%s19840_s30 + $0x8] sm:$0xf] %v7201_v55  ;;  %v7246_v12 = vsel %vm19832_vm9, %v7235_v14, 0  ;;  %v6288_v40 = vcombine.high %v6286_v22, %v6286_v22  ;;  %v6698_v47 = vrot.slane %v6697_v39, 4  ;;  %v6097_v53 = vadd.f32 %v19728_v46, %v6074_v9  ;;  %v19964_v62 = vpop.f32.mrf.mxu1 }
 0x563   : >> { %v6711_v23 = vsel %vm2678_vm1, %v6286_v22, -inf  ;;  %13943 = vst [vmem:[%s19840_s30 + $0x58] sm:$0xf] %v7246_v12  ;;  %v6704_v19 = vsel %vm2678_vm1, %v6287_v43, -inf  ;;  %v6098_v60 = vadd.f32 %v19728_v46, %v6075_v17  ;;  %v6046_v51 = vadd.f32 %v19903_v8, %v15055_v11 }
 0x564   : >> { %v6712_v1 = vrot.slane %v6711_v23, 4  ;;  %v6699_v34 = vmax.f32 %v6697_v39, %v6698_v47  ;;  %v6705_v35 = vrot.slane %v6704_v19, 4  ;;  %v6718_v3 = vsel %vm2678_vm1, %v6288_v40, -inf }
 0x565   : >> { %v6719_v32 = vrot.slane %v6718_v3, 4  ;;  %v6113_v5 = vmax.f32 %v6097_v53, 0.0  ;;  %v6114_v61 = vmax.f32 %v6098_v60, 0.0  ;;  %v19949_v52 = vadd.f32 %v6046_v51, %v19707_v29 }
 0x566   : >> { %v6713_v25 = vmax.f32 %v6711_v23, %v6712_v1  ;;  %v6700_v4 = vrot.slane %v6699_v34, 2  ;;  %v6706_v7 = vmax.f32 %v6704_v19, %v6705_v35  ;;  %v19952_v54 = vadd.f32 %v15057_v33, %v15056_v42 }
 0x567   : >> { %v6720_v58 = vmax.f32 %v6718_v3, %v6719_v32  ;;  %v6289_v20 = vcombine.high %v6113_v5, %v6113_v5  ;;  %v6296_v46 = vrot.slane %v6113_v5, %v18349_v27  ;;  %v6306_v37 = vcombine.high %v6114_v61, %v6114_v61 }
 0x568   : >> { %v6714_v16 = vrot.slane %v6713_v25, 2  ;;  %v6701_v31 = vmax.f32 %v6699_v34, %v6700_v4  ;;  %v6707_v59 = vrot.slane %v6706_v7, 2  ;;  %v6313_v36 = vrot.slane %v6114_v61, %v18349_v27  ;;  %v6050_v34 = vpop.f32.mrf.mxu1  ;;  %v15059_v4 = vpop.f32.mrf.mxu0 }
 0x569   : >> { %v6721_v28 = vrot.slane %v6720_v58, 2  ;;  %v6303_v0 = vrot.slane %v6289_v20, %v18349_v27  ;;  %v6304_v21 = vcombine.high %v6296_v46, %v6296_v46  ;;  %v6725_v29 = vsel %vm2678_vm1, %v6296_v46, -inf }
 0x56a   : >> { %v6715_v8 = vmax.f32 %v6713_v25, %v6714_v16  ;;  %v6702_v56 = vrot.slane %v6701_v31, 1  ;;  %v6708_v18 = vmax.f32 %v6706_v7, %v6707_v59  ;;  %v6726_v11 = vrot.slane %v6725_v29, 4 }
 0x56b   : >> { %v6722_v57 = vmax.f32 %v6720_v58, %v6721_v28  ;;  %v6305_v10 = vcombine.high %v6303_v0, %v6303_v0  ;;  %v6732_v26 = vsel %vm2678_vm1, %v6304_v21, -inf  ;;  %v6739_v24 = vsel %vm2678_vm1, %v6303_v0, -inf }
 0x56c   : >> { %v6716_v45 = vrot.slane %v6715_v8, 1  ;;  %v6709_v2 = vrot.slane %v6708_v18, 1  ;;  %v6320_v49 = vrot.slane %v6306_v37, %v18349_v27  ;;  %v19960_v15 = vmax.f32 %v6701_v31, %v6702_v56 }
 0x56d   : >> { %v6727_v30 = vmax.f32 %v6725_v29, %v6726_v11  ;;  %v6733_v48 = vrot.slane %v6732_v26, 4  ;;  %v6723_v14 = vrot.slane %v6722_v57, 1  ;;  %v6740_v22 = vrot.slane %v6739_v24, 4 }
 0x56e   : >> { %v19962_v44 = vmax.f32 %v6715_v8, %v6716_v45  ;;  %v6746_v9 = vsel %vm2678_vm1, %v6305_v10, -inf  ;;  %v6321_v55 = vcombine.high %v6313_v36, %v6313_v36  ;;  %v19967_v43 = vmax.f32 %v6708_v18, %v6709_v2  ;;  %v19975_v8 = vpop.f32.mrf.mxu1  ;;  %v19984_v45 = vld [vmem:[%s20719_s4] ss:$0 sm:$0xff]  ;;  %v15060_v10 = vpop.f32.mrf.mxu0 }
 0x56f   : >> { %v6728_v39 = vrot.slane %v6727_v30, 2  ;;  %v6734_v17 = vmax.f32 %v6732_v26, %v6733_v48  ;;  %v6747_v42 = vrot.slane %v6746_v9, 4  ;;  %v6741_v12 = vmax.f32 %v6739_v24, %v6740_v22 }
 0x570   : >> { %v6322_v40 = vcombine.high %v6320_v49, %v6320_v49  ;;  %v6753_v47 = vsel %vm2678_vm1, %v6313_v36, -inf  ;;  %v6760_v23 = vsel %vm2678_vm1, %v6321_v55, -inf  ;;  %v6767_v51 = vsel %vm2678_vm1, %v6320_v49, -inf  ;;  %v6053_v22 = vpop.f32.mrf.mxu1 }
 0x571   : >> { %v6729_v19 = vmax.f32 %v6727_v30, %v6728_v39  ;;  %v6735_v1 = vrot.slane %v6734_v17, 2  ;;  %v6748_v53 = vmax.f32 %v6746_v9, %v6747_v42  ;;  %v6754_v60 = vrot.slane %v6753_v47, 4 }
 0x572   : >> { %v6742_v35 = vrot.slane %v6741_v12, 2  ;;  %v6761_v3 = vrot.slane %v6760_v23, 4  ;;  %v6774_v25 = vsel %vm2678_vm1, %v6322_v40, -inf  ;;  %v6768_v58 = vrot.slane %v6767_v51, 4 }
 0x573   : >> { %v6730_v32 = vrot.slane %v6729_v19, 1  ;;  %v6736_v5 = vmax.f32 %v6734_v17, %v6735_v1  ;;  %v6749_v61 = vrot.slane %v6748_v53, 2  ;;  %v6755_v33 = vmax.f32 %v6753_v47, %v6754_v60 }
 0x574   : >> { %v6743_v7 = vmax.f32 %v6741_v12, %v6742_v35  ;;  %v6762_v16 = vmax.f32 %v6760_v23, %v6761_v3  ;;  %v6775_v20 = vrot.slane %v6774_v25, 4  ;;  %v6724_v46 = vmax.f32 %v6722_v57, %v6723_v14 }
 0x575   : >> { %v6737_v31 = vrot.slane %v6736_v5, 1  ;;  %v19973_v59 = vmax.f32 %v6748_v53, %v6749_v61  ;;  %v6756_v37 = vrot.slane %v6755_v33, 2  ;;  %v6769_v21 = vmax.f32 %v6767_v51, %v6768_v58 }
 0x576   : >> { %v6744_v28 = vrot.slane %v6743_v7, 1  ;;  %v6763_v0 = vrot.slane %v6762_v16, 2  ;;  %v6776_v56 = vmax.f32 %v6774_v25, %v6775_v20  ;;  %v19977_v18 = vmax.f32 %v6729_v19, %v6730_v32 }
 0x577   : >> { %v19979_v29 = vmax.f32 %v6736_v5, %v6737_v31  ;;  %v6757_v36 = vmax.f32 %v6755_v33, %v6756_v37  ;;  %v6099_v57 = vadd.f32 %v19984_v45, %v19949_v52  ;;  %v6751_v11 = vrot.slane %v19973_v59, 1 }
 0x578   : >> { %v6764_v2 = vmax.f32 %v6762_v16, %v6763_v0  ;;  %v6770_v26 = vrot.slane %v6769_v21, 2  ;;  %v6777_v24 = vrot.slane %v6776_v56, 2  ;;  %v19989_v49 = vmax.f32 %v6743_v7, %v6744_v28 }
 0x579   : >> { %v6758_v30 = vrot.slane %v6757_v36, 1  ;;  %v6115_v48 = vmax.f32 %v6099_v57, 0.0  ;;  %v6051_v14 = vadd.f32 %v19952_v54, %v6050_v34  ;;  %v15061_v17 = vadd.f32 %v15060_v10, %v15059_v4 }
 0x57a   : >> { %v6765_v9 = vrot.slane %v6764_v2, 1  ;;  %v6771_v55 = vmax.f32 %v6769_v21, %v6770_v26  ;;  %v6778_v39 = vmax.f32 %v6776_v56, %v6777_v24 }
 0x57b   : >> { %v6759_v42 = vmax.f32 %v6757_v36, %v6758_v30  ;;  %v6323_v12 = vcombine.high %v6115_v48, %v6115_v48  ;;  %v6330_v52 = vrot.slane %v6115_v48, %v18349_v27  ;;  %v6077_v40 = vadd.f32 %v6051_v14, %v19711_v6 }
 0x57c   : >> { %v6766_v47 = vmax.f32 %v6764_v2, %v6765_v9  ;;  %v6772_v23 = vrot.slane %v6771_v55, 1  ;;  %v6779_v19 = vrot.slane %v6778_v39, 1  ;;  %v6054_v1 = vadd.f32 %v15061_v17, %v6053_v22 }
 0x57d   : >> { %v6937_v53 = vmax.f32 %v19960_v15, %v6759_v42  ;;  %v6337_v60 = vrot.slane %v6323_v12, %v18349_v27  ;;  %v6338_v54 = vcombine.high %v6330_v52, %v6330_v52  ;;  %v6781_v34 = vsel %vm2678_vm1, %v6330_v52, -inf }
 0x57e   : >> { %v6773_v35 = vmax.f32 %v6771_v55, %v6772_v23  ;;  %v6780_v3 = vmax.f32 %v6778_v39, %v6779_v19  ;;  %v6938_v51 = vmax.f32 %v19967_v43, %v6766_v47  ;;  %v6782_v25 = vrot.slane %v6781_v34, 4 }
 0x57f   : >> { %v6969_v32 = vpack.c.bf16 %v6937_v53, %v6937_v53  ;;  %v6339_v5 = vcombine.high %v6337_v60, %v6337_v60  ;;  %v6788_v6 = vsel %vm2678_vm1, %v6338_v54, -inf  ;;  %v6795_v61 = vsel %vm2678_vm1, %v6337_v60, -inf }
 0x580   : >> { %v6939_v33 = vmax.f32 %v19962_v44, %v6773_v35  ;;  %v6940_v4 = vmax.f32 %v6724_v46, %v6780_v3  ;;  %v6970_v15 = vpack.c.bf16 %v6938_v51, %v6938_v51  ;;  %v6783_v7 = vmax.f32 %v6781_v34, %v6782_v25  ;;  %v15062_v51 = vpop.f32.mrf.mxu0 }
 0x581   : >> { %v7035_v16 = vunpack.c.l.b16 %v6969_v32  ;;  %v6789_v58 = vrot.slane %v6788_v6, 4  ;;  %v6796_v20 = vrot.slane %v6795_v61, 4  ;;  %v6802_v31 = vsel %vm2678_vm1, %v6339_v5, -inf }
 0x582   : >> { %v6971_v37 = vpack.c.bf16 %v6939_v33, %v6939_v33  ;;  %v6972_v28 = vpack.c.bf16 %v6940_v4, %v6940_v4  ;;  %v7036_v43 = vunpack.c.l.b16 %v6970_v15  ;;  %v6784_v0 = vrot.slane %v6783_v7, 2 }
 0x583   : >> { %v6790_v21 = vmax.f32 %v6788_v6, %v6789_v58  ;;  %v6797_v56 = vmax.f32 %v6795_v61, %v6796_v20  ;;  %v6803_v36 = vrot.slane %v6802_v31, 4  ;;  %v6100_v57 = vadd.f32 %v19984_v45, %v6077_v40 }
 0x584   : >> { %v7037_v10 = vunpack.c.l.b16 %v6971_v37  ;;  %v7038_v2 = vunpack.c.l.b16 %v6972_v28  ;;  %v7136_v44 = vsel %vm3961_vm2, %v7036_v43, %v7035_v16  ;;  %v7177_v46 = vsel %vm3963_vm3, %v7036_v43, %v7035_v16 }
 0x585   : >> { %v6785_v26 = vmax.f32 %v6783_v7, %v6784_v0  ;;  %v6791_v24 = vrot.slane %v6790_v21, 2  ;;  %v6798_v30 = vrot.slane %v6797_v56, 2  ;;  %v6804_v48 = vmax.f32 %v6802_v31, %v6803_v36 }
 0x586   : >> { %v7137_v14 = vsel %vm3963_vm3, %v7037_v10, %v7136_v44  ;;  %v7178_v22 = vsel %vm3965_vm4, %v7037_v10, %v7177_v46  ;;  %v7222_v9 = vsel %vm3961_vm2, %v7037_v10, %v7036_v43  ;;  %v6116_v55 = vmax.f32 %v6100_v57, 0.0 }
 0x587   : >> { %v7138_v39 = vsel %vm3965_vm4, %v7038_v2, %v7137_v14  ;;  %v7179_v17 = vsel %vm3967_vm5, %v7038_v2, %v7178_v22  ;;  %v6786_v42 = vrot.slane %v6785_v26, 1  ;;  %v6792_v12 = vmax.f32 %v6790_v21, %v6791_v24 }
 0x588   : >> { %v6799_v52 = vmax.f32 %v6797_v56, %v6798_v30  ;;  %v6805_v40 = vrot.slane %v6804_v48, 2  ;;  %v7223_v47 = vsel %vm3963_vm3, %v7038_v2, %v7222_v9  ;;  %v6340_v23 = vcombine.high %v6116_v55, %v6116_v55 }
 0x589   : >> { %v6752_v19 = vmax.f32 %v19973_v59, %v6751_v11  ;;  %v6787_v53 = vmax.f32 %v6785_v26, %v6786_v42  ;;  %v6793_v60 = vrot.slane %v6792_v12, 1  ;;  %v6347_v54 = vrot.slane %v6116_v55, %v18349_v27 }
 0x58a   : >> { %v6800_v34 = vrot.slane %v6799_v52, 1  ;;  %v6806_v35 = vmax.f32 %v6804_v48, %v6805_v40  ;;  %v6354_v3 = vrot.slane %v6340_v23, %v18349_v27  ;;  %v6078_v25 = vadd.f32 %v6054_v1, %v19717_v63 }
 0x58b   : >> { %v6794_v32 = vmax.f32 %v6792_v12, %v6793_v60  ;;  %v6941_v5 = vmax.f32 %v19977_v18, %v6787_v53  ;;  %v6355_v6 = vcombine.high %v6347_v54, %v6347_v54  ;;  %v6809_v61 = vsel %vm2678_vm1, %v6347_v54, -inf  ;;  %v15063_v18 = vpop.f32.mrf.mxu0 }
 0x58c   : >> { %v6801_v33 = vmax.f32 %v6799_v52, %v6800_v34  ;;  %v6807_v4 = vrot.slane %v6806_v35, 1  ;;  %v6356_v59 = vcombine.high %v6354_v3, %v6354_v3  ;;  %v6810_v11 = vrot.slane %v6809_v61, 4 }
 0x58d   : >> { %v6942_v15 = vmax.f32 %v19979_v29, %v6794_v32  ;;  %v6973_v7 = vpack.c.bf16 %v6941_v5, %v6941_v5  ;;  %v6816_v16 = vsel %vm2678_vm1, %v6355_v6, -inf  ;;  %v6823_v58 = vsel %vm2678_vm1, %v6354_v3, -inf  ;;  %v15065_v30 = vpop.f32.mrf.mxu0 }
 0x58e   : >> { %v6808_v20 = vmax.f32 %v6806_v35, %v6807_v4  ;;  %v6943_v63 = vmax.f32 %v19989_v49, %v6801_v33  ;;  %v6811_v1 = vmax.f32 %v6809_v61, %v6810_v11  ;;  %v6817_v31 = vrot.slane %v6816_v16, 4 }
 0x58f   : >> { %v6974_v37 = vpack.c.bf16 %v6942_v15, %v6942_v15  ;;  %v7039_v28 = vunpack.c.l.b16 %v6973_v7  ;;  %v6824_v43 = vrot.slane %v6823_v58, 4  ;;  %v6830_v0 = vsel %vm2678_vm1, %v6356_v59, -inf  ;;  %v15066_v60 = vpop.f32.mrf.mxu0 }
 0x590   : >> { %v6944_v21 = vmax.f32 %v6752_v19, %v6808_v20  ;;  %v6975_v56 = vpack.c.bf16 %v6943_v63, %v6943_v63  ;;  %v6812_v36 = vrot.slane %v6811_v1, 2  ;;  %v6818_v29 = vmax.f32 %v6816_v16, %v6817_v31 }
 0x591   : >> { %v7040_v57 = vunpack.c.l.b16 %v6974_v37  ;;  %v7139_v10 = vsel %vm3967_vm5, %v7039_v28, %v7138_v39  ;;  %v7180_v2 = vsel %vm3969_vm6, %v7039_v28, %v7179_v17  ;;  %v7224_v44 = vsel %vm3965_vm4, %v7039_v28, %v7223_v47 }
 0x592   : >> { %v6976_v49 = vpack.c.bf16 %v6944_v21, %v6944_v21  ;;  %v7041_v46 = vunpack.c.l.b16 %v6975_v56  ;;  %v6813_v26 = vmax.f32 %v6811_v1, %v6812_v36  ;;  %v6819_v24 = vrot.slane %v6818_v29, 2 }
 0x593   : >> { %v7140_v48 = vsel %vm3969_vm6, %v7040_v57, %v7139_v10  ;;  %v7181_v14 = vsel %vm3971_vm7, %v7040_v57, %v7180_v2  ;;  %v7225_v22 = vsel %vm3967_vm5, %v7040_v57, %v7224_v44  ;;  %v6825_v9 = vmax.f32 %v6823_v58, %v6824_v43 }
 0x594   : >> { %v7042_v55 = vunpack.c.l.b16 %v6976_v49  ;;  %v7141_v39 = vsel %vm3971_vm7, %v7041_v46, %v7140_v48  ;;  %v7182_v17 = vsel %vm3973_vm8, %v7041_v46, %v7181_v14  ;;  %v7226_v42 = vsel %vm3969_vm6, %v7041_v46, %v7225_v22 }
 0x595   : >> { %v7191_v12 = vpack.c.b16 %v7182_v17, %v7182_v17  ;;  %v6820_v52 = vmax.f32 %v6818_v29, %v6819_v24  ;;  %v15064_v40 = vadd.f32 %v15063_v18, %v15062_v51  ;;  %v6831_v19 = vrot.slane %v6830_v0, 4 }
 0x596   : >> { %v7142_v47 = vsel %vm3973_vm8, %v7042_v55, %v7141_v39  ;;  %v7227_v23 = vsel %vm3971_vm7, %v7042_v55, %v7226_v42  ;;  %v6101_v53 = vadd.f32 %v19984_v45, %v6078_v25  ;;  %v6814_v3 = vrot.slane %v6813_v26, 1 }
 0x597   : >> { %v7152_v54 = vpack.c.b16 %v7142_v47, %v7142_v47  ;;  %v7202_v34 = vsel %vm18800_vm14, 0, %v7191_v12  ;;  %v7236_v35 = vpack.c.b16 %v7227_v23, %v7227_v23  ;;  %v6821_v32 = vrot.slane %v6820_v52, 1 }
 0x598   : >> { %13938 = vst [vmem:[%s19840_s30 + $0xc] sm:$0xf] %v7202_v34  ;;  %v6826_v5 = vrot.slane %v6825_v9, 2  ;;  %v6832_v6 = vmax.f32 %v6830_v0, %v6831_v19  ;;  %v6117_v51 = vmax.f32 %v6101_v53, 0.0  ;;  %v6059_v33 = vadd.f32 %v19964_v62, %v15064_v40 }
 0x599   : >> { %13932 = vst [vmem:[%s19840_s30 + $0x34] sm:$0xf] %v7152_v54  ;;  %v7247_v61 = vsel %vm19832_vm9, %v7236_v35, 0  ;;  %v15067_v4 = vadd.f32 %v15066_v60, %v15065_v30  ;;  %v20047_v16 = vmax.f32 %v6813_v26, %v6814_v3  ;;  %v20049_v58 = vmax.f32 %v6820_v52, %v6821_v32 }
 0x59a   : >> { %13944 = vst [vmem:[%s19840_s30 + $0x5c] sm:$0xf] %v7247_v61  ;;  %v6833_v25 = vrot.slane %v6832_v6, 2  ;;  %v6357_v59 = vcombine.high %v6117_v51, %v6117_v51  ;;  %v6364_v11 = vrot.slane %v6117_v51, %v18349_v27  ;;  %v6079_v15 = vadd.f32 %v6059_v33, %v19715_v13 }
 0x59b   : >> { %v6062_v7 = vadd.f32 %v19975_v8, %v15067_v4  ;;  %v6827_v20 = vmax.f32 %v6825_v9, %v6826_v5 }
 0x59c   : >> { %v6371_v63 = vrot.slane %v6357_v59, %v18349_v27  ;;  %v6372_v1 = vcombine.high %v6364_v11, %v6364_v11  ;;  %v6837_v62 = vsel %vm2678_vm1, %v6364_v11, -inf  ;;  %v6102_v31 = vadd.f32 %v19984_v45, %v6079_v15 }
 0x59d   : >> { %v6080_v18 = vadd.f32 %v6062_v7, %v19722_v50  ;;  %v6834_v37 = vmax.f32 %v6832_v6, %v6833_v25  ;;  %v6838_v43 = vrot.slane %v6837_v62, 4  ;;  %v6828_v36 = vrot.slane %v6827_v20, 1 }
 0x59e   : >> { %v6373_v28 = vcombine.high %v6371_v63, %v6371_v63  ;;  %v6851_v13 = vsel %vm2678_vm1, %v6371_v63, -inf  ;;  %v6844_v8 = vsel %vm2678_vm1, %v6372_v1, -inf  ;;  %v6118_v21 = vmax.f32 %v6102_v31, 0.0 }
 0x59f   : >> { %v6852_v0 = vrot.slane %v6851_v13, 4  ;;  %v6103_v56 = vadd.f32 %v19984_v45, %v6080_v18  ;;  %v6839_v29 = vmax.f32 %v6837_v62, %v6838_v43  ;;  %v6845_v57 = vrot.slane %v6844_v8, 4 }
 0x5a0   : >> { %v6858_v10 = vsel %vm2678_vm1, %v6373_v28, -inf  ;;  %v6374_v49 = vcombine.high %v6118_v21, %v6118_v21  ;;  %v6381_v50 = vrot.slane %v6118_v21, %v18349_v27  ;;  %v6835_v46 = vrot.slane %v6834_v37, 1 }
 0x5a1   : >> { %v6853_v2 = vmax.f32 %v6851_v13, %v6852_v0  ;;  %v6859_v44 = vrot.slane %v6858_v10, 4  ;;  %v6840_v26 = vrot.slane %v6839_v29, 2  ;;  %v6846_v24 = vmax.f32 %v6844_v8, %v6845_v57 }
 0x5a2   : >> { %v6119_v30 = vmax.f32 %v6103_v56, 0.0  ;;  %v6388_v22 = vrot.slane %v6374_v49, %v18349_v27  ;;  %v6389_v9 = vcombine.high %v6381_v50, %v6381_v50  ;;  %v6865_v39 = vsel %vm2678_vm1, %v6381_v50, -inf }
 0x5a3   : >> { %v6854_v48 = vrot.slane %v6853_v2, 2  ;;  %v6860_v14 = vmax.f32 %v6858_v10, %v6859_v44  ;;  %v6841_v45 = vmax.f32 %v6839_v29, %v6840_v26  ;;  %v6847_v55 = vrot.slane %v6846_v24, 2 }
 0x5a4   : >> { %v6391_v17 = vcombine.high %v6119_v30, %v6119_v30  ;;  %v6390_v52 = vcombine.high %v6388_v22, %v6388_v22  ;;  %v6866_v40 = vrot.slane %v6865_v39, 4  ;;  %v6872_v19 = vsel %vm2678_vm1, %v6389_v9, -inf }
 0x5a5   : >> { %v6855_v42 = vmax.f32 %v6853_v2, %v6854_v48  ;;  %v6861_v12 = vrot.slane %v6860_v14, 2  ;;  %v6842_v47 = vrot.slane %v6841_v45, 1  ;;  %v6848_v23 = vmax.f32 %v6846_v24, %v6847_v55 }
 0x5a6   : >> { %v6879_v53 = vsel %vm2678_vm1, %v6388_v22, -inf  ;;  %v6867_v34 = vmax.f32 %v6865_v39, %v6866_v40  ;;  %v6873_v35 = vrot.slane %v6872_v19, 4  ;;  %v6829_v3 = vmax.f32 %v6827_v20, %v6828_v36 }
 0x5a7   : >> { %v6856_v60 = vrot.slane %v6855_v42, 1  ;;  %v20064_v54 = vmax.f32 %v6860_v14, %v6861_v12  ;;  %v6836_v32 = vmax.f32 %v6834_v37, %v6835_v46  ;;  %v6880_v5 = vrot.slane %v6879_v53, 4 }
 0x5a8   : >> { %v6886_v6 = vsel %vm2678_vm1, %v6390_v52, -inf  ;;  %v20067_v51 = vmax.f32 %v6841_v45, %v6842_v47  ;;  %v6849_v61 = vrot.slane %v6848_v23, 1  ;;  %v6868_v33 = vrot.slane %v6867_v34, 2 }
 0x5a9   : >> { %v6874_v4 = vmax.f32 %v6872_v19, %v6873_v35  ;;  %v20069_v25 = vmax.f32 %v6855_v42, %v6856_v60  ;;  %v6881_v59 = vmax.f32 %v6879_v53, %v6880_v5  ;;  %v6887_v11 = vrot.slane %v6886_v6, 4 }
 0x5aa   : >> { %v6398_v15 = vrot.slane %v6119_v30, %v18349_v27  ;;  %v6863_v7 = vrot.slane %v20064_v54, 1  ;;  %v6869_v63 = vmax.f32 %v6867_v34, %v6868_v33  ;;  %v6405_v20 = vrot.slane %v6391_v17, %v18349_v27 }
 0x5ab   : >> { %v6875_v1 = vrot.slane %v6874_v4, 2  ;;  %v6882_v62 = vrot.slane %v6881_v59, 2  ;;  %v6888_v31 = vmax.f32 %v6886_v6, %v6887_v11  ;;  %v6850_v19 = vmax.f32 %v6848_v23, %v6849_v61 }
 0x5ac   : >> { %v6406_v18 = vcombine.high %v6398_v15, %v6398_v15  ;;  %v6893_v37 = vsel %vm2678_vm1, %v6398_v15, -inf  ;;  %v6870_v28 = vrot.slane %v6869_v63, 1  ;;  %v6407_v13 = vcombine.high %v6405_v20, %v6405_v20 }
 0x5ad   : >> { %v6876_v43 = vmax.f32 %v6874_v4, %v6875_v1  ;;  %v6894_v8 = vrot.slane %v6893_v37, 4  ;;  %v6883_v0 = vmax.f32 %v6881_v59, %v6882_v62  ;;  %v6889_v21 = vrot.slane %v6888_v31, 2 }
 0x5ae   : >> { %v6900_v56 = vsel %vm2678_vm1, %v6406_v18, -inf  ;;  %v6907_v36 = vsel %vm2678_vm1, %v6405_v20, -inf  ;;  %v6871_v29 = vmax.f32 %v6869_v63, %v6870_v28  ;;  %v6914_v46 = vsel %vm2678_vm1, %v6407_v13, -inf }
 0x5af   : >> { %v6877_v57 = vrot.slane %v6876_v43, 1  ;;  %v6895_v10 = vmax.f32 %v6893_v37, %v6894_v8  ;;  %v6901_v2 = vrot.slane %v6900_v56, 4  ;;  %v6884_v44 = vrot.slane %v6883_v0, 1 }
 0x5b0   : >> { %v6890_v49 = vmax.f32 %v6888_v31, %v6889_v21  ;;  %v6908_v50 = vrot.slane %v6907_v36, 4  ;;  %v6945_v24 = vmax.f32 %v20047_v16, %v6871_v29  ;;  %v6915_v45 = vrot.slane %v6914_v46, 4 }
 0x5b1   : >> { %v6878_v26 = vmax.f32 %v6876_v43, %v6877_v57  ;;  %v6896_v30 = vrot.slane %v6895_v10, 2  ;;  %v6902_v48 = vmax.f32 %v6900_v56, %v6901_v2  ;;  %v6885_v14 = vmax.f32 %v6883_v0, %v6884_v44 }
 0x5b2   : >> { %v6891_v22 = vrot.slane %v6890_v49, 1  ;;  %v6909_v9 = vmax.f32 %v6907_v36, %v6908_v50  ;;  %v6977_v39 = vpack.c.bf16 %v6945_v24, %v6945_v24  ;;  %v6916_v47 = vmax.f32 %v6914_v46, %v6915_v45 }
 0x5b3   : >> { %v6946_v55 = vmax.f32 %v20049_v58, %v6878_v26  ;;  %v6897_v17 = vmax.f32 %v6895_v10, %v6896_v30  ;;  %v6903_v42 = vrot.slane %v6902_v48, 2  ;;  %v6947_v52 = vmax.f32 %v6829_v3, %v6885_v14 }
 0x5b4   : >> { %v6892_v12 = vmax.f32 %v6890_v49, %v6891_v22  ;;  %v6910_v40 = vrot.slane %v6909_v9, 2  ;;  %v6917_v6 = vrot.slane %v6916_v47, 2  ;;  %v7043_v33 = vunpack.c.l.b16 %v6977_v39 }
 0x5b5   : >> { %v6978_v53 = vpack.c.bf16 %v6946_v55, %v6946_v55  ;;  %v6898_v60 = vrot.slane %v6897_v17, 1  ;;  %v6904_v34 = vmax.f32 %v6902_v48, %v6903_v42  ;;  %v6979_v35 = vpack.c.bf16 %v6947_v52, %v6947_v52  ;;  %v15745_v52 = vld [vmem:[%s20720_s5 + $0x138] sm:$0xff] (%p4295_p12)  }
 0x5b6   : >> { %v6948_v16 = vmax.f32 %v6836_v32, %v6892_v12  ;;  %v6911_v5 = vmax.f32 %v6909_v9, %v6910_v40  ;;  %v6918_v1 = vmax.f32 %v6916_v47, %v6917_v6  ;;  %v6864_v8 = vmax.f32 %v20064_v54, %v6863_v7  ;;  %15084 = vmatprep.subr.bf16.mxu0 (%p4295_p12), %v15745_v52  ;;  %v15748_v40 = vld [vmem:[%s20720_s5 + $0x130] sm:$0xff] (%p4295_p12)   ;;  %v15757_v6 = vld [vmem:[%s20720_s5 + $0x118] sm:$0xff] (%p4295_p12)  }
 0x5b7   : >> { %v7044_v4 = vunpack.c.l.b16 %v6978_v53  ;;  %v6899_v59 = vmax.f32 %v6897_v17, %v6898_v60  ;;  %v6905_v11 = vrot.slane %v6904_v34, 1  ;;  %v7045_v15 = vunpack.c.l.b16 %v6979_v35  ;;  %15085 = vmatpush3.bf16.msra.mxu0 (%p4295_p12), %v15746_v41  ;;  %v15749_v47 = vld [vmem:[%s20720_s5 + $0xf0] sm:$0xff] (%p4295_p12)   ;;  %v15751_v53 = vld [vmem:[%s20720_s5 + $0x128] sm:$0xff] (%p4295_p12)   ;;  %v15755_v35 = vld [vmem:[%s20720_s5 + $0xe0] sm:$0xff] (%p4295_p12)  }
 0x5b8   : >> { %v6980_v58 = vpack.c.bf16 %v6948_v16, %v6948_v16  ;;  %v6912_v63 = vrot.slane %v6911_v5, 1  ;;  %v6919_v28 = vrot.slane %v6918_v1, 1  ;;  %15086 = vmatprep.subr.bf16.mxu0 (%p4295_p12), %v15748_v40  ;;  %v15752_v60 = vld [vmem:[%s20720_s5 + $0xe8] sm:$0xff] (%p4295_p12)   ;;  %v15754_v16 = vld [vmem:[%s20720_s5 + $0x120] sm:$0xff] (%p4295_p12)   ;;  %v15808_v52 = vld [vmem:[%s20720_s5 + $0x1b8] sm:$0xff] (%p4295_p12)  }
 0x5b9   : >> { %v7143_v3 = vsel %vm3961_vm2, %v7044_v4, %v7043_v33  ;;  %v7183_v20 = vsel %vm3963_vm3, %v7044_v4, %v7043_v33  ;;  %v6906_v23 = vmax.f32 %v6904_v34, %v6905_v11  ;;  %v6949_v61 = vmax.f32 %v20067_v51, %v6899_v59  ;;  %v15753_v34 = vld [vmem:[%s20720_s5 + $0x168] sm:$0xff] (%p4295_p12)   ;;  %v15759_v33 = vld [vmem:[%s20720_s5 + $0x158] sm:$0xff] (%p4295_p12)   ;;  %v15760_v59 = vld [vmem:[%s20720_s5 + $0x110] sm:$0xff] (%p4295_p12)  }
 0x5ba   : >> { %v7046_v62 = vunpack.c.l.b16 %v6980_v58  ;;  %v7144_v32 = vsel %vm3963_vm3, %v7045_v15, %v7143_v3  ;;  %v7184_v31 = vsel %vm3965_vm4, %v7045_v15, %v7183_v20  ;;  %v7228_v18 = vsel %vm3961_vm2, %v7045_v15, %v7044_v4  ;;  %v15758_v4 = vld [vmem:[%s20720_s5 + $0xd8] sm:$0xff] (%p4295_p12)   ;;  %v15762_v11 = vld [vmem:[%s20720_s5 + $0x150] sm:$0xff] (%p4295_p12)   ;;  %v15763_v15 = vld [vmem:[%s20720_s5 + $0x108] sm:$0xff] (%p4295_p12)  }
 0x5bb   : >> { %v6913_v37 = vmax.f32 %v6911_v5, %v6912_v63  ;;  %v6950_v43 = vmax.f32 %v6850_v19, %v6906_v23  ;;  %v6981_v13 = vpack.c.bf16 %v6949_v61, %v6949_v61  ;;  %v6920_v56 = vmax.f32 %v6918_v1, %v6919_v28  ;;  %v15750_v19 = vld [vmem:[%s20720_s5 + $0x170] sm:$0xff] (%p4295_p12)   ;;  %15087 = vmatpush3.bf16.msra.mxu0 (%p4295_p12), %v15749_v47  ;;  %v15756_v5 = vld [vmem:[%s20720_s5 + $0x160] sm:$0xff] (%p4295_p12)   ;;  %v15764_v63 = vld [vmem:[%s20720_s5 + $0xc8] sm:$0xff] (%p4295_p12)  }
 0x5bc   : >> { %v7145_v0 = vsel %vm3965_vm4, %v7046_v62, %v7144_v32  ;;  %v7185_v21 = vsel %vm3967_vm5, %v7046_v62, %v7184_v31  ;;  %v7229_v51 = vsel %vm3963_vm3, %v7046_v62, %v7228_v18  ;;  %15427 = vmatprep.subr.bf16.mxu1 (%p4295_p12), %v15750_v19  ;;  %15088 = vmatprep.subr.bf16.mxu0 (%p4295_p12), %v15751_v53  ;;  %v15761_v58 = vld [vmem:[%s20720_s5 + $0xd0] sm:$0xff] (%p4295_p12)   ;;  %v15765_v1 = vld [vmem:[%s20720_s5 + $0x148] sm:$0xff] (%p4295_p12)   ;;  %v15766_v3 = vld [vmem:[%s20720_s5 + $0x100] sm:$0xff] (%p4295_p12)  }
 0x5bd   : >> { %v6951_v36 = vmax.f32 %v20069_v25, %v6913_v37  ;;  %v6982_v29 = vpack.c.bf16 %v6950_v43, %v6950_v43  ;;  %v7047_v57 = vunpack.c.l.b16 %v6981_v13  ;;  %v6952_v10 = vmax.f32 %v6864_v8, %v6920_v56  ;;  %15428 = vmatpush3.bf16.msra.mxu1 (%p4295_p12), %v15750_v19  ;;  %v15767_v23 = vld [vmem:[%s20720_s5 + $0xc0] sm:$0xff] (%p4295_p12)   ;;  %v15771_v31 = vld [vmem:[%s20720_s5 + $0x78] sm:$0xff] (%p4295_p12)   ;;  %v15776_v43 = vld [vmem:[%s20720_s5 + $0x70] sm:$0xff] (%p4295_p12)  }
 0x5be   : > { %15429 = vmatprep.subr.bf16.mxu1 (%p4295_p12), %v15753_v34  ;;  %v15768_v61 = vld [vmem:[%s20720_s5 + $0x140] sm:$0xff] (%p4295_p12)   ;;  %v15773_v18 = vld [vmem:[%s20720_s5 + $0x38] sm:$0xff] (%p4295_p12)   ;;  %v15778_v13 = vld [vmem:[%s20720_s5 + $0xb0] sm:$0xff] (%p4295_p12)  }
 0x5bf   : >> { %v6983_v2 = vpack.c.bf16 %v6951_v36, %v6951_v36  ;;  %v7048_v44 = vunpack.c.l.b16 %v6982_v29  ;;  %v7146_v49 = vsel %vm3967_vm5, %v7047_v57, %v7145_v0  ;;  %v7186_v50 = vsel %vm3969_vm6, %v7047_v57, %v7185_v21  ;;  %15089 = vmatpush3.bf16.msra.mxu0 (%p4295_p12), %v15752_v60  ;;  %v15775_v37 = vld [vmem:[%s20720_s5 + $0xb8] sm:$0xff] (%p4295_p12)   ;;  %v15777_v0 = vld [vmem:[%s20720_s5 + $0x30] sm:$0xff] (%p4295_p12)   ;;  %v15781_v21 = vld [vmem:[%s20720_s5 + $0x68] sm:$0xff] (%p4295_p12)  }
 0x5c0   : >> { %v7230_v54 = vsel %vm3965_vm4, %v7047_v57, %v7229_v51  ;;  %v6984_v7 = vpack.c.bf16 %v6952_v10, %v6952_v10  ;;  %15090 = vmatprep.subr.bf16.mxu0 (%p4295_p12), %v15754_v16  ;;  %v15783_v56 = vld [vmem:[%s20720_s5 + $0xa8] sm:$0xff] (%p4295_p12)   ;;  %v15784_v29 = vld [vmem:[%s20720_s5 + $0x60] sm:$0xff] (%p4295_p12)   ;;  %v15812_v47 = vld [vmem:[%s20720_s5 + $0x1f0] sm:$0xff] (%p4295_p12)  }
 0x5c1   : >> { %v7049_v46 = vunpack.c.l.b16 %v6983_v2  ;;  %v7147_v26 = vsel %vm3969_vm6, %v7048_v44, %v7146_v49  ;;  %v7187_v25 = vsel %vm3971_vm7, %v7048_v44, %v7186_v50  ;;  %v7231_v24 = vsel %vm3967_vm5, %v7048_v44, %v7230_v54  ;;  %15430 = vmatpush3.bf16.msra.mxu1 (%p4295_p12), %v15753_v34  ;;  %v15782_v36 = vld [vmem:[%s20720_s5 + $0x28] sm:$0xff] (%p4295_p12)   ;;  %v15786_v57 = vld [vmem:[%s20720_s5 + $0xa0] sm:$0xff] (%p4295_p12)   ;;  %v15789_v49 = vld [vmem:[%s20720_s5 + $0x58] sm:$0xff] (%p4295_p12)  }
 0x5c2   : >> { %v7050_v30 = vunpack.c.l.b16 %v6984_v7  ;;  %15431 = vmatprep.subr.bf16.mxu1 (%p4295_p12), %v15756_v5  ;;  %v15785_v2 = vld [vmem:[%s20720_s5 + $0x20] sm:$0xff] (%p4295_p12)   ;;  %v15791_v54 = vld [vmem:[%s20720_s5 + $0x18] sm:$0xff] (%p4295_p12)   ;;  %v15813_v19 = vld [vmem:[%s20720_s5 + $0x1b0] sm:$0xff] (%p4295_p12)  }
 0x5c3   : >> { %v7148_v48 = vsel %vm3971_vm7, %v7049_v46, %v7147_v26  ;;  %v7188_v14 = vsel %vm3973_vm8, %v7049_v46, %v7187_v25  ;;  %v7232_v22 = vsel %vm3969_vm6, %v7049_v46, %v7231_v24  ;;  %15091 = vmatpush3.bf16.msra.mxu0 (%p4295_p12), %v15755_v35  ;;  %v15793_v46 = vld [vmem:[%s20720_s5 + $0x98] sm:$0xff] (%p4295_p12)   ;;  %v15794_v26 = vld [vmem:[%s20720_s5 + $0x50] sm:$0xff] (%p4295_p12)   ;;  %v15817_v16 = vld [vmem:[%s20720_s5 + $0x1e8] sm:$0xff] (%p4295_p12)  }
 0x5c4   : >> { %v7192_v9 = vpack.c.b16 %v7188_v14, %v7188_v14  ;;  %v7149_v45 = vsel %vm3973_vm8, %v7050_v30, %v7148_v48  ;;  %v7233_v55 = vsel %vm3971_vm7, %v7050_v30, %v7232_v22  ;;  %4297 = sbr.rel (!%p4295_p12) target bundleno = 940 (0x3ac), region = 198  ;;  %15092 = vmatprep.subr.bf16.mxu0 (%p4295_p12), %v15757_v6  ;;  %v15795_v25 = vld [vmem:[%s20720_s5 + $0x10] sm:$0xff] (%p4295_p12)   ;;  %v15799_v14 = vld [vmem:[%s20720_s5 + $0x48] sm:$0xff] (%p4295_p12)   ;;  %v15820_v6 = vld [vmem:[%s20720_s5 + $0x1e0] sm:$0xff] (%p4295_p12)  }
 0x5c5   : >> { %v7153_v39 = vpack.c.b16 %v7149_v45, %v7149_v45  ;;  %v7237_v42 = vpack.c.b16 %v7233_v55, %v7233_v55  ;;  %15432 = vmatpush3.bf16.msra.mxu1 (%p4295_p12), %v15756_v5  ;;  %v15796_v24 = vld [vmem:[%s20720_s5 + $0x90] sm:$0xff] (%p4295_p12)   ;;  %v15800_v22 = vld [vmem:[%s20720_s5 + $0x8] sm:$0xff] (%p4295_p12)   ;;  %v15802_v45 = vld [vmem:[%s20720_s5 + $0x40] sm:$0xff] (%p4295_p12)  }
 0x5c6   : >> { %v7203_v17 = vsel %vm18800_vm14, 0, %v7192_v9  ;;  %15433 = vmatprep.subr.bf16.mxu1 (%p4295_p12), %v15759_v33  ;;  %v15801_v9 = vld [vmem:[%s20720_s5 + $0x88] sm:$0xff] (%p4295_p12)   ;;  %v15803_v55 = vld [vmem:[%s20720_s5] sm:$0xff] (%p4295_p12)   ;;  %v15814_v53 = vld [vmem:[%s20720_s5 + $0x230] sm:$0xff] (%p4295_p12)  }
 0x5c7   : >> { %13939 = vst [vmem:[%s19840_s30 + $0x10] sm:$0xf] %v7203_v17  ;;  %13933 = vst [vmem:[%s19840_s30 + $0x38] sm:$0xf] %v7153_v39  ;;  %v7248_v12 = vsel %vm19832_vm9, %v7237_v42, 0  ;;  %15093 = vmatpush3.bf16.msra.mxu0 (%p4295_p12), %v15758_v4  ;;  %v15804_v39 = vld [vmem:[%s20720_s5 + $0x80] sm:$0xff] (%p4295_p12)  }
 0x5c8   : >> { %13945 = vst [vmem:[%s19840_s30 + $0x60] sm:$0xf] %v7248_v12  ;;  %15094 = vmatprep.subr.bf16.mxu0 (%p4295_p12), %v15760_v59  ;;  %v15807_v12 = vld [vmem:[%s20720_s5 + $0x1f8] sm:$0xff] (%p4295_p12)   ;;  %v15818_v35 = vld [vmem:[%s20720_s5 + $0x1a8] sm:$0xff] (%p4295_p12)   ;;  %v15822_v4 = vld [vmem:[%s20720_s5 + $0x220] sm:$0xff] (%p4295_p12)  }
 0x5c9   : > { %15434 = vmatpush3.bf16.msra.mxu1 %v15759_v33  ;;  %v15819_v5 = vld [vmem:[%s20720_s5 + $0x228] sm:$0xff]   ;;  %v15821_v33 = vld [vmem:[%s20720_s5 + $0x1a0] sm:$0xff]  }
 0x5ca   : > { %15435 = vmatprep.subr.bf16.mxu1 %v15762_v11 }
 0x5cb   : > { %15095 = vmatpush3.bf16.msra.mxu0 %v15761_v58  ;;  %v15825_v58 = vld [vmem:[%s20720_s5 + $0x1d8] sm:$0xff]  }
 0x5cc   : > { %15096 = vmatprep.subr.bf16.mxu0 %v15763_v15  ;;  %v15826_v15 = vld [vmem:[%s20720_s5 + $0x198] sm:$0xff]  }
 0x5cd   : > { %15436 = vmatpush3.bf16.msra.mxu1 %v15762_v11 }
 0x5ce   : > { %15437 = vmatprep.subr.bf16.mxu1 %v15765_v1 }
 0x5cf   : > { %v15769_v20 = vld [vmem:[#allocation3 + $0x2c] sm:$0xff]   ;;  %15097 = vmatpush3.bf16.msra.mxu0 %v15764_v63  ;;  %v15772_v62 = vld [vmem:[#allocation3 + $0x54] sm:$0xff]   ;;  %v15770_v32 = vld [vmem:[#allocation3 + $0x4] sm:$0xff]  }
 0x5d0   : > { %7702 = vmatprep.mubr.bf16.mxu0 %v15769_v20  ;;  %15098 = vmatprep.subr.bf16.mxu0 %v15766_v3  ;;  %v15774_v28 = vld [vmem:[#allocation3 + $0x5c] sm:$0xff]   ;;  %v15779_v8 = vld [vmem:[#allocation3 + $0x34] sm:$0xff]   ;;  %v15780_v51 = vld [vmem:[#allocation3 + $0xc] sm:$0xff]  }
 0x5d1   : > { %15438 = vmatpush3.bf16.msra.mxu1 %v15765_v1  ;;  %15441 = vmatprep.mubr.bf16.mxu1 %v15772_v62  ;;  %v15787_v10 = vld [vmem:[#allocation3 + $0x3c] sm:$0xff]   ;;  %v15788_v44 = vld [vmem:[#allocation3 + $0x14] sm:$0xff]   ;;  %v15790_v50 = vld [vmem:[#allocation3 + $0x64] sm:$0xff]  }
 0x5d2   : > { %15439 = vmatprep.subr.bf16.mxu1 %v15768_v61  ;;  %v15792_v7 = vld [vmem:[#allocation3 + $0x6c] sm:$0xff]   ;;  %v15797_v30 = vld [vmem:[#allocation3 + $0x44] sm:$0xff]   ;;  %v15798_v48 = vld [vmem:[#allocation3 + $0x1c] sm:$0xff]  }
 0x5d3   : > { %15099 = vmatpush3.bf16.msra.mxu0 %v15767_v23  ;;  %v15805_v17 = vld [vmem:[#allocation3 + $0x28] sm:$0xff]   ;;  %v15806_v42 = vld [vmem:[#allocation3] sm:$0xff]   ;;  %v15809_v41 = vld [vmem:[#allocation3 + $0x50] sm:$0xff]  }
 0x5d4   : > { %15136 = vmatprep.subr.bf16.mxu0 %v15771_v31  ;;  %v15811_v40 = vld [vmem:[#allocation3 + $0x58] sm:$0xff]   ;;  %v15815_v60 = vld [vmem:[#allocation3 + $0x30] sm:$0xff]   ;;  %v15816_v34 = vld [vmem:[#allocation3 + $0x8] sm:$0xff]  }
 0x5d5   : > { %15440 = vmatpush3.bf16.msra.mxu1 %v15768_v61  ;;  %v15823_v59 = vld [vmem:[#allocation3 + $0x38] sm:$0xff]   ;;  %v15824_v11 = vld [vmem:[#allocation3 + $0x10] sm:$0xff]   ;;  %v15827_v63 = vld [vmem:[%s20720_s5 + $0x218] sm:$0xff]  }
 0x5d6   : > { %7703 = vmatmul.mubr.bf16.vlgmr.msra.gmra.mxu0 %v15770_v32  ;;  %15449 = vmatprep.subr.bf16.mxu1 %v15775_v37  ;;  %v15828_v1 = vld [vmem:[#allocation3 + $0x60] sm:$0xff]   ;;  %v15829_v3 = vld [vmem:[#allocation3 + $0x68] sm:$0xff]   ;;  %v15834_v32 = vld [vmem:[#allocation3 + $0x18] sm:$0xff]  }
 0x5d7   : > { %15137 = vmatpush3.bf16.msra.mxu0 %v15773_v18  ;;  %7710 = vmatprep.mubr.bf16.mxu0 %v15779_v8  ;;  %v15830_v20 = vld [vmem:[%s20720_s5 + $0x1d0] sm:$0xff]   ;;  %v15835_v31 = vld [vmem:[%s20720_s5 + $0x1c8] sm:$0xff]   ;;  %v15841_v8 = vld [vmem:[#allocation3 + $0x30] sm:$0xff]  }
 0x5d8   : > { %15442 = vmatmul.mubr.bf16.vlgmr.msra.gmra.mxu1 %v15774_v28  ;;  %15138 = vmatprep.subr.bf16.mxu0 %v15776_v43  ;;  %v15831_v23 = vld [vmem:[%s20720_s5 + $0x190] sm:$0xff]   ;;  %v15836_v18 = vld [vmem:[%s20720_s5 + $0x188] sm:$0xff]   ;;  %v15838_v28 = vld [vmem:[%s20720_s5 + $0x1c0] sm:$0xff]  }
 0x5d9   : > { %15450 = vmatpush3.bf16.msra.mxu1 %v15775_v37  ;;  %15445 = vmatprep.mubr.bf16.mxu1 %v15790_v50  ;;  %v15832_v61 = vld [vmem:[%s20720_s5 + $0x210] sm:$0xff]   ;;  %v15837_v37 = vld [vmem:[%s20720_s5 + $0x208] sm:$0xff]   ;;  %v15839_v43 = vld [vmem:[%s20720_s5 + $0x180] sm:$0xff]  }
 0x5da   : > { %15451 = vmatprep.subr.bf16.mxu1 %v15778_v13  ;;  %v15833_v62 = vld [vmem:[#allocation3 + $0x40] sm:$0xff]  }
 0x5db   : > { %15139 = vmatpush3.bf16.msra.mxu0 %v15777_v0  ;;  %v15842_v0 = vld [vmem:[#allocation3 + $0x8] sm:$0xff]  }
 0x5dc   : > { %15140 = vmatprep.subr.bf16.mxu0 %v15781_v21  ;;  %v15843_v21 = vld [vmem:[#allocation3 + $0x58] sm:$0xff]  }
 0x5dd   : > { %15452 = vmatpush3.bf16.msra.mxu1 %v15778_v13  ;;  %v15840_v13 = vld [vmem:[%s20720_s5 + $0x200] sm:$0xff]  }
 0x5de   : > { %7711 = vmatmul.mubr.bf16.gmra.mxu0 %v15780_v51  ;;  %15453 = vmatprep.subr.bf16.mxu1 %v15783_v56  ;;  %v15844_v51 = vld [vmem:[#allocation3 + $0x60] sm:$0xff]  }
 0x5df   : > { %15141 = vmatpush3.bf16.msra.mxu0 %v15782_v36  ;;  %7718 = vmatprep.mubr.bf16.mxu0 %v15787_v10  ;;  %v15846_v36 = vld [vmem:[#allocation3 + $0x10] sm:$0xff]  }
 0x5e0   : > { %15142 = vmatprep.subr.bf16.mxu0 %v15784_v29  ;;  %15446 = vmatmul.mubr.bf16.gmra.mxu1 %v15792_v7  ;;  %v15849_v29 = vld [vmem:[#allocation3 + $0x68] sm:$0xff]   ;;  %v15850_v10 = vld [vmem:[#allocation3 + $0x70] sm:$0xff]  }
 0x5e1   : > { %15454 = vmatpush3.bf16.msra.mxu1 %v15783_v56  ;;  %15465 = vmatprep.mubr.bf16.mxu1 %v15809_v41  ;;  %v15845_v56 = vld [vmem:[#allocation3 + $0x38] sm:$0xff]  }
 0x5e2   : > { %15455 = vmatprep.subr.bf16.mxu1 %v15786_v57 }
 0x5e3   : > { %15143 = vmatpush3.bf16.msra.mxu0 %v15785_v2  ;;  %v15848_v2 = vld [vmem:[#allocation3 + $0x18] sm:$0xff]  }
 0x5e4   : > { %15144 = vmatprep.subr.bf16.mxu0 %v15789_v49  ;;  %v15852_v49 = vld [vmem:[#allocation3 + $0x20] sm:$0xff]  }
 0x5e5   : > { %15456 = vmatpush3.bf16.msra.mxu1 %v15786_v57  ;;  %v15847_v57 = vld [vmem:[#allocation3 + $0x40] sm:$0xff]  }
 0x5e6   : > { %7719 = vmatmul.mubr.bf16.gmra.mxu0 %v15788_v44  ;;  %15457 = vmatprep.subr.bf16.mxu1 %v15793_v46  ;;  %v15851_v44 = vld [vmem:[#allocation3 + $0x48] sm:$0xff]  }
 0x5e7   : > { %15145 = vmatpush3.bf16.msra.mxu0 %v15791_v54  ;;  %7726 = vmatprep.mubr.bf16.mxu0 %v15797_v30 }
 0x5e8   : > { %15146 = vmatprep.subr.bf16.mxu0 %v15794_v26 }
 0x5e9   : > { %15458 = vmatpush3.bf16.msra.mxu1 %v15793_v46 }
 0x5ea   : > { %15459 = vmatprep.subr.bf16.mxu1 %v15796_v24 }
 0x5eb   : > { %15147 = vmatpush3.bf16.msra.mxu0 %v15795_v25 }
 0x5ec   : > { %15148 = vmatprep.subr.bf16.mxu0 %v15799_v14 }
 0x5ed   : > { %15460 = vmatpush3.bf16.msra.mxu1 %v15796_v24 }
 0x5ee   : > { %7727 = vmatmul.mubr.bf16.gmra.mxu0 %v15798_v48  ;;  %15461 = vmatprep.subr.bf16.mxu1 %v15801_v9 }
 0x5ef   : > { %15149 = vmatpush3.bf16.msra.mxu0 %v15800_v22  ;;  %8000 = vmatprep.mubr.bf16.mxu0 %v15805_v17 }
 0x5f0   : > { %15150 = vmatprep.subr.bf16.mxu0 %v15802_v45 }
 0x5f1   : > { %15462 = vmatpush3.bf16.msra.mxu1 %v15801_v9 }
 0x5f2   : > { %15463 = vmatprep.subr.bf16.mxu1 %v15804_v39 }
 0x5f3   : > { %15151 = vmatpush3.bf16.msra.mxu0 %v15803_v55 }
 0x5f4   : > { %15188 = vmatprep.subr.bf16.mxu0 %v15807_v12 }
 0x5f5   : > { %15464 = vmatpush3.bf16.msra.mxu1 %v15804_v39 }
 0x5f6   : > { %8001 = vmatmul.mubr.bf16.vlgmr.msra.gmra.mxu0 %v15806_v42  ;;  %15473 = vmatprep.subr.bf16.mxu1 %v15810_v38 }
 0x5f7   : > { %15189 = vmatpush3.bf16.msra.mxu0 %v15808_v52  ;;  %8008 = vmatprep.mubr.bf16.mxu0 %v15815_v60 }
 0x5f8   : > { %15466 = vmatmul.mubr.bf16.vlgmr.msra.gmra.mxu1 %v15811_v40  ;;  %15190 = vmatprep.subr.bf16.mxu0 %v15812_v47 }
 0x5f9   : > { %15474 = vmatpush3.bf16.msra.mxu1 %v15810_v38  ;;  %15469 = vmatprep.mubr.bf16.mxu1 %v15828_v1 }
 0x5fa   : > { %15475 = vmatprep.subr.bf16.mxu1 %v15814_v53 }
 0x5fb   : > { %15191 = vmatpush3.bf16.msra.mxu0 %v15813_v19 }
 0x5fc   : > { %15192 = vmatprep.subr.bf16.mxu0 %v15817_v16 }
 0x5fd   : > { %15476 = vmatpush3.bf16.msra.mxu1 %v15814_v53 }
 0x5fe   : > { %8009 = vmatmul.mubr.bf16.gmra.mxu0 %v15816_v34  ;;  %15477 = vmatprep.subr.bf16.mxu1 %v15819_v5 }
 0x5ff   : > { %15193 = vmatpush3.bf16.msra.mxu0 %v15818_v35  ;;  %8016 = vmatprep.mubr.bf16.mxu0 %v15823_v59 }
 0x600   : > { %15194 = vmatprep.subr.bf16.mxu0 %v15820_v6  ;;  %15470 = vmatmul.mubr.bf16.gmra.mxu1 %v15829_v3 }
 0x601   : > { %15478 = vmatpush3.bf16.msra.mxu1 %v15819_v5  ;;  %15489 = vmatprep.mubr.bf16.mxu1 %v15843_v21 }
 0x602   : > { %15479 = vmatprep.subr.bf16.mxu1 %v15822_v4 }
 0x603   : > { %15195 = vmatpush3.bf16.msra.mxu0 %v15821_v33 }
 0x604   : > { %15196 = vmatprep.subr.bf16.mxu0 %v15825_v58 }
 0x605   : > { %15480 = vmatpush3.bf16.msra.mxu1 %v15822_v4 }
 0x606   : > { %8017 = vmatmul.mubr.bf16.gmra.mxu0 %v15824_v11  ;;  %15481 = vmatprep.subr.bf16.mxu1 %v15827_v63 }
 0x607   : > { %15197 = vmatpush3.bf16.msra.mxu0 %v15826_v15  ;;  %8024 = vmatprep.mubr.bf16.mxu0 %v15833_v62 }
 0x608   : > { %15198 = vmatprep.subr.bf16.mxu0 %v15830_v20 }
 0x609   : > { %15482 = vmatpush3.bf16.msra.mxu1 %v15827_v63 }
 0x60a   : > { %15483 = vmatprep.subr.bf16.mxu1 %v15832_v61 }
 0x60b   : > { %15199 = vmatpush3.bf16.msra.mxu0 %v15831_v23 }
 0x60c   : > { %15200 = vmatprep.subr.bf16.mxu0 %v15835_v31 }
 0x60d   : > { %15484 = vmatpush3.bf16.msra.mxu1 %v15832_v61 }
 0x60e   : > { %8025 = vmatmul.mubr.bf16.gmra.mxu0 %v15834_v32  ;;  %15485 = vmatprep.subr.bf16.mxu1 %v15837_v37 }
 0x60f   : > { %15201 = vmatpush3.bf16.msra.mxu0 %v15836_v18  ;;  %8422 = vmatprep.mubr.bf16.mxu0 %v15841_v8 }
 0x610   : > { %15202 = vmatprep.subr.bf16.mxu0 %v15838_v28 }
 0x611   : > { %15486 = vmatpush3.bf16.msra.mxu1 %v15837_v37 }
 0x612   : > { %15487 = vmatprep.subr.bf16.mxu1 %v15840_v13 }
 0x613   : > { %15203 = vmatpush3.bf16.msra.mxu0 %v15839_v43 }
 0x615   : > { %15488 = vmatpush3.bf16.msra.mxu1 %v15840_v13 }
 0x616   : > { %8423 = vmatmul.mubr.bf16.vlgmr.msra.gmra.mxu0 %v15842_v0 }
 0x617   : > { %8430 = vmatprep.mubr.bf16.mxu0 %v15845_v56 }
 0x618   : > { %15490 = vmatmul.mubr.bf16.vlgmr.msra.gmra.mxu1 %v15844_v51 }
 0x619   : > { %15493 = vmatprep.mubr.bf16.mxu1 %v15849_v29 }
 0x61e   : > { %8431 = vmatmul.mubr.bf16.gmra.mxu0 %v15846_v36 }
 0x61f   : > { %8438 = vmatprep.mubr.bf16.mxu0 %v15847_v57 }
 0x620   : > { %15494 = vmatmul.mubr.bf16.gmra.mxu1 %v15850_v10 }
 0x626   : > { %8439 = vmatmul.mubr.bf16.gmra.mxu0 %v15848_v2 }
 0x627   : > { %8446 = vmatprep.mubr.bf16.mxu0 %v15851_v44 }
 0x62e   : > { %8447 = vmatmul.mubr.bf16.gmra.mxu0 %v15852_v49 }
 0x696   : > { %v15100_v50 = vpop.f32.mrf.mxu0 }
 0x698   : > { %v15101_v54 = vpop.f32.mrf.mxu0  ;;  %v15443_v14 = vpop.f32.mrf.mxu1 }
 0x699   : > { %v15102_v7 = vadd.f32 %v15101_v54, %v15100_v50 }
 0x69a   : > { %v15103_v46 = vpop.f32.mrf.mxu0  ;;  %v7769_v55 = vpop.f32.mrf.mxu1 }
 0x69b   : > { %v7770_v56 = vadd.f32 %v15102_v7, %v7769_v55  ;;  %v20347_v7 = vld [vmem:[%s20721_s6] ss:$0 sm:$0xff] }
 0x69c   : > { %v15104_v26 = vpop.f32.mrf.mxu0  ;;  %v15444_v12 = vpop.f32.mrf.mxu1 }
 0x69d   : > { %v15105_v25 = vadd.f32 %v15104_v26, %v15103_v46 }
 0x69e   : > { %v15106_v24 = vpop.f32.mrf.mxu0  ;;  %v7772_v40 = vpop.f32.mrf.mxu1 }
 0x69f   : > { %v7773_v49 = vadd.f32 %v15105_v25, %v7772_v40 }
 0x6a0   : > { %v15107_v30 = vpop.f32.mrf.mxu0  ;;  %v15447_v19 = vpop.f32.mrf.mxu1 }
 0x6a1   : > { %v15108_v48 = vadd.f32 %v15107_v30, %v15106_v24 }
 0x6a2   : > { %v15109_v22 = vpop.f32.mrf.mxu0  ;;  %v7785_v16 = vpop.f32.mrf.mxu1 }
 0x6a3   : > { %v7778_v24 = vadd.f32 %v15443_v14, %v15108_v48 }
 0x6a4   : > { %v15110_v9 = vpop.f32.mrf.mxu0  ;;  %v20334_v6 = vpop.f32.mrf.mxu1 }
 0x6a5   : > { %v20330_v45 = vadd.f32 %v15110_v9, %v15109_v22 }
 0x6a6   : > { %v15112_v39 = vpop.f32.mrf.mxu0  ;;  %v7788_v59 = vpop.f32.mrf.mxu1 }
 0x6a7   : > { %v7781_v25 = vadd.f32 %v15444_v12, %v20330_v45 }
 0x6a8   : > { %v15113_v17 = vpop.f32.mrf.mxu0 }
 0x6a9   : > { %v20332_v42 = vadd.f32 %v15113_v17, %v15112_v39 }
 0x6aa   : > { %v15115_v52 = vpop.f32.mrf.mxu0 }
 0x6ab   : > { %v7786_v40 = vadd.f32 %v20332_v42, %v7785_v16 }
 0x6ac   : > { %v15116_v41 = vpop.f32.mrf.mxu0 }
 0x6ad   : > { %v15117_v38 = vadd.f32 %v15116_v41, %v15115_v52 }
 0x6ae   : > { %v15118_v47 = vpop.f32.mrf.mxu0 }
 0x6af   : > { %v7789_v14 = vadd.f32 %v15117_v38, %v7788_v59 }
 0x6b0   : > { %v15119_v53 = vpop.f32.mrf.mxu0 }
 0x6b1   : > { %v15120_v60 = vadd.f32 %v15119_v53, %v15118_v47 }
 0x6b2   : > { %v15121_v34 = vpop.f32.mrf.mxu0 }
 0x6b4   : > { %v15122_v35 = vpop.f32.mrf.mxu0 }
 0x6b6   : > { %v15152_v5 = vpop.f32.mrf.mxu0 }
 0x6b8   : > { %v15153_v33 = vpop.f32.mrf.mxu0  ;;  %v20336_v58 = vpop.f32.mrf.mxu1 }
 0x6b9   : > { %v15154_v21 = vadd.f32 %v15153_v33, %v15152_v5  ;;  %v7794_v5 = vadd.f32 %v15447_v19, %v15120_v60  ;;  %v15123_v33 = vadd.f32 %v15122_v35, %v15121_v34 }
 0x6ba   : > { %v15155_v4 = vpop.f32.mrf.mxu0  ;;  %v8067_v1 = vpop.f32.mrf.mxu1 }
 0x6bb   : > { %v8003_v10 = vadd.f32 %v15154_v21, %v7770_v56  ;;  %v20353_v16 = vadd.f32 %v20334_v6, %v15123_v33 }
 0x6bc   : > { %v15156_v11 = vpop.f32.mrf.mxu0  ;;  %v20338_v23 = vpop.f32.mrf.mxu1 }
 0x6bd   : > { %v15157_v57 = vadd.f32 %v15156_v11, %v15155_v4  ;;  %v8068_v30 = vadd.f32 %v8067_v1, %v8003_v10 }
 0x6be   : > { %v15158_v15 = vpop.f32.mrf.mxu0  ;;  %v8070_v32 = vpop.f32.mrf.mxu1 }
 0x6bf   : > { %v8006_v22 = vadd.f32 %v15157_v57, %v7773_v49 }
 0x6c0   : > { %v15159_v63 = vpop.f32.mrf.mxu0  ;;  %v15471_v18 = vpop.f32.mrf.mxu1 }
 0x6c1   : > { %v15160_v54 = vadd.f32 %v15159_v63, %v15158_v15  ;;  %v8071_v63 = vadd.f32 %v8070_v32, %v8006_v22 }
 0x6c2   : > { %v15161_v3 = vpop.f32.mrf.mxu0  ;;  %v8083_v43 = vpop.f32.mrf.mxu1 }
 0x6c3   : > { %v8011_v4 = vadd.f32 %v15160_v54, %v7778_v24 }
 0x6c4   : > { %v15162_v20 = vpop.f32.mrf.mxu0  ;;  %v20342_v0 = vpop.f32.mrf.mxu1 }
 0x6c5   : > { %v15163_v39 = vadd.f32 %v15162_v20, %v15161_v3  ;;  %v8076_v38 = vadd.f32 %v20336_v58, %v8011_v4 }
 0x6c6   : > { %v15164_v61 = vpop.f32.mrf.mxu0  ;;  %v8086_v36 = vpop.f32.mrf.mxu1 }
 0x6c7   : > { %v8014_v20 = vadd.f32 %v15163_v39, %v7781_v25 }
 0x6c8   : > { %v15165_v62 = vpop.f32.mrf.mxu0 }
 0x6c9   : > { %v15166_v17 = vadd.f32 %v15165_v62, %v15164_v61  ;;  %v20359_v32 = vadd.f32 %v20338_v23, %v8014_v20 }
 0x6ca   : > { %v15167_v31 = vpop.f32.mrf.mxu0 }
 0x6cb   : > { %v8019_v61 = vadd.f32 %v15166_v17, %v7786_v40 }
 0x6cc   : > { %v15168_v37 = vpop.f32.mrf.mxu0 }
 0x6cd   : > { %v15169_v52 = vadd.f32 %v15168_v37, %v15167_v31 }
 0x6ce   : > { %v15170_v28 = vpop.f32.mrf.mxu0 }
 0x6cf   : > { %v8022_v31 = vadd.f32 %v15169_v52, %v7789_v14 }
 0x6d0   : > { %v15171_v13 = vpop.f32.mrf.mxu0 }
 0x6d1   : > { %v15172_v41 = vadd.f32 %v15171_v13, %v15170_v28  ;;  %v20361_v28 = vadd.f32 %v8083_v43, %v8019_v61  ;;  %v20365_v21 = vadd.f32 %v8086_v36, %v8022_v31 }
 0x6d2   : > { %v20340_v8 = vpop.f32.mrf.mxu0 }
 0x6d3   : > { %v8027_v62 = vadd.f32 %v15172_v41, %v7794_v5 }
 0x6d4   : > { %v15174_v51 = vpop.f32.mrf.mxu0 }
 0x6d5   : > { %v20363_v13 = vadd.f32 %v15471_v18, %v8027_v62  ;;  %v20370_v10 = vadd.f32 %v15174_v51, %v20340_v8 }
 0x6d6   : > { %v15204_v29 = vpop.f32.mrf.mxu0 }
 0x6d8   : > { %v15205_v2 = vpop.f32.mrf.mxu0  ;;  %v15491_v44 = vpop.f32.mrf.mxu1 }
 0x6d9   : > { %v15206_v50 = vadd.f32 %v15205_v2, %v15204_v29 }
 0x6da   : > { %v15207_v46 = vpop.f32.mrf.mxu0  ;;  %v8489_v26 = vpop.f32.mrf.mxu1 }
 0x6db   : > { %v8490_v9 = vadd.f32 %v15206_v50, %v8489_v26 }
 0x6dc   : > { %v15208_v55 = vpop.f32.mrf.mxu0  ;;  %v15492_v47 = vpop.f32.mrf.mxu1 }
 0x6dd   : > { %v8520_v53 = vadd.f32 %v8490_v9, %v8068_v30  ;;  %v15209_v48 = vadd.f32 %v15208_v55, %v15207_v46 }
 0x6de   : > { %v15210_v11 = vpop.f32.mrf.mxu0  ;;  %v8492_v15 = vpop.f32.mrf.mxu1 }
 0x6df   : > { %v8535_v1 = vadd.f32 %v20347_v7, %v8520_v53  ;;  %v8493_v3 = vadd.f32 %v15209_v48, %v8492_v15 }
 0x6e0   : > { %v15211_v37 = vpop.f32.mrf.mxu0 }
 0x6e1   : > { %v8543_v45 = vmax.f32 %v8535_v1, 0.0  ;;  %v8521_v12 = vadd.f32 %v8493_v3, %v8071_v63  ;;  %v15212_v42 = vadd.f32 %v15211_v37, %v15210_v11 }
 0x6e2   : > { %v15213_v19 = vpop.f32.mrf.mxu0 }
 0x6e3   : > { %v8559_v60 = vcombine.high %v8543_v45, %v8543_v45  ;;  %v8566_v34 = vrot.slane %v8543_v45, %v18349_v27  ;;  %v8536_v35 = vadd.f32 %v20347_v7, %v8521_v12  ;;  %v8498_v59 = vadd.f32 %v15491_v44, %v15212_v42 }
 0x6e4   : > { %v15214_v6 = vpop.f32.mrf.mxu0 }
 0x6e5   : > { %v8573_v56 = vrot.slane %v8559_v60, %v18349_v27  ;;  %v8574_v58 = vcombine.high %v8566_v34, %v8566_v34  ;;  %v8728_v29 = vsel %vm2678_vm1, %v8566_v34, -inf  ;;  %v8544_v57 = vmax.f32 %v8536_v35, 0.0 }
 0x6e6   : > { %v8729_v2 = vrot.slane %v8728_v29, 4  ;;  %v8522_v44 = vadd.f32 %v8498_v59, %v8076_v38  ;;  %v15215_v23 = vadd.f32 %v15214_v6, %v15213_v19  ;;  %v15216_v42 = vpop.f32.mrf.mxu0 }
 0x6e7   : > { %v8575_v49 = vcombine.high %v8573_v56, %v8573_v56  ;;  %v8735_v43 = vsel %vm2678_vm1, %v8574_v58, -inf  ;;  %v8742_v18 = vsel %vm2678_vm1, %v8573_v56, -inf  ;;  %v8576_v36 = vcombine.high %v8544_v57, %v8544_v57 }
 0x6e8   : > { %v8730_v50 = vmax.f32 %v8728_v29, %v8729_v2  ;;  %v8736_v54 = vrot.slane %v8735_v43, 4  ;;  %v8743_v46 = vrot.slane %v8742_v18, 4  ;;  %v8583_v26 = vrot.slane %v8544_v57, %v18349_v27 }
 0x6e9   : > { %v8749_v24 = vsel %vm2678_vm1, %v8575_v49, -inf  ;;  %v8590_v30 = vrot.slane %v8576_v36, %v18349_v27  ;;  %v8537_v8 = vadd.f32 %v20347_v7, %v8522_v44  ;;  %v8501_v51 = vadd.f32 %v15492_v47, %v15215_v23 }
 0x6ea   : > { %v8731_v22 = vrot.slane %v8730_v50, 2  ;;  %v8737_v9 = vmax.f32 %v8735_v43, %v8736_v54  ;;  %v8744_v39 = vmax.f32 %v8742_v18, %v8743_v46  ;;  %v8750_v17 = vrot.slane %v8749_v24, 4  ;;  %v15217_v18 = vpop.f32.mrf.mxu0 }
 0x6eb   : > { %v8591_v52 = vcombine.high %v8583_v26, %v8583_v26  ;;  %v8592_v41 = vcombine.high %v8590_v30, %v8590_v30  ;;  %v8756_v55 = vsel %vm2678_vm1, %v8583_v26, -inf  ;;  %v8770_v25 = vsel %vm2678_vm1, %v8590_v30, -inf }
 0x6ec   : > { %v8732_v40 = vmax.f32 %v8730_v50, %v8731_v22  ;;  %v8738_v53 = vrot.slane %v8737_v9, 2  ;;  %v8745_v48 = vrot.slane %v8744_v39, 2  ;;  %v8751_v14 = vmax.f32 %v8749_v24, %v8750_v17 }
 0x6ed   : > { %v8757_v5 = vrot.slane %v8756_v55, 4  ;;  %v8763_v33 = vsel %vm2678_vm1, %v8591_v52, -inf  ;;  %v8771_v4 = vrot.slane %v8770_v25, 4  ;;  %v8777_v47 = vsel %vm2678_vm1, %v8592_v41, -inf  ;;  %v20387_v52 = vpop.f32.mrf.mxu1 }
 0x6ee   : > { %v8733_v11 = vrot.slane %v8732_v40, 1  ;;  %v8739_v15 = vmax.f32 %v8737_v9, %v8738_v53  ;;  %v8746_v63 = vmax.f32 %v8744_v39, %v8745_v48  ;;  %v8752_v1 = vrot.slane %v8751_v14, 2 }
 0x6ef   : > { %v8758_v3 = vmax.f32 %v8756_v55, %v8757_v5  ;;  %v8764_v20 = vrot.slane %v8763_v33, 4  ;;  %v8772_v61 = vmax.f32 %v8770_v25, %v8771_v4  ;;  %v8778_v62 = vrot.slane %v8777_v47, 4  ;;  %v15219_v25 = vpop.f32.mrf.mxu0 }
 0x6f0   : > { %v8734_v31 = vmax.f32 %v8732_v40, %v8733_v11  ;;  %v8740_v37 = vrot.slane %v8739_v15, 1  ;;  %v8747_v45 = vrot.slane %v8746_v63, 1  ;;  %v8753_v12 = vmax.f32 %v8751_v14, %v8752_v1 }
 0x6f1   : > { %v8759_v38 = vrot.slane %v8758_v3, 2  ;;  %v8765_v19 = vmax.f32 %v8763_v33, %v8764_v20  ;;  %v8773_v60 = vrot.slane %v8772_v61, 2  ;;  %v8779_v34 = vmax.f32 %v8777_v47, %v8778_v62 }
 0x6f2   : > { %v8741_v35 = vmax.f32 %v8739_v15, %v8740_v37  ;;  %v8748_v59 = vmax.f32 %v8746_v63, %v8747_v45  ;;  %v8754_v6 = vrot.slane %v8753_v12, 1  ;;  %v8545_v56 = vmax.f32 %v8537_v8, 0.0  ;;  %v15220_v45 = vpop.f32.mrf.mxu0 }
 0x6f3   : > { %v8760_v58 = vmax.f32 %v8758_v3, %v8759_v38  ;;  %v8766_v29 = vrot.slane %v8765_v19, 2  ;;  %v8774_v57 = vmax.f32 %v8772_v61, %v8773_v60  ;;  %v8780_v2 = vrot.slane %v8779_v34, 2  ;;  %v8505_v3 = vpop.f32.mrf.mxu1 }
 0x6f4   : > { %v8755_v44 = vmax.f32 %v8753_v12, %v8754_v6  ;;  %v8593_v23 = vcombine.high %v8545_v56, %v8545_v56  ;;  %v8600_v49 = vrot.slane %v8545_v56, %v18349_v27  ;;  %v8523_v43 = vadd.f32 %v8501_v51, %v20359_v32 }
 0x6f5   : > { %v8761_v36 = vrot.slane %v8760_v58, 1  ;;  %v8767_v50 = vmax.f32 %v8765_v19, %v8766_v29  ;;  %v8775_v54 = vrot.slane %v8774_v57, 1  ;;  %v8781_v46 = vmax.f32 %v8779_v34, %v8780_v2 }
 0x6f6   : > { %v8607_v26 = vrot.slane %v8593_v23, %v18349_v27  ;;  %v8608_v24 = vcombine.high %v8600_v49, %v8600_v49  ;;  %v8784_v30 = vsel %vm2678_vm1, %v8600_v49, -inf  ;;  %v8538_v8 = vadd.f32 %v20347_v7, %v8523_v43  ;;  %v15222_v43 = vpop.f32.mrf.mxu0 }
 0x6f7   : > { %v8762_v22 = vmax.f32 %v8760_v58, %v8761_v36  ;;  %v8768_v9 = vrot.slane %v8767_v50, 1  ;;  %v8776_v39 = vmax.f32 %v8774_v57, %v8775_v54  ;;  %v8782_v17 = vrot.slane %v8781_v46, 1  ;;  %v20405_v57 = vpop.f32.mrf.mxu1 }
 0x6f8   : > { %v8609_v41 = vcombine.high %v8607_v26, %v8607_v26  ;;  %v8785_v32 = vrot.slane %v8784_v30, 4  ;;  %v8791_v51 = vsel %vm2678_vm1, %v8608_v24, -inf  ;;  %v8798_v55 = vsel %vm2678_vm1, %v8607_v26, -inf }
 0x6f9   : > { %v8769_v40 = vmax.f32 %v8767_v50, %v8768_v9  ;;  %v8783_v53 = vmax.f32 %v8781_v46, %v8782_v17  ;;  %v8952_v48 = vmax.f32 %v8734_v31, %v8762_v22  ;;  %v8954_v14 = vmax.f32 %v8748_v59, %v8776_v39  ;;  %v8508_v22 = vpop.f32.mrf.mxu1 }
 0x6fa   : > { %v8786_v5 = vmax.f32 %v8784_v30, %v8785_v32  ;;  %v8792_v33 = vrot.slane %v8791_v51, 4  ;;  %v8799_v4 = vrot.slane %v8798_v55, 4  ;;  %v8805_v47 = vsel %vm2678_vm1, %v8609_v41, -inf  ;;  %v15223_v32 = vpop.f32.mrf.mxu0 }
 0x6fb   : > { %v8953_v11 = vmax.f32 %v8741_v35, %v8769_v40  ;;  %v8955_v15 = vmax.f32 %v8755_v44, %v8783_v53  ;;  %v20392_v63 = vpack.c.bf16 %v8952_v48, %v8952_v48  ;;  %v20394_v1 = vpack.c.bf16 %v8954_v14, %v8954_v14 }
 0x6fc   : > { %v8787_v20 = vrot.slane %v8786_v5, 2  ;;  %v8793_v61 = vmax.f32 %v8791_v51, %v8792_v33  ;;  %v8800_v62 = vmax.f32 %v8798_v55, %v8799_v4  ;;  %v8806_v37 = vrot.slane %v8805_v47, 4 }
 0x6fd   : > { %v20396_v12 = vpack.c.bf16 %v8953_v11, %v8953_v11  ;;  %v20398_v31 = vpack.c.bf16 %v8955_v15, %v8955_v15  ;;  %v8546_v38 = vmax.f32 %v8538_v8, 0.0  ;;  %v15218_v19 = vadd.f32 %v15217_v18, %v15216_v42 }
 0x6fe   : > { %v8788_v60 = vmax.f32 %v8786_v5, %v8787_v20  ;;  %v8794_v34 = vrot.slane %v8793_v61, 2  ;;  %v8801_v35 = vrot.slane %v8800_v62, 2  ;;  %v8807_v59 = vmax.f32 %v8805_v47, %v8806_v37 }
 0x6ff   : > { %v20402_v6 = vadd.f32 %v20370_v10, %v20353_v16  ;;  %v8610_v56 = vcombine.high %v8546_v38, %v8546_v38  ;;  %v8617_v58 = vrot.slane %v8546_v38, %v18349_v27  ;;  %v8506_v29 = vadd.f32 %v15218_v19, %v8505_v3 }
 0x700   : > { %v8789_v2 = vrot.slane %v8788_v60, 1  ;;  %v8795_v44 = vmax.f32 %v8793_v61, %v8794_v34  ;;  %v8802_v23 = vmax.f32 %v8800_v62, %v8801_v35  ;;  %v8808_v49 = vrot.slane %v8807_v59, 2 }
 0x701   : > { %v8624_v42 = vrot.slane %v8610_v56, %v18349_v27  ;;  %v8625_v18 = vcombine.high %v8617_v58, %v8617_v58  ;;  %v8812_v36 = vsel %vm2678_vm1, %v8617_v58, -inf  ;;  %v8524_v50 = vadd.f32 %v8506_v29, %v20361_v28 }
 0x702   : > { %v8796_v16 = vrot.slane %v8795_v44, 1  ;;  %v8803_v10 = vrot.slane %v8802_v23, 1  ;;  %v8809_v54 = vmax.f32 %v8807_v59, %v8808_v49  ;;  %v15221_v46 = vadd.f32 %v15220_v45, %v15219_v25 }
 0x703   : > { %v8626_v26 = vcombine.high %v8624_v42, %v8624_v42  ;;  %v8813_v24 = vrot.slane %v8812_v36, 4  ;;  %v8819_v30 = vsel %vm2678_vm1, %v8625_v18, -inf  ;;  %v8826_v8 = vsel %vm2678_vm1, %v8624_v42, -inf }
 0x704   : > { %v8790_v9 = vmax.f32 %v8788_v60, %v8789_v2  ;;  %v8797_v39 = vmax.f32 %v8795_v44, %v8796_v16  ;;  %v8810_v17 = vrot.slane %v8809_v54, 1  ;;  %v8820_v41 = vrot.slane %v8819_v30, 4 }
 0x705   : > { %v8814_v51 = vmax.f32 %v8812_v36, %v8813_v24  ;;  %v8827_v55 = vrot.slane %v8826_v8, 4  ;;  %v8833_v28 = vsel %vm2678_vm1, %v8626_v26, -inf  ;;  %v8539_v40 = vadd.f32 %v20347_v7, %v8524_v50 }
 0x706   : > { %v8804_v53 = vmax.f32 %v8802_v23, %v8803_v10  ;;  %v8821_v25 = vmax.f32 %v8819_v30, %v8820_v41  ;;  %v8834_v48 = vrot.slane %v8833_v28, 4  ;;  %v8509_v14 = vadd.f32 %v15221_v46, %v8508_v22  ;;  %v15225_v22 = vpop.f32.mrf.mxu0 }
 0x707   : > { %v8815_v5 = vrot.slane %v8814_v51, 2  ;;  %v8828_v33 = vmax.f32 %v8826_v8, %v8827_v55  ;;  %v8547_v4 = vmax.f32 %v8539_v40, 0.0  ;;  %v15224_v47 = vadd.f32 %v15223_v32, %v15222_v43 }
 0x708   : > { %v8811_v11 = vmax.f32 %v8809_v54, %v8810_v17  ;;  %v8822_v15 = vrot.slane %v8821_v25, 2  ;;  %v8835_v3 = vmax.f32 %v8833_v28, %v8834_v48  ;;  %v8525_v20 = vadd.f32 %v8509_v14, %v20365_v21 }
 0x709   : > { %v8816_v61 = vmax.f32 %v8814_v51, %v8815_v5  ;;  %v8829_v62 = vrot.slane %v8828_v33, 2  ;;  %v8627_v37 = vcombine.high %v8547_v4, %v8547_v4  ;;  %v8634_v45 = vrot.slane %v8547_v4, %v18349_v27 }
 0x70a   : > { %v8823_v38 = vmax.f32 %v8821_v25, %v8822_v15  ;;  %v8836_v19 = vrot.slane %v8835_v3, 2  ;;  %v8540_v60 = vadd.f32 %v20347_v7, %v8525_v20  ;;  %v8514_v34 = vadd.f32 %v20387_v52, %v15224_v47  ;;  %v15226_v47 = vpop.f32.mrf.mxu0 }
 0x70b   : > { %v8817_v35 = vrot.slane %v8816_v61, 1  ;;  %v8830_v59 = vmax.f32 %v8828_v33, %v8829_v62  ;;  %v8641_v56 = vrot.slane %v8627_v37, %v18349_v27  ;;  %v8642_v58 = vcombine.high %v8634_v45, %v8634_v45 }
 0x70c   : > { %v8824_v29 = vrot.slane %v8823_v38, 1  ;;  %v8837_v2 = vmax.f32 %v8835_v3, %v8836_v19  ;;  %v8840_v21 = vsel %vm2678_vm1, %v8634_v45, -inf  ;;  %v8548_v44 = vmax.f32 %v8540_v60, 0.0 }
 0x70d   : > { %v8818_v23 = vmax.f32 %v8816_v61, %v8817_v35  ;;  %v8831_v49 = vrot.slane %v8830_v59, 1  ;;  %v8643_v43 = vcombine.high %v8641_v56, %v8641_v56  ;;  %v8841_v42 = vrot.slane %v8840_v21, 4 }
 0x70e   : > { %v8825_v18 = vmax.f32 %v8823_v38, %v8824_v29  ;;  %v8838_v36 = vrot.slane %v8837_v2, 1  ;;  %v8847_v50 = vsel %vm2678_vm1, %v8642_v58, -inf  ;;  %v8854_v52 = vsel %vm2678_vm1, %v8641_v56, -inf }
 0x70f   : > { %v8832_v16 = vmax.f32 %v8830_v59, %v8831_v49  ;;  %v8956_v10 = vmax.f32 %v8790_v9, %v8818_v23  ;;  %v8842_v54 = vmax.f32 %v8840_v21, %v8841_v42  ;;  %v8848_v46 = vrot.slane %v8847_v50, 4 }
 0x710   : > { %v8839_v26 = vmax.f32 %v8837_v2, %v8838_v36  ;;  %v8957_v24 = vmax.f32 %v8797_v39, %v8825_v18  ;;  %v8855_v30 = vrot.slane %v8854_v52, 4  ;;  %v8861_v8 = vsel %vm2678_vm1, %v8643_v43, -inf }
 0x711   : > { %v8958_v17 = vmax.f32 %v8804_v53, %v8832_v16  ;;  %v20423_v41 = vpack.c.bf16 %v8956_v10, %v8956_v10  ;;  %v8843_v32 = vrot.slane %v8842_v54, 2  ;;  %v8849_v51 = vmax.f32 %v8847_v50, %v8848_v46 }
 0x712   : > { %v8959_v55 = vmax.f32 %v8811_v11, %v8839_v26  ;;  %v20425_v28 = vpack.c.bf16 %v8957_v24, %v8957_v24  ;;  %v8856_v40 = vmax.f32 %v8854_v52, %v8855_v30  ;;  %v8862_v25 = vrot.slane %v8861_v8, 4 }
 0x713   : > { %v20427_v48 = vpack.c.bf16 %v8958_v17, %v8958_v17  ;;  %v8844_v9 = vmax.f32 %v8842_v54, %v8843_v32  ;;  %v8850_v14 = vrot.slane %v8849_v51, 2  ;;  %v8644_v5 = vcombine.high %v8548_v44, %v8548_v44 }
 0x714   : > { %v20429_v39 = vpack.c.bf16 %v8959_v55, %v8959_v55  ;;  %v8857_v33 = vrot.slane %v8856_v40, 2  ;;  %v8863_v4 = vmax.f32 %v8861_v8, %v8862_v25  ;;  %v8651_v53 = vrot.slane %v8548_v44, %v18349_v27 }
 0x715   : > { %v8845_v15 = vrot.slane %v8844_v9, 1  ;;  %v8851_v3 = vmax.f32 %v8849_v51, %v8850_v14  ;;  %v8658_v11 = vrot.slane %v8644_v5, %v18349_v27  ;;  %v8526_v20 = vadd.f32 %v8514_v34, %v20363_v13 }
 0x716   : > { %v8858_v61 = vmax.f32 %v8856_v40, %v8857_v33  ;;  %v8864_v62 = vrot.slane %v8863_v4, 2  ;;  %v8659_v37 = vcombine.high %v8651_v53, %v8651_v53  ;;  %v8868_v45 = vsel %vm2678_vm1, %v8651_v53, -inf }
 0x717   : > { %v8660_v38 = vcombine.high %v8658_v11, %v8658_v11  ;;  %v8869_v19 = vrot.slane %v8868_v45, 4  ;;  %v15227_v60 = vadd.f32 %v15226_v47, %v15225_v22  ;;  %v8852_v35 = vrot.slane %v8851_v3, 1 }
 0x718   : > { %v8859_v59 = vrot.slane %v8858_v61, 1  ;;  %v8875_v56 = vsel %vm2678_vm1, %v8659_v37, -inf  ;;  %v8882_v58 = vsel %vm2678_vm1, %v8658_v11, -inf  ;;  %v8095_v29 = vadd.f32 %v20342_v0, %v20402_v6 }
 0x719   : > { %v8870_v2 = vmax.f32 %v8868_v45, %v8869_v19  ;;  %v8876_v21 = vrot.slane %v8875_v56, 4  ;;  %v8883_v13 = vrot.slane %v8882_v58, 4  ;;  %v8846_v34 = vmax.f32 %v8844_v9, %v8845_v15 }
 0x71a   : > { %v8865_v44 = vmax.f32 %v8863_v4, %v8864_v62  ;;  %v8889_v23 = vsel %vm2678_vm1, %v8660_v38, -inf  ;;  %v8541_v49 = vadd.f32 %v20347_v7, %v8526_v20  ;;  %v8853_v50 = vmax.f32 %v8851_v3, %v8852_v35 }
 0x71b   : > { %v8871_v43 = vrot.slane %v8870_v2, 2  ;;  %v8877_v42 = vmax.f32 %v8875_v56, %v8876_v21  ;;  %v8884_v18 = vmax.f32 %v8882_v58, %v8883_v13  ;;  %v8890_v36 = vrot.slane %v8889_v23, 4 }
 0x71c   : > { %v8860_v52 = vmax.f32 %v8858_v61, %v8859_v59  ;;  %v8549_v16 = vmax.f32 %v8541_v49, 0.0  ;;  %v8517_v10 = vadd.f32 %v20405_v57, %v15227_v60  ;;  %v8866_v26 = vrot.slane %v8865_v44, 1 }
 0x71d   : > { %v8872_v54 = vmax.f32 %v8870_v2, %v8871_v43  ;;  %v8878_v0 = vrot.slane %v8877_v42, 2  ;;  %v8885_v6 = vrot.slane %v8884_v18, 2  ;;  %v8891_v46 = vmax.f32 %v8889_v23, %v8890_v36 }
 0x71e   : > { %v8661_v24 = vcombine.high %v8549_v16, %v8549_v16  ;;  %v8668_v30 = vrot.slane %v8549_v16, %v18349_v27  ;;  %v8527_v8 = vadd.f32 %v8517_v10, %v8095_v29  ;;  %v8867_v62 = vmax.f32 %v8865_v44, %v8866_v26 }
 0x71f   : > { %v8873_v22 = vrot.slane %v8872_v54, 1  ;;  %v8879_v17 = vmax.f32 %v8877_v42, %v8878_v0  ;;  %v8886_v32 = vmax.f32 %v8884_v18, %v8885_v6  ;;  %v8892_v51 = vrot.slane %v8891_v46, 2 }
 0x720   : > { %v8675_v55 = vrot.slane %v8661_v24, %v18349_v27  ;;  %v8676_v40 = vcombine.high %v8668_v30, %v8668_v30  ;;  %v8896_v25 = vsel %vm2678_vm1, %v8668_v30, -inf  ;;  %v8542_v57 = vadd.f32 %v20347_v7, %v8527_v8 }
 0x721   : > { %v8874_v9 = vmax.f32 %v8872_v54, %v8873_v22  ;;  %v8880_v14 = vrot.slane %v8879_v17, 1  ;;  %v8887_v5 = vrot.slane %v8886_v32, 1  ;;  %v8893_v33 = vmax.f32 %v8891_v46, %v8892_v51 }
 0x722   : > { %v8677_v4 = vcombine.high %v8675_v55, %v8675_v55  ;;  %v8897_v53 = vrot.slane %v8896_v25, 4  ;;  %v8903_v47 = vsel %vm2678_vm1, %v8676_v40, -inf  ;;  %v8910_v15 = vsel %vm2678_vm1, %v8675_v55, -inf }
 0x723   : > { %v8881_v3 = vmax.f32 %v8879_v17, %v8880_v14  ;;  %v8888_v11 = vmax.f32 %v8886_v32, %v8887_v5  ;;  %v8894_v20 = vrot.slane %v8893_v33, 1  ;;  %v8960_v61 = vmax.f32 %v8846_v34, %v8874_v9 }
 0x724   : > { %v8904_v37 = vrot.slane %v8903_v47, 4  ;;  %v8911_v45 = vrot.slane %v8910_v15, 4  ;;  %v8917_v38 = vsel %vm2678_vm1, %v8677_v4, -inf  ;;  %v8898_v59 = vmax.f32 %v8896_v25, %v8897_v53 }
 0x725   : > { %v8895_v7 = vmax.f32 %v8893_v33, %v8894_v20  ;;  %v8961_v19 = vmax.f32 %v8853_v50, %v8881_v3  ;;  %v8962_v60 = vmax.f32 %v8860_v52, %v8888_v11  ;;  %v20449_v35 = vpack.c.bf16 %v8960_v61, %v8960_v61 }
 0x726   : > { %v8918_v56 = vrot.slane %v8917_v38, 4  ;;  %v8550_v21 = vmax.f32 %v8542_v57, 0.0  ;;  %v8905_v13 = vmax.f32 %v8903_v47, %v8904_v37  ;;  %v8912_v34 = vmax.f32 %v8910_v15, %v8911_v45 }
 0x727   : > { %v8963_v58 = vmax.f32 %v8867_v62, %v8895_v7  ;;  %v20451_v29 = vpack.c.bf16 %v8961_v19, %v8961_v19  ;;  %v20453_v2 = vpack.c.bf16 %v8962_v60, %v8962_v60  ;;  %v8899_v42 = vrot.slane %v8898_v59, 2 }
 0x728   : > { %v8678_v23 = vcombine.high %v8550_v21, %v8550_v21  ;;  %v8685_v49 = vrot.slane %v8550_v21, %v18349_v27  ;;  %v8919_v43 = vmax.f32 %v8917_v38, %v8918_v56  ;;  %v8906_v52 = vrot.slane %v8905_v13, 2 }
 0x729   : > { %v20455_v44 = vpack.c.bf16 %v8963_v58, %v8963_v58  ;;  %v8913_v16 = vrot.slane %v8912_v34, 2  ;;  %v8900_v24 = vmax.f32 %v8898_v59, %v8899_v42 }
 0x72a   : > { %v8692_v18 = vrot.slane %v8678_v23, %v18349_v27  ;;  %v8693_v36 = vcombine.high %v8685_v49, %v8685_v49  ;;  %v8924_v50 = vsel %vm2678_vm1, %v8685_v49, -inf  ;;  %v8920_v46 = vrot.slane %v8919_v43, 2 }
 0x72b   : > { %v8925_v54 = vrot.slane %v8924_v50, 4  ;;  %v8907_v17 = vmax.f32 %v8905_v13, %v8906_v52  ;;  %v8914_v51 = vmax.f32 %v8912_v34, %v8913_v16  ;;  %v8901_v14 = vrot.slane %v8900_v24, 1 }
 0x72c   : > { %v8694_v10 = vcombine.high %v8692_v18, %v8692_v18  ;;  %v8931_v0 = vsel %vm2678_vm1, %v8693_v36, -inf  ;;  %v8938_v6 = vsel %vm2678_vm1, %v8692_v18, -inf  ;;  %v8921_v25 = vmax.f32 %v8919_v43, %v8920_v46 }
 0x72d   : > { %v8932_v26 = vrot.slane %v8931_v0, 4  ;;  %v8926_v30 = vmax.f32 %v8924_v50, %v8925_v54  ;;  %v8939_v8 = vrot.slane %v8938_v6, 4  ;;  %v8908_v4 = vrot.slane %v8907_v17, 1 }
 0x72e   : > { %v8945_v22 = vsel %vm2678_vm1, %v8694_v10, -inf  ;;  %v8915_v15 = vrot.slane %v8914_v51, 1  ;;  %v8922_v20 = vrot.slane %v8921_v25, 1  ;;  %v8902_v37 = vmax.f32 %v8900_v24, %v8901_v14 }
 0x72f   : > { %v8933_v27 = vmax.f32 %v8931_v0, %v8932_v26  ;;  %v8946_v32 = vrot.slane %v8945_v22, 4  ;;  %v8927_v55 = vrot.slane %v8926_v30, 2  ;;  %v8940_v40 = vmax.f32 %v8938_v6, %v8939_v8 }
 0x730   : > { %v8909_v7 = vmax.f32 %v8907_v17, %v8908_v4  ;;  %v8916_v59 = vmax.f32 %v8914_v51, %v8915_v15  ;;  %v8923_v21 = vmax.f32 %v8921_v25, %v8922_v20 }
 0x731   : > { %v8934_v57 = vrot.slane %v8933_v27, 2  ;;  %v8947_v9 = vmax.f32 %v8945_v22, %v8946_v32  ;;  %v8928_v5 = vmax.f32 %v8926_v30, %v8927_v55  ;;  %v8941_v33 = vrot.slane %v8940_v40, 2 }
 0x733   : > { %v8935_v53 = vmax.f32 %v8933_v27, %v8934_v57  ;;  %v8948_v47 = vrot.slane %v8947_v9, 2  ;;  %v8929_v3 = vrot.slane %v8928_v5, 1  ;;  %v8942_v11 = vmax.f32 %v8940_v40, %v8941_v33 }
 0x735   : > { %v8936_v61 = vrot.slane %v8935_v53, 1  ;;  %v8949_v62 = vmax.f32 %v8947_v9, %v8948_v47  ;;  %v8930_v45 = vmax.f32 %v8928_v5, %v8929_v3  ;;  %v8943_v38 = vrot.slane %v8942_v11, 1 }
 0x737   : > { %v8937_v19 = vmax.f32 %v8935_v53, %v8936_v61  ;;  %v8950_v60 = vrot.slane %v8949_v62, 1  ;;  %v8944_v56 = vmax.f32 %v8942_v11, %v8943_v38  ;;  %v8964_v58 = vmax.f32 %v8902_v37, %v8930_v45 }
 0x739   : > { %v8951_v13 = vmax.f32 %v8949_v62, %v8950_v60  ;;  %v8965_v34 = vmax.f32 %v8909_v7, %v8937_v19  ;;  %v8966_v23 = vmax.f32 %v8916_v59, %v8944_v56  ;;  %v20463_v49 = vpack.c.bf16 %v8964_v58, %v8964_v58 }
 0x73b   : > { %v8967_v43 = vmax.f32 %v8923_v21, %v8951_v13  ;;  %v20465_v42 = vpack.c.bf16 %v8965_v34, %v8965_v34  ;;  %v20467_v18 = vpack.c.bf16 %v8966_v23, %v8966_v23 }
 0x73d   : > { %v20469_v36 = vpack.c.bf16 %v8967_v43, %v8967_v43 }
 0x73e   : > { %16484 = dma.done.wait [#allocation5], 65536 }
 0x73f   : > { %16485 = vsyncadd [#allocation5], 4294901760  ;;  %12114 = vmatprep.mubr.bf16.mxu0 %v20396_v12  ;;  %12155 = vmatprep.mubr.bf16.mxu1 %v20398_v31  ;;  %v15853_v50 = vld [vmem:[#allocation4 + $0xea4] ss:$-1368 sps:$4 sm:$0xff]   ;;  %v15857_v16 = vld [vmem:[#allocation4 + $0xea0] ss:$-1368 sps:$4 sm:$0xff]  }
 0x740   : > { %v15855_v52 = vld [vmem:[#allocation4 + $0x8e4] ss:$-1712 sps:$4 sm:$0xff]   ;;  %12082 = vmatprep.subr.bf16.mxu0 %v15853_v50  ;;  %v15858_v10 = vld [vmem:[#allocation4 + $0x8e0] ss:$-1712 sps:$4 sm:$0xff]   ;;  %v15859_v54 = vld [vmem:[#allocation4 + $0x5cc] ss:$-464 sps:$4 sm:$0xff]  }
 0x741   : > { %12123 = vmatprep.subr.bf16.mxu1 %v15855_v52  ;;  %12083 = vmatpush1.bf16.msra.mxu0 %v15857_v16  ;;  %v15861_v0 = vld [vmem:[#allocation4 + $0xdf4] ss:$-3184 sps:$4 sm:$0xff]   ;;  %v15863_v6 = vld [vmem:[#allocation4 + $0x5c8] ss:$-464 sps:$4 sm:$0xff]   ;;  %v15864_v46 = vld [vmem:[#allocation4 + $0xdf0] ss:$-3184 sps:$4 sm:$0xff]  }
 0x742   : > { %12124 = vmatpush1.bf16.msra.mxu1 %v15858_v10  ;;  %12084 = vmatprep.subr.bf16.mxu0 %v15859_v54  ;;  %v15865_v26 = vld [vmem:[#allocation4 + $0x74c] ss:$936 sps:$4 sm:$0xff]   ;;  %v15869_v30 = vld [vmem:[#allocation4 + $0x748] ss:$936 sps:$4 sm:$0xff]   ;;  %v15877_v51 = vld [vmem:[#allocation4 + $0xca4] ss:$184 sps:$4 sm:$0xff]  }
 0x743   : > { %12125 = vmatprep.subr.bf16.mxu1 %v15861_v0  ;;  %v15867_v24 = vld [vmem:[#allocation4 + $0x1bc] ss:$1176 sps:$4 sm:$0xff]   ;;  %v15870_v8 = vld [vmem:[#allocation4 + $0x1b8] ss:$1176 sps:$4 sm:$0xff]   ;;  %v15879_v55 = vld [vmem:[#allocation4 + $0xecc] ss:$-2152 sps:$4 sm:$0xff]  }
 0x744   : > { %v15871_v22 = vld [vmem:[#allocation4 + $0x72c] ss:$104 sps:$4 sm:$0xff]   ;;  %v15875_v27 = vld [vmem:[#allocation4 + $0x728] ss:$104 sps:$4 sm:$0xff]   ;;  %v15881_v40 = vld [vmem:[#allocation4 + $0xca0] ss:$184 sps:$4 sm:$0xff]  }
 0x745   : > { %12085 = vmatpush1.bf16.msra.mxu0 %v15863_v6  ;;  %v15873_v17 = vld [vmem:[#allocation4 + $0xbcc] ss:$-2864 sps:$4 sm:$0xff]   ;;  %v15876_v32 = vld [vmem:[#allocation4 + $0xbc8] ss:$-2864 sps:$4 sm:$0xff]   ;;  %v8992_v14 = vld [vmem:[#allocation4 + $0xc50] sm:$0xff]  ;;  %vm16517_vm1 = vmmov 0  }
 0x746   : > { %12126 = vmatpush1.bf16.msra.mxu1 %v15864_v46  ;;  %12086 = vmatprep.subr.bf16.mxu0 %v15865_v26  ;;  %v15882_v25 = vld [vmem:[#allocation4 + $0xec8] ss:$-2152 sps:$4 sm:$0xff]   ;;  %v15883_v57 = vld [vmem:[#allocation4 + $0x454] ss:$1224 sps:$4 sm:$0xff]   ;;  %v15887_v33 = vld [vmem:[#allocation4 + $0x450] ss:$1224 sps:$4 sm:$0xff]  }
 0x747   : > { %12127 = vmatprep.subr.bf16.mxu1 %v15867_v24  ;;  %v15885_v9 = vld [vmem:[#allocation4 + $0xbdc] ss:$-2512 sps:$4 sm:$0xff]   ;;  %v8994_v5 = vld [vmem:[#allocation4 + $0x770] sm:$0xff]  ;;  %v15888_v4 = vld [vmem:[#allocation4 + $0xbd8] ss:$-2512 sps:$4 sm:$0xff]   ;;  %s14703_s21 = sshll.u32 %s16610_s29, 4 }
 0x748   : > { %v15889_v53 = vld [vmem:[#allocation4 + $0x35c] ss:$304 sps:$4 sm:$0xff]   ;;  %v14156_v47 = vcombine.high %v8992_v14, %v8994_v5  ;;  %v15891_v11 = vld [vmem:[#allocation4 + $0x358] ss:$304 sps:$4 sm:$0xff]   ;;  %v14155_v61 = vcombine.low %v8992_v14, %v8994_v5  ;;  %v9112_v38 = vld [vmem:[#allocation4 + $0xb10] sm:$0xff]  ;;  %s13204_s22 = sshll.u32 %s18183_s16, 4  ;;  %s20671_s0 = scalar_lea.hbm %s20728_s13, %s14703_s21  ;;  %s20673_s22 = int_to_ptr.vmem [resolvable:$true] %s13204_s22 }
 0x749   : > { %12087 = vmatpush1.bf16.msra.mxu0 %v15869_v30  ;;  %v9052_v15 = vld [vmem:[#allocation4 + $0xe68] sm:$0xff]  ;;  %v15892_v20 = vld [vmem:[#allocation4 + $0xab4] ss:$-1496 sps:$4 sm:$0xff]   ;;  %v15894_v19 = vld [vmem:[#allocation4 + $0xab0] ss:$-1496 sps:$4 sm:$0xff]   ;;  %s20792_s20 = sand.u32 1, %s16496_s26  }
 0x74a   : > { %12128 = vmatpush1.bf16.msra.mxu1 %v15870_v8  ;;  %12088 = vmatprep.subr.bf16.mxu0 %v15871_v22  ;;  %v9054_v3 = vld [vmem:[#allocation4 + $0xbe8] sm:$0xff]  ;;  %v9048_v62 = vld [vmem:[#allocation4 + $0xc58] sm:$0xff]  ;;  %v9114_v7 = vld [vmem:[#allocation4 + $0x310] sm:$0xff]  ;;  %s13192_s15 = scalar_lea.sflag [#allocation7], %s20792_s20  ;;  %s16434_s14 = scalar_lea.vmem %s20673_s22, 16 }
 0x74b   : > { %12129 = vmatprep.subr.bf16.mxu1 %v15873_v17  ;;  %v14216_v37 = vcombine.high %v9052_v15, %v9054_v3  ;;  %v9050_v45 = vld [vmem:[#allocation4 + $0x9d8] sm:$0xff]  ;;  %v14215_v60 = vcombine.low %v9052_v15, %v9054_v3  ;;  %v14276_v56 = vcombine.high %v9112_v38, %v9114_v7  ;;  %v14275_v21 = vcombine.low %v9112_v38, %v9114_v7  ;;  %v15895_v13 = vld [vmem:[#allocation4 + $0x74] ss:$2584 sps:$4 sm:$0xff]   ;;  %v15899_v23 = vld [vmem:[#allocation4 + $0x70] ss:$2584 sps:$4 sm:$0xff]   ;;  %p16435_p13 = scmp.ne.s32.totalorder %s20673_s22, %s16434_s14  ;;  %s16518_s29 = smov [#allocation6]  }
 0x74c   : > { %v14212_v59 = vcombine.high %v9048_v62, %v9050_v45  ;;  %v14211_v58 = vcombine.low %v9048_v62, %v9050_v45  ;;  %v15897_v34 = vld [vmem:[#allocation4 + $0x3dc] ss:$1448 sps:$4 sm:$0xff]   ;;  %v15900_v43 = vld [vmem:[#allocation4 + $0x3d8] ss:$1448 sps:$4 sm:$0xff]   ;;  %v15903_v52 = vld [vmem:[#allocation4 + $0xa2c] ss:$808 sps:$4 sm:$0xff]  }
 0x74d   : > { %12089 = vmatpush1.bf16.msra.mxu0 %v15875_v27  ;;  %v15901_v50 = vld [vmem:[#allocation4 + $0x5fc] ss:$56 sps:$4 sm:$0xff]   ;;  %v15905_v16 = vld [vmem:[#allocation4 + $0x5f8] ss:$56 sps:$4 sm:$0xff]   ;;  %v15907_v54 = vld [vmem:[#allocation4 + $0x8ec] ss:$-1480 sps:$4 sm:$0xff]   ;;  %p16436_p0 = pnand %p16435_p13, %p16627_p5 }
 0x74e   : > { %12130 = vmatpush1.bf16.msra.mxu1 %v15876_v32  ;;  %12090 = vmatprep.subr.bf16.mxu0 %v15877_v51  ;;  %v15906_v10 = vld [vmem:[#allocation4 + $0xa28] ss:$808 sps:$4 sm:$0xff]   ;;  %v15909_v0 = vld [vmem:[#allocation4 + $0xec4] ss:$-536 sps:$4 sm:$0xff]   ;;  %v15925_v38 = vld [vmem:[#allocation4 + $0x6f8] ss:$136 sps:$4 sm:$0xff]  }
 0x74f   : > { %12131 = vmatprep.subr.bf16.mxu1 %v15879_v55  ;;  %v9096_v6 = vld [vmem:[#allocation4 + $0x760] sm:$0xff]  ;;  %v15916_v27 = vld [vmem:[#allocation4 + $0xcdc] ss:$-1968 sps:$4 sm:$0xff]   ;;  %v9020_v14 = vld [vmem:[#allocation4 + $0x9d0] sm:$0xff]  ;;  %p16437_p1 = pneg %p16436_p0  ;;  %s16438_s17 = sshll.u32 %s16518_s29, 4  ;;  %s16439_s17 = int_to_ptr.vmem [resolvable:$false] %s16438_s17 }
 0x750   : > { %v9098_v46 = vld [vmem:[#allocation4 + $0x100] sm:$0xff]  ;;  %v15918_v32 = vld [vmem:[#allocation4 + $0xeac] ss:$-2704 sps:$4 sm:$0xff]   ;;  %v9022_v5 = vld [vmem:[#allocation4 + $0x910] sm:$0xff]  ;;  %s16440_s19 = scalar_lea.vmem %s16439_s17, 32  ;;  %p16441_p2 = scmp.lt.s32.totalorder %s20673_s22, %s16439_s17 }
 0x751   : > { %12091 = vmatpush1.bf16.msra.mxu0 %v15881_v40  ;;  %v15911_v26 = vld [vmem:[#allocation4 + $0x8e8] ss:$-1480 sps:$4 sm:$0xff]   ;;  %v15913_v30 = vld [vmem:[#allocation4 + $0x424] ss:$2736 sps:$4 sm:$0xff]   ;;  %v14260_v8 = vcombine.high %v9096_v6, %v9098_v46  ;;  %v14259_v17 = vcombine.low %v9096_v6, %v9098_v46  ;;  %v14184_v15 = vcombine.high %v9020_v14, %v9022_v5  ;;  %p16442_p3 = scmp.lt.s32.totalorder %s16440_s19, %s16434_s14 }
 0x752   : > { %12132 = vmatpush1.bf16.msra.mxu1 %v15882_v25  ;;  %12092 = vmatprep.subr.bf16.mxu0 %v15883_v57  ;;  %v15912_v24 = vld [vmem:[#allocation4 + $0xec0] ss:$-536 sps:$4 sm:$0xff]   ;;  %v15922_v57 = vld [vmem:[#allocation4 + $0x254] ss:$2056 sps:$4 sm:$0xff]  }
 0x753   : > { %12133 = vmatprep.subr.bf16.mxu1 %v15885_v9  ;;  %v15915_v22 = vld [vmem:[#allocation4 + $0x420] ss:$2736 sps:$4 sm:$0xff]   ;;  %v9024_v51 = vld [vmem:[#allocation4 + $0xd68] sm:$0xff]  ;;  %v15930_v62 = vld [vmem:[#allocation4 + $0xbc] ss:$2664 sps:$4 sm:$0xff]   ;;  %p16443_p4 = por %p16442_p3, %p16441_p2 }
 0x754   : > { %v9026_v55 = vld [vmem:[#allocation4 + $0x868] sm:$0xff]  ;;  %v9206_v45 = vld [vmem:[#allocation4 + $0xe90] sm:$0xff]  ;;  %v15928_v7 = vld [vmem:[#allocation4 + $0xb8] ss:$2664 sps:$4 sm:$0xff]  }
 0x755   : > { %12093 = vmatpush1.bf16.msra.mxu0 %v15887_v33  ;;  %v15920_v40 = vld [vmem:[#allocation4 + $0xcd8] ss:$-1968 sps:$4 sm:$0xff]   ;;  %v14188_v9 = vcombine.high %v9024_v51, %v9026_v55  ;;  %v9124_v6 = vld [vmem:[#allocation4 + $0x950] sm:$0xff]  ;;  %p16444_p7 = pnand %p16443_p4, %p16437_p1 }
 0x756   : > { %12134 = vmatpush1.bf16.msra.mxu1 %v15888_v4  ;;  %12094 = vmatprep.subr.bf16.mxu0 %v14156_v47  ;;  %v15921_v25 = vld [vmem:[#allocation4 + $0xea8] ss:$-2704 sps:$4 sm:$0xff]   ;;  %v9126_v46 = vld [vmem:[#allocation4 + $0x2d0] sm:$0xff] }
 0x757   : > { %12135 = vmatprep.subr.bf16.mxu1 %v15889_v53  ;;  %v9084_v33 = vld [vmem:[#allocation4 + $0x708] sm:$0xff]  ;;  %v14187_v53 = vcombine.low %v9024_v51, %v9026_v55  ;;  %v15924_v47 = vld [vmem:[#allocation4 + $0x250] ss:$2056 sps:$4 sm:$0xff]   ;;  %v15951_v51 = vld [vmem:[#allocation4 + $0xe24] ss:$184 sps:$4 sm:$0xff]  }
 0x758   : > { %v9086_v4 = vld [vmem:[#allocation4 + $0xe48] sm:$0xff]  ;;  %v15954_v55 = vld [vmem:[#allocation4 + $0x274] ss:$808 sps:$4 sm:$0xff]  }
 0x759   : > { %12095 = vmatpush1.bf16.msra.mxu0 %v14155_v61  ;;  %v14248_v3 = vcombine.high %v9084_v33, %v9086_v4  ;;  %v15927_v61 = vld [vmem:[#allocation4 + $0x6fc] ss:$136 sps:$4 sm:$0xff]  }
 0x75a   : > { %12136 = vmatpush1.bf16.msra.mxu1 %v15891_v11  ;;  %12096 = vmatprep.subr.bf16.mxu0 %v15892_v20  ;;  %v14183_v11 = vcombine.low %v9020_v14, %v9022_v5  ;;  %v14247_v20 = vcombine.low %v9084_v33, %v9086_v4  ;;  %v15957_v5 = vld [vmem:[#allocation4 + $0x39c] ss:$-440 sps:$4 sm:$0xff]  }
 0x75b   : > { %12137 = vmatprep.subr.bf16.mxu1 %v14216_v37  ;;  %v9204_v37 = vld [vmem:[#allocation4 + $0xe50] sm:$0xff]  ;;  %v9240_v33 = vld [vmem:[#allocation4 + $0x140] sm:$0xff] }
 0x75c   : > { %v9242_v4 = vld [vmem:[#allocation4 + $0xba0] sm:$0xff] }
 0x75d   : > { %12097 = vmatpush1.bf16.msra.mxu0 %v15894_v19  ;;  %v15933_v19 = vld [vmem:[#allocation4 + $0x68c] ss:$464 sps:$4 sm:$0xff]  }
 0x75e   : > { %12138 = vmatpush1.bf16.msra.mxu1 %v14215_v60  ;;  %12098 = vmatprep.subr.bf16.mxu0 %v14212_v59  ;;  %v14368_v60 = vcombine.high %v9204_v37, %v9206_v45  ;;  %v15931_v59 = vld [vmem:[#allocation4 + $0x688] ss:$464 sps:$4 sm:$0xff]  }
 0x75f   : > { %12139 = vmatprep.subr.bf16.mxu1 %v14276_v56  ;;  %v14367_v56 = vcombine.low %v9204_v37, %v9206_v45  ;;  %v9168_v37 = vld [vmem:[#allocation4 + $0xf00] sm:$0xff] }
 0x760   : > { %v9170_v45 = vld [vmem:[#allocation4 + $0xe00] sm:$0xff] }
 0x761   : > { %12099 = vmatpush2.bf16.msra.mxu0 %v14211_v58  ;;  %v15936_v58 = vld [vmem:[#allocation4 + $0x3d4] ss:$2352 sps:$4 sm:$0xff]  }
 0x762   : > { %12140 = vmatpush2.bf16.msra.mxu1 %v14275_v21  ;;  %12100 = vmatprep.subr.bf16.mxu0 %v15895_v13  ;;  %v15939_v21 = vld [vmem:[#allocation4 + $0x8a4] ss:$712 sps:$4 sm:$0xff]   ;;  %v9196_v13 = vld [vmem:[#allocation4 + $0x6d0] sm:$0xff] }
 0x763   : > { %12141 = vmatprep.subr.bf16.mxu1 %v15897_v34  ;;  %v9198_v34 = vld [vmem:[#allocation4 + $0x470] sm:$0xff] }
 0x765   : > { %12101 = vmatpush2.bf16.msra.mxu0 %v15899_v23  ;;  %v15934_v23 = vld [vmem:[#allocation4 + $0x3d0] ss:$2352 sps:$4 sm:$0xff]  }
 0x766   : > { %12142 = vmatpush2.bf16.msra.mxu1 %v15900_v43  ;;  %12102 = vmatprep.subr.bf16.mxu0 %v15901_v50  ;;  %v15937_v43 = vld [vmem:[#allocation4 + $0x8a0] ss:$712 sps:$4 sm:$0xff]   ;;  %v15942_v50 = vld [vmem:[#allocation4 + $0xc44] ss:$-1160 sps:$4 sm:$0xff]  }
 0x767   : > { %12143 = vmatprep.subr.bf16.mxu1 %v15903_v52  ;;  %v14360_v52 = vcombine.high %v9196_v13, %v9198_v34 }
 0x769   : > { %12103 = vmatpush2.bf16.msra.mxu0 %v15905_v16  ;;  %v15940_v16 = vld [vmem:[#allocation4 + $0xc40] ss:$-1160 sps:$4 sm:$0xff]  }
 0x76a   : > { %12144 = vmatpush2.bf16.msra.mxu1 %v15906_v10  ;;  %12104 = vmatprep.subr.bf16.mxu0 %v15907_v54  ;;  %v15945_v10 = vld [vmem:[#allocation4 + $0xb94] ss:$912 sps:$4 sm:$0xff]   ;;  %v14359_v54 = vcombine.low %v9196_v13, %v9198_v34  ;;  %v15969_v13 = vld [vmem:[#allocation4 + $0x56c] ss:$1168 sps:$4 sm:$0xff]  }
 0x76b   : > { %12145 = vmatprep.subr.bf16.mxu1 %v15909_v0  ;;  %v15948_v0 = vld [vmem:[#allocation4 + $0xe9c] ss:$-2184 sps:$4 sm:$0xff]  }
 0x76c   : > { %v15972_v34 = vld [vmem:[#allocation4 + $0x174] ss:$2888 sps:$4 sm:$0xff]  }
 0x76d   : > { %12105 = vmatpush2.bf16.msra.mxu0 %v15911_v26  ;;  %v9188_v26 = vld [vmem:[#allocation4 + $0xb08] sm:$0xff] }
 0x76e   : > { %12146 = vmatpush2.bf16.msra.mxu1 %v15912_v24  ;;  %12106 = vmatprep.subr.bf16.mxu0 %v15913_v30  ;;  %v9190_v24 = vld [vmem:[#allocation4 + $0x308] sm:$0xff]  ;;  %v15943_v30 = vld [vmem:[#allocation4 + $0xb90] ss:$912 sps:$4 sm:$0xff]  }
 0x76f   : > { %12147 = vmatprep.subr.bf16.mxu1 %v14260_v8  ;;  %v15946_v8 = vld [vmem:[#allocation4 + $0xe98] ss:$-2184 sps:$4 sm:$0xff]  }
 0x771   : > { %12107 = vmatpush2.bf16.msra.mxu0 %v15915_v22  ;;  %v14288_v22 = vcombine.high %v9124_v6, %v9126_v46 }
 0x772   : > { %12148 = vmatpush2.bf16.msra.mxu1 %v14259_v17  ;;  %12108 = vmatprep.subr.bf16.mxu0 %v15916_v27  ;;  %v14352_v17 = vcombine.high %v9188_v26, %v9190_v24  ;;  %v14287_v27 = vcombine.low %v9124_v6, %v9126_v46  ;;  %v15978_v6 = vld [vmem:[#allocation4 + $0xbac] ss:$-2232 sps:$4 sm:$0xff]  }
 0x773   : > { %12149 = vmatprep.subr.bf16.mxu1 %v15918_v32  ;;  %v14351_v32 = vcombine.low %v9188_v26, %v9190_v24  ;;  %v15981_v46 = vld [vmem:[#allocation4 + $0x5ac] ss:$1392 sps:$4 sm:$0xff]   ;;  %v15976_v26 = vld [vmem:[#allocation4 + $0xba8] ss:$-2232 sps:$4 sm:$0xff]  }
 0x774   : > { %v15979_v24 = vld [vmem:[#allocation4 + $0x5a8] ss:$1392 sps:$4 sm:$0xff]  }
 0x775   : > { %12109 = vmatpush2.bf16.msra.mxu0 %v15920_v40  ;;  %v9116_v40 = vld [vmem:[#allocation4 + $0x1c0] sm:$0xff] }
 0x776   : > { %12150 = vmatpush2.bf16.msra.mxu1 %v15921_v25  ;;  %12110 = vmatprep.subr.bf16.mxu0 %v14188_v9  ;;  %v9118_v25 = vld [vmem:[#allocation4 + $0x820] sm:$0xff]  ;;  %v15952_v9 = vld [vmem:[#allocation4 + $0x270] ss:$808 sps:$4 sm:$0xff]  }
 0x777   : > { %12151 = vmatprep.subr.bf16.mxu1 %v15922_v57  ;;  %v15949_v57 = vld [vmem:[#allocation4 + $0xe20] ss:$184 sps:$4 sm:$0xff]   ;;  %v14280_v14 = vcombine.high %v9116_v40, %v9118_v25 }
 0x779   : > { %12111 = vmatpush2.bf16.msra.mxu0 %v14187_v53  ;;  %v14279_v53 = vcombine.low %v9116_v40, %v9118_v25  ;;  %v15988_v40 = vld [vmem:[#allocation4 + $0xbc0] ss:$-1800 sps:$4 sm:$0xff]  }
 0x77a   : > { %12152 = vmatpush2.bf16.msra.mxu1 %v15924_v47  ;;  %12112 = vmatprep.subr.bf16.mxu0 %v14184_v15  ;;  %v15955_v47 = vld [vmem:[#allocation4 + $0x398] ss:$-440 sps:$4 sm:$0xff]   ;;  %v15960_v15 = vld [vmem:[#allocation4 + $0x924] ss:$-1456 sps:$4 sm:$0xff]  }
 0x77b   : > { %12153 = vmatprep.subr.bf16.mxu1 %v14248_v3  ;;  %v14404_v3 = vcombine.high %v9240_v33, %v9242_v4 }
 0x77d   : > { %12113 = vmatpush2.bf16.msra.mxu0 %v14183_v11  ;;  %v15958_v11 = vld [vmem:[#allocation4 + $0x920] ss:$-1456 sps:$4 sm:$0xff]  }
 0x77e   : > { %12154 = vmatpush2.bf16.msra.mxu1 %v14247_v20  ;;  %12164 = vmatprep.subr.bf16.mxu0 %v15927_v61  ;;  %v15963_v20 = vld [vmem:[#allocation4 + $0x6e4] ss:$-184 sps:$4 sm:$0xff]   ;;  %v14403_v61 = vcombine.low %v9240_v33, %v9242_v4  ;;  %v15991_v33 = vld [vmem:[#allocation4 + $0x968] ss:$-1648 sps:$4 sm:$0xff]  }
 0x77f   : > { %12205 = vmatprep.subr.bf16.mxu1 %v15930_v62  ;;  %v15966_v62 = vld [vmem:[#allocation4 + $0xb5c] ss:$-2392 sps:$4 sm:$0xff]   ;;  %v15994_v4 = vld [vmem:[#allocation4 + $0xf8] ss:$56 sps:$4 sm:$0xff]  }
 0x780   : > { %12115 = vmatmul.mubr.bf16.vlgmr.msra.gmra.mxu0 %v20392_v63 }
 0x781   : > { %12156 = vmatmul.mubr.bf16.vlgmr.msra.gmra.mxu1 %v20394_v1  ;;  %12165 = vmatpush1.bf16.msra.mxu0 %v15925_v38  ;;  %v9232_v38 = vld [vmem:[#allocation4 + $0x500] sm:$0xff] }
 0x782   : > { %12206 = vmatpush1.bf16.msra.mxu1 %v15928_v7  ;;  %12166 = vmatprep.subr.bf16.mxu0 %v15933_v19  ;;  %v9234_v7 = vld [vmem:[#allocation4 + $0x8c0] sm:$0xff] }
 0x783   : > { %12207 = vmatprep.subr.bf16.mxu1 %v14368_v60  ;;  %12196 = vmatprep.mubr.bf16.mxu0 %v20425_v28  ;;  %v15961_v19 = vld [vmem:[#allocation4 + $0x6e0] ss:$-184 sps:$4 sm:$0xff]  }
 0x784   : > { %12237 = vmatprep.mubr.bf16.mxu1 %v20429_v39  ;;  %v15964_v60 = vld [vmem:[#allocation4 + $0xb58] ss:$-2392 sps:$4 sm:$0xff]  }
 0x785   : > { %12167 = vmatpush1.bf16.msra.mxu0 %v15931_v59  ;;  %v14332_v59 = vcombine.high %v9168_v37, %v9170_v45 }
 0x786   : > { %12208 = vmatpush1.bf16.msra.mxu1 %v14367_v56  ;;  %12168 = vmatprep.subr.bf16.mxu0 %v15936_v58  ;;  %v14396_v56 = vcombine.high %v9232_v38, %v9234_v7  ;;  %v14331_v58 = vcombine.low %v9168_v37, %v9170_v45  ;;  %v9262_v45 = vld [vmem:[#allocation4 + $0x848] sm:$0xff] }
 0x787   : > { %12209 = vmatprep.subr.bf16.mxu1 %v15939_v21  ;;  %v14395_v21 = vcombine.low %v9232_v38, %v9234_v7  ;;  %v9324_v38 = vld [vmem:[#allocation4 + $0x4d0] sm:$0xff] }
 0x788   : > { %v9326_v7 = vld [vmem:[#allocation4 + $0xcb0] sm:$0xff] }
 0x789   : > { %12169 = vmatpush1.bf16.msra.mxu0 %v15934_v23  ;;  %v9160_v23 = vld [vmem:[#allocation4 + $0xfe0] sm:$0xff] }
 0x78a   : > { %12210 = vmatpush1.bf16.msra.mxu1 %v15937_v43  ;;  %12170 = vmatprep.subr.bf16.mxu0 %v15942_v50  ;;  %v9162_v43 = vld [vmem:[#allocation4 + $0x840] sm:$0xff]  ;;  %v15967_v50 = vld [vmem:[#allocation4 + $0x568] ss:$1168 sps:$4 sm:$0xff]  }
 0x78b   : > { %12211 = vmatprep.subr.bf16.mxu1 %v14360_v52  ;;  %v15970_v52 = vld [vmem:[#allocation4 + $0x170] ss:$2888 sps:$4 sm:$0xff]  }
 0x78d   : > { %12171 = vmatpush1.bf16.msra.mxu0 %v15940_v16  ;;  %v14324_v16 = vcombine.high %v9160_v23, %v9162_v43 }
 0x78e   : > { %12212 = vmatpush1.bf16.msra.mxu1 %v14359_v54  ;;  %12172 = vmatprep.subr.bf16.mxu0 %v15945_v10  ;;  %v15975_v10 = vld [vmem:[#allocation4 + $0x57c] ss:$-8 sps:$4 sm:$0xff]   ;;  %v14323_v54 = vcombine.low %v9160_v23, %v9162_v43  ;;  %v16003_v23 = vld [vmem:[#allocation4 + $0xff8] ss:$-2664 sps:$4 sm:$0xff]  }
 0x78f   : > { %12213 = vmatprep.subr.bf16.mxu1 %v15948_v0  ;;  %v15973_v0 = vld [vmem:[#allocation4 + $0x578] ss:$-8 sps:$4 sm:$0xff]  }
 0x790   : > { %v16006_v43 = vld [vmem:[#allocation4 + $0xf40] ss:$-816 sps:$4 sm:$0xff]  }
 0x791   : > { %12173 = vmatpush1.bf16.msra.mxu0 %v15943_v30  ;;  %v15984_v30 = vld [vmem:[#allocation4 + $0x3c] ss:$1936 sps:$4 sm:$0xff]  }
 0x792   : > { %12214 = vmatpush1.bf16.msra.mxu1 %v15946_v8  ;;  %12174 = vmatprep.subr.bf16.mxu0 %v14288_v22  ;;  %v15987_v8 = vld [vmem:[#allocation4 + $0x214] ss:$2680 sps:$4 sm:$0xff]  }
 0x793   : > { %12215 = vmatprep.subr.bf16.mxu1 %v14352_v17  ;;  %v9212_v22 = vld [vmem:[#allocation4 + $0xc8] sm:$0xff] }
 0x794   : > { %v9214_v17 = vld [vmem:[#allocation4 + $0x2a8] sm:$0xff] }
 0x795   : > { %12175 = vmatpush1.bf16.msra.mxu0 %v14287_v27  ;;  %v15982_v27 = vld [vmem:[#allocation4 + $0x38] ss:$1936 sps:$4 sm:$0xff]   ;;  %v14375_v25 = vcombine.low %v9212_v22, %v9214_v17 }
 0x796   : > { %12216 = vmatpush1.bf16.msra.mxu1 %v14351_v32  ;;  %12176 = vmatprep.subr.bf16.mxu0 %v15951_v51  ;;  %v15985_v32 = vld [vmem:[#allocation4 + $0x210] ss:$2680 sps:$4 sm:$0xff]   ;;  %v15990_v51 = vld [vmem:[#allocation4 + $0xbc4] ss:$-1800 sps:$4 sm:$0xff]  }
 0x797   : > { %12217 = vmatprep.subr.bf16.mxu1 %v15954_v55  ;;  %v14376_v55 = vcombine.high %v9212_v22, %v9214_v17  ;;  %v9304_v22 = vld [vmem:[#allocation4 + $0xfc8] sm:$0xff] }
 0x798   : > { %v9306_v17 = vld [vmem:[#allocation4 + $0x828] sm:$0xff] }
 0x799   : > { %12177 = vmatpush1.bf16.msra.mxu0 %v15949_v57  ;;  %v15993_v57 = vld [vmem:[#allocation4 + $0x96c] ss:$-1648 sps:$4 sm:$0xff]  }
 0x79a   : > { %12218 = vmatpush1.bf16.msra.mxu1 %v15952_v9  ;;  %12178 = vmatprep.subr.bf16.mxu0 %v14280_v14  ;;  %v15996_v9 = vld [vmem:[#allocation4 + $0xfc] ss:$56 sps:$4 sm:$0xff]   ;;  %v9332_v14 = vld [vmem:[#allocation4 + $0x888] sm:$0xff] }
 0x79b   : > { %12219 = vmatprep.subr.bf16.mxu1 %v15957_v5  ;;  %v9334_v5 = vld [vmem:[#allocation4 + $0x128] sm:$0xff] }
 0x79d   : > { %12179 = vmatpush1.bf16.msra.mxu0 %v14279_v53  ;;  %v15999_v53 = vld [vmem:[#allocation4 + $0x64c] ss:$-792 sps:$4 sm:$0xff]  }
 0x79e   : > { %12220 = vmatpush1.bf16.msra.mxu1 %v15955_v47  ;;  %12180 = vmatprep.subr.bf16.mxu0 %v15960_v15  ;;  %v14496_v47 = vcombine.high %v9332_v14, %v9334_v5  ;;  %v9328_v15 = vld [vmem:[#allocation4 + $0xf28] sm:$0xff] }
 0x79f   : > { %12221 = vmatprep.subr.bf16.mxu1 %v14404_v3  ;;  %v9330_v3 = vld [vmem:[#allocation4 + $0xdc8] sm:$0xff] }
 0x7a0   : > { %v14492_v37 = vcombine.high %v9328_v15, %v9330_v3 }
 0x7a1   : > { %12181 = vmatpush2.bf16.msra.mxu0 %v15958_v11  ;;  %v15997_v11 = vld [vmem:[#allocation4 + $0x648] ss:$-792 sps:$4 sm:$0xff]  }
 0x7a2   : > { %12222 = vmatpush2.bf16.msra.mxu1 %v14403_v61  ;;  %12182 = vmatprep.subr.bf16.mxu0 %v15963_v20  ;;  %v14495_v20 = vcombine.low %v9332_v14, %v9334_v5  ;;  %v16002_v61 = vld [vmem:[#allocation4 + $0x644] ss:$440 sps:$4 sm:$0xff]   ;;  %v9360_v14 = vld [vmem:[#allocation4 + $0x3e8] sm:$0xff] }
 0x7a3   : > { %12223 = vmatprep.subr.bf16.mxu1 %v15966_v62  ;;  %v9260_v62 = vld [vmem:[#allocation4 + $0x6c8] sm:$0xff] }
 0x7a4   : > { %v9362_v5 = vld [vmem:[#allocation4 + $0x248] sm:$0xff] }
 0x7a5   : > { %12183 = vmatpush2.bf16.msra.mxu0 %v15961_v19  ;;  %v16000_v19 = vld [vmem:[#allocation4 + $0x640] ss:$440 sps:$4 sm:$0xff]  }
 0x7a6   : > { %12224 = vmatpush2.bf16.msra.mxu1 %v15964_v60  ;;  %12184 = vmatprep.subr.bf16.mxu0 %v14332_v59  ;;  %v14491_v60 = vcombine.low %v9328_v15, %v9330_v3  ;;  %v14424_v59 = vcombine.high %v9260_v62, %v9262_v45  ;;  %v16033_v15 = vld [vmem:[#allocation4 + $0xa38] ss:$840 sps:$4 sm:$0xff]   ;;  %v14523_v3 = vcombine.low %v9360_v14, %v9362_v5 }
 0x7a7   : > { %12225 = vmatprep.subr.bf16.mxu1 %v14396_v56  ;;  %v14488_v56 = vcombine.high %v9324_v38, %v9326_v7 }
 0x7a9   : > { %12185 = vmatpush2.bf16.msra.mxu0 %v14331_v58  ;;  %v14423_v58 = vcombine.low %v9260_v62, %v9262_v45  ;;  %v16039_v62 = vld [vmem:[#allocation4 + $0x4e8] ss:$936 sps:$4 sm:$0xff]   ;;  %v16047_v45 = vld [vmem:[#allocation4 + $0x484] ss:$2160 sps:$4 sm:$0xff]  }
 0x7aa   : > { %12226 = vmatpush2.bf16.msra.mxu1 %v14395_v21  ;;  %12186 = vmatprep.subr.bf16.mxu0 %v15969_v13  ;;  %v14487_v21 = vcombine.low %v9324_v38, %v9326_v7  ;;  %v16005_v13 = vld [vmem:[#allocation4 + $0xffc] ss:$-2664 sps:$4 sm:$0xff]  }
 0x7ab   : > { %12227 = vmatprep.subr.bf16.mxu1 %v15972_v34  ;;  %v16008_v34 = vld [vmem:[#allocation4 + $0xf44] ss:$-816 sps:$4 sm:$0xff]  }
 0x7ac   : > { %v9284_v38 = vld [vmem:[#allocation4 + $0x670] sm:$0xff] }
 0x7ad   : > { %12187 = vmatpush2.bf16.msra.mxu0 %v15967_v50  ;;  %v16011_v50 = vld [vmem:[#allocation4 + $0xb4c] ss:$-744 sps:$4 sm:$0xff]   ;;  %v9286_v7 = vld [vmem:[#allocation4 + $0x530] sm:$0xff] }
 0x7ae   : > { %12228 = vmatpush2.bf16.msra.mxu1 %v15970_v52  ;;  %12188 = vmatprep.subr.bf16.mxu0 %v14324_v16  ;;  %v16014_v52 = vld [vmem:[#allocation4 + $0x354] ss:$1832 sps:$4 sm:$0xff]  }
 0x7af   : > { %12229 = vmatprep.subr.bf16.mxu1 %v15975_v10  ;;  %v9312_v16 = vld [vmem:[#allocation4 + $0x1b0] sm:$0xff] }
 0x7b0   : > { %v9314_v10 = vld [vmem:[#allocation4 + $0xfb0] sm:$0xff] }
 0x7b1   : > { %12189 = vmatpush2.bf16.msra.mxu0 %v14323_v54  ;;  %v16009_v54 = vld [vmem:[#allocation4 + $0xb48] ss:$-744 sps:$4 sm:$0xff]  }
 0x7b2   : > { %12230 = vmatpush2.bf16.msra.mxu1 %v15973_v0  ;;  %12190 = vmatprep.subr.bf16.mxu0 %v15978_v6  ;;  %v16012_v0 = vld [vmem:[#allocation4 + $0x350] ss:$1832 sps:$4 sm:$0xff]   ;;  %v16017_v6 = vld [vmem:[#allocation4 + $0x364] ss:$-584 sps:$4 sm:$0xff]  }
 0x7b3   : > { %12231 = vmatprep.subr.bf16.mxu1 %v15981_v46  ;;  %v14476_v46 = vcombine.high %v9312_v16, %v9314_v10 }
 0x7b5   : > { %12191 = vmatpush2.bf16.msra.mxu0 %v15976_v26  ;;  %v16015_v26 = vld [vmem:[#allocation4 + $0x360] ss:$-584 sps:$4 sm:$0xff]  }
 0x7b6   : > { %12232 = vmatpush2.bf16.msra.mxu1 %v15979_v24  ;;  %12192 = vmatprep.subr.bf16.mxu0 %v15984_v30  ;;  %v14475_v24 = vcombine.low %v9312_v16, %v9314_v10  ;;  %v16020_v30 = vld [vmem:[#allocation4 + $0xd74] ss:$-2000 sps:$4 sm:$0xff]   ;;  %v16051_v16 = vld [vmem:[#allocation4 + $0xad8] ss:$-2648 sps:$4 sm:$0xff]  }
 0x7b7   : > { %12233 = vmatprep.subr.bf16.mxu1 %v15987_v8  ;;  %v16023_v8 = vld [vmem:[#allocation4 + $0x97c] ss:$1544 sps:$4 sm:$0xff]  }
 0x7b9   : > { %12193 = vmatpush2.bf16.msra.mxu0 %v15982_v27  ;;  %v16018_v27 = vld [vmem:[#allocation4 + $0xd70] ss:$-2000 sps:$4 sm:$0xff]  }
 0x7ba   : > { %12234 = vmatpush2.bf16.msra.mxu1 %v15985_v32  ;;  %12194 = vmatprep.subr.bf16.mxu0 %v15990_v51  ;;  %v16021_v32 = vld [vmem:[#allocation4 + $0x978] ss:$1544 sps:$4 sm:$0xff]   ;;  %v14468_v51 = vcombine.high %v9304_v22, %v9306_v17 }
 0x7bb   : > { %12235 = vmatprep.subr.bf16.mxu1 %v14376_v55  ;;  %v16026_v55 = vld [vmem:[#allocation4 + $0x544] ss:$664 sps:$4 sm:$0xff]  }
 0x7bd   : > { %12195 = vmatpush2.bf16.msra.mxu0 %v15988_v40  ;;  %v14467_v40 = vcombine.low %v9304_v22, %v9306_v17  ;;  %v16057_v22 = vld [vmem:[#allocation4 + $0x1d0] ss:$464 sps:$4 sm:$0xff]  }
 0x7be   : > { %12236 = vmatpush2.bf16.msra.mxu1 %v14375_v25  ;;  %12246 = vmatprep.subr.bf16.mxu0 %v15993_v57  ;;  %v16024_v25 = vld [vmem:[#allocation4 + $0x540] ss:$664 sps:$4 sm:$0xff]   ;;  %v16029_v57 = vld [vmem:[#allocation4 + $0x554] ss:$-88 sps:$4 sm:$0xff]  }
 0x7bf   : > { %12287 = vmatprep.subr.bf16.mxu1 %v15996_v9  ;;  %v16032_v9 = vld [vmem:[#allocation4 + $0x3cc] ss:$-328 sps:$4 sm:$0xff]   ;;  %v16060_v17 = vld [vmem:[#allocation4 + $0x538] ss:$1304 sps:$4 sm:$0xff]  }
 0x7c0   : > { %12197 = vmatmul.mubr.bf16.vlgmr.msra.gmra.mxu0 %v20423_v41 }
 0x7c1   : > { %12238 = vmatmul.mubr.bf16.vlgmr.msra.gmra.mxu1 %v20427_v48  ;;  %12247 = vmatpush1.bf16.msra.mxu0 %v15991_v33  ;;  %v16027_v33 = vld [vmem:[#allocation4 + $0x550] ss:$-88 sps:$4 sm:$0xff]  }
 0x7c2   : > { %12288 = vmatpush1.bf16.msra.mxu1 %v15994_v4  ;;  %12248 = vmatprep.subr.bf16.mxu0 %v15999_v53  ;;  %v16030_v4 = vld [vmem:[#allocation4 + $0x3c8] ss:$-328 sps:$4 sm:$0xff]   ;;  %v16035_v53 = vld [vmem:[#allocation4 + $0xa3c] ss:$840 sps:$4 sm:$0xff]  }
 0x7c3   : > { %12289 = vmatprep.subr.bf16.mxu1 %v14496_v47  ;;  %12278 = vmatprep.mubr.bf16.mxu0 %v20451_v29  ;;  %v14524_v47 = vcombine.high %v9360_v14, %v9362_v5  ;;  %v9454_v14 = vld [vmem:[#allocation4 + $0x740] sm:$0xff]  ;;  %v16069_v5 = vld [vmem:[#allocation4 + $0xfa8] ss:$-816 sps:$4 sm:$0xff]  }
 0x7c4   : > { %12319 = vmatprep.mubr.bf16.mxu1 %v20455_v44 }
 0x7c5   : > { %12249 = vmatpush1.bf16.msra.mxu0 %v15997_v11  ;;  %v16038_v11 = vld [vmem:[#allocation4 + $0x524] ss:$920 sps:$4 sm:$0xff]  }
 0x7c6   : > { %12290 = vmatpush1.bf16.msra.mxu1 %v14495_v20  ;;  %12250 = vmatprep.subr.bf16.mxu0 %v16002_v61  ;;  %v16041_v20 = vld [vmem:[#allocation4 + $0x4ec] ss:$936 sps:$4 sm:$0xff]   ;;  %v16036_v61 = vld [vmem:[#allocation4 + $0x520] ss:$920 sps:$4 sm:$0xff]  }
 0x7c7   : > { %12291 = vmatprep.subr.bf16.mxu1 %v14492_v37  ;;  %v16044_v37 = vld [vmem:[#allocation4 + $0xf74] ss:$-3816 sps:$4 sm:$0xff]  }
 0x7c9   : > { %12251 = vmatpush1.bf16.msra.mxu0 %v16000_v19  ;;  %v16042_v19 = vld [vmem:[#allocation4 + $0xf70] ss:$-3816 sps:$4 sm:$0xff]  }
 0x7ca   : > { %12292 = vmatpush1.bf16.msra.mxu1 %v14491_v60  ;;  %12252 = vmatprep.subr.bf16.mxu0 %v14424_v59  ;;  %v16045_v60 = vld [vmem:[#allocation4 + $0x480] ss:$2160 sps:$4 sm:$0xff]   ;;  %v16050_v59 = vld [vmem:[#allocation4 + $0xa1c] ss:$-8 sps:$4 sm:$0xff]  }
 0x7cb   : > { %12293 = vmatprep.subr.bf16.mxu1 %v14488_v56  ;;  %v14448_v56 = vcombine.high %v9284_v38, %v9286_v7 }
 0x7cd   : > { %12253 = vmatpush1.bf16.msra.mxu0 %v14423_v58  ;;  %v9344_v58 = vld [vmem:[#allocation4 + $0xa40] sm:$0xff] }
 0x7ce   : > { %12294 = vmatpush1.bf16.msra.mxu1 %v14487_v21  ;;  %12254 = vmatprep.subr.bf16.mxu0 %v16005_v13  ;;  %v9346_v21 = vld [vmem:[#allocation4 + $0xbe0] sm:$0xff]  ;;  %v14447_v13 = vcombine.low %v9284_v38, %v9286_v7 }
 0x7cf   : > { %12295 = vmatprep.subr.bf16.mxu1 %v16008_v34  ;;  %v16048_v34 = vld [vmem:[#allocation4 + $0xa18] ss:$-8 sps:$4 sm:$0xff]   ;;  %v14507_v10 = vcombine.low %v9344_v58, %v9346_v21  ;;  %v16080_v38 = vld [vmem:[#allocation4 + $0xc6c] ss:$760 sps:$4 sm:$0xff]  }
 0x7d1   : > { %12255 = vmatpush1.bf16.msra.mxu0 %v16003_v23  ;;  %v16053_v23 = vld [vmem:[#allocation4 + $0xadc] ss:$-2648 sps:$4 sm:$0xff]  }
 0x7d2   : > { %12296 = vmatpush1.bf16.msra.mxu1 %v16006_v43  ;;  %12256 = vmatprep.subr.bf16.mxu0 %v16011_v50  ;;  %v14508_v43 = vcombine.high %v9344_v58, %v9346_v21  ;;  %v9340_v50 = vld [vmem:[#allocation4 + $0x1d8] sm:$0xff]  ;;  %v16083_v58 = vld [vmem:[#allocation4 + $0xf6c] ss:$-2680 sps:$4 sm:$0xff]   ;;  %v9436_v21 = vld [vmem:[#allocation4 + $0xaa0] sm:$0xff] }
 0x7d3   : > { %12297 = vmatprep.subr.bf16.mxu1 %v16014_v52  ;;  %v9342_v52 = vld [vmem:[#allocation4 + $0x638] sm:$0xff] }
 0x7d5   : > { %12257 = vmatpush1.bf16.msra.mxu0 %v16009_v54  ;;  %v16056_v54 = vld [vmem:[#allocation4 + $0x4] ss:$4048 sps:$4 sm:$0xff]  }
 0x7d6   : > { %12298 = vmatpush1.bf16.msra.mxu1 %v16012_v0  ;;  %12258 = vmatprep.subr.bf16.mxu0 %v16017_v6  ;;  %v14504_v0 = vcombine.high %v9340_v50, %v9342_v52  ;;  %v16054_v6 = vld [vmem:[#allocation4] ss:$4048 sps:$4 sm:$0xff]  }
 0x7d7   : > { %12299 = vmatprep.subr.bf16.mxu1 %v14476_v46  ;;  %v14503_v46 = vcombine.low %v9340_v50, %v9342_v52  ;;  %v16086_v50 = vld [vmem:[#allocation4 + $0xd3c] ss:$-2032 sps:$4 sm:$0xff]  }
 0x7d9   : > { %12259 = vmatpush1.bf16.msra.mxu0 %v16015_v26  ;;  %v16059_v26 = vld [vmem:[#allocation4 + $0x1d4] ss:$464 sps:$4 sm:$0xff]  }
 0x7da   : > { %12300 = vmatpush1.bf16.msra.mxu1 %v14475_v24  ;;  %12260 = vmatprep.subr.bf16.mxu0 %v16020_v30  ;;  %v16062_v24 = vld [vmem:[#allocation4 + $0x53c] ss:$1304 sps:$4 sm:$0xff]  }
 0x7db   : > { %12301 = vmatprep.subr.bf16.mxu1 %v16023_v8  ;;  %v9396_v30 = vld [vmem:[#allocation4 + $0xfb8] sm:$0xff] }
 0x7dc   : > { %v9398_v8 = vld [vmem:[#allocation4 + $0xdd8] sm:$0xff] }
 0x7dd   : > { %12261 = vmatpush1.bf16.msra.mxu0 %v16018_v27  ;;  %v14560_v27 = vcombine.high %v9396_v30, %v9398_v8 }
 0x7de   : > { %12302 = vmatpush1.bf16.msra.mxu1 %v16021_v32  ;;  %12262 = vmatprep.subr.bf16.mxu0 %v14468_v51  ;;  %v16065_v32 = vld [vmem:[#allocation4 + $0xc34] ss:$-2000 sps:$4 sm:$0xff]   ;;  %v16063_v51 = vld [vmem:[#allocation4 + $0xc30] ss:$-2000 sps:$4 sm:$0xff]  }
 0x7df   : > { %12303 = vmatprep.subr.bf16.mxu1 %v16026_v55  ;;  %v14559_v55 = vcombine.low %v9396_v30, %v9398_v8  ;;  %v16087_v8 = vld [vmem:[#allocation4 + $0x730] ss:$-1136 sps:$4 sm:$0xff]  }
 0x7e1   : > { %12263 = vmatpush2.bf16.msra.mxu0 %v14467_v40  ;;  %v16068_v40 = vld [vmem:[#allocation4 + $0x80c] ss:$-328 sps:$4 sm:$0xff]  }
 0x7e2   : > { %12304 = vmatpush2.bf16.msra.mxu1 %v16024_v25  ;;  %12264 = vmatprep.subr.bf16.mxu0 %v16029_v57  ;;  %v16071_v25 = vld [vmem:[#allocation4 + $0xfac] ss:$-816 sps:$4 sm:$0xff]   ;;  %v16066_v57 = vld [vmem:[#allocation4 + $0x808] ss:$-328 sps:$4 sm:$0xff]  }
 0x7e3   : > { %12305 = vmatprep.subr.bf16.mxu1 %v16032_v9  ;;  %v9452_v9 = vld [vmem:[#allocation4 + $0xa80] sm:$0xff] }
 0x7e5   : > { %12265 = vmatpush2.bf16.msra.mxu0 %v16027_v33  ;;  %v16074_v33 = vld [vmem:[#allocation4 + $0x5dc] ss:$-784 sps:$4 sm:$0xff]  }
 0x7e6   : > { %12306 = vmatpush2.bf16.msra.mxu1 %v16030_v4  ;;  %12266 = vmatprep.subr.bf16.mxu0 %v16035_v53  ;;  %v14616_v4 = vcombine.high %v9452_v9, %v9454_v14  ;;  %v9448_v53 = vld [vmem:[#allocation4 + $0x238] sm:$0xff] }
 0x7e7   : > { %12307 = vmatprep.subr.bf16.mxu1 %v14524_v47  ;;  %v9450_v47 = vld [vmem:[#allocation4 + $0xd18] sm:$0xff] }
 0x7e9   : > { %12267 = vmatpush2.bf16.msra.mxu0 %v16033_v15  ;;  %v16072_v15 = vld [vmem:[#allocation4 + $0x5d8] ss:$-784 sps:$4 sm:$0xff]  }
 0x7ea   : > { %12308 = vmatpush2.bf16.msra.mxu1 %v14523_v3  ;;  %12268 = vmatprep.subr.bf16.mxu0 %v16038_v11  ;;  %v14615_v3 = vcombine.low %v9452_v9, %v9454_v14  ;;  %v16077_v11 = vld [vmem:[#allocation4 + $0x5ec] ss:$2568 sps:$4 sm:$0xff]   ;;  %v16098_v14 = vld [vmem:[#allocation4 + $0x6a4] ss:$-1160 sps:$4 sm:$0xff]  }
 0x7eb   : > { %12309 = vmatprep.subr.bf16.mxu1 %v16041_v20  ;;  %v14612_v20 = vcombine.high %v9448_v53, %v9450_v47 }
 0x7ed   : > { %12269 = vmatpush2.bf16.msra.mxu0 %v16036_v61  ;;  %v9444_v61 = vld [vmem:[#allocation4 + $0xd10] sm:$0xff] }
 0x7ee   : > { %12310 = vmatpush2.bf16.msra.mxu1 %v16039_v62  ;;  %12270 = vmatprep.subr.bf16.mxu0 %v16044_v37  ;;  %v9446_v62 = vld [vmem:[#allocation4 + $0x8f0] sm:$0xff] }
 0x7ef   : > { %12311 = vmatprep.subr.bf16.mxu1 %v16047_v45  ;;  %v16075_v37 = vld [vmem:[#allocation4 + $0x5e8] ss:$2568 sps:$4 sm:$0xff]   ;;  %v14611_v45 = vcombine.low %v9448_v53, %v9450_v47  ;;  %v14608_v7 = vcombine.high %v9444_v61, %v9446_v62  ;;  %v16104_v53 = vld [vmem:[#allocation4 + $0x7d4] ss:$-696 sps:$4 sm:$0xff]   ;;  %v16107_v47 = vld [vmem:[#allocation4 + $0xac4] ss:$-312 sps:$4 sm:$0xff]  }
 0x7f1   : > { %12271 = vmatpush2.bf16.msra.mxu0 %v16042_v19  ;;  %v9376_v19 = vld [vmem:[#allocation4 + $0xc08] sm:$0xff] }
 0x7f2   : > { %12312 = vmatpush2.bf16.msra.mxu1 %v16045_v60  ;;  %12272 = vmatprep.subr.bf16.mxu0 %v14448_v56  ;;  %v9378_v60 = vld [vmem:[#allocation4 + $0x408] sm:$0xff]  ;;  %v14607_v56 = vcombine.low %v9444_v61, %v9446_v62  ;;  %v9408_v61 = vld [vmem:[#allocation4 + $0x1f0] sm:$0xff] }
 0x7f3   : > { %12313 = vmatprep.subr.bf16.mxu1 %v16050_v59  ;;  %v16078_v59 = vld [vmem:[#allocation4 + $0xc68] ss:$760 sps:$4 sm:$0xff]   ;;  %v9410_v62 = vld [vmem:[#allocation4 + $0xef0] sm:$0xff] }
 0x7f5   : > { %12273 = vmatpush2.bf16.msra.mxu0 %v14447_v13  ;;  %v14540_v13 = vcombine.high %v9376_v19, %v9378_v60 }
 0x7f6   : > { %12314 = vmatpush2.bf16.msra.mxu1 %v16048_v34  ;;  %12274 = vmatprep.subr.bf16.mxu0 %v16053_v23  ;;  %v9438_v34 = vld [vmem:[#allocation4 + $0x260] sm:$0xff]  ;;  %v14539_v23 = vcombine.low %v9376_v19, %v9378_v60  ;;  %v9468_v19 = vld [vmem:[#allocation4 + $0xdf8] sm:$0xff]  ;;  %v14572_v60 = vcombine.high %v9408_v61, %v9410_v62 }
 0x7f7   : > { %12315 = vmatprep.subr.bf16.mxu1 %v14508_v43  ;;  %v16081_v43 = vld [vmem:[#allocation4 + $0xf68] ss:$-2680 sps:$4 sm:$0xff]   ;;  %v14600_v52 = vcombine.high %v9436_v21, %v9438_v34 }
 0x7f9   : > { %12275 = vmatpush2.bf16.msra.mxu0 %v16051_v16  ;;  %v9432_v16 = vld [vmem:[#allocation4 + $0x108] sm:$0xff] }
 0x7fa   : > { %12316 = vmatpush2.bf16.msra.mxu1 %v14507_v10  ;;  %12276 = vmatprep.subr.bf16.mxu0 %v16056_v54  ;;  %v9434_v10 = vld [vmem:[#allocation4 + $0x368] sm:$0xff] }
 0x7fb   : > { %12317 = vmatprep.subr.bf16.mxu1 %v14504_v0  ;;  %v16084_v54 = vld [vmem:[#allocation4 + $0xd38] ss:$-2032 sps:$4 sm:$0xff]   ;;  %v14599_v0 = vcombine.low %v9436_v21, %v9438_v34  ;;  %v14595_v30 = vcombine.low %v9432_v16, %v9434_v10  ;;  %v14571_v21 = vcombine.low %v9408_v61, %v9410_v62 }
 0x7fc   : > { %v9017_v34 = vld [vmem:[#allocation4 + $0xb78] sm:$0xff] }
 0x7fd   : > { %12277 = vmatpush2.bf16.msra.mxu0 %v16054_v6  ;;  %v16089_v6 = vld [vmem:[#allocation4 + $0x734] ss:$-1136 sps:$4 sm:$0xff]  }
 0x7fe   : > { %12318 = vmatpush2.bf16.msra.mxu1 %v14503_v46  ;;  %12328 = vmatprep.subr.bf16.mxu0 %v16059_v26  ;;  %v14596_v46 = vcombine.high %v9432_v16, %v9434_v10  ;;  %v9428_v26 = vld [vmem:[#allocation4 + $0x10] sm:$0xff] }
 0x7ff   : > { %12369 = vmatprep.subr.bf16.mxu1 %v16062_v24  ;;  %v9430_v24 = vld [vmem:[#allocation4 + $0xf30] sm:$0xff] }
 0x800   : > { %12279 = vmatmul.mubr.bf16.vlgmr.msra.gmra.mxu0 %v20449_v35  ;;  %v16114_v16 = vld [vmem:[#allocation4 + $0x198] ss:$1112 sps:$4 sm:$0xff]  }
 0x801   : > { %12320 = vmatmul.mubr.bf16.vlgmr.msra.gmra.mxu1 %v20453_v2  ;;  %12329 = vmatpush1.bf16.msra.mxu0 %v16057_v22  ;;  %v16092_v22 = vld [vmem:[#allocation4 + $0xd9c] ss:$-2456 sps:$4 sm:$0xff]  }
 0x802   : > { %12370 = vmatpush1.bf16.msra.mxu1 %v16060_v17  ;;  %12330 = vmatprep.subr.bf16.mxu0 %v14560_v27  ;;  %v14592_v17 = vcombine.high %v9428_v26, %v9430_v24  ;;  %v9488_v27 = vld [vmem:[#allocation4 + $0x4a8] sm:$0xff] }
 0x803   : > { %12371 = vmatprep.subr.bf16.mxu1 %v16065_v32  ;;  %12360 = vmatprep.mubr.bf16.mxu0 %v20465_v42  ;;  %v9490_v32 = vld [vmem:[#allocation4 + $0x1c8] sm:$0xff] }
 0x804   : > { %12401 = vmatprep.mubr.bf16.mxu1 %v20469_v36  ;;  %v14651_v9 = vcombine.low %v9488_v27, %v9490_v32 }
 0x805   : > { %12331 = vmatpush1.bf16.msra.mxu0 %v14559_v55  ;;  %v16090_v55 = vld [vmem:[#allocation4 + $0xd98] ss:$-2456 sps:$4 sm:$0xff]  }
 0x806   : > { %12372 = vmatpush1.bf16.msra.mxu1 %v16063_v51  ;;  %12332 = vmatprep.subr.bf16.mxu0 %v16068_v40  ;;  %v14591_v51 = vcombine.low %v9428_v26, %v9430_v24  ;;  %v16095_v40 = vld [vmem:[#allocation4 + $0x2c] ss:$616 sps:$4 sm:$0xff]  }
 0x807   : > { %12373 = vmatprep.subr.bf16.mxu1 %v16071_v25  ;;  %v14652_v25 = vcombine.high %v9488_v27, %v9490_v32  ;;  %v16122_v27 = vld [vmem:[#allocation4 + $0x9b4] ss:$-1832 sps:$4 sm:$0xff]  }
 0x809   : > { %12333 = vmatpush1.bf16.msra.mxu0 %v16066_v57  ;;  %v16093_v57 = vld [vmem:[#allocation4 + $0x28] ss:$616 sps:$4 sm:$0xff]  }
 0x80a   : > { %12374 = vmatpush1.bf16.msra.mxu1 %v16069_v5  ;;  %12334 = vmatprep.subr.bf16.mxu0 %v16074_v33  ;;  %v16101_v5 = vld [vmem:[#allocation4 + $0xc94] ss:$104 sps:$4 sm:$0xff]   ;;  %v16096_v33 = vld [vmem:[#allocation4 + $0x6a0] ss:$-1160 sps:$4 sm:$0xff]  }
 0x80b   : > { %12375 = vmatprep.subr.bf16.mxu1 %v14616_v4  ;;  %v16099_v4 = vld [vmem:[#allocation4 + $0xc90] ss:$104 sps:$4 sm:$0xff]  }
 0x80d   : > { %12335 = vmatpush1.bf16.msra.mxu0 %v16072_v15  ;;  %v16102_v15 = vld [vmem:[#allocation4 + $0x7d0] ss:$-696 sps:$4 sm:$0xff]  }
 0x80e   : > { %12376 = vmatpush1.bf16.msra.mxu1 %v14615_v3  ;;  %12336 = vmatprep.subr.bf16.mxu0 %v16077_v11  ;;  %v16105_v3 = vld [vmem:[#allocation4 + $0xac0] ss:$-312 sps:$4 sm:$0xff]   ;;  %v16110_v11 = vld [vmem:[#allocation4 + $0x6bc] ss:$952 sps:$4 sm:$0xff]  }
 0x80f   : > { %12377 = vmatprep.subr.bf16.mxu1 %v14612_v20  ;;  %v16113_v20 = vld [vmem:[#allocation4 + $0x50c] ss:$1072 sps:$4 sm:$0xff]  }
 0x811   : > { %12337 = vmatpush1.bf16.msra.mxu0 %v16075_v37  ;;  %v9472_v37 = vld [vmem:[#allocation4 + $0x7e0] sm:$0xff] }
 0x812   : > { %12378 = vmatpush1.bf16.msra.mxu1 %v14611_v45  ;;  %12338 = vmatprep.subr.bf16.mxu0 %v16080_v38  ;;  %v9474_v45 = vld [vmem:[#allocation4 + $0x4c0] sm:$0xff]  ;;  %v16108_v38 = vld [vmem:[#allocation4 + $0x6b8] ss:$952 sps:$4 sm:$0xff]  }
 0x813   : > { %12379 = vmatprep.subr.bf16.mxu1 %v14608_v7  ;;  %v16111_v7 = vld [vmem:[#allocation4 + $0x508] ss:$1072 sps:$4 sm:$0xff]  }
 0x815   : > { %12339 = vmatpush1.bf16.msra.mxu0 %v16078_v59  ;;  %v14636_v59 = vcombine.high %v9472_v37, %v9474_v45 }
 0x816   : > { %12380 = vmatpush1.bf16.msra.mxu1 %v14607_v56  ;;  %12340 = vmatprep.subr.bf16.mxu0 %v14540_v13  ;;  %v9470_v56 = vld [vmem:[#allocation4 + $0xe38] sm:$0xff]  ;;  %v14635_v13 = vcombine.low %v9472_v37, %v9474_v45  ;;  %v16131_v37 = vld [vmem:[#allocation4 + $0x6ec] ss:$-936 sps:$4 sm:$0xff]  }
 0x817   : > { %12381 = vmatprep.subr.bf16.mxu1 %v16083_v58  ;;  %v16116_v58 = vld [vmem:[#allocation4 + $0x19c] ss:$1112 sps:$4 sm:$0xff]   ;;  %v14631_v10 = vcombine.low %v9468_v19, %v9470_v56 }
 0x818   : > { %v16134_v45 = vld [vmem:[#allocation4 + $0xf3c] ss:$-1264 sps:$4 sm:$0xff]  }
 0x819   : > { %12341 = vmatpush1.bf16.msra.mxu0 %v14539_v23  ;;  %v9019_v23 = vld [vmem:[#allocation4 + $0xbf8] sm:$0xff] }
 0x81a   : > { %12382 = vmatpush1.bf16.msra.mxu1 %v16081_v43  ;;  %12342 = vmatprep.subr.bf16.mxu0 %v16086_v50  ;;  %v9081_v43 = vld [vmem:[#allocation4 + $0xc00] sm:$0xff]  ;;  %v14632_v50 = vcombine.high %v9468_v19, %v9470_v56  ;;  %v14182_v26 = vcombine.high %v9017_v34, %v9019_v23  ;;  %v16135_v19 = vld [vmem:[#allocation4 + $0xb28] ss:$-1560 sps:$4 sm:$0xff]  }
 0x81b   : > { %12383 = vmatprep.subr.bf16.mxu1 %v14600_v52  ;;  %v9083_v52 = vld [vmem:[#allocation4 + $0x2e0] sm:$0xff] }
 0x81c   : > { %v14246_v24 = vcombine.high %v9081_v43, %v9083_v52  ;;  %v16146_v56 = vld [vmem:[#allocation4 + $0x584] ss:$-1064 sps:$4 sm:$0xff]  }
 0x81d   : > { %12343 = vmatpush1.bf16.msra.mxu0 %v16084_v54  ;;  %v20791_v54 = vld [vmem:[#allocation15_spill] sm:$0xff] }
 0x81e   : > { %12384 = vmatpush1.bf16.msra.mxu1 %v14599_v0  ;;  %12344 = vmatprep.subr.bf16.mxu0 %v14596_v46  ;;  %v12064_v0 = vsub.s32 0, %v20791_v54  ;;  %v9500_v46 = vld [vmem:[%s20723_s8] sm:$0xf] }
 0x81f   : > { %12385 = vmatprep.subr.bf16.mxu1 %v16089_v6  ;;  %v12068_v6 = vsub.s32 1, %v20791_v54 }
 0x821   : > { %12345 = vmatpush2.bf16.msra.mxu0 %v14595_v30  ;;  %v12065_v30 = vrot.slane %v9500_v46, %v12064_v0  ;;  %v12069_v32 = vrot.slane %v9500_v46, %v12068_v6  ;;  %v16153_v0 = vld [vmem:[#allocation4 + $0xbb0] ss:$-920 sps:$4 sm:$0xff]   ;;  %v16158_v46 = vld [vmem:[#allocation4 + $0x8dc] ss:$-216 sps:$4 sm:$0xff]  }
 0x822   : > { %12386 = vmatpush2.bf16.msra.mxu1 %v16087_v8  ;;  %12346 = vmatprep.subr.bf16.mxu0 %v14592_v17  ;;  %v14181_v8 = vcombine.low %v9017_v34, %v9019_v23  ;;  %v16119_v17 = vld [vmem:[#allocation4 + $0xd7c] ss:$400 sps:$4 sm:$0xff]   ;;  %v16152_v34 = vld [vmem:[#allocation4 + $0x494] ss:$2256 sps:$4 sm:$0xff]  }
 0x823   : > { %12387 = vmatprep.subr.bf16.mxu1 %v16092_v22  ;;  %v14245_v22 = vcombine.low %v9081_v43, %v9083_v52  ;;  %v9053_v23 = vld [vmem:[#allocation4 + $0x6f0] sm:$0xff] }
 0x824   : > { %v9055_v43 = vld [vmem:[#allocation4 + $0xd30] sm:$0xff] }
 0x825   : > { %12347 = vmatpush2.bf16.msra.mxu0 %v14591_v51  ;;  %v16117_v51 = vld [vmem:[#allocation4 + $0xd78] ss:$400 sps:$4 sm:$0xff]   ;;  %v16150_v52 = vld [vmem:[#allocation4 + $0x490] ss:$2256 sps:$4 sm:$0xff]   ;;  %v14217_v6 = vcombine.low %v9053_v23, %v9055_v43 }
 0x826   : > { %12388 = vmatpush2.bf16.msra.mxu1 %v16090_v55  ;;  %12348 = vmatprep.subr.bf16.mxu0 %v16095_v40  ;;  %v16120_v55 = vld [vmem:[#allocation4 + $0x9b0] ss:$-1832 sps:$4 sm:$0xff]  }
 0x827   : > { %12389 = vmatprep.subr.bf16.mxu1 %v14652_v25 }
 0x829   : > { %12349 = vmatpush2.bf16.msra.mxu0 %v16093_v57 }
 0x82a   : > { %12390 = vmatpush2.bf16.msra.mxu1 %v14651_v9  ;;  %12350 = vmatprep.subr.bf16.mxu0 %v16098_v14 }
 0x82b   : > { %12391 = vmatprep.subr.bf16.mxu1 %v16101_v5  ;;  %v16125_v5 = vld [vmem:[#allocation4 + $0x834] ss:$-632 sps:$4 sm:$0xff]  }
 0x82d   : > { %12351 = vmatpush2.bf16.msra.mxu0 %v16096_v33  ;;  %v16128_v33 = vld [vmem:[#allocation4 + $0x18c] ss:$-248 sps:$4 sm:$0xff]  }
 0x82e   : > { %12392 = vmatpush2.bf16.msra.mxu1 %v16099_v4  ;;  %12352 = vmatprep.subr.bf16.mxu0 %v16104_v53 }
 0x82f   : > { %12393 = vmatprep.subr.bf16.mxu1 %v16107_v47 }
 0x831   : > { %12353 = vmatpush2.bf16.msra.mxu0 %v16102_v15 }
 0x832   : > { %12394 = vmatpush2.bf16.msra.mxu1 %v16105_v3  ;;  %12354 = vmatprep.subr.bf16.mxu0 %v16110_v11  ;;  %v16123_v11 = vld [vmem:[#allocation4 + $0x830] ss:$-632 sps:$4 sm:$0xff]  }
 0x833   : > { %12395 = vmatprep.subr.bf16.mxu1 %v16113_v20  ;;  %v16126_v20 = vld [vmem:[#allocation4 + $0x188] ss:$-248 sps:$4 sm:$0xff]  }
 0x835   : > { %12355 = vmatpush2.bf16.msra.mxu0 %v16108_v38  ;;  %v16129_v38 = vld [vmem:[#allocation4 + $0x6e8] ss:$-936 sps:$4 sm:$0xff]  }
 0x836   : > { %12396 = vmatpush2.bf16.msra.mxu1 %v16111_v7  ;;  %12356 = vmatprep.subr.bf16.mxu0 %v14572_v60  ;;  %v16140_v7 = vld [vmem:[#allocation4 + $0xdb4] ss:$-1752 sps:$4 sm:$0xff]   ;;  %v16138_v60 = vld [vmem:[#allocation4 + $0xdb0] ss:$-1752 sps:$4 sm:$0xff]  }
 0x837   : > { %12397 = vmatprep.subr.bf16.mxu1 %v14636_v59  ;;  %v16143_v59 = vld [vmem:[#allocation4 + $0xb8c] ss:$408 sps:$4 sm:$0xff]  }
 0x839   : > { %12357 = vmatpush2.bf16.msra.mxu0 %v14571_v21  ;;  %v16144_v21 = vld [vmem:[#allocation4 + $0x580] ss:$-1064 sps:$4 sm:$0xff]  }
 0x83a   : > { %12398 = vmatpush2.bf16.msra.mxu1 %v14635_v13  ;;  %12358 = vmatprep.subr.bf16.mxu0 %v16116_v58  ;;  %v16141_v58 = vld [vmem:[#allocation4 + $0xb88] ss:$408 sps:$4 sm:$0xff]   ;;  %v16149_v13 = vld [vmem:[#allocation4 + $0x814] ss:$-1240 sps:$4 sm:$0xff]  }
 0x83b   : > { %12399 = vmatprep.subr.bf16.mxu1 %v14632_v50  ;;  %v16147_v50 = vld [vmem:[#allocation4 + $0x810] ss:$-1240 sps:$4 sm:$0xff]  }
 0x83d   : > { %12359 = vmatpush2.bf16.msra.mxu0 %v16114_v16  ;;  %v16155_v16 = vld [vmem:[#allocation4 + $0xbb4] ss:$-920 sps:$4 sm:$0xff]  }
 0x83e   : > { %12400 = vmatpush2.bf16.msra.mxu1 %v14631_v10  ;;  %12410 = vmatprep.subr.bf16.mxu0 %v14182_v26  ;;  %v14218_v10 = vcombine.high %v9053_v23, %v9055_v43  ;;  %v16161_v26 = vld [vmem:[#allocation4 + $0x964] ss:$-2184 sps:$4 sm:$0xff]  }
 0x83f   : > { %12451 = vmatprep.subr.bf16.mxu1 %v14246_v24  ;;  %v16156_v24 = vld [vmem:[#allocation4 + $0x8d8] ss:$-216 sps:$4 sm:$0xff]  }
 0x840   : > { %v12116_v40 = vpop.f32.mrf.mxu0  ;;  %12361 = vmatmul.mubr.bf16.vlgmr.msra.gmra.mxu0 %v20463_v49 }
 0x841   : > { %v12157_v25 = vpop.f32.mrf.mxu1  ;;  %12402 = vmatmul.mubr.bf16.vlgmr.msra.gmra.mxu1 %v20467_v18  ;;  %v12117_v57 = vadd.f32 %v12116_v40, %v12065_v30  ;;  %12411 = vmatpush1.bf16.msra.mxu0 %v14181_v8  ;;  %v16159_v30 = vld [vmem:[#allocation4 + $0x960] ss:$-2184 sps:$4 sm:$0xff]   ;;  %v16164_v8 = vld [vmem:[#allocation4 + $0x67c] ss:$1288 sps:$4 sm:$0xff]  }
 0x842   : > { %12452 = vmatpush1.bf16.msra.mxu1 %v14245_v22  ;;  %v12118_v9 = vpop.f32.mrf.mxu0  ;;  %12412 = vmatprep.subr.bf16.mxu0 %v16119_v17  ;;  %v16167_v22 = vld [vmem:[#allocation4 + $0x5e4] ss:$944 sps:$4 sm:$0xff]   ;;  %v16162_v17 = vld [vmem:[#allocation4 + $0x678] ss:$1288 sps:$4 sm:$0xff]  }
 0x843   : > { %v12159_v14 = vpop.f32.mrf.mxu1  ;;  %12453 = vmatprep.subr.bf16.mxu1 %v16122_v27  ;;  %v20492_v4 = vadd.f32 %v12157_v25, %v12117_v57  ;;  %v12119_v53 = vadd.f32 %v12118_v9, %v12069_v32  ;;  %12442 = vmatprep.mubr.bf16.mxu0 %v20396_v12  ;;  %v16132_v12 = vld [vmem:[#allocation4 + $0xf38] ss:$-1264 sps:$4 sm:$0xff]   ;;  %v16165_v27 = vld [vmem:[#allocation4 + $0x5e0] ss:$944 sps:$4 sm:$0xff]   ;;  %v16170_v32 = vld [vmem:[#allocation4 + $0x624] ss:$392 sps:$4 sm:$0xff]  }
 0x844   : > { %12483 = vmatprep.mubr.bf16.mxu1 %v20398_v31  ;;  %v12120_v47 = vpop.f32.mrf.mxu0  ;;  %v16137_v31 = vld [vmem:[#allocation4 + $0xb2c] ss:$-1560 sps:$4 sm:$0xff]   ;;  %v9103_v40 = vld [vmem:[#allocation4 + $0xaf8] sm:$0xff]  ;;  %v16168_v25 = vld [vmem:[#allocation4 + $0x620] ss:$392 sps:$4 sm:$0xff]  }
 0x845   : > { %v12161_v15 = vpop.f32.mrf.mxu1  ;;  %v20496_v3 = vadd.f32 %v12159_v14, %v12119_v53  ;;  %12413 = vmatpush1.bf16.msra.mxu0 %v16117_v51  ;;  %v16173_v51 = vld [vmem:[#allocation4 + $0xa24] ss:$408 sps:$4 sm:$0xff]   ;;  %v16171_v57 = vld [vmem:[#allocation4 + $0xa20] ss:$408 sps:$4 sm:$0xff]  }
 0x846   : > { %12454 = vmatpush1.bf16.msra.mxu1 %v16120_v55  ;;  %v12121_v61 = vpop.f32.mrf.mxu0  ;;  %12414 = vmatprep.subr.bf16.mxu0 %v16125_v5  ;;  %v9101_v55 = vld [vmem:[#allocation4 + $0x438] sm:$0xff]  ;;  %v16176_v9 = vld [vmem:[#allocation4 + $0x8b4] ss:$-432 sps:$4 sm:$0xff]   ;;  %v16174_v53 = vld [vmem:[#allocation4 + $0x8b0] ss:$-432 sps:$4 sm:$0xff]  }
 0x847   : > { %v12162_v62 = vpop.f32.mrf.mxu1  ;;  %12455 = vmatprep.subr.bf16.mxu1 %v16128_v33  ;;  %v14266_v14 = vcombine.high %v9101_v55, %v9103_v40  ;;  %v9033_v5 = vld [vmem:[#allocation4 + $0x940] sm:$0xff]  ;;  %v14265_v47 = vcombine.low %v9101_v55, %v9103_v40  ;;  %v9031_v61 = vld [vmem:[#allocation4 + $0xfd8] sm:$0xff] }
 0x848   : > { %v9035_v33 = vld [vmem:[#allocation4 + $0x160] sm:$0xff] }
 0x849   : > { %12415 = vmatpush1.bf16.msra.mxu0 %v16123_v11  ;;  %v14198_v15 = vcombine.high %v9033_v5, %v9035_v33  ;;  %v16179_v11 = vld [vmem:[#allocation4 + $0x9e4] ss:$-2408 sps:$4 sm:$0xff]   ;;  %v14197_v62 = vcombine.low %v9033_v5, %v9035_v33  ;;  %v16198_v5 = vld [vmem:[#allocation4 + $0x228] ss:$624 sps:$4 sm:$0xff]  }
 0x84a   : > { %12456 = vmatpush1.bf16.msra.mxu1 %v16126_v20  ;;  %12416 = vmatprep.subr.bf16.mxu0 %v16131_v37  ;;  %v9029_v20 = vld [vmem:[#allocation4 + $0x18] sm:$0xff] }
 0x84b   : > { %12457 = vmatprep.subr.bf16.mxu1 %v16134_v45  ;;  %v16177_v37 = vld [vmem:[#allocation4 + $0x9e0] ss:$-2408 sps:$4 sm:$0xff]   ;;  %v14194_v45 = vcombine.high %v9029_v20, %v9031_v61 }
 0x84d   : > { %12417 = vmatpush1.bf16.msra.mxu0 %v16129_v38  ;;  %v16182_v38 = vld [vmem:[#allocation4 + $0x9c4] ss:$-1456 sps:$4 sm:$0xff]  }
 0x84e   : > { %12458 = vmatpush1.bf16.msra.mxu1 %v16132_v12  ;;  %12418 = vmatprep.subr.bf16.mxu0 %v16137_v31  ;;  %v9025_v12 = vld [vmem:[#allocation4 + $0xbf0] sm:$0xff] }
 0x84f   : > { %12459 = vmatprep.subr.bf16.mxu1 %v16140_v7  ;;  %v9027_v31 = vld [vmem:[#allocation4 + $0xe30] sm:$0xff]  ;;  %v9089_v7 = vld [vmem:[#allocation4 + $0x380] sm:$0xff] }
 0x851   : > { %12419 = vmatpush1.bf16.msra.mxu0 %v16135_v19  ;;  %v9091_v19 = vld [vmem:[#allocation4 + $0xae0] sm:$0xff] }
 0x852   : > { %12460 = vmatpush1.bf16.msra.mxu1 %v16138_v60  ;;  %12420 = vmatprep.subr.bf16.mxu0 %v16143_v59  ;;  %v14193_v60 = vcombine.low %v9029_v20, %v9031_v61  ;;  %v16180_v59 = vld [vmem:[#allocation4 + $0x9c0] ss:$-1456 sps:$4 sm:$0xff]   ;;  %v14253_v23 = vcombine.low %v9089_v7, %v9091_v19  ;;  %v16212_v20 = vld [vmem:[#allocation4 + $0x26c] ss:$-536 sps:$4 sm:$0xff]   ;;  %v9125_v61 = vld [vmem:[#allocation4 + $0x698] sm:$0xff] }
 0x853   : > { %12461 = vmatprep.subr.bf16.mxu1 %v16146_v56  ;;  %v14190_v56 = vcombine.high %v9025_v12, %v9027_v31 }
 0x855   : > { %12421 = vmatpush1.bf16.msra.mxu0 %v16141_v58  ;;  %v14254_v58 = vcombine.high %v9089_v7, %v9091_v19  ;;  %v9121_v19 = vld [vmem:[#allocation4 + $0xb60] sm:$0xff] }
 0x856   : > { %12462 = vmatpush1.bf16.msra.mxu1 %v16144_v21  ;;  %12422 = vmatprep.subr.bf16.mxu0 %v16149_v13  ;;  %v9021_v21 = vld [vmem:[#allocation4 + $0xa90] sm:$0xff] }
 0x857   : > { %12463 = vmatprep.subr.bf16.mxu1 %v16152_v34  ;;  %v9023_v13 = vld [vmem:[#allocation4 + $0xbd0] sm:$0xff]  ;;  %v14189_v34 = vcombine.low %v9025_v12, %v9027_v31 }
 0x858   : > { %v14186_v43 = vcombine.high %v9021_v21, %v9023_v13  ;;  %v16210_v12 = vld [vmem:[#allocation4 + $0x268] ss:$-536 sps:$4 sm:$0xff]  }
 0x859   : > { %12423 = vmatpush1.bf16.msra.mxu0 %v16147_v50  ;;  %v16185_v50 = vld [vmem:[#allocation4 + $0x42c] ss:$2648 sps:$4 sm:$0xff]  }
 0x85a   : > { %12464 = vmatpush1.bf16.msra.mxu1 %v16150_v52  ;;  %12424 = vmatprep.subr.bf16.mxu0 %v16155_v16  ;;  %v14185_v52 = vcombine.low %v9021_v21, %v9023_v13  ;;  %v16183_v16 = vld [vmem:[#allocation4 + $0x428] ss:$2648 sps:$4 sm:$0xff]   ;;  %v16215_v21 = vld [vmem:[#allocation4 + $0x8fc] ss:$-424 sps:$4 sm:$0xff]  }
 0x85b   : > { %12465 = vmatprep.subr.bf16.mxu1 %v14218_v10  ;;  %v16188_v10 = vld [vmem:[#allocation4 + $0xc74] ss:$-2680 sps:$4 sm:$0xff]   ;;  %v9117_v13 = vld [vmem:[#allocation4 + $0xac8] sm:$0xff] }
 0x85d   : > { %12425 = vmatpush1.bf16.msra.mxu0 %v16153_v0  ;;  %v16191_v0 = vld [vmem:[#allocation4 + $0xc4c] ss:$-3096 sps:$4 sm:$0xff]  }
 0x85e   : > { %12466 = vmatpush1.bf16.msra.mxu1 %v14217_v6  ;;  %12426 = vmatprep.subr.bf16.mxu0 %v16158_v46  ;;  %v16186_v6 = vld [vmem:[#allocation4 + $0xc70] ss:$-2680 sps:$4 sm:$0xff]  }
 0x85f   : > { %12467 = vmatprep.subr.bf16.mxu1 %v16161_v26  ;;  %v16189_v46 = vld [vmem:[#allocation4 + $0xc48] ss:$-3096 sps:$4 sm:$0xff]   ;;  %v16194_v26 = vld [vmem:[#allocation4 + $0x5c4] ss:$-328 sps:$4 sm:$0xff]  }
 0x861   : > { %12427 = vmatpush2.bf16.msra.mxu0 %v16156_v24  ;;  %v16197_v24 = vld [vmem:[#allocation4 + $0x7c4] ss:$1144 sps:$4 sm:$0xff]  }
 0x862   : > { %12468 = vmatpush2.bf16.msra.mxu1 %v16159_v30  ;;  %12428 = vmatprep.subr.bf16.mxu0 %v16164_v8  ;;  %v9201_v30 = vld [vmem:[#allocation4 + $0xe88] sm:$0xff] }
 0x863   : > { %12469 = vmatprep.subr.bf16.mxu1 %v16167_v22  ;;  %v9203_v8 = vld [vmem:[#allocation4 + $0x6a8] sm:$0xff] }
 0x864   : > { %v14365_v33 = vcombine.low %v9201_v30, %v9203_v8 }
 0x865   : > { %12429 = vmatpush2.bf16.msra.mxu0 %v16162_v17 }
 0x866   : > { %12470 = vmatpush2.bf16.msra.mxu1 %v16165_v27  ;;  %12430 = vmatprep.subr.bf16.mxu0 %v16170_v32  ;;  %v16192_v32 = vld [vmem:[#allocation4 + $0x5c0] ss:$-328 sps:$4 sm:$0xff]  }
 0x867   : > { %12471 = vmatprep.subr.bf16.mxu1 %v16173_v51  ;;  %v16195_v51 = vld [vmem:[#allocation4 + $0x7c0] ss:$1144 sps:$4 sm:$0xff]  }
 0x869   : > { %12431 = vmatpush2.bf16.msra.mxu0 %v16168_v25  ;;  %v16200_v25 = vld [vmem:[#allocation4 + $0x22c] ss:$624 sps:$4 sm:$0xff]  }
 0x86a   : > { %12472 = vmatpush2.bf16.msra.mxu1 %v16171_v57  ;;  %12432 = vmatprep.subr.bf16.mxu0 %v16176_v9  ;;  %v14366_v57 = vcombine.high %v9201_v30, %v9203_v8  ;;  %v16222_v30 = vld [vmem:[#allocation4 + $0xc0] ss:$16 sps:$4 sm:$0xff]  }
 0x86b   : > { %12473 = vmatprep.subr.bf16.mxu1 %v14266_v14 }
 0x86d   : > { %12433 = vmatpush2.bf16.msra.mxu0 %v16174_v53 }
 0x86e   : > { %12474 = vmatpush2.bf16.msra.mxu1 %v14265_v47  ;;  %12434 = vmatprep.subr.bf16.mxu0 %v14198_v15  ;;  %v16203_v15 = vld [vmem:[#allocation4 + $0xd4c] ss:$-1688 sps:$4 sm:$0xff]  }
 0x86f   : > { %12475 = vmatprep.subr.bf16.mxu1 %v16179_v11  ;;  %v16206_v11 = vld [vmem:[#allocation4 + $0xa64] ss:$-312 sps:$4 sm:$0xff]  }
 0x871   : > { %12435 = vmatpush2.bf16.msra.mxu0 %v14197_v62  ;;  %v9127_v62 = vld [vmem:[#allocation4 + $0xf18] sm:$0xff] }
 0x872   : > { %12476 = vmatpush2.bf16.msra.mxu1 %v16177_v37  ;;  %12436 = vmatprep.subr.bf16.mxu0 %v14194_v45  ;;  %v9189_v37 = vld [vmem:[#allocation4 + $0xde8] sm:$0xff]  ;;  %v14290_v31 = vcombine.high %v9125_v61, %v9127_v62 }
 0x873   : > { %12477 = vmatprep.subr.bf16.mxu1 %v16182_v38  ;;  %v9191_v45 = vld [vmem:[#allocation4 + $0x9a8] sm:$0xff] }
 0x874   : > { %v16207_v38 = vld [vmem:[#allocation4 + $0x458] ss:$-1104 sps:$4 sm:$0xff]   ;;  %v14354_v7 = vcombine.high %v9189_v37, %v9191_v45 }
 0x875   : > { %12437 = vmatpush2.bf16.msra.mxu0 %v14193_v60  ;;  %v9123_v60 = vld [vmem:[#allocation4 + $0xc80] sm:$0xff] }
 0x876   : > { %12478 = vmatpush2.bf16.msra.mxu1 %v16180_v59  ;;  %12438 = vmatprep.subr.bf16.mxu0 %v14190_v56  ;;  %v14289_v59 = vcombine.low %v9125_v61, %v9127_v62  ;;  %v14353_v56 = vcombine.low %v9189_v37, %v9191_v45  ;;  %v9153_v62 = vld [vmem:[#allocation4 + $0x3b0] sm:$0xff]  ;;  %v9217_v45 = vld [vmem:[#allocation4 + $0x998] sm:$0xff] }
 0x877   : > { %12479 = vmatprep.subr.bf16.mxu1 %v14254_v58  ;;  %v14286_v58 = vcombine.high %v9121_v19, %v9123_v60  ;;  %v9155_v37 = vld [vmem:[#allocation4 + $0xd90] sm:$0xff] }
 0x879   : > { %12439 = vmatpush2.bf16.msra.mxu0 %v14189_v34  ;;  %v9119_v34 = vld [vmem:[#allocation4 + $0x8c8] sm:$0xff] }
 0x87a   : > { %12480 = vmatpush2.bf16.msra.mxu1 %v14253_v23  ;;  %12440 = vmatprep.subr.bf16.mxu0 %v14186_v43  ;;  %v14285_v23 = vcombine.low %v9121_v19, %v9123_v60  ;;  %v16213_v43 = vld [vmem:[#allocation4 + $0x8f8] ss:$-424 sps:$4 sm:$0xff]   ;;  %v9149_v60 = vld [vmem:[#allocation4 + $0x788] sm:$0xff] }
 0x87b   : > { %12481 = vmatprep.subr.bf16.mxu1 %v16185_v50  ;;  %v14282_v50 = vcombine.high %v9117_v13, %v9119_v34 }
 0x87d   : > { %12441 = vmatpush2.bf16.msra.mxu0 %v14185_v52  ;;  %v16218_v52 = vld [vmem:[#allocation4 + $0xe4] ss:$3760 sps:$4 sm:$0xff]  }
 0x87e   : > { %12482 = vmatpush2.bf16.msra.mxu1 %v16183_v16  ;;  %12492 = vmatprep.subr.bf16.mxu0 %v16188_v10  ;;  %v14281_v16 = vcombine.low %v9117_v13, %v9119_v34  ;;  %v16216_v10 = vld [vmem:[#allocation4 + $0xe0] ss:$3760 sps:$4 sm:$0xff]  }
 0x87f   : > { %12533 = vmatprep.subr.bf16.mxu1 %v16191_v0  ;;  %v16221_v0 = vld [vmem:[#allocation4 + $0xefc] ss:$-3088 sps:$4 sm:$0xff]  }
 0x880   : > { %v12198_v22 = vpop.f32.mrf.mxu0  ;;  %12443 = vmatmul.mubr.bf16.vlgmr.msra.gmra.mxu0 %v20392_v63 }
 0x881   : > { %v12239_v17 = vpop.f32.mrf.mxu1  ;;  %12484 = vmatmul.mubr.bf16.vlgmr.msra.gmra.mxu1 %v20394_v1  ;;  %v12199_v27 = vadd.f32 %v12198_v22, %v20492_v4  ;;  %12493 = vmatpush1.bf16.msra.mxu0 %v16186_v6  ;;  %v16224_v6 = vld [vmem:[#allocation4 + $0xc4] ss:$16 sps:$4 sm:$0xff]  }
 0x882   : > { %12534 = vmatpush1.bf16.msra.mxu1 %v16189_v46  ;;  %v12200_v55 = vpop.f32.mrf.mxu0  ;;  %12494 = vmatprep.subr.bf16.mxu0 %v16194_v26  ;;  %v9173_v46 = vld [vmem:[#allocation4 + $0x970] sm:$0xff] }
 0x883   : > { %v12241_v40 = vpop.f32.mrf.mxu1  ;;  %12535 = vmatprep.subr.bf16.mxu1 %v16197_v24  ;;  %v20501_v9 = vadd.f32 %v12239_v17, %v12199_v27  ;;  %v12201_v14 = vadd.f32 %v12200_v55, %v20496_v3  ;;  %12524 = vmatprep.mubr.bf16.mxu0 %v20425_v28  ;;  %v16201_v3 = vld [vmem:[#allocation4 + $0xd48] ss:$-1688 sps:$4 sm:$0xff]   ;;  %v16227_v22 = vld [vmem:[#allocation4 + $0x61c] ss:$-104 sps:$4 sm:$0xff]  }
 0x884   : > { %12565 = vmatprep.mubr.bf16.mxu1 %v20429_v39  ;;  %v12202_v63 = vpop.f32.mrf.mxu0  ;;  %v16204_v28 = vld [vmem:[#allocation4 + $0xa60] ss:$-312 sps:$4 sm:$0xff]   ;;  %v16209_v39 = vld [vmem:[#allocation4 + $0x45c] ss:$-1104 sps:$4 sm:$0xff]   ;;  %v9175_v26 = vld [vmem:[#allocation4 + $0xb50] sm:$0xff] }
 0x885   : > { %v12243_v1 = vpop.f32.mrf.mxu1  ;;  %v20506_v4 = vadd.f32 %v12241_v40, %v12201_v14  ;;  %12495 = vmatpush1.bf16.msra.mxu0 %v16192_v32  ;;  %v16219_v24 = vld [vmem:[#allocation4 + $0xef8] ss:$-3088 sps:$4 sm:$0xff]   ;;  %v14338_v8 = vcombine.high %v9173_v46, %v9175_v26  ;;  %v14337_v32 = vcombine.low %v9173_v46, %v9175_v26  ;;  %v16230_v40 = vld [vmem:[#allocation4 + $0xe64] ss:$-88 sps:$4 sm:$0xff]   ;;  %v16233_v14 = vld [vmem:[#allocation4 + $0xb34] ss:$-2552 sps:$4 sm:$0xff]  }
 0x886   : > { %12536 = vmatpush1.bf16.msra.mxu1 %v16195_v51  ;;  %v12203_v53 = vpop.f32.mrf.mxu0  ;;  %12496 = vmatprep.subr.bf16.mxu0 %v16200_v25  ;;  %v9169_v17 = vld [vmem:[#allocation4 + $0xd08] sm:$0xff]  ;;  %v16225_v51 = vld [vmem:[#allocation4 + $0x618] ss:$-104 sps:$4 sm:$0xff]   ;;  %v9225_v1 = vld [vmem:[#allocation4 + $0x600] sm:$0xff] }
 0x887   : > { %v12244_v47 = vpop.f32.mrf.mxu1  ;;  %12537 = vmatprep.subr.bf16.mxu1 %v14366_v57  ;;  %v9171_v27 = vld [vmem:[#allocation4 + $0xc28] sm:$0xff]  ;;  %v9265_v26 = vld [vmem:[#allocation4 + $0x258] sm:$0xff] }
 0x888   : > { %v14334_v55 = vcombine.high %v9169_v17, %v9171_v27  ;;  %v14333_v25 = vcombine.low %v9169_v17, %v9171_v27  ;;  %v16228_v57 = vld [vmem:[#allocation4 + $0xe60] ss:$-88 sps:$4 sm:$0xff]   ;;  %v16236_v63 = vld [vmem:[#allocation4 + $0x83c] ss:$1520 sps:$4 sm:$0xff]  }
 0x889   : > { %12497 = vmatpush1.bf16.msra.mxu0 %v16198_v5  ;;  %v9227_v5 = vld [vmem:[#allocation4 + $0xb40] sm:$0xff]  ;;  %v16234_v53 = vld [vmem:[#allocation4 + $0x838] ss:$1520 sps:$4 sm:$0xff]   ;;  %v16239_v47 = vld [vmem:[#allocation4 + $0xb9c] ss:$-1072 sps:$4 sm:$0xff]  }
 0x88a   : > { %12538 = vmatpush1.bf16.msra.mxu1 %v14365_v33  ;;  %12498 = vmatprep.subr.bf16.mxu0 %v16203_v15  ;;  %v16231_v33 = vld [vmem:[#allocation4 + $0xb30] ss:$-2552 sps:$4 sm:$0xff]   ;;  %v14390_v15 = vcombine.high %v9225_v1, %v9227_v5  ;;  %v16254_v46 = vld [vmem:[#allocation4 + $0x60c] ss:$-1168 sps:$4 sm:$0xff]  }
 0x88b   : > { %12539 = vmatprep.subr.bf16.mxu1 %v16206_v11  ;;  %v9221_v11 = vld [vmem:[#allocation4 + $0x668] sm:$0xff]  ;;  %v16249_v17 = vld [vmem:[#allocation4 + $0x120] ss:$1528 sps:$4 sm:$0xff]  }
 0x88c   : > { %v16252_v27 = vld [vmem:[#allocation4 + $0x608] ss:$-1168 sps:$4 sm:$0xff]  }
 0x88d   : > { %12499 = vmatpush1.bf16.msra.mxu0 %v16201_v3  ;;  %v9223_v3 = vld [vmem:[#allocation4 + $0x468] sm:$0xff] }
 0x88e   : > { %12540 = vmatpush1.bf16.msra.mxu1 %v16204_v28  ;;  %12500 = vmatprep.subr.bf16.mxu0 %v16209_v39  ;;  %v16237_v28 = vld [vmem:[#allocation4 + $0xb98] ss:$-1072 sps:$4 sm:$0xff]   ;;  %v14389_v39 = vcombine.low %v9225_v1, %v9227_v5  ;;  %v14386_v61 = vcombine.high %v9221_v11, %v9223_v3 }
 0x88f   : > { %12541 = vmatprep.subr.bf16.mxu1 %v16212_v20  ;;  %v16242_v20 = vld [vmem:[#allocation4 + $0x9cc] ss:$-1016 sps:$4 sm:$0xff]  }
 0x891   : > { %12501 = vmatpush1.bf16.msra.mxu0 %v16207_v38  ;;  %v9219_v38 = vld [vmem:[#allocation4 + $0xab8] sm:$0xff] }
 0x892   : > { %12542 = vmatpush1.bf16.msra.mxu1 %v16210_v12  ;;  %12502 = vmatprep.subr.bf16.mxu0 %v14290_v31  ;;  %v16240_v12 = vld [vmem:[#allocation4 + $0x9c8] ss:$-1016 sps:$4 sm:$0xff]   ;;  %v14385_v31 = vcombine.low %v9221_v11, %v9223_v3  ;;  %v14382_v19 = vcombine.high %v9217_v45, %v9219_v38  ;;  %v14381_v13 = vcombine.low %v9217_v45, %v9219_v38  ;;  %v16272_v3 = vld [vmem:[#allocation4 + $0xeb4] ss:$-488 sps:$4 sm:$0xff]   ;;  %v16279_v45 = vld [vmem:[#allocation4 + $0xdc0] ss:$-8 sps:$4 sm:$0xff]  }
 0x893   : > { %12543 = vmatprep.subr.bf16.mxu1 %v14354_v7  ;;  %v14318_v7 = vcombine.high %v9153_v62, %v9155_v37  ;;  %v16267_v11 = vld [vmem:[#allocation4 + $0x908] ss:$-1896 sps:$4 sm:$0xff]   ;;  %v16284_v38 = vld [vmem:[#allocation4 + $0x44c] ss:$2072 sps:$4 sm:$0xff]  }
 0x895   : > { %12503 = vmatpush1.bf16.msra.mxu0 %v14289_v59  ;;  %v9151_v59 = vld [vmem:[#allocation4 + $0x4c8] sm:$0xff] }
 0x896   : > { %12544 = vmatpush1.bf16.msra.mxu1 %v14353_v56  ;;  %12504 = vmatprep.subr.bf16.mxu0 %v14286_v58  ;;  %v9213_v56 = vld [vmem:[#allocation4 + $0x2b8] sm:$0xff]  ;;  %v14314_v34 = vcombine.high %v9149_v60, %v9151_v59 }
 0x897   : > { %12545 = vmatprep.subr.bf16.mxu1 %v16215_v21  ;;  %v9215_v58 = vld [vmem:[#allocation4 + $0xf78] sm:$0xff]  ;;  %v14317_v21 = vcombine.low %v9153_v62, %v9155_v37  ;;  %v16276_v37 = vld [vmem:[#allocation4 + $0xde0] ss:$-1872 sps:$4 sm:$0xff]  }
 0x898   : > { %v16281_v62 = vld [vmem:[#allocation4 + $0xdc4] ss:$-8 sps:$4 sm:$0xff]  }
 0x899   : > { %12505 = vmatpush1.bf16.msra.mxu0 %v14285_v23  ;;  %v14378_v23 = vcombine.high %v9213_v56, %v9215_v58 }
 0x89a   : > { %12546 = vmatpush1.bf16.msra.mxu1 %v16213_v43  ;;  %12506 = vmatprep.subr.bf16.mxu0 %v14282_v50  ;;  %v14313_v43 = vcombine.low %v9149_v60, %v9151_v59  ;;  %v14377_v50 = vcombine.low %v9213_v56, %v9215_v58  ;;  %v16293_v60 = vld [vmem:[#allocation4 + $0x37c] ss:$-784 sps:$4 sm:$0xff]   ;;  %v16288_v59 = vld [vmem:[#allocation4 + $0xf48] ss:$-264 sps:$4 sm:$0xff]  }
 0x89b   : > { %12547 = vmatprep.subr.bf16.mxu1 %v16218_v52  ;;  %v16245_v52 = vld [vmem:[#allocation4 + $0x7f4] ss:$1072 sps:$4 sm:$0xff]   ;;  %v16291_v56 = vld [vmem:[#allocation4 + $0x378] ss:$-784 sps:$4 sm:$0xff]  }
 0x89c   : > { %v16296_v58 = vld [vmem:[#allocation4 + $0xf9c] ss:$-696 sps:$4 sm:$0xff]  }
 0x89d   : > { %12507 = vmatpush1.bf16.msra.mxu0 %v14281_v16  ;;  %v16248_v16 = vld [vmem:[#allocation4 + $0x8d4] ss:$-2088 sps:$4 sm:$0xff]  }
 0x89e   : > { %12548 = vmatpush1.bf16.msra.mxu1 %v16216_v10  ;;  %12508 = vmatprep.subr.bf16.mxu0 %v16221_v0  ;;  %v16243_v10 = vld [vmem:[#allocation4 + $0x7f0] ss:$1072 sps:$4 sm:$0xff]  }
 0x89f   : > { %12549 = vmatprep.subr.bf16.mxu1 %v16224_v6  ;;  %v16246_v0 = vld [vmem:[#allocation4 + $0x8d0] ss:$-2088 sps:$4 sm:$0xff]   ;;  %v16251_v6 = vld [vmem:[#allocation4 + $0x124] ss:$1528 sps:$4 sm:$0xff]  }
 0x8a1   : > { %12509 = vmatpush2.bf16.msra.mxu0 %v16219_v24  ;;  %v9267_v24 = vld [vmem:[#allocation4 + $0x278] sm:$0xff] }
 0x8a2   : > { %12550 = vmatpush2.bf16.msra.mxu1 %v16222_v30  ;;  %12510 = vmatprep.subr.bf16.mxu0 %v14338_v8 }
 0x8a3   : > { %12551 = vmatprep.subr.bf16.mxu1 %v16227_v22 }
 0x8a5   : > { %12511 = vmatpush2.bf16.msra.mxu0 %v14337_v32 }
 0x8a6   : > { %12552 = vmatpush2.bf16.msra.mxu1 %v16225_v51  ;;  %12512 = vmatprep.subr.bf16.mxu0 %v14334_v55  ;;  %v14430_v55 = vcombine.high %v9265_v26, %v9267_v24 }
 0x8a7   : > { %12553 = vmatprep.subr.bf16.mxu1 %v16230_v40  ;;  %v16257_v40 = vld [vmem:[#allocation4 + $0xf8c] ss:$-2600 sps:$4 sm:$0xff]  }
 0x8a9   : > { %12513 = vmatpush2.bf16.msra.mxu0 %v14333_v25 }
 0x8aa   : > { %12554 = vmatpush2.bf16.msra.mxu1 %v16228_v57  ;;  %12514 = vmatprep.subr.bf16.mxu0 %v16233_v14  ;;  %v14429_v14 = vcombine.low %v9265_v26, %v9267_v24  ;;  %v16305_v26 = vld [vmem:[#allocation4 + $0x224] ss:$408 sps:$4 sm:$0xff]  }
 0x8ab   : > { %12555 = vmatprep.subr.bf16.mxu1 %v16236_v63  ;;  %v16255_v63 = vld [vmem:[#allocation4 + $0xf88] ss:$-2600 sps:$4 sm:$0xff]   ;;  %v9289_v24 = vld [vmem:[#allocation4 + $0xeb8] sm:$0xff] }
 0x8ad   : > { %12515 = vmatpush2.bf16.msra.mxu0 %v16231_v33  ;;  %v16260_v33 = vld [vmem:[#allocation4 + $0xeec] ss:$-112 sps:$4 sm:$0xff]  }
 0x8ae   : > { %12556 = vmatpush2.bf16.msra.mxu1 %v16234_v53  ;;  %12516 = vmatprep.subr.bf16.mxu0 %v16239_v47  ;;  %v16263_v53 = vld [vmem:[#allocation4 + $0xfa4] ss:$-3640 sps:$4 sm:$0xff]  }
 0x8af   : > { %12557 = vmatprep.subr.bf16.mxu1 %v14390_v15  ;;  %v16269_v47 = vld [vmem:[#allocation4 + $0x90c] ss:$-1896 sps:$4 sm:$0xff]   ;;  %v16264_v15 = vld [vmem:[#allocation4 + $0x758] ss:$936 sps:$4 sm:$0xff]  }
 0x8b1   : > { %12517 = vmatpush2.bf16.msra.mxu0 %v16237_v28  ;;  %v16275_v28 = vld [vmem:[#allocation4 + $0x38c] ss:$2360 sps:$4 sm:$0xff]  }
 0x8b2   : > { %12558 = vmatpush2.bf16.msra.mxu1 %v14389_v39  ;;  %12518 = vmatprep.subr.bf16.mxu0 %v16242_v20  ;;  %v16270_v39 = vld [vmem:[#allocation4 + $0xeb0] ss:$-488 sps:$4 sm:$0xff]  }
 0x8b3   : > { %12559 = vmatprep.subr.bf16.mxu1 %v14386_v61  ;;  %v16273_v20 = vld [vmem:[#allocation4 + $0x388] ss:$2360 sps:$4 sm:$0xff]   ;;  %v16278_v61 = vld [vmem:[#allocation4 + $0xde4] ss:$-1872 sps:$4 sm:$0xff]  }
 0x8b5   : > { %12519 = vmatpush2.bf16.msra.mxu0 %v16240_v12  ;;  %v16287_v12 = vld [vmem:[#allocation4 + $0x3e4] ss:$2928 sps:$4 sm:$0xff]  }
 0x8b6   : > { %12560 = vmatpush2.bf16.msra.mxu1 %v14385_v31  ;;  %12520 = vmatprep.subr.bf16.mxu0 %v14318_v7  ;;  %v16282_v31 = vld [vmem:[#allocation4 + $0x448] ss:$2072 sps:$4 sm:$0xff]  }
 0x8b7   : > { %12561 = vmatprep.subr.bf16.mxu1 %v14382_v19  ;;  %v16285_v7 = vld [vmem:[#allocation4 + $0x3e0] ss:$2928 sps:$4 sm:$0xff]   ;;  %v16290_v19 = vld [vmem:[#allocation4 + $0xf4c] ss:$-264 sps:$4 sm:$0xff]  }
 0x8b9   : > { %12521 = vmatpush2.bf16.msra.mxu0 %v14317_v21  ;;  %v16299_v21 = vld [vmem:[#allocation4 + $0xc9c] ss:$-656 sps:$4 sm:$0xff]  }
 0x8ba   : > { %12562 = vmatpush2.bf16.msra.mxu1 %v14381_v13  ;;  %12522 = vmatprep.subr.bf16.mxu0 %v14314_v34  ;;  %v9361_v13 = vld [vmem:[#allocation4 + $0xe10] sm:$0xff] }
 0x8bb   : > { %12563 = vmatprep.subr.bf16.mxu1 %v14378_v23  ;;  %v9363_v34 = vld [vmem:[#allocation4 + $0x3f0] sm:$0xff]  ;;  %v16294_v23 = vld [vmem:[#allocation4 + $0xf98] ss:$-696 sps:$4 sm:$0xff]  }
 0x8bd   : > { %12523 = vmatpush2.bf16.msra.mxu0 %v14313_v43  ;;  %v16297_v43 = vld [vmem:[#allocation4 + $0xc98] ss:$-656 sps:$4 sm:$0xff]  }
 0x8be   : > { %12564 = vmatpush2.bf16.msra.mxu1 %v14377_v50  ;;  %12574 = vmatprep.subr.bf16.mxu0 %v16245_v52  ;;  %v16302_v50 = vld [vmem:[#allocation4 + $0x58c] ss:$-1256 sps:$4 sm:$0xff]   ;;  %v14526_v52 = vcombine.high %v9361_v13, %v9363_v34 }
 0x8bf   : > { %12615 = vmatprep.subr.bf16.mxu1 %v16248_v16  ;;  %v9293_v16 = vld [vmem:[#allocation4 + $0x430] sm:$0xff] }
 0x8c0   : > { %v12280_v30 = vpop.f32.mrf.mxu0  ;;  %12525 = vmatmul.mubr.bf16.vlgmr.msra.gmra.mxu0 %v20423_v41 }
 0x8c1   : > { %v12321_v8 = vpop.f32.mrf.mxu1  ;;  %12566 = vmatmul.mubr.bf16.vlgmr.msra.gmra.mxu1 %v20427_v48  ;;  %v12281_v22 = vadd.f32 %v12280_v30, %v20501_v9  ;;  %12575 = vmatpush1.bf16.msra.mxu0 %v16243_v10  ;;  %v9295_v10 = vld [vmem:[#allocation4 + $0x4b0] sm:$0xff]  ;;  %v9291_v30 = vld [vmem:[#allocation4 + $0x318] sm:$0xff] }
 0x8c2   : > { %12616 = vmatpush1.bf16.msra.mxu1 %v16246_v0  ;;  %v12282_v32 = vpop.f32.mrf.mxu0  ;;  %12576 = vmatprep.subr.bf16.mxu0 %v16251_v6  ;;  %v16300_v0 = vld [vmem:[#allocation4 + $0x588] ss:$-1256 sps:$4 sm:$0xff]   ;;  %v14525_v6 = vcombine.low %v9361_v13, %v9363_v34 }
 0x8c3   : > { %v12323_v51 = vpop.f32.mrf.mxu1  ;;  %12617 = vmatprep.subr.bf16.mxu1 %v16254_v46  ;;  %v20511_v25 = vadd.f32 %v12321_v8, %v12281_v22  ;;  %v12283_v57 = vadd.f32 %v12282_v32, %v20506_v4  ;;  %12606 = vmatprep.mubr.bf16.mxu0 %v20451_v29  ;;  %v16258_v4 = vld [vmem:[#allocation4 + $0xee8] ss:$-112 sps:$4 sm:$0xff]   ;;  %v14458_v46 = vcombine.high %v9293_v16, %v9295_v10  ;;  %v9285_v32 = vld [vmem:[#allocation4 + $0xda0] sm:$0xff] }
 0x8c4   : > { %12647 = vmatprep.mubr.bf16.mxu1 %v20455_v44  ;;  %v12284_v41 = vpop.f32.mrf.mxu0  ;;  %v16261_v29 = vld [vmem:[#allocation4 + $0xfa0] ss:$-3640 sps:$4 sm:$0xff]   ;;  %v16266_v44 = vld [vmem:[#allocation4 + $0x75c] ss:$936 sps:$4 sm:$0xff]   ;;  %v14457_v8 = vcombine.low %v9293_v16, %v9295_v10 }
 0x8c5   : > { %v12325_v48 = vpop.f32.mrf.mxu1  ;;  %v20516_v9 = vadd.f32 %v12323_v51, %v12283_v57  ;;  %12577 = vmatpush1.bf16.msra.mxu0 %v16249_v17  ;;  %v16303_v22 = vld [vmem:[#allocation4 + $0x220] ss:$408 sps:$4 sm:$0xff]   ;;  %v14454_v17 = vcombine.high %v9289_v24, %v9291_v30  ;;  %v16311_v41 = vld [vmem:[#allocation4 + $0x304] ss:$2600 sps:$4 sm:$0xff]  }
 0x8c6   : > { %12618 = vmatpush1.bf16.msra.mxu1 %v16252_v27  ;;  %v12285_v1 = vpop.f32.mrf.mxu0  ;;  %12578 = vmatprep.subr.bf16.mxu0 %v14430_v55  ;;  %v16308_v27 = vld [vmem:[#allocation4 + $0x244] ss:$-504 sps:$4 sm:$0xff]   ;;  %v14453_v55 = vcombine.low %v9289_v24, %v9291_v30  ;;  %v9445_v24 = vld [vmem:[#allocation4 + $0xb38] sm:$0xff] }
 0x8c7   : > { %v12326_v5 = vpop.f32.mrf.mxu1  ;;  %12619 = vmatprep.subr.bf16.mxu1 %v16257_v40  ;;  %v9287_v51 = vld [vmem:[#allocation4 + $0x20] sm:$0xff]  ;;  %v16317_v1 = vld [vmem:[#allocation4 + $0x95c] ss:$376 sps:$4 sm:$0xff]  }
 0x8c8   : > { %v16306_v40 = vld [vmem:[#allocation4 + $0x240] ss:$-504 sps:$4 sm:$0xff]   ;;  %v14450_v57 = vcombine.high %v9285_v32, %v9287_v51  ;;  %v14449_v48 = vcombine.low %v9285_v32, %v9287_v51  ;;  %v9447_v30 = vld [vmem:[#allocation4 + $0x798] sm:$0xff] }
 0x8c9   : > { %12579 = vmatpush1.bf16.msra.mxu0 %v14429_v14  ;;  %v16309_v14 = vld [vmem:[#allocation4 + $0x300] ss:$2600 sps:$4 sm:$0xff]   ;;  %v14609_v51 = vcombine.low %v9445_v24, %v9447_v30 }
 0x8ca   : > { %12620 = vmatpush1.bf16.msra.mxu1 %v16255_v63  ;;  %12580 = vmatprep.subr.bf16.mxu0 %v16260_v33  ;;  %v16314_v63 = vld [vmem:[#allocation4 + $0x87c] ss:$1328 sps:$4 sm:$0xff]   ;;  %v9385_v16 = vld [vmem:[#allocation4 + $0x440] sm:$0xff] }
 0x8cb   : > { %12621 = vmatprep.subr.bf16.mxu1 %v16263_v53  ;;  %v9277_v5 = vld [vmem:[#allocation4 + $0xe8] sm:$0xff]  ;;  %v9387_v10 = vld [vmem:[#allocation4 + $0x720] sm:$0xff] }
 0x8cc   : > { %v9279_v33 = vld [vmem:[#allocation4 + $0x8a8] sm:$0xff]  ;;  %v16339_v32 = vld [vmem:[#allocation4 + $0x658] ss:$2408 sps:$4 sm:$0xff]  }
 0x8cd   : > { %12581 = vmatpush1.bf16.msra.mxu0 %v16258_v4  ;;  %v16312_v53 = vld [vmem:[#allocation4 + $0x878] ss:$1328 sps:$4 sm:$0xff]  }
 0x8ce   : > { %12622 = vmatpush1.bf16.msra.mxu1 %v16261_v29  ;;  %12582 = vmatprep.subr.bf16.mxu0 %v16266_v44  ;;  %v16315_v4 = vld [vmem:[#allocation4 + $0x958] ss:$376 sps:$4 sm:$0xff]   ;;  %v14442_v29 = vcombine.high %v9277_v5, %v9279_v33  ;;  %v16320_v44 = vld [vmem:[#allocation4 + $0xe5c] ss:$-1512 sps:$4 sm:$0xff]  }
 0x8cf   : > { %12623 = vmatprep.subr.bf16.mxu1 %v16269_v47  ;;  %v14441_v47 = vcombine.low %v9277_v5, %v9279_v33  ;;  %v16348_v5 = vld [vmem:[#allocation4 + $0x190] ss:$88 sps:$4 sm:$0xff]  }
 0x8d0   : > { %v16351_v33 = vld [vmem:[#allocation4 + $0xee0] ss:$-2872 sps:$4 sm:$0xff]  }
 0x8d1   : > { %12583 = vmatpush1.bf16.msra.mxu0 %v16264_v15  ;;  %v16318_v15 = vld [vmem:[#allocation4 + $0xe58] ss:$-1512 sps:$4 sm:$0xff]  }
 0x8d2   : > { %12624 = vmatpush1.bf16.msra.mxu1 %v16267_v11  ;;  %12584 = vmatprep.subr.bf16.mxu0 %v16272_v3  ;;  %v16323_v11 = vld [vmem:[#allocation4 + $0xdd4] ss:$-1048 sps:$4 sm:$0xff]  }
 0x8d3   : > { %12625 = vmatprep.subr.bf16.mxu1 %v16275_v28  ;;  %v16326_v3 = vld [vmem:[#allocation4 + $0x32c] ss:$1160 sps:$4 sm:$0xff]  }
 0x8d4   : > { %v9397_v28 = vld [vmem:[#allocation4 + $0xb0] sm:$0xff] }
 0x8d5   : > { %12585 = vmatpush1.bf16.msra.mxu0 %v16270_v39  ;;  %v9399_v39 = vld [vmem:[#allocation4 + $0xa30] sm:$0xff] }
 0x8d6   : > { %12626 = vmatpush1.bf16.msra.mxu1 %v16273_v20  ;;  %12586 = vmatprep.subr.bf16.mxu0 %v16278_v61  ;;  %v16321_v20 = vld [vmem:[#allocation4 + $0xdd0] ss:$-1048 sps:$4 sm:$0xff]  }
 0x8d7   : > { %12627 = vmatprep.subr.bf16.mxu1 %v16281_v62  ;;  %v16324_v61 = vld [vmem:[#allocation4 + $0x328] ss:$1160 sps:$4 sm:$0xff]   ;;  %v14562_v62 = vcombine.high %v9397_v28, %v9399_v39 }
 0x8d9   : > { %12587 = vmatpush1.bf16.msra.mxu0 %v16276_v37  ;;  %v16329_v37 = vld [vmem:[#allocation4 + $0xf14] ss:$-1656 sps:$4 sm:$0xff]  }
 0x8da   : > { %12628 = vmatpush1.bf16.msra.mxu1 %v16279_v45  ;;  %12588 = vmatprep.subr.bf16.mxu0 %v16284_v38  ;;  %v9457_v45 = vld [vmem:[#allocation4 + $0xa98] sm:$0xff] }
 0x8db   : > { %12629 = vmatprep.subr.bf16.mxu1 %v16287_v12  ;;  %v9459_v38 = vld [vmem:[#allocation4 + $0x2d8] sm:$0xff] }
 0x8dc   : > { %v14621_v34 = vcombine.low %v9457_v45, %v9459_v38 }
 0x8dd   : > { %12589 = vmatpush1.bf16.msra.mxu0 %v16282_v31 }
 0x8de   : > { %12630 = vmatpush1.bf16.msra.mxu1 %v16285_v7  ;;  %12590 = vmatprep.subr.bf16.mxu0 %v16290_v19  ;;  %v14561_v19 = vcombine.low %v9397_v28, %v9399_v39  ;;  %v16365_v28 = vld [vmem:[#allocation4 + $0xc1c] ss:$-1848 sps:$4 sm:$0xff]  }
 0x8df   : > { %12631 = vmatprep.subr.bf16.mxu1 %v16293_v60  ;;  %v16327_v60 = vld [vmem:[#allocation4 + $0xf10] ss:$-1656 sps:$4 sm:$0xff]   ;;  %v16368_v39 = vld [vmem:[#allocation4 + $0x44] ss:$4008 sps:$4 sm:$0xff]  }
 0x8e1   : > { %12591 = vmatpush2.bf16.msra.mxu0 %v16288_v59 }
 0x8e2   : > { %12632 = vmatpush2.bf16.msra.mxu1 %v16291_v56  ;;  %12592 = vmatprep.subr.bf16.mxu0 %v16296_v58  ;;  %v16332_v58 = vld [vmem:[#allocation4 + $0x64] ss:$2696 sps:$4 sm:$0xff]  }
 0x8e3   : > { %12633 = vmatprep.subr.bf16.mxu1 %v16299_v21  ;;  %v14622_v21 = vcombine.high %v9457_v45, %v9459_v38  ;;  %v16371_v45 = vld [vmem:[#allocation4 + $0xf4] ss:$-152 sps:$4 sm:$0xff]  }
 0x8e5   : > { %12593 = vmatpush2.bf16.msra.mxu0 %v16294_v23 }
 0x8e6   : > { %12634 = vmatpush2.bf16.msra.mxu1 %v16297_v43  ;;  %12594 = vmatprep.subr.bf16.mxu0 %v16302_v50  ;;  %v16335_v50 = vld [vmem:[#allocation4 + $0xb74] ss:$-1080 sps:$4 sm:$0xff]  }
 0x8e7   : > { %12635 = vmatprep.subr.bf16.mxu1 %v14526_v52  ;;  %v16338_v52 = vld [vmem:[#allocation4 + $0x2b4] ss:$2040 sps:$4 sm:$0xff]  }
 0x8e9   : > { %12595 = vmatpush2.bf16.msra.mxu0 %v16300_v0  ;;  %v9449_v0 = vld [vmem:[#allocation4 + $0xa00] sm:$0xff] }
 0x8ea   : > { %12636 = vmatpush2.bf16.msra.mxu1 %v14525_v6  ;;  %12596 = vmatprep.subr.bf16.mxu0 %v14458_v46  ;;  %v9451_v6 = vld [vmem:[#allocation4 + $0xd40] sm:$0xff]  ;;  %v14550_v46 = vcombine.high %v9385_v16, %v9387_v10 }
 0x8eb   : > { %12637 = vmatprep.subr.bf16.mxu1 %v16305_v26  ;;  %v14614_v26 = vcombine.high %v9449_v0, %v9451_v6 }
 0x8ed   : > { %12597 = vmatpush2.bf16.msra.mxu0 %v14457_v8  ;;  %v14549_v8 = vcombine.low %v9385_v16, %v9387_v10  ;;  %v16384_v10 = vld [vmem:[#allocation4 + $0x900] ss:$-496 sps:$4 sm:$0xff]  }
 0x8ee   : > { %12638 = vmatpush2.bf16.msra.mxu1 %v16303_v22  ;;  %12598 = vmatprep.subr.bf16.mxu0 %v14454_v17  ;;  %v14613_v22 = vcombine.low %v9449_v0, %v9451_v6  ;;  %v16341_v17 = vld [vmem:[#allocation4 + $0x65c] ss:$2408 sps:$4 sm:$0xff]  }
 0x8ef   : > { %12639 = vmatprep.subr.bf16.mxu1 %v16308_v27  ;;  %v14610_v27 = vcombine.high %v9445_v24, %v9447_v30  ;;  %v16389_v0 = vld [vmem:[#allocation4 + $0xcd4] ss:$-1328 sps:$4 sm:$0xff]   ;;  %v12076_v24 = vsub.s32 3, %v20791_v54 }
 0x8f0   : > { %v16392_v6 = vld [vmem:[#allocation4 + $0x9a4] ss:$-1552 sps:$4 sm:$0xff]  }
 0x8f1   : > { %12599 = vmatpush2.bf16.msra.mxu0 %v14453_v55  ;;  %v16344_v55 = vld [vmem:[#allocation4 + $0x2a4] ss:$1352 sps:$4 sm:$0xff]  }
 0x8f2   : > { %12640 = vmatpush2.bf16.msra.mxu1 %v16306_v40  ;;  %12600 = vmatprep.subr.bf16.mxu0 %v14450_v57  ;;  %v16347_v40 = vld [vmem:[#allocation4 + $0x884] ss:$-48 sps:$4 sm:$0xff]   ;;  %v16342_v57 = vld [vmem:[#allocation4 + $0x2a0] ss:$1352 sps:$4 sm:$0xff]  }
 0x8f3   : > { %12641 = vmatprep.subr.bf16.mxu1 %v16311_v41  ;;  %v16345_v41 = vld [vmem:[#allocation4 + $0x880] ss:$-48 sps:$4 sm:$0xff]  }
 0x8f5   : > { %12601 = vmatpush2.bf16.msra.mxu0 %v14449_v48  ;;  %v16350_v48 = vld [vmem:[#allocation4 + $0x194] ss:$88 sps:$4 sm:$0xff]  }
 0x8f6   : > { %12642 = vmatpush2.bf16.msra.mxu1 %v16309_v14  ;;  %12602 = vmatprep.subr.bf16.mxu0 %v16314_v63  ;;  %v16353_v14 = vld [vmem:[#allocation4 + $0xee4] ss:$-2872 sps:$4 sm:$0xff]  }
 0x8f7   : > { %12643 = vmatprep.subr.bf16.mxu1 %v16317_v1  ;;  %v9497_v63 = vld [vmem:[#allocation4 + $0x3c0] sm:$0xff] }
 0x8f8   : > { %v9499_v1 = vld [vmem:[#allocation4 + $0x4a0] sm:$0xff] }
 0x8f9   : > { %12603 = vmatpush2.bf16.msra.mxu0 %v16312_v53  ;;  %v16356_v53 = vld [vmem:[#allocation4 + $0x77c] ss:$-1640 sps:$4 sm:$0xff]  }
 0x8fa   : > { %12644 = vmatpush2.bf16.msra.mxu1 %v16315_v4  ;;  %12604 = vmatprep.subr.bf16.mxu0 %v14442_v29  ;;  %v14662_v4 = vcombine.high %v9497_v63, %v9499_v1  ;;  %v16354_v29 = vld [vmem:[#allocation4 + $0x778] ss:$-1640 sps:$4 sm:$0xff]  }
 0x8fb   : > { %12645 = vmatprep.subr.bf16.mxu1 %v16320_v44  ;;  %v14661_v44 = vcombine.low %v9497_v63, %v9499_v1 }
 0x8fd   : > { %12605 = vmatpush2.bf16.msra.mxu0 %v14441_v47  ;;  %v16359_v47 = vld [vmem:[#allocation4 + $0xa6c] ss:$-1000 sps:$4 sm:$0xff]  }
 0x8fe   : > { %12646 = vmatpush2.bf16.msra.mxu1 %v16318_v15  ;;  %12656 = vmatprep.subr.bf16.mxu0 %v16323_v11  ;;  %v16362_v15 = vld [vmem:[#allocation4 + $0x154] ss:$328 sps:$4 sm:$0xff]   ;;  %v16357_v11 = vld [vmem:[#allocation4 + $0xa68] ss:$-1000 sps:$4 sm:$0xff]  }
 0x8ff   : > { %12697 = vmatprep.subr.bf16.mxu1 %v16326_v3  ;;  %v16360_v3 = vld [vmem:[#allocation4 + $0x150] ss:$328 sps:$4 sm:$0xff]  }
 0x900   : > { %v12362_v12 = vpop.f32.mrf.mxu0  ;;  %12607 = vmatmul.mubr.bf16.vlgmr.msra.gmra.mxu0 %v20449_v35 }
 0x901   : > { %v12403_v31 = vpop.f32.mrf.mxu1  ;;  %12648 = vmatmul.mubr.bf16.vlgmr.msra.gmra.mxu1 %v20453_v2  ;;  %v12363_v7 = vadd.f32 %v12362_v12, %v20511_v25  ;;  %12657 = vmatpush1.bf16.msra.mxu0 %v16321_v20  ;;  %v16330_v25 = vld [vmem:[#allocation4 + $0x60] ss:$2696 sps:$4 sm:$0xff]   ;;  %v16369_v12 = vld [vmem:[#allocation4 + $0xf0] ss:$-152 sps:$4 sm:$0xff]  }
 0x902   : > { %12698 = vmatpush1.bf16.msra.mxu1 %v16324_v61  ;;  %v20521_v59 = vpop.f32.mrf.mxu0  ;;  %12658 = vmatprep.subr.bf16.mxu0 %v14562_v62  ;;  %v9485_v20 = vld [vmem:[#allocation4 + $0xce8] sm:$0xff]  ;;  %v16363_v62 = vld [vmem:[#allocation4 + $0xc18] ss:$-1848 sps:$4 sm:$0xff]  }
 0x903   : > { %v20523_v56 = vpop.f32.mrf.mxu1  ;;  %12699 = vmatprep.subr.bf16.mxu1 %v16329_v37  ;;  %v20525_v13 = vadd.f32 %v12403_v31, %v12363_v7  ;;  %12688 = vmatprep.mubr.bf16.mxu0 %v20465_v42  ;;  %v16333_v42 = vld [vmem:[#allocation4 + $0xb70] ss:$-1080 sps:$4 sm:$0xff]   ;;  %v9487_v61 = vld [vmem:[#allocation4 + $0x1a8] sm:$0xff]  ;;  %v16374_v7 = vld [vmem:[#allocation4 + $0xe1c] ss:$-1064 sps:$4 sm:$0xff]  }
 0x904   : > { %12729 = vmatprep.mubr.bf16.mxu1 %v20469_v36  ;;  %v12366_v35 = vpop.f32.mrf.mxu0  ;;  %v16336_v36 = vld [vmem:[#allocation4 + $0x2b0] ss:$2040 sps:$4 sm:$0xff]   ;;  %v14650_v38 = vcombine.high %v9485_v20, %v9487_v61  ;;  %v14649_v31 = vcombine.low %v9485_v20, %v9487_v61  ;;  %v16415_v61 = vld [vmem:[%s20724_s9 + $0xe0] sm:$0xff]  }
 0x905   : > { %v12407_v2 = vpop.f32.mrf.mxu1  ;;  %12659 = vmatpush1.bf16.msra.mxu0 %v14561_v19  ;;  %v16366_v37 = vld [vmem:[#allocation4 + $0x40] ss:$4008 sps:$4 sm:$0xff]   ;;  %v16377_v19 = vld [vmem:[#allocation4 + $0x934] ss:$-1512 sps:$4 sm:$0xff]  }
 0x906   : > { %12700 = vmatpush1.bf16.msra.mxu1 %v16327_v60  ;;  %v12367_v23 = vpop.f32.mrf.mxu0  ;;  %12660 = vmatprep.subr.bf16.mxu0 %v16332_v58  ;;  %v16372_v60 = vld [vmem:[#allocation4 + $0xe18] ss:$-1064 sps:$4 sm:$0xff]   ;;  %v16383_v35 = vld [vmem:[#allocation4 + $0x9ec] ss:$-1168 sps:$4 sm:$0xff]  }
 0x907   : > { %v12408_v43 = vpop.f32.mrf.mxu1  ;;  %12701 = vmatprep.subr.bf16.mxu1 %v14622_v21  ;;  %v16375_v58 = vld [vmem:[#allocation4 + $0x930] ss:$-1512 sps:$4 sm:$0xff]   ;;  %v16380_v21 = vld [vmem:[#allocation4 + $0xf5c] ss:$-232 sps:$4 sm:$0xff]  }
 0x908   : > { %v9409_v2 = vld [vmem:[#allocation4 + $0xd88] sm:$0xff] }
 0x909   : > { %12661 = vmatpush1.bf16.msra.mxu0 %v16330_v25  ;;  %v9411_v25 = vld [vmem:[#allocation4 + $0x148] sm:$0xff] }
 0x90a   : > { %12702 = vmatpush1.bf16.msra.mxu1 %v14621_v34  ;;  %12662 = vmatprep.subr.bf16.mxu0 %v16335_v50  ;;  %v16378_v34 = vld [vmem:[#allocation4 + $0xf58] ss:$-232 sps:$4 sm:$0xff]   ;;  %v14574_v43 = vcombine.high %v9409_v2, %v9411_v25  ;;  %v16386_v50 = vld [vmem:[#allocation4 + $0x904] ss:$-496 sps:$4 sm:$0xff]   ;;  %v14573_v16 = vcombine.low %v9409_v2, %v9411_v25  ;;  %v16403_v20 = vld [vmem:[%s20724_s9 + $0x50] sm:$0xff]  }
 0x90b   : > { %12703 = vmatprep.subr.bf16.mxu1 %v16338_v52  ;;  %v16381_v23 = vld [vmem:[#allocation4 + $0x9e8] ss:$-1168 sps:$4 sm:$0xff]   ;;  %v12365_v52 = vadd.f32 %v20521_v59, %v20516_v9  ;;  %v16393_v9 = vld [vmem:[%s20724_s9 + $0x78] sm:$0xff]  }
 0x90d   : > { %12663 = vmatpush1.bf16.msra.mxu0 %v16333_v42  ;;  %v12406_v42 = vadd.f32 %v20523_v56, %v12365_v52  ;;  %v16433_v56 = vld [vmem:[%s20723_s8] sm:$0xf] }
 0x90e   : > { %12704 = vmatpush1.bf16.msra.mxu1 %v16336_v36  ;;  %12664 = vmatprep.subr.bf16.mxu0 %v14550_v46  ;;  %v16387_v36 = vld [vmem:[#allocation4 + $0xcd0] ss:$-1328 sps:$4 sm:$0xff]  }
 0x90f   : > { %12705 = vmatprep.subr.bf16.mxu1 %v14614_v26  ;;  %v16390_v46 = vld [vmem:[#allocation4 + $0x9a0] ss:$-1552 sps:$4 sm:$0xff]   ;;  %v12072_v26 = vsub.s32 2, %v20791_v54  ;;  %v12739_v59 = vmax.f32 %v12406_v42, 0.0 }
 0x911   : > { %12665 = vmatpush1.bf16.msra.mxu0 %v14549_v8  ;;  %v12073_v30 = vrot.slane %v16433_v56, %v12072_v26  ;;  %v16394_v8 = vld [vmem:[%s20724_s9 + $0x38] sm:$0xff]   ;;  %v16424_v26 = vld [vmem:[%s20724_s9 + $0x80] sm:$0xff]  }
 0x912   : > { %12706 = vmatpush1.bf16.msra.mxu1 %v14613_v22  ;;  %12666 = vmatprep.subr.bf16.mxu0 %v16341_v17  ;;  %v16395_v22 = vld [vmem:[%s20724_s9 + $0x70] sm:$0xff]   ;;  %v12743_v17 = vpack.c.bf16 %v12739_v59, %v12739_v59  ;;  %v16516_v59 = vmov 0.0  }
 0x913   : > { %12707 = vmatprep.subr.bf16.mxu1 %v14610_v27  ;;  %v12077_v27 = vrot.slane %v16433_v56, %v12076_v24  ;;  %v16426_v24 = vld [vmem:[%s20726_s11 + $0x30] sm:$0xff]   ;;  %v16427_v56 = vld [vmem:[%s20726_s11 + $0x28] sm:$0xff]  }
 0x915   : > { %12667 = vmatpush1.bf16.msra.mxu0 %v16339_v32 }
 0x916   : > { %12708 = vmatpush1.bf16.msra.mxu1 %v14609_v51  ;;  %12668 = vmatprep.subr.bf16.mxu0 %v16344_v55  ;;  %v16396_v55 = vld [vmem:[%s20724_s9 + $0x30] sm:$0xff]  }
 0x917   : > { %12709 = vmatprep.subr.bf16.mxu1 %v16347_v40 }
 0x919   : > { %12669 = vmatpush1.bf16.msra.mxu0 %v16342_v57 }
 0x91a   : > { %12710 = vmatpush1.bf16.msra.mxu1 %v16345_v41  ;;  %12670 = vmatprep.subr.bf16.mxu0 %v16350_v48  ;;  %v16397_v41 = vld [vmem:[%s20724_s9 + $0x68] sm:$0xff]  }
 0x91b   : > { %12711 = vmatprep.subr.bf16.mxu1 %v16353_v14 }
 0x91d   : > { %12671 = vmatpush1.bf16.msra.mxu0 %v16348_v5  ;;  %v16399_v5 = vld [vmem:[%s20724_s9 + $0x60] sm:$0xff]  }
 0x91e   : > { %12712 = vmatpush1.bf16.msra.mxu1 %v16351_v33  ;;  %12672 = vmatprep.subr.bf16.mxu0 %v16356_v53 }
 0x91f   : > { %12713 = vmatprep.subr.bf16.mxu1 %v14662_v4  ;;  %v16409_v4 = vld [vmem:[%s20724_s9 + $0xf8] sm:$0xff]  }
 0x921   : > { %12673 = vmatpush2.bf16.msra.mxu0 %v16354_v29  ;;  %v16410_v29 = vld [vmem:[%s20724_s9 + $0xb8] sm:$0xff]  }
 0x922   : > { %12714 = vmatpush2.bf16.msra.mxu1 %v14661_v44  ;;  %12674 = vmatprep.subr.bf16.mxu0 %v16359_v47  ;;  %v16411_v44 = vld [vmem:[%s20724_s9 + $0xf0] sm:$0xff]   ;;  %v16400_v47 = vld [vmem:[%s20724_s9 + $0x20] sm:$0xff]  }
 0x923   : > { %12715 = vmatprep.subr.bf16.mxu1 %v16362_v15  ;;  %v16412_v15 = vld [vmem:[%s20724_s9 + $0xb0] sm:$0xff]  }
 0x925   : > { %12675 = vmatpush2.bf16.msra.mxu0 %v16357_v11  ;;  %v16401_v11 = vld [vmem:[%s20724_s9 + $0x58] sm:$0xff]  }
 0x926   : > { %12716 = vmatpush2.bf16.msra.mxu1 %v16360_v3  ;;  %12676 = vmatprep.subr.bf16.mxu0 %v16365_v28  ;;  %v16413_v3 = vld [vmem:[%s20724_s9 + $0xe8] sm:$0xff]   ;;  %v16402_v28 = vld [vmem:[%s20724_s9 + $0x18] sm:$0xff]  }
 0x927   : > { %12717 = vmatprep.subr.bf16.mxu1 %v16368_v39  ;;  %v16414_v39 = vld [vmem:[%s20724_s9 + $0xa8] sm:$0xff]  }
 0x929   : > { %12677 = vmatpush2.bf16.msra.mxu0 %v16363_v62  ;;  %v16404_v62 = vld [vmem:[%s20724_s9 + $0x10] sm:$0xff]  }
 0x92a   : > { %12718 = vmatpush2.bf16.msra.mxu1 %v16366_v37  ;;  %12678 = vmatprep.subr.bf16.mxu0 %v16371_v45  ;;  %v16416_v37 = vld [vmem:[%s20724_s9 + $0xa0] sm:$0xff]   ;;  %v16405_v45 = vld [vmem:[%s20724_s9 + $0x48] sm:$0xff]  }
 0x92b   : > { %12719 = vmatprep.subr.bf16.mxu1 %v14650_v38  ;;  %v16417_v38 = vld [vmem:[%s20724_s9 + $0xd8] sm:$0xff]  }
 0x92d   : > { %12679 = vmatpush2.bf16.msra.mxu0 %v16369_v12  ;;  %v16406_v12 = vld [vmem:[%s20724_s9 + $0x8] sm:$0xff]  }
 0x92e   : > { %12720 = vmatpush2.bf16.msra.mxu1 %v14649_v31  ;;  %12680 = vmatprep.subr.bf16.mxu0 %v16374_v7  ;;  %v16418_v31 = vld [vmem:[%s20724_s9 + $0x98] sm:$0xff]   ;;  %v16407_v7 = vld [vmem:[%s20724_s9 + $0x40] sm:$0xff]  }
 0x92f   : > { %12721 = vmatprep.subr.bf16.mxu1 %v16377_v19  ;;  %v16408_v19 = vld [vmem:[%s20724_s9] sm:$0xff]  }
 0x931   : > { %12681 = vmatpush2.bf16.msra.mxu0 %v16372_v60  ;;  %v12738_v60 = vmax.f32 %v20525_v13, 0.0  ;;  %v16421_v13 = vld [vmem:[%s20724_s9 + $0xc8] sm:$0xff]  }
 0x932   : > { %12722 = vmatpush2.bf16.msra.mxu1 %v16375_v58  ;;  %12682 = vmatprep.subr.bf16.mxu0 %v16380_v21  ;;  %v16419_v21 = vld [vmem:[%s20724_s9 + $0xd0] sm:$0xff]  }
 0x933   : > { %12723 = vmatprep.subr.bf16.mxu1 %v16383_v35  ;;  %v12742_v58 = vpack.c.bf16 %v12738_v60, %v12738_v60  ;;  %v16420_v35 = vld [vmem:[%s20724_s9 + $0x90] sm:$0xff]  }
 0x935   : > { %12683 = vmatpush2.bf16.msra.mxu0 %v16378_v34 }
 0x936   : > { %12724 = vmatpush2.bf16.msra.mxu1 %v16381_v23  ;;  %12684 = vmatprep.subr.bf16.mxu0 %v14574_v43 }
 0x937   : > { %12725 = vmatprep.subr.bf16.mxu1 %v16386_v50 }
 0x939   : > { %12685 = vmatpush2.bf16.msra.mxu0 %v14573_v16  ;;  %v16422_v16 = vld [vmem:[%s20724_s9 + $0x88] sm:$0xff]  }
 0x93a   : > { %12726 = vmatpush2.bf16.msra.mxu1 %v16384_v10  ;;  %12686 = vmatprep.subr.bf16.mxu0 %v16389_v0 }
 0x93b   : > { %12727 = vmatprep.subr.bf16.mxu1 %v16392_v6 }
 0x93d   : > { %12687 = vmatpush2.bf16.msra.mxu0 %v16387_v36 }
 0x93e   : > { %12728 = vmatpush2.bf16.msra.mxu1 %v16390_v46  ;;  %15240 = vmatprep.subr.bf16.mxu0 %v16393_v9  ;;  %v16423_v46 = vld [vmem:[%s20724_s9 + $0xc0] sm:$0xff]   ;;  %v16425_v9 = vld [vmem:[%s20726_s11 + $0x38] sm:$0xff]  }
 0x93f   : > { %15262 = vmatprep.subr.bf16.mxu1 %v16409_v4 }
 0x940   : > { %v12444_v32 = vpop.f32.mrf.mxu0  ;;  %12689 = vmatmul.mubr.bf16.vlgmr.msra.gmra.mxu0 %v20463_v49 }
 0x941   : > { %v12485_v54 = vpop.f32.mrf.mxu1  ;;  %12730 = vmatmul.mubr.bf16.vlgmr.msra.gmra.mxu1 %v20467_v18  ;;  %v12445_v51 = vadd.f32 %v12444_v32, %v12073_v30  ;;  %15241 = vmatpush3.bf16.msra.mxu0 %v16394_v8  ;;  %v16398_v18 = vld [vmem:[%s20724_s9 + $0x28] sm:$0xff]   ;;  %v16428_v30 = vld [vmem:[%s20726_s11 + $0x20] sm:$0xff]   ;;  %v16429_v8 = vld [vmem:[%s20726_s11 + $0x18] sm:$0xff]  }
 0x942   : > { %13035 = vmatprep.mubr.bf16.mxu0 %v12743_v17  ;;  %v12446_v40 = vpop.f32.mrf.mxu0  ;;  %15242 = vmatprep.subr.bf16.mxu0 %v16395_v22 }
 0x943   : > { %v12487_v57 = vpop.f32.mrf.mxu1  ;;  %v12486_v48 = vadd.f32 %v12485_v54, %v12445_v51  ;;  %v12447_v14 = vadd.f32 %v12446_v40, %v12077_v27  ;;  %15263 = vmatpush3.bf16.msra.mxu1 %v16410_v29 }
 0x944   : > { %v12448_v63 = vpop.f32.mrf.mxu0  ;;  %15264 = vmatprep.subr.bf16.mxu1 %v16411_v44 }
 0x945   : > { %v12489_v49 = vpop.f32.mrf.mxu1  ;;  %v12488_v1 = vadd.f32 %v12487_v57, %v12447_v14  ;;  %15243 = vmatpush3.bf16.msra.mxu0 %v16396_v55 }
 0x946   : > { %v12449_v33 = vpop.f32.mrf.mxu0  ;;  %15244 = vmatprep.subr.bf16.mxu0 %v16397_v41 }
 0x947   : > { %v12490_v53 = vpop.f32.mrf.mxu1  ;;  %15265 = vmatpush3.bf16.msra.mxu1 %v16412_v15 }
 0x948   : > { %15266 = vmatprep.subr.bf16.mxu1 %v16413_v3 }
 0x949   : > { %15245 = vmatpush3.bf16.msra.mxu0 %v16398_v18 }
 0x94a   : > { %15246 = vmatprep.subr.bf16.mxu0 %v16399_v5 }
 0x94b   : > { %15267 = vmatpush3.bf16.msra.mxu1 %v16414_v39 }
 0x94c   : > { %15268 = vmatprep.subr.bf16.mxu1 %v16415_v61 }
 0x94d   : > { %15247 = vmatpush3.bf16.msra.mxu0 %v16400_v47 }
 0x94e   : > { %15248 = vmatprep.subr.bf16.mxu0 %v16401_v11 }
 0x94f   : > { %15269 = vmatpush3.bf16.msra.mxu1 %v16416_v37 }
 0x950   : > { %15270 = vmatprep.subr.bf16.mxu1 %v16417_v38  ;;  %v16430_v38 = vld [vmem:[%s20726_s11 + $0x10] sm:$0xff]  }
 0x951   : > { %15249 = vmatpush3.bf16.msra.mxu0 %v16402_v28 }
 0x952   : > { %15250 = vmatprep.subr.bf16.mxu0 %v16403_v20 }
 0x953   : > { %15271 = vmatpush3.bf16.msra.mxu1 %v16418_v31  ;;  %v16432_v31 = vld [vmem:[%s20726_s11] sm:$0xff]  }
 0x954   : > { %15272 = vmatprep.subr.bf16.mxu1 %v16419_v21 }
 0x955   : > { %15251 = vmatpush3.bf16.msra.mxu0 %v16404_v62 }
 0x956   : > { %15252 = vmatprep.subr.bf16.mxu0 %v16405_v45 }
 0x957   : > { %15273 = vmatpush3.bf16.msra.mxu1 %v16420_v35 }
 0x958   : > { %15274 = vmatprep.subr.bf16.mxu1 %v16421_v13 }
 0x959   : > { %15253 = vmatpush3.bf16.msra.mxu0 %v16406_v12  ;;  %v16431_v12 = vld [vmem:[%s20726_s11 + $0x8] sm:$0xff]  }
 0x95a   : > { %15254 = vmatprep.subr.bf16.mxu0 %v16407_v7  ;;  %v12810_v7 = vld [vmem:[%s20725_s10] sm:$0x1] }
 0x95b   : > { %15275 = vmatpush3.bf16.msra.mxu1 %v16422_v16 }
 0x95c   : > { %15276 = vmatprep.subr.bf16.mxu1 %v16423_v46 }
 0x95d   : > { %15255 = vmatpush3.bf16.msra.mxu0 %v16408_v19 }
 0x95e   : > { %15497 = vmatprep.subr.bf16.mxu0 %v16516_v59 }
 0x95f   : > { %15277 = vmatpush3.bf16.msra.mxu1 %v16424_v26 }
 0x960   : > { %13036 = vmatmul.mubr.bf16.vlgmr.msra.gmra.mxu0 %v12742_v58 }
 0x961   : > { %15498 = vmatpush3.bf16.msra.mxu0 %v16425_v9  ;;  %15513 = vmatprep.mubr.msk.bf16.mxu0 %vm16517_vm1, %v16516_v59 }
 0x962   : > { %15499 = vmatprep.subr.bf16.mxu0 %v16516_v59 }
 0x965   : > { %15500 = vmatpush3.bf16.msra.mxu0 %v16426_v24 }
 0x966   : > { %15501 = vmatprep.subr.bf16.mxu0 %v16516_v59 }
 0x969   : > { %15502 = vmatpush3.bf16.msra.mxu0 %v16427_v56 }
 0x96a   : > { %15503 = vmatprep.subr.bf16.mxu0 %v16516_v59 }
 0x96d   : > { %15504 = vmatpush3.bf16.msra.mxu0 %v16428_v30 }
 0x96e   : > { %15505 = vmatprep.subr.bf16.mxu0 %v16516_v59 }
 0x971   : > { %15506 = vmatpush3.bf16.msra.mxu0 %v16429_v8 }
 0x972   : > { %15507 = vmatprep.subr.bf16.mxu0 %v16516_v59 }
 0x975   : > { %15508 = vmatpush3.bf16.msra.mxu0 %v16430_v38 }
 0x976   : > { %15509 = vmatprep.subr.bf16.mxu0 %v16516_v59 }
 0x979   : > { %15510 = vmatpush3.bf16.msra.mxu0 %v16431_v12 }
 0x97a   : > { %15511 = vmatprep.subr.bf16.mxu0 %v16516_v59 }
 0x97d   : > { %15512 = vmatpush3.bf16.msra.mxu0 %v16432_v31 }
 0x980   : > { %v12526_v2 = vpop.f32.mrf.mxu0 }
 0x981   : > { %v12567_v25 = vpop.f32.mrf.mxu1  ;;  %v12527_v34 = vadd.f32 %v12526_v2, %v12486_v48 }
 0x982   : > { %v12528_v23 = vpop.f32.mrf.mxu0 }
 0x983   : > { %v12569_v43 = vpop.f32.mrf.mxu1  ;;  %v12568_v50 = vadd.f32 %v12567_v25, %v12527_v34  ;;  %v12529_v52 = vadd.f32 %v12528_v23, %v12488_v1 }
 0x984   : > { %v12530_v10 = vpop.f32.mrf.mxu0 }
 0x985   : > { %v12571_v0 = vpop.f32.mrf.mxu1  ;;  %v12570_v6 = vadd.f32 %v12569_v43, %v12529_v52  ;;  %v13101_v43 = vld [vmem:[%s20727_s12] sm:$0x1] }
 0x986   : > { %v12531_v42 = vpop.f32.mrf.mxu0 }
 0x987   : > { %v12572_v36 = vpop.f32.mrf.mxu1 }
 0x9c0   : > { %v12608_v22 = vpop.f32.mrf.mxu0 }
 0x9c1   : > { %v12649_v17 = vpop.f32.mrf.mxu1  ;;  %v12609_v27 = vadd.f32 %v12608_v22, %v12568_v50 }
 0x9c2   : > { %v12610_v32 = vpop.f32.mrf.mxu0 }
 0x9c3   : > { %v12651_v54 = vpop.f32.mrf.mxu1  ;;  %v12650_v51 = vadd.f32 %v12649_v17, %v12609_v27  ;;  %v12611_v48 = vadd.f32 %v12610_v32, %v12570_v6 }
 0x9c4   : > { %v12612_v55 = vpop.f32.mrf.mxu0 }
 0x9c5   : > { %v12653_v40 = vpop.f32.mrf.mxu1  ;;  %v12652_v49 = vadd.f32 %v12651_v54, %v12611_v48 }
 0x9c6   : > { %v12613_v57 = vpop.f32.mrf.mxu0 }
 0x9c7   : > { %v12654_v41 = vpop.f32.mrf.mxu1 }
 0xa00   : > { %v12690_v14 = vpop.f32.mrf.mxu0 }
 0xa01   : > { %v12731_v63 = vpop.f32.mrf.mxu1  ;;  %v12691_v1 = vadd.f32 %v12690_v14, %v12650_v51 }
 0xa02   : > { %v12692_v18 = vpop.f32.mrf.mxu0 }
 0xa03   : > { %v12733_v5 = vpop.f32.mrf.mxu1  ;;  %v12732_v33 = vadd.f32 %v12731_v63, %v12691_v1  ;;  %v12693_v53 = vadd.f32 %v12692_v18, %v12652_v49 }
 0xa04   : > { %v12694_v4 = vpop.f32.mrf.mxu0 }
 0xa05   : > { %v12735_v29 = vpop.f32.mrf.mxu1  ;;  %v12734_v44 = vadd.f32 %v12733_v5, %v12693_v53  ;;  %v12740_v47 = vmax.f32 %v12732_v33, 0.0 }
 0xa06   : > { %v12695_v15 = vpop.f32.mrf.mxu0 }
 0xa07   : > { %v12736_v11 = vpop.f32.mrf.mxu1  ;;  %v12741_v3 = vmax.f32 %v12734_v44, 0.0  ;;  %v12744_v39 = vpack.c.bf16 %v12740_v47, %v12740_v47 }
 0xa09   : > { %v12745_v28 = vpack.c.bf16 %v12741_v3, %v12741_v3 }
 0xa0b   : > { %13075 = vmatprep.mubr.bf16.mxu1 %v12745_v28 }
 0xa0c   : > { %13076 = vmatmul.mubr.bf16.vlgmr.msra.gmra.mxu1 %v12744_v39 }
 0xa20   : > { %v15256_v20 = vpop.f32.mrf.mxu0 }
 0xa22   : > { %v15257_v61 = vpop.f32.mrf.mxu0 }
 0xa23   : > { %v15258_v62 = vadd.f32 %v15257_v61, %v15256_v20 }
 0xa24   : > { %v15259_v37 = vpop.f32.mrf.mxu0 }
 0xa25   : > { %v13038_v58 = vadd.f32 %v15258_v62, %v12810_v7 }
 0xa26   : > { %v15260_v45 = vpop.f32.mrf.mxu0 }
 0xacc   : > { %v15278_v19 = vpop.f32.mrf.mxu1 }
 0xace   : > { %v15279_v60 = vpop.f32.mrf.mxu1 }
 0xacf   : > { %v15280_v21 = vadd.f32 %v15279_v60, %v15278_v19 }
 0xad0   : > { %v15281_v35 = vpop.f32.mrf.mxu1 }
 0xad1   : > { %v13078_v2 = vadd.f32 %v15280_v21, %v13038_v58 }
 0xad2   : > { %v15282_v25 = vpop.f32.mrf.mxu1 }
 0xad3   : > { %v13083_v34 = vmax.f32 %v13078_v2, 0.0 }
 0xad5   : > { %v13084_v23 = vpack.c.bf16 %v13083_v34, %v13083_v34 }
 0xad7   : > { %15514 = vmatmul.mubr.bf16.vlgmr.msra.gmra.mxu0 %v13084_v23 }
 0xb97   : > { %v13184_v13 = vpop.f32.mrf.mxu0 }
 0xb98   : > { %v13185_v50 = vadd.f32 %v13184_v13, %v13101_v43 }
 0xb99   : > { %v15515_v52 = vpop.f32.mrf.mxu0 }
 0xb9a   : > { %13190 = vst [vmem:[%s18183_s16] sm:$0x1] %v13185_v50 }
 0xb9b   : > { %v13187_v16 = vpop.f32.mrf.mxu0 }
 0xb9c   : > { %16447 = shalt.err (!%p16444_p7)
}
 0xb9d   : > { %s16448_s16 = scalar_lea.hbm %s20671_s0, 16  ;;  %s16452_s21 = scalar_lea.hbm %s20728_s13, 32 }
 0xb9e   : > { %p16449_p8 = scmp.ne.s32.totalorder %s20671_s0, %s16448_s16  ;;  %p16453_p11 = scmp.lt.s32.totalorder %s20671_s0, %s20728_s13 }
 0xb9f   : > { %p16454_p12 = scmp.lt.s32.totalorder %s16452_s21, %s16448_s16 }
 0xba0   : > { %p16450_p9 = pnand %p16449_p8, %p16627_p5 }
 0xba1   : > { %p16455_p13 = por %p16454_p12, %p16453_p11 }
 0xba2   : > { %p16451_p10 = pneg %p16450_p9 }
 0xba4   : > { %p16456_p0 = pnand %p16455_p13, %p16451_p10 }
 0xba6   : > { %16459 = shalt.err (!%p16456_p0)
}
 0xba7   : > { %15521 = dma.vmem_to_hbm [thread:$0]  (%p16627_p5), %s20673_s22, 16, %s20671_s0, %s13192_s15   ;;  %v15516_v10 = vpop.f32.mrf.mxu0 }
 0xba8 PF: > { %p15527_p1 = scmp.ge.s32.totalorder %s16504_s28, 2  ;;  %s13216_s14 = sand.u32 1, %s16492_s25  }
 0xba9   : > { %s13217_s29 = scalar_lea.sflag [#allocation7], %s13216_s14 }
 0xbaa   : > { %p15524_p2 = pnand %p15527_p1, %p16631_p6 }
 0xbac   : > { %p15525_p3 = pneg %p15524_p2 }
 0xbae   : > { %16487 = dma.done.wait (%p15525_p3), %s13217_s29, 16  }
 0xbaf   : > { %16489 = vsyncadd (%p15525_p3), %s13217_s29, 4294967280  ;;  %s20794_s28 = sld [smem:[#allocation12_spill]]  ;;  %s20797_s25 = smov %s16496_s26 }
 0xbb0   : > { %s20795_s17 = sld [smem:[#allocation11_spill]] }
 0xbb1   : > { %s20796_s27 = sld [smem:[#allocation13_spill]] }
 0xbb5   : > { %p23_p4 = scmp.ge.s32.totalorder %s20794_s28, 4  }
 0xbb6   : > { %s20798_s26 = smov %s20795_s17 }
 0xbb7   :  { %25 = sbr.rel (!%p23_p4) target bundleno = 5 (0x5), region = 209 }
 0xbbc   :  { %13221 = vsyncpa [#allocation7], 1 }
 0xbbd   :  { %13223 = vsyncpa [#allocation7 + $0x1], 1 }
 0xbbe   :  { %13224 = vsyncmov [#allocation5] }
 0xbc1   :  { %s13225_s18 = vpop.sfrf %13224 }
 0xbc2   :  { %p14706_p5 = scmp.ne.s32.totalorder %s13225_s18, 0 }
 0xbc4   :  { %13229 = shalt.err (%p14706_p5)  }

</bundles_post_ra>
